<compile_context>
chip_gen: v7x
topology: tpu7x:2x2x1
jax: 0.10.0
libtpu: 0.0.40
codegen_flags: <defaults>
</compile_context>

<pallas_src>
import functools

import numpy as np

import jax
import jax.numpy as jnp
from jax.experimental import pallas as pl
from jax.experimental.pallas import tpu as pltpu

EPS = 1e-5          # nn.BatchNorm2d default eps
LANES = 128         # MXU lane width
KSIZE = 3
STRIDE = 2
PAD = 1
NUM_LAYERS = 4


def _out_dim(d):
    return (d + 2 * PAD - KSIZE) // STRIDE + 1


def _build_kernel(N, H, W, cins, out_c):
    """Build the fused 4-layer kernel (fully static / unrolled) for one geometry."""
    hs, ws = [H], [W]
    for _ in range(NUM_LAYERS):
        hs.append(_out_dim(hs[-1]))
        ws.append(_out_dim(ws[-1]))
    for l in range(NUM_LAYERS):
        assert ws[l] % 2 == 0, "input width must halve evenly at every layer"
        assert KSIZE * KSIZE * cins[l] <= LANES, "packed K must fit in 128 lanes"
    assert out_c <= LANES

    m_list = [N * hs[l + 1] * ws[l + 1] for l in range(NUM_LAYERS)]
    m_max = max(m_list)

    def kernel(*refs):
        x_ref = refs[0]
        w_ref = refs[1]          # (L, 128, 128) bf16 : K-packed (tap, cin) x cout
        b_ref = refs[2]          # (L, 1, 128) f32
        g_ref = refs[3]
        bt_ref = refs[4]
        p_refs = refs[5:5 + NUM_LAYERS - 1]              # bf16 W-parity 0/1 perms
        o_ref = refs[5 + NUM_LAYERS - 1]
        bufs = refs[5 + NUM_LAYERS:5 + 2 * NUM_LAYERS]   # per-layer padded acts
        col_ref = refs[5 + 2 * NUM_LAYERS]               # (m_max, 128) f32

        # K padding lanes of col are never written by any layer -> zero once.
        col_ref[...] = jnp.zeros(col_ref.shape, col_ref.dtype)

        # Halo-only zeroing: interiors are fully rewritten (layer 0 from x,
        # deeper layers from the writeback below).
        for l, buf in enumerate(bufs):
            hp = hs[l] + 2 * PAD
            wpd = ws[l] + 2 * PAD
            c = cins[l]
            for n in range(N):
                buf[n, 0:1, :, :] = jnp.zeros((1, wpd, c), jnp.float32)
                buf[n, hp - 1:hp, :, :] = jnp.zeros((1, wpd, c), jnp.float32)
                buf[n, :, 0:1, :] = jnp.zeros((hp, 1, c), jnp.float32)
                buf[n, :, wpd - 1:wpd, :] = jnp.zeros((hp, 1, c), jnp.float32)

        # Layer-1 input (already column-swizzled by the wrapper) -> interior.
        bufs[0][:, PAD:PAD + H, PAD:PAD + W, :] = x_ref[...]

        for l in range(NUM_LAYERS):
            src = bufs[l]
            cin = cins[l]
            wpd = ws[l] + 2 * PAD
            ho_n, wo_n = hs[l + 1], ws[l + 1]
            e = wpd // 2                     # number of even padded columns
            m = m_list[l]

            # ---- in-VMEM im2col (contiguous static slices, 9*cin K lanes) ----
            # swizzled column j < e  -> padded col 2*j (even)
            # swizzled column j >= e -> padded col 2*(j-e)+1 (odd)
            # tap kw needs padded cols 2*wo+kw:
            #   kw=0 -> start 0 ; kw=1 -> start e ; kw=2 -> start 1
            col_start = (0, e, 1)
            for n in range(N):
                for ho in range(ho_n):
                    row0 = (n * ho_n + ho) * wo_n
                    for kh in range(KSIZE):
                        r = STRIDE * ho + kh
                        for kw in range(KSIZE):
                            t = kh * KSIZE + kw
                            c0 = col_start[kw]
                            col_ref[row0:row0 + wo_n, t * cin:(t + 1) * cin] = (
                                src[n, r, c0:c0 + wo_n, :])

            # ---- conv = ONE lane-dense MXU matmul (bf16 in, f32 accumulate) ----
            patches = col_ref[0:m, :].astype(jnp.bfloat16)
            y = jnp.dot(patches, w_ref[l], preferred_element_type=jnp.float32)
            y = y + b_ref[l]
            y = jnp.maximum(y, 0.0)                      # ReLU

            # ---- BatchNorm2d train-mode stats, one pass (sum & sum-of-squares),
            #      folded into per-channel scale/shift ----
            inv_m = 1.0 / m
            s1 = jnp.sum(y, axis=0, keepdims=True)
            s2 = jnp.sum(y * y, axis=0, keepdims=True)
            mean = s1 * inv_m
            var = jnp.maximum(s2 * inv_m - mean * mean, 0.0)
            inv = jax.lax.rsqrt(var + EPS)
            scale = g_ref[l] * inv
            shift = bt_ref[l] - mean * scale
            out = y * scale + shift                      # (m, 128) f32

            # ---- write back ----
            if l + 1 < NUM_LAYERS:
                # Tiny bf16 0/1 permutation: per (n, ho) block put even-wo rows
                # first, then odd-wo rows -> both halves store as contiguous
                # slices of the next W-swizzled buffer. Exact (next conv would
                # cast these activations to bf16 anyway).
                out_p = jnp.dot(p_refs[l][...], out.astype(jnp.bfloat16),
                                preferred_element_type=jnp.float32)
                dst = bufs[l + 1]
                c_next = cins[l + 1]
                e_next = (ws[l + 1] + 2 * PAD) // 2
                n_even = (wo_n + 1) // 2
                n_odd = wo_n // 2
                for n in range(N):
                    for ho in range(ho_n):
                        row0 = (n * ho_n + ho) * wo_n
                        # even wo -> odd padded col -> swizzled [e_next, e_next+n_even)
                        dst[n, ho + PAD, e_next:e_next + n_even, :] = (
                            out_p[row0:row0 + n_even, :c_next])
                        # odd wo -> even padded col -> swizzled [1, 1+n_odd)
                        if n_odd > 0:
                            dst[n, ho + PAD, 1:1 + n_odd, :] = (
                                out_p[row0 + n_even:row0 + wo_n, :c_next])
            else:
                # Final layer: natural order, full f32, lane-dense output.
                for n in range(N):
                    for ho in range(ho_n):
                        row0 = (n * ho_n + ho) * wo_n
                        o_ref[n, ho, :, :] = out[row0:row0 + wo_n, :]

    scratch_shapes = [
        pltpu.VMEM((N, hs[l] + 2 * PAD, ws[l] + 2 * PAD, cins[l]), jnp.float32)
        for l in range(NUM_LAYERS)
    ]
    scratch_shapes.append(pltpu.VMEM((m_max, LANES), jnp.float32))
    out_shape = jax.ShapeDtypeStruct((N, hs[-1], ws[-1], LANES), jnp.float32)
    return kernel, scratch_shapes, out_shape, (hs, ws)


def init_cnn_params(in_c, out_c, key):
    """Deterministic synthetic parameters matching nn.Conv2d/BatchNorm2d shapes."""
    params = []
    c_in = in_c
    for _ in range(NUM_LAYERS):
        key, kw_key, kb_key = jax.random.split(key, 3)
        w = 0.1 * jax.random.normal(kw_key, (out_c, c_in, KSIZE, KSIZE),
                                    dtype=jnp.float32)
        b = 0.05 * jax.random.normal(kb_key, (out_c,), dtype=jnp.float32)
        gamma = jnp.ones((out_c,), dtype=jnp.float32)   # BN weight init
        beta = jnp.zeros((out_c,), dtype=jnp.float32)   # BN bias init
        params.append(dict(w=w, b=b, gamma=gamma, beta=beta))
        c_in = out_c
    return params


def pack_params(params):
    """Init-time transform: torch-layout params -> K-packed (9*cin lanes) bf16
    (128,128) weight slabs + f32 per-channel vectors (built once, reused)."""
    w_list, b_list, g_list, bt_list = [], [], [], []
    for layer in params:
        w = layer["w"]                                       # (cout, cin, 3, 3)
        cout, cin, _, _ = w.shape
        kreal = KSIZE * KSIZE * cin
        assert cout <= LANES and kreal <= LANES
        w_m = jnp.transpose(w, (2, 3, 1, 0)).reshape(kreal, cout)
        w_pad = jnp.zeros((LANES, LANES), jnp.float32)
        w_pad = w_pad.at[:kreal, :cout].set(w_m)
        w_list.append(w_pad.astype(jnp.bfloat16))

        def _pad_vec(v):
            z = jnp.zeros((1, LANES), jnp.float32)
            return z.at[0, :v.shape[0]].set(v.astype(jnp.float32))

        b_list.append(_pad_vec(layer["b"]))
        g_list.append(_pad_vec(layer["gamma"]))
        bt_list.append(_pad_vec(layer["beta"]))

    return dict(
        w=jnp.stack(w_list),          # (4, 128, 128) bf16
        b=jnp.stack(b_list),          # (4, 1, 128) f32
        gamma=jnp.stack(g_list),
        beta=jnp.stack(bt_list),
    )


def _make_perm(n, ho, wo):
    """Constant 0/1 permutation (bf16): natural (n, ho, wo) row order ->
    per-(n, ho) blocks with even-wo rows first, then odd-wo rows."""
    src = []
    for b in range(n * ho):
        base = b * wo
        src.extend(base + w_ for w_ in range(0, wo, 2))
        src.extend(base + w_ for w_ in range(1, wo, 2))
    m = n * ho * wo
    p = np.zeros((m, m), np.float32)
    p[np.arange(m), np.asarray(src, np.int64)] = 1.0
    return jnp.asarray(p, dtype=jnp.bfloat16)


@functools.partial(jax.jit, static_argnames=("out_c",))
def cnn_forward(x_nchw, packed, out_c):
    """Forward equivalent to CNN.forward (4x bn(relu(conv(x)))), NCHW in/out."""
    N, cin, H, W = x_nchw.shape

    # Layout glue (cheap, fused under jit): NCHW -> NHWC (real channels only),
    # swizzle W columns into [odd input cols | even input cols] to match the
    # kernel's (even padded | odd padded) buffer layout.
    x = jnp.transpose(x_nchw, (0, 2, 3, 1)).astype(jnp.float32)
    x = jnp.concatenate([x[:, :, 1::2, :], x[:, :, 0::2, :]], axis=2)

    cins = tuple([cin] + [out_c] * (NUM_LAYERS - 1))
    kernel, scratch_shapes, out_shape, (hs, ws) = _build_kernel(N, H, W, cins, out_c)
    perms = [_make_perm(N, hs[l + 1], ws[l + 1]) for l in range(NUM_LAYERS - 1)]

    def full_spec(shape):
        nd = len(shape)
        return pl.BlockSpec(shape, lambda i, _nd=nd: (0,) * _nd)

    args = [x, packed["w"], packed["b"], packed["gamma"], packed["beta"], *perms]
    out = pl.pallas_call(
        kernel,
        out_shape=out_shape,
        grid=(1,),
        in_specs=[full_spec(a.shape) for a in args],
        out_specs=full_spec(out_shape.shape),
        scratch_shapes=scratch_shapes,
        compiler_params=pltpu.CompilerParams(
            dimension_semantics=("arbitrary",),
            vmem_limit_bytes=32 * 1024 * 1024,
        ),
    )(*args)

    out = out[:, :, :, :out_c]                   # drop lane padding
    return jnp.transpose(out, (0, 3, 1, 2))      # NHWC -> NCHW


def cnn_reference(x_nchw, params):
    """Pure-JAX reference (same bf16 matmul inputs / f32 elementwise as kernel)."""
    x = x_nchw.astype(jnp.float32)
    for layer in params:
        y = jax.lax.conv_general_dilated(
            x.astype(jnp.bfloat16),
            layer["w"].astype(jnp.bfloat16),
            window_strides=(STRIDE, STRIDE),
            padding=((PAD, PAD), (PAD, PAD)),
            dimension_numbers=("NCHW", "OIHW", "NCHW"),
            preferred_element_type=jnp.float32,
        )
        y = y + layer["b"].reshape(1, -1, 1, 1)
        y = jnp.maximum(y, 0.0)
        mean = jnp.mean(y, axis=(0, 2, 3), keepdims=True)
        var = jnp.mean((y - mean) ** 2, axis=(0, 2, 3), keepdims=True)
        y = (y - mean) * jax.lax.rsqrt(var + EPS)
        x = (y * layer["gamma"].reshape(1, -1, 1, 1)
             + layer["beta"].reshape(1, -1, 1, 1))
    return x


if __name__ == "__main__":
    key = jax.random.PRNGKey(0)
    key, xkey, pkey = jax.random.split(key, 3)

    in_c, out_c = 4, 8
    N, H, W = 2, 16, 16
    x = jax.random.normal(xkey, (N, in_c, H, W), dtype=jnp.float32)

    params = init_cnn_params(in_c, out_c, pkey)
    packed = pack_params(params)      # hoisted: built once, reused per forward

    out = cnn_forward(x, packed, out_c=out_c)
    out = jax.block_until_ready(out)

    # Four stride-2 convs on 16x16 -> 1x1 spatial.
    assert out.shape == (N, out_c, H // 16, W // 16), out.shape
    assert bool(jnp.all(jnp.isfinite(out)))

    ref = cnn_reference(x, params)
    assert bool(jnp.allclose(out, ref, rtol=5e-2, atol=5e-2)), (
        float(jnp.max(jnp.abs(out - ref))))

    print("KERNEL_OK")
</pallas_src>

<mosaic_0001>
module attributes {stable_mosaic.version = 11 : i64} {
  func.func @kernel(%arg0: i32, %arg1: memref<2x16x16x4xf32, #tpu.memory_space<vmem>>, %arg2: memref<4x128x128xbf16, #tpu.memory_space<vmem>>, %arg3: memref<4x1x128xf32, #tpu.memory_space<vmem>>, %arg4: memref<4x1x128xf32, #tpu.memory_space<vmem>>, %arg5: memref<4x1x128xf32, #tpu.memory_space<vmem>>, %arg6: memref<128x128xbf16, #tpu.memory_space<vmem>>, %arg7: memref<32x32xbf16, #tpu.memory_space<vmem>>, %arg8: memref<8x8xbf16, #tpu.memory_space<vmem>>, %arg9: memref<2x1x1x128xf32, #tpu.memory_space<vmem>>, %arg10: memref<2x18x18x4xf32, #tpu.memory_space<vmem>>, %arg11: memref<2x10x10x8xf32, #tpu.memory_space<vmem>>, %arg12: memref<2x6x6x8xf32, #tpu.memory_space<vmem>>, %arg13: memref<2x4x4x8xf32, #tpu.memory_space<vmem>>, %arg14: memref<128x128xf32, #tpu.memory_space<vmem>>) attributes {dimension_semantics = [#tpu.dimension_semantics<arbitrary>], iteration_bounds = array<i64: 1>, scalar_prefetch = 0 : i64, scratch_operands = 5 : i64, tpu.core_type = #tpu.core_type<tc>, window_params = [{pipeline_mode = #tpu.pipeline_mode<synchronous>, transform_indices = @transform_0, window_bounds = array<i64: 2, 16, 16, 4>}, {pipeline_mode = #tpu.pipeline_mode<synchronous>, transform_indices = @transform_1, window_bounds = array<i64: 4, 128, 128>}, {pipeline_mode = #tpu.pipeline_mode<synchronous>, transform_indices = @transform_2, window_bounds = array<i64: 4, 1, 128>}, {pipeline_mode = #tpu.pipeline_mode<synchronous>, transform_indices = @transform_3, window_bounds = array<i64: 4, 1, 128>}, {pipeline_mode = #tpu.pipeline_mode<synchronous>, transform_indices = @transform_4, window_bounds = array<i64: 4, 1, 128>}, {pipeline_mode = #tpu.pipeline_mode<synchronous>, transform_indices = @transform_5, window_bounds = array<i64: 128, 128>}, {pipeline_mode = #tpu.pipeline_mode<synchronous>, transform_indices = @transform_6, window_bounds = array<i64: 32, 32>}, {pipeline_mode = #tpu.pipeline_mode<synchronous>, transform_indices = @transform_7, window_bounds = array<i64: 8, 8>}, {pipeline_mode = #tpu.pipeline_mode<synchronous>, transform_indices = @transform_8, window_bounds = array<i64: 2, 1, 1, 128>}]} {
    %cst = arith.constant 0.000000e+00 : f32
    %0 = vector.broadcast %cst : f32 to vector<128x128xf32>
    %c0 = arith.constant 0 : index
    %c0_0 = arith.constant 0 : index
    %1 = vector.load %arg14[%c0, %c0_0] : memref<128x128xf32, #tpu.memory_space<vmem>>, vector<128x128xf32>
    tpu.vector_store %arg14[%c0, %c0_0], %0 {strides = array<i32>} : memref<128x128xf32, #tpu.memory_space<vmem>>, vector<128x128xf32>,
    %cst_1 = arith.constant 0.000000e+00 : f32
    %2 = vector.broadcast %cst_1 : f32 to vector<1x18x4xf32>
    %c0_2 = arith.constant 0 : index
    %c0_3 = arith.constant 0 : index
    %c0_4 = arith.constant 0 : index
    %c0_5 = arith.constant 0 : index
    %3 = vector.load %arg10[%c0_2, %c0_3, %c0_4, %c0_5] : memref<2x18x18x4xf32, #tpu.memory_space<vmem>>, vector<1x1x18x4xf32>
    %4 = vector.shape_cast %3 : vector<1x1x18x4xf32> to vector<1x18x4xf32>
    %5 = vector.shape_cast %2 : vector<1x18x4xf32> to vector<1x1x18x4xf32>
    tpu.vector_store %arg10[%c0_2, %c0_3, %c0_4, %c0_5], %5 {strides = array<i32>} : memref<2x18x18x4xf32, #tpu.memory_space<vmem>>, vector<1x1x18x4xf32>,
    %cst_6 = arith.constant 0.000000e+00 : f32
    %6 = vector.broadcast %cst_6 : f32 to vector<1x18x4xf32>
    %c0_7 = arith.constant 0 : index
    %c17 = arith.constant 17 : index
    %c0_8 = arith.constant 0 : index
    %c0_9 = arith.constant 0 : index
    %7 = vector.load %arg10[%c0_7, %c17, %c0_8, %c0_9] : memref<2x18x18x4xf32, #tpu.memory_space<vmem>>, vector<1x1x18x4xf32>
    %8 = vector.shape_cast %7 : vector<1x1x18x4xf32> to vector<1x18x4xf32>
    %9 = vector.shape_cast %6 : vector<1x18x4xf32> to vector<1x1x18x4xf32>
    tpu.vector_store %arg10[%c0_7, %c17, %c0_8, %c0_9], %9 {strides = array<i32>} : memref<2x18x18x4xf32, #tpu.memory_space<vmem>>, vector<1x1x18x4xf32>,
    %cst_10 = arith.constant 0.000000e+00 : f32
    %10 = vector.broadcast %cst_10 : f32 to vector<18x1x4xf32>
    %c0_11 = arith.constant 0 : index
    %c0_12 = arith.constant 0 : index
    %c0_13 = arith.constant 0 : index
    %c0_14 = arith.constant 0 : index
    %11 = vector.load %arg10[%c0_11, %c0_12, %c0_13, %c0_14] : memref<2x18x18x4xf32, #tpu.memory_space<vmem>>, vector<1x18x1x4xf32>
    %12 = vector.shape_cast %11 : vector<1x18x1x4xf32> to vector<18x1x4xf32>
    %13 = vector.shape_cast %10 : vector<18x1x4xf32> to vector<1x18x1x4xf32>
    tpu.vector_store %arg10[%c0_11, %c0_12, %c0_13, %c0_14], %13 {strides = array<i32>} : memref<2x18x18x4xf32, #tpu.memory_space<vmem>>, vector<1x18x1x4xf32>,
    %cst_15 = arith.constant 0.000000e+00 : f32
    %14 = vector.broadcast %cst_15 : f32 to vector<18x1x4xf32>
    %c0_16 = arith.constant 0 : index
    %c0_17 = arith.constant 0 : index
    %c17_18 = arith.constant 17 : index
    %c0_19 = arith.constant 0 : index
    %15 = vector.load %arg10[%c0_16, %c0_17, %c17_18, %c0_19] : memref<2x18x18x4xf32, #tpu.memory_space<vmem>>, vector<1x18x1x4xf32>
    %16 = vector.shape_cast %15 : vector<1x18x1x4xf32> to vector<18x1x4xf32>
    %17 = vector.shape_cast %14 : vector<18x1x4xf32> to vector<1x18x1x4xf32>
    tpu.vector_store %arg10[%c0_16, %c0_17, %c17_18, %c0_19], %17 {strides = array<i32>} : memref<2x18x18x4xf32, #tpu.memory_space<vmem>>, vector<1x18x1x4xf32>,
    %cst_20 = arith.constant 0.000000e+00 : f32
    %18 = vector.broadcast %cst_20 : f32 to vector<1x18x4xf32>
    %c1 = arith.constant 1 : index
    %c0_21 = arith.constant 0 : index
    %c0_22 = arith.constant 0 : index
    %c0_23 = arith.constant 0 : index
    %19 = vector.load %arg10[%c1, %c0_21, %c0_22, %c0_23] : memref<2x18x18x4xf32, #tpu.memory_space<vmem>>, vector<1x1x18x4xf32>
    %20 = vector.shape_cast %19 : vector<1x1x18x4xf32> to vector<1x18x4xf32>
    %21 = vector.shape_cast %18 : vector<1x18x4xf32> to vector<1x1x18x4xf32>
    tpu.vector_store %arg10[%c1, %c0_21, %c0_22, %c0_23], %21 {strides = array<i32>} : memref<2x18x18x4xf32, #tpu.memory_space<vmem>>, vector<1x1x18x4xf32>,
    %cst_24 = arith.constant 0.000000e+00 : f32
    %22 = vector.broadcast %cst_24 : f32 to vector<1x18x4xf32>
    %c1_25 = arith.constant 1 : index
    %c17_26 = arith.constant 17 : index
    %c0_27 = arith.constant 0 : index
    %c0_28 = arith.constant 0 : index
    %23 = vector.load %arg10[%c1_25, %c17_26, %c0_27, %c0_28] : memref<2x18x18x4xf32, #tpu.memory_space<vmem>>, vector<1x1x18x4xf32>
    %24 = vector.shape_cast %23 : vector<1x1x18x4xf32> to vector<1x18x4xf32>
    %25 = vector.shape_cast %22 : vector<1x18x4xf32> to vector<1x1x18x4xf32>
    tpu.vector_store %arg10[%c1_25, %c17_26, %c0_27, %c0_28], %25 {strides = array<i32>} : memref<2x18x18x4xf32, #tpu.memory_space<vmem>>, vector<1x1x18x4xf32>,
    %cst_29 = arith.constant 0.000000e+00 : f32
    %26 = vector.broadcast %cst_29 : f32 to vector<18x1x4xf32>
    %c1_30 = arith.constant 1 : index
    %c0_31 = arith.constant 0 : index
    %c0_32 = arith.constant 0 : index
    %c0_33 = arith.constant 0 : index
    %27 = vector.load %arg10[%c1_30, %c0_31, %c0_32, %c0_33] : memref<2x18x18x4xf32, #tpu.memory_space<vmem>>, vector<1x18x1x4xf32>
    %28 = vector.shape_cast %27 : vector<1x18x1x4xf32> to vector<18x1x4xf32>
    %29 = vector.shape_cast %26 : vector<18x1x4xf32> to vector<1x18x1x4xf32>
    tpu.vector_store %arg10[%c1_30, %c0_31, %c0_32, %c0_33], %29 {strides = array<i32>} : memref<2x18x18x4xf32, #tpu.memory_space<vmem>>, vector<1x18x1x4xf32>,
    %cst_34 = arith.constant 0.000000e+00 : f32
    %30 = vector.broadcast %cst_34 : f32 to vector<18x1x4xf32>
    %c1_35 = arith.constant 1 : index
    %c0_36 = arith.constant 0 : index
    %c17_37 = arith.constant 17 : index
    %c0_38 = arith.constant 0 : index
    %31 = vector.load %arg10[%c1_35, %c0_36, %c17_37, %c0_38] : memref<2x18x18x4xf32, #tpu.memory_space<vmem>>, vector<1x18x1x4xf32>
    %32 = vector.shape_cast %31 : vector<1x18x1x4xf32> to vector<18x1x4xf32>
    %33 = vector.shape_cast %30 : vector<18x1x4xf32> to vector<1x18x1x4xf32>
    tpu.vector_store %arg10[%c1_35, %c0_36, %c17_37, %c0_38], %33 {strides = array<i32>} : memref<2x18x18x4xf32, #tpu.memory_space<vmem>>, vector<1x18x1x4xf32>,
    %cst_39 = arith.constant 0.000000e+00 : f32
    %34 = vector.broadcast %cst_39 : f32 to vector<1x10x8xf32>
    %c0_40 = arith.constant 0 : index
    %c0_41 = arith.constant 0 : index
    %c0_42 = arith.constant 0 : index
    %c0_43 = arith.constant 0 : index
    %35 = vector.load %arg11[%c0_40, %c0_41, %c0_42, %c0_43] : memref<2x10x10x8xf32, #tpu.memory_space<vmem>>, vector<1x1x10x8xf32>
    %36 = vector.shape_cast %35 : vector<1x1x10x8xf32> to vector<1x10x8xf32>
    %37 = vector.shape_cast %34 : vector<1x10x8xf32> to vector<1x1x10x8xf32>
    tpu.vector_store %arg11[%c0_40, %c0_41, %c0_42, %c0_43], %37 {strides = array<i32>} : memref<2x10x10x8xf32, #tpu.memory_space<vmem>>, vector<1x1x10x8xf32>,
    %cst_44 = arith.constant 0.000000e+00 : f32
    %38 = vector.broadcast %cst_44 : f32 to vector<1x10x8xf32>
    %c0_45 = arith.constant 0 : index
    %c9 = arith.constant 9 : index
    %c0_46 = arith.constant 0 : index
    %c0_47 = arith.constant 0 : index
    %39 = vector.load %arg11[%c0_45, %c9, %c0_46, %c0_47] : memref<2x10x10x8xf32, #tpu.memory_space<vmem>>, vector<1x1x10x8xf32>
    %40 = vector.shape_cast %39 : vector<1x1x10x8xf32> to vector<1x10x8xf32>
    %41 = vector.shape_cast %38 : vector<1x10x8xf32> to vector<1x1x10x8xf32>
    tpu.vector_store %arg11[%c0_45, %c9, %c0_46, %c0_47], %41 {strides = array<i32>} : memref<2x10x10x8xf32, #tpu.memory_space<vmem>>, vector<1x1x10x8xf32>,
    %cst_48 = arith.constant 0.000000e+00 : f32
    %42 = vector.broadcast %cst_48 : f32 to vector<10x1x8xf32>
    %c0_49 = arith.constant 0 : index
    %c0_50 = arith.constant 0 : index
    %c0_51 = arith.constant 0 : index
    %c0_52 = arith.constant 0 : index
    %43 = vector.load %arg11[%c0_49, %c0_50, %c0_51, %c0_52] : memref<2x10x10x8xf32, #tpu.memory_space<vmem>>, vector<1x10x1x8xf32>
    %44 = vector.shape_cast %43 : vector<1x10x1x8xf32> to vector<10x1x8xf32>
    %45 = vector.shape_cast %42 : vector<10x1x8xf32> to vector<1x10x1x8xf32>
    tpu.vector_store %arg11[%c0_49, %c0_50, %c0_51, %c0_52], %45 {strides = array<i32>} : memref<2x10x10x8xf32, #tpu.memory_space<vmem>>, vector<1x10x1x8xf32>,
    %cst_53 = arith.constant 0.000000e+00 : f32
    %46 = vector.broadcast %cst_53 : f32 to vector<10x1x8xf32>
    %c0_54 = arith.constant 0 : index
    %c0_55 = arith.constant 0 : index
    %c9_56 = arith.constant 9 : index
    %c0_57 = arith.constant 0 : index
    %47 = vector.load %arg11[%c0_54, %c0_55, %c9_56, %c0_57] : memref<2x10x10x8xf32, #tpu.memory_space<vmem>>, vector<1x10x1x8xf32>
    %48 = vector.shape_cast %47 : vector<1x10x1x8xf32> to vector<10x1x8xf32>
    %49 = vector.shape_cast %46 : vector<10x1x8xf32> to vector<1x10x1x8xf32>
    tpu.vector_store %arg11[%c0_54, %c0_55, %c9_56, %c0_57], %49 {strides = array<i32>} : memref<2x10x10x8xf32, #tpu.memory_space<vmem>>, vector<1x10x1x8xf32>,
    %cst_58 = arith.constant 0.000000e+00 : f32
    %50 = vector.broadcast %cst_58 : f32 to vector<1x10x8xf32>
    %c1_59 = arith.constant 1 : index
    %c0_60 = arith.constant 0 : index
    %c0_61 = arith.constant 0 : index
    %c0_62 = arith.constant 0 : index
    %51 = vector.load %arg11[%c1_59, %c0_60, %c0_61, %c0_62] : memref<2x10x10x8xf32, #tpu.memory_space<vmem>>, vector<1x1x10x8xf32>
    %52 = vector.shape_cast %51 : vector<1x1x10x8xf32> to vector<1x10x8xf32>
    %53 = vector.shape_cast %50 : vector<1x10x8xf32> to vector<1x1x10x8xf32>
    tpu.vector_store %arg11[%c1_59, %c0_60, %c0_61, %c0_62], %53 {strides = array<i32>} : memref<2x10x10x8xf32, #tpu.memory_space<vmem>>, vector<1x1x10x8xf32>,
    %cst_63 = arith.constant 0.000000e+00 : f32
    %54 = vector.broadcast %cst_63 : f32 to vector<1x10x8xf32>
    %c1_64 = arith.constant 1 : index
    %c9_65 = arith.constant 9 : index
    %c0_66 = arith.constant 0 : index
    %c0_67 = arith.constant 0 : index
    %55 = vector.load %arg11[%c1_64, %c9_65, %c0_66, %c0_67] : memref<2x10x10x8xf32, #tpu.memory_space<vmem>>, vector<1x1x10x8xf32>
    %56 = vector.shape_cast %55 : vector<1x1x10x8xf32> to vector<1x10x8xf32>
    %57 = vector.shape_cast %54 : vector<1x10x8xf32> to vector<1x1x10x8xf32>
    tpu.vector_store %arg11[%c1_64, %c9_65, %c0_66, %c0_67], %57 {strides = array<i32>} : memref<2x10x10x8xf32, #tpu.memory_space<vmem>>, vector<1x1x10x8xf32>,
    %cst_68 = arith.constant 0.000000e+00 : f32
    %58 = vector.broadcast %cst_68 : f32 to vector<10x1x8xf32>
    %c1_69 = arith.constant 1 : index
    %c0_70 = arith.constant 0 : index
    %c0_71 = arith.constant 0 : index
    %c0_72 = arith.constant 0 : index
    %59 = vector.load %arg11[%c1_69, %c0_70, %c0_71, %c0_72] : memref<2x10x10x8xf32, #tpu.memory_space<vmem>>, vector<1x10x1x8xf32>
    %60 = vector.shape_cast %59 : vector<1x10x1x8xf32> to vector<10x1x8xf32>
    %61 = vector.shape_cast %58 : vector<10x1x8xf32> to vector<1x10x1x8xf32>
    tpu.vector_store %arg11[%c1_69, %c0_70, %c0_71, %c0_72], %61 {strides = array<i32>} : memref<2x10x10x8xf32, #tpu.memory_space<vmem>>, vector<1x10x1x8xf32>,
    %cst_73 = arith.constant 0.000000e+00 : f32
    %62 = vector.broadcast %cst_73 : f32 to vector<10x1x8xf32>
    %c1_74 = arith.constant 1 : index
    %c0_75 = arith.constant 0 : index
    %c9_76 = arith.constant 9 : index
    %c0_77 = arith.constant 0 : index
    %63 = vector.load %arg11[%c1_74, %c0_75, %c9_76, %c0_77] : memref<2x10x10x8xf32, #tpu.memory_space<vmem>>, vector<1x10x1x8xf32>
    %64 = vector.shape_cast %63 : vector<1x10x1x8xf32> to vector<10x1x8xf32>
    %65 = vector.shape_cast %62 : vector<10x1x8xf32> to vector<1x10x1x8xf32>
    tpu.vector_store %arg11[%c1_74, %c0_75, %c9_76, %c0_77], %65 {strides = array<i32>} : memref<2x10x10x8xf32, #tpu.memory_space<vmem>>, vector<1x10x1x8xf32>,
    %cst_78 = arith.constant 0.000000e+00 : f32
    %66 = vector.broadcast %cst_78 : f32 to vector<1x6x8xf32>
    %c0_79 = arith.constant 0 : index
    %c0_80 = arith.constant 0 : index
    %c0_81 = arith.constant 0 : index
    %c0_82 = arith.constant 0 : index
    %67 = vector.load %arg12[%c0_79, %c0_80, %c0_81, %c0_82] : memref<2x6x6x8xf32, #tpu.memory_space<vmem>>, vector<1x1x6x8xf32>
    %68 = vector.shape_cast %67 : vector<1x1x6x8xf32> to vector<1x6x8xf32>
    %69 = vector.shape_cast %66 : vector<1x6x8xf32> to vector<1x1x6x8xf32>
    tpu.vector_store %arg12[%c0_79, %c0_80, %c0_81, %c0_82], %69 {strides = array<i32>} : memref<2x6x6x8xf32, #tpu.memory_space<vmem>>, vector<1x1x6x8xf32>,
    %cst_83 = arith.constant 0.000000e+00 : f32
    %70 = vector.broadcast %cst_83 : f32 to vector<1x6x8xf32>
    %c0_84 = arith.constant 0 : index
    %c5 = arith.constant 5 : index
    %c0_85 = arith.constant 0 : index
    %c0_86 = arith.constant 0 : index
    %71 = vector.load %arg12[%c0_84, %c5, %c0_85, %c0_86] : memref<2x6x6x8xf32, #tpu.memory_space<vmem>>, vector<1x1x6x8xf32>
    %72 = vector.shape_cast %71 : vector<1x1x6x8xf32> to vector<1x6x8xf32>
    %73 = vector.shape_cast %70 : vector<1x6x8xf32> to vector<1x1x6x8xf32>
    tpu.vector_store %arg12[%c0_84, %c5, %c0_85, %c0_86], %73 {strides = array<i32>} : memref<2x6x6x8xf32, #tpu.memory_space<vmem>>, vector<1x1x6x8xf32>,
    %cst_87 = arith.constant 0.000000e+00 : f32
    %74 = vector.broadcast %cst_87 : f32 to vector<6x1x8xf32>
    %c0_88 = arith.constant 0 : index
    %c0_89 = arith.constant 0 : index
    %c0_90 = arith.constant 0 : index
    %c0_91 = arith.constant 0 : index
    %75 = vector.load %arg12[%c0_88, %c0_89, %c0_90, %c0_91] : memref<2x6x6x8xf32, #tpu.memory_space<vmem>>, vector<1x6x1x8xf32>
    %76 = vector.shape_cast %75 : vector<1x6x1x8xf32> to vector<6x1x8xf32>
    %77 = vector.shape_cast %74 : vector<6x1x8xf32> to vector<1x6x1x8xf32>
    tpu.vector_store %arg12[%c0_88, %c0_89, %c0_90, %c0_91], %77 {strides = array<i32>} : memref<2x6x6x8xf32, #tpu.memory_space<vmem>>, vector<1x6x1x8xf32>,
    %cst_92 = arith.constant 0.000000e+00 : f32
    %78 = vector.broadcast %cst_92 : f32 to vector<6x1x8xf32>
    %c0_93 = arith.constant 0 : index
    %c0_94 = arith.constant 0 : index
    %c5_95 = arith.constant 5 : index
    %c0_96 = arith.constant 0 : index
    %79 = vector.load %arg12[%c0_93, %c0_94, %c5_95, %c0_96] : memref<2x6x6x8xf32, #tpu.memory_space<vmem>>, vector<1x6x1x8xf32>
    %80 = vector.shape_cast %79 : vector<1x6x1x8xf32> to vector<6x1x8xf32>
    %81 = vector.shape_cast %78 : vector<6x1x8xf32> to vector<1x6x1x8xf32>
    tpu.vector_store %arg12[%c0_93, %c0_94, %c5_95, %c0_96], %81 {strides = array<i32>} : memref<2x6x6x8xf32, #tpu.memory_space<vmem>>, vector<1x6x1x8xf32>,
    %cst_97 = arith.constant 0.000000e+00 : f32
    %82 = vector.broadcast %cst_97 : f32 to vector<1x6x8xf32>
    %c1_98 = arith.constant 1 : index
    %c0_99 = arith.constant 0 : index
    %c0_100 = arith.constant 0 : index
    %c0_101 = arith.constant 0 : index
    %83 = vector.load %arg12[%c1_98, %c0_99, %c0_100, %c0_101] : memref<2x6x6x8xf32, #tpu.memory_space<vmem>>, vector<1x1x6x8xf32>
    %84 = vector.shape_cast %83 : vector<1x1x6x8xf32> to vector<1x6x8xf32>
    %85 = vector.shape_cast %82 : vector<1x6x8xf32> to vector<1x1x6x8xf32>
    tpu.vector_store %arg12[%c1_98, %c0_99, %c0_100, %c0_101], %85 {strides = array<i32>} : memref<2x6x6x8xf32, #tpu.memory_space<vmem>>, vector<1x1x6x8xf32>,
    %cst_102 = arith.constant 0.000000e+00 : f32
    %86 = vector.broadcast %cst_102 : f32 to vector<1x6x8xf32>
    %c1_103 = arith.constant 1 : index
    %c5_104 = arith.constant 5 : index
    %c0_105 = arith.constant 0 : index
    %c0_106 = arith.constant 0 : index
    %87 = vector.load %arg12[%c1_103, %c5_104, %c0_105, %c0_106] : memref<2x6x6x8xf32, #tpu.memory_space<vmem>>, vector<1x1x6x8xf32>
    %88 = vector.shape_cast %87 : vector<1x1x6x8xf32> to vector<1x6x8xf32>
    %89 = vector.shape_cast %86 : vector<1x6x8xf32> to vector<1x1x6x8xf32>
    tpu.vector_store %arg12[%c1_103, %c5_104, %c0_105, %c0_106], %89 {strides = array<i32>} : memref<2x6x6x8xf32, #tpu.memory_space<vmem>>, vector<1x1x6x8xf32>,
    %cst_107 = arith.constant 0.000000e+00 : f32
    %90 = vector.broadcast %cst_107 : f32 to vector<6x1x8xf32>
    %c1_108 = arith.constant 1 : index
    %c0_109 = arith.constant 0 : index
    %c0_110 = arith.constant 0 : index
    %c0_111 = arith.constant 0 : index
    %91 = vector.load %arg12[%c1_108, %c0_109, %c0_110, %c0_111] : memref<2x6x6x8xf32, #tpu.memory_space<vmem>>, vector<1x6x1x8xf32>
    %92 = vector.shape_cast %91 : vector<1x6x1x8xf32> to vector<6x1x8xf32>
    %93 = vector.shape_cast %90 : vector<6x1x8xf32> to vector<1x6x1x8xf32>
    tpu.vector_store %arg12[%c1_108, %c0_109, %c0_110, %c0_111], %93 {strides = array<i32>} : memref<2x6x6x8xf32, #tpu.memory_space<vmem>>, vector<1x6x1x8xf32>,
    %cst_112 = arith.constant 0.000000e+00 : f32
    %94 = vector.broadcast %cst_112 : f32 to vector<6x1x8xf32>
    %c1_113 = arith.constant 1 : index
    %c0_114 = arith.constant 0 : index
    %c5_115 = arith.constant 5 : index
    %c0_116 = arith.constant 0 : index
    %95 = vector.load %arg12[%c1_113, %c0_114, %c5_115, %c0_116] : memref<2x6x6x8xf32, #tpu.memory_space<vmem>>, vector<1x6x1x8xf32>
    %96 = vector.shape_cast %95 : vector<1x6x1x8xf32> to vector<6x1x8xf32>
    %97 = vector.shape_cast %94 : vector<6x1x8xf32> to vector<1x6x1x8xf32>
    tpu.vector_store %arg12[%c1_113, %c0_114, %c5_115, %c0_116], %97 {strides = array<i32>} : memref<2x6x6x8xf32, #tpu.memory_space<vmem>>, vector<1x6x1x8xf32>,
    %cst_117 = arith.constant 0.000000e+00 : f32
    %98 = vector.broadcast %cst_117 : f32 to vector<1x4x8xf32>
    %c0_118 = arith.constant 0 : index
    %c0_119 = arith.constant 0 : index
    %c0_120 = arith.constant 0 : index
    %c0_121 = arith.constant 0 : index
    %99 = vector.load %arg13[%c0_118, %c0_119, %c0_120, %c0_121] : memref<2x4x4x8xf32, #tpu.memory_space<vmem>>, vector<1x1x4x8xf32>
    %100 = vector.shape_cast %99 : vector<1x1x4x8xf32> to vector<1x4x8xf32>
    %101 = vector.shape_cast %98 : vector<1x4x8xf32> to vector<1x1x4x8xf32>
    tpu.vector_store %arg13[%c0_118, %c0_119, %c0_120, %c0_121], %101 {strides = array<i32>} : memref<2x4x4x8xf32, #tpu.memory_space<vmem>>, vector<1x1x4x8xf32>,
    %cst_122 = arith.constant 0.000000e+00 : f32
    %102 = vector.broadcast %cst_122 : f32 to vector<1x4x8xf32>
    %c0_123 = arith.constant 0 : index
    %c3 = arith.constant 3 : index
    %c0_124 = arith.constant 0 : index
    %c0_125 = arith.constant 0 : index
    %103 = vector.load %arg13[%c0_123, %c3, %c0_124, %c0_125] : memref<2x4x4x8xf32, #tpu.memory_space<vmem>>, vector<1x1x4x8xf32>
    %104 = vector.shape_cast %103 : vector<1x1x4x8xf32> to vector<1x4x8xf32>
    %105 = vector.shape_cast %102 : vector<1x4x8xf32> to vector<1x1x4x8xf32>
    tpu.vector_store %arg13[%c0_123, %c3, %c0_124, %c0_125], %105 {strides = array<i32>} : memref<2x4x4x8xf32, #tpu.memory_space<vmem>>, vector<1x1x4x8xf32>,
    %cst_126 = arith.constant 0.000000e+00 : f32
    %106 = vector.broadcast %cst_126 : f32 to vector<4x1x8xf32>
    %c0_127 = arith.constant 0 : index
    %c0_128 = arith.constant 0 : index
    %c0_129 = arith.constant 0 : index
    %c0_130 = arith.constant 0 : index
    %107 = vector.load %arg13[%c0_127, %c0_128, %c0_129, %c0_130] : memref<2x4x4x8xf32, #tpu.memory_space<vmem>>, vector<1x4x1x8xf32>
    %108 = vector.shape_cast %107 : vector<1x4x1x8xf32> to vector<4x1x8xf32>
    %109 = vector.shape_cast %106 : vector<4x1x8xf32> to vector<1x4x1x8xf32>
    tpu.vector_store %arg13[%c0_127, %c0_128, %c0_129, %c0_130], %109 {strides = array<i32>} : memref<2x4x4x8xf32, #tpu.memory_space<vmem>>, vector<1x4x1x8xf32>,
    %cst_131 = arith.constant 0.000000e+00 : f32
    %110 = vector.broadcast %cst_131 : f32 to vector<4x1x8xf32>
    %c0_132 = arith.constant 0 : index
    %c0_133 = arith.constant 0 : index
    %c3_134 = arith.constant 3 : index
    %c0_135 = arith.constant 0 : index
    %111 = vector.load %arg13[%c0_132, %c0_133, %c3_134, %c0_135] : memref<2x4x4x8xf32, #tpu.memory_space<vmem>>, vector<1x4x1x8xf32>
    %112 = vector.shape_cast %111 : vector<1x4x1x8xf32> to vector<4x1x8xf32>
    %113 = vector.shape_cast %110 : vector<4x1x8xf32> to vector<1x4x1x8xf32>
    tpu.vector_store %arg13[%c0_132, %c0_133, %c3_134, %c0_135], %113 {strides = array<i32>} : memref<2x4x4x8xf32, #tpu.memory_space<vmem>>, vector<1x4x1x8xf32>,
    %cst_136 = arith.constant 0.000000e+00 : f32
    %114 = vector.broadcast %cst_136 : f32 to vector<1x4x8xf32>
    %c1_137 = arith.constant 1 : index
    %c0_138 = arith.constant 0 : index
    %c0_139 = arith.constant 0 : index
    %c0_140 = arith.constant 0 : index
    %115 = vector.load %arg13[%c1_137, %c0_138, %c0_139, %c0_140] : memref<2x4x4x8xf32, #tpu.memory_space<vmem>>, vector<1x1x4x8xf32>
    %116 = vector.shape_cast %115 : vector<1x1x4x8xf32> to vector<1x4x8xf32>
    %117 = vector.shape_cast %114 : vector<1x4x8xf32> to vector<1x1x4x8xf32>
    tpu.vector_store %arg13[%c1_137, %c0_138, %c0_139, %c0_140], %117 {strides = array<i32>} : memref<2x4x4x8xf32, #tpu.memory_space<vmem>>, vector<1x1x4x8xf32>,
    %cst_141 = arith.constant 0.000000e+00 : f32
    %118 = vector.broadcast %cst_141 : f32 to vector<1x4x8xf32>
    %c1_142 = arith.constant 1 : index
    %c3_143 = arith.constant 3 : index
    %c0_144 = arith.constant 0 : index
    %c0_145 = arith.constant 0 : index
    %119 = vector.load %arg13[%c1_142, %c3_143, %c0_144, %c0_145] : memref<2x4x4x8xf32, #tpu.memory_space<vmem>>, vector<1x1x4x8xf32>
    %120 = vector.shape_cast %119 : vector<1x1x4x8xf32> to vector<1x4x8xf32>
    %121 = vector.shape_cast %118 : vector<1x4x8xf32> to vector<1x1x4x8xf32>
    tpu.vector_store %arg13[%c1_142, %c3_143, %c0_144, %c0_145], %121 {strides = array<i32>} : memref<2x4x4x8xf32, #tpu.memory_space<vmem>>, vector<1x1x4x8xf32>,
    %cst_146 = arith.constant 0.000000e+00 : f32
    %122 = vector.broadcast %cst_146 : f32 to vector<4x1x8xf32>
    %c1_147 = arith.constant 1 : index
    %c0_148 = arith.constant 0 : index
    %c0_149 = arith.constant 0 : index
    %c0_150 = arith.constant 0 : index
    %123 = vector.load %arg13[%c1_147, %c0_148, %c0_149, %c0_150] : memref<2x4x4x8xf32, #tpu.memory_space<vmem>>, vector<1x4x1x8xf32>
    %124 = vector.shape_cast %123 : vector<1x4x1x8xf32> to vector<4x1x8xf32>
    %125 = vector.shape_cast %122 : vector<4x1x8xf32> to vector<1x4x1x8xf32>
    tpu.vector_store %arg13[%c1_147, %c0_148, %c0_149, %c0_150], %125 {strides = array<i32>} : memref<2x4x4x8xf32, #tpu.memory_space<vmem>>, vector<1x4x1x8xf32>,
    %cst_151 = arith.constant 0.000000e+00 : f32
    %126 = vector.broadcast %cst_151 : f32 to vector<4x1x8xf32>
    %c1_152 = arith.constant 1 : index
    %c0_153 = arith.constant 0 : index
    %c3_154 = arith.constant 3 : index
    %c0_155 = arith.constant 0 : index
    %127 = vector.load %arg13[%c1_152, %c0_153, %c3_154, %c0_155] : memref<2x4x4x8xf32, #tpu.memory_space<vmem>>, vector<1x4x1x8xf32>
    %128 = vector.shape_cast %127 : vector<1x4x1x8xf32> to vector<4x1x8xf32>
    %129 = vector.shape_cast %126 : vector<4x1x8xf32> to vector<1x4x1x8xf32>
    tpu.vector_store %arg13[%c1_152, %c0_153, %c3_154, %c0_155], %129 {strides = array<i32>} : memref<2x4x4x8xf32, #tpu.memory_space<vmem>>, vector<1x4x1x8xf32>,
    %c0_156 = arith.constant 0 : index
    %c0_157 = arith.constant 0 : index
    %c0_158 = arith.constant 0 : index
    %c0_159 = arith.constant 0 : index
    %130 = vector.load %arg1[%c0_156, %c0_157, %c0_158, %c0_159] : memref<2x16x16x4xf32, #tpu.memory_space<vmem>>, vector<2x16x16x4xf32>
    %c0_160 = arith.constant 0 : index
    %c1_161 = arith.constant 1 : index
    %c1_162 = arith.constant 1 : index
    %c0_163 = arith.constant 0 : index
    %131 = vector.load %arg10[%c0_160, %c1_161, %c1_162, %c0_163] : memref<2x18x18x4xf32, #tpu.memory_space<vmem>>, vector<2x16x16x4xf32>
    tpu.vector_store %arg10[%c0_160, %c1_161, %c1_162, %c0_163], %130 {strides = array<i32>} : memref<2x18x18x4xf32, #tpu.memory_space<vmem>>, vector<2x16x16x4xf32>,
    %c0_164 = arith.constant 0 : index
    %c0_165 = arith.constant 0 : index
    %c0_166 = arith.constant 0 : index
    %c0_167 = arith.constant 0 : index
    %132 = vector.load %arg10[%c0_164, %c0_165, %c0_166, %c0_167] : memref<2x18x18x4xf32, #tpu.memory_space<vmem>>, vector<1x1x8x4xf32>
    %133 = vector.shape_cast %132 : vector<1x1x8x4xf32> to vector<8x4xf32>
    %c0_168 = arith.constant 0 : index
    %c0_169 = arith.constant 0 : index
    %134 = vector.load %arg14[%c0_168, %c0_169] : memref<128x128xf32, #tpu.memory_space<vmem>>, vector<8x4xf32>
    tpu.vector_store %arg14[%c0_168, %c0_169], %133 {strides = array<i32>} : memref<128x128xf32, #tpu.memory_space<vmem>>, vector<8x4xf32>,
    %c0_170 = arith.constant 0 : index
    %c0_171 = arith.constant 0 : index
    %c9_172 = arith.constant 9 : index
    %c0_173 = arith.constant 0 : index
    %135 = vector.load %arg10[%c0_170, %c0_171, %c9_172, %c0_173] : memref<2x18x18x4xf32, #tpu.memory_space<vmem>>, vector<1x1x8x4xf32>
    %136 = vector.shape_cast %135 : vector<1x1x8x4xf32> to vector<8x4xf32>
    %c0_174 = arith.constant 0 : index
    %c4 = arith.constant 4 : index
    %137 = vector.load %arg14[%c0_174, %c4] : memref<128x128xf32, #tpu.memory_space<vmem>>, vector<8x4xf32>
    tpu.vector_store %arg14[%c0_174, %c4], %136 {strides = array<i32>} : memref<128x128xf32, #tpu.memory_space<vmem>>, vector<8x4xf32>,
    %c0_175 = arith.constant 0 : index
    %c0_176 = arith.constant 0 : index
    %c1_177 = arith.constant 1 : index
    %c0_178 = arith.constant 0 : index
    %138 = vector.load %arg10[%c0_175, %c0_176, %c1_177, %c0_178] : memref<2x18x18x4xf32, #tpu.memory_space<vmem>>, vector<1x1x8x4xf32>
    %139 = vector.shape_cast %138 : vector<1x1x8x4xf32> to vector<8x4xf32>
    %c0_179 = arith.constant 0 : index
    %c8 = arith.constant 8 : index
    %140 = vector.load %arg14[%c0_179, %c8] : memref<128x128xf32, #tpu.memory_space<vmem>>, vector<8x4xf32>
    tpu.vector_store %arg14[%c0_179, %c8], %139 {strides = array<i32>} : memref<128x128xf32, #tpu.memory_space<vmem>>, vector<8x4xf32>,
    %c0_180 = arith.constant 0 : index
    %c1_181 = arith.constant 1 : index
    %c0_182 = arith.constant 0 : index
    %c0_183 = arith.constant 0 : index
    %141 = vector.load %arg10[%c0_180, %c1_181, %c0_182, %c0_183] : memref<2x18x18x4xf32, #tpu.memory_space<vmem>>, vector<1x1x8x4xf32>
    %142 = vector.shape_cast %141 : vector<1x1x8x4xf32> to vector<8x4xf32>
    %c0_184 = arith.constant 0 : index
    %c12 = arith.constant 12 : index
    %143 = vector.load %arg14[%c0_184, %c12] : memref<128x128xf32, #tpu.memory_space<vmem>>, vector<8x4xf32>
    tpu.vector_store %arg14[%c0_184, %c12], %142 {strides = array<i32>} : memref<128x128xf32, #tpu.memory_space<vmem>>, vector<8x4xf32>,
    %c0_185 = arith.constant 0 : index
    %c1_186 = arith.constant 1 : index
    %c9_187 = arith.constant 9 : index
    %c0_188 = arith.constant 0 : index
    %144 = vector.load %arg10[%c0_185, %c1_186, %c9_187, %c0_188] : memref<2x18x18x4xf32, #tpu.memory_space<vmem>>, vector<1x1x8x4xf32>
    %145 = vector.shape_cast %144 : vector<1x1x8x4xf32> to vector<8x4xf32>
    %c0_189 = arith.constant 0 : index
    %c16 = arith.constant 16 : index
    %146 = vector.load %arg14[%c0_189, %c16] : memref<128x128xf32, #tpu.memory_space<vmem>>, vector<8x4xf32>
    tpu.vector_store %arg14[%c0_189, %c16], %145 {strides = array<i32>} : memref<128x128xf32, #tpu.memory_space<vmem>>, vector<8x4xf32>,
    %c0_190 = arith.constant 0 : index
    %c1_191 = arith.constant 1 : index
    %c1_192 = arith.constant 1 : index
    %c0_193 = arith.constant 0 : index
    %147 = vector.load %arg10[%c0_190, %c1_191, %c1_192, %c0_193] : memref<2x18x18x4xf32, #tpu.memory_space<vmem>>, vector<1x1x8x4xf32>
    %148 = vector.shape_cast %147 : vector<1x1x8x4xf32> to vector<8x4xf32>
    %c0_194 = arith.constant 0 : index
    %c20 = arith.constant 20 : index
    %149 = vector.load %arg14[%c0_194, %c20] : memref<128x128xf32, #tpu.memory_space<vmem>>, vector<8x4xf32>
    tpu.vector_store %arg14[%c0_194, %c20], %148 {strides = array<i32>} : memref<128x128xf32, #tpu.memory_space<vmem>>, vector<8x4xf32>,
    %c0_195 = arith.constant 0 : index
    %c2 = arith.constant 2 : index
    %c0_196 = arith.constant 0 : index
    %c0_197 = arith.constant 0 : index
    %150 = vector.load %arg10[%c0_195, %c2, %c0_196, %c0_197] : memref<2x18x18x4xf32, #tpu.memory_space<vmem>>, vector<1x1x8x4xf32>
    %151 = vector.shape_cast %150 : vector<1x1x8x4xf32> to vector<8x4xf32>
    %c0_198 = arith.constant 0 : index
    %c24 = arith.constant 24 : index
    %152 = vector.load %arg14[%c0_198, %c24] : memref<128x128xf32, #tpu.memory_space<vmem>>, vector<8x4xf32>
    tpu.vector_store %arg14[%c0_198, %c24], %151 {strides = array<i32>} : memref<128x128xf32, #tpu.memory_space<vmem>>, vector<8x4xf32>,
    %c0_199 = arith.constant 0 : index
    %c2_200 = arith.constant 2 : index
    %c9_201 = arith.constant 9 : index
    %c0_202 = arith.constant 0 : index
    %153 = vector.load %arg10[%c0_199, %c2_200, %c9_201, %c0_202] : memref<2x18x18x4xf32, #tpu.memory_space<vmem>>, vector<1x1x8x4xf32>
    %154 = vector.shape_cast %153 : vector<1x1x8x4xf32> to vector<8x4xf32>
    %c0_203 = arith.constant 0 : index
    %c28 = arith.constant 28 : index
    %155 = vector.load %arg14[%c0_203, %c28] : memref<128x128xf32, #tpu.memory_space<vmem>>, vector<8x4xf32>
    tpu.vector_store %arg14[%c0_203, %c28], %154 {strides = array<i32>} : memref<128x128xf32, #tpu.memory_space<vmem>>, vector<8x4xf32>,
    %c0_204 = arith.constant 0 : index
    %c2_205 = arith.constant 2 : index
    %c1_206 = arith.constant 1 : index
    %c0_207 = arith.constant 0 : index
    %156 = vector.load %arg10[%c0_204, %c2_205, %c1_206, %c0_207] : memref<2x18x18x4xf32, #tpu.memory_space<vmem>>, vector<1x1x8x4xf32>
    %157 = vector.shape_cast %156 : vector<1x1x8x4xf32> to vector<8x4xf32>
    %c0_208 = arith.constant 0 : index
    %c32 = arith.constant 32 : index
    %158 = vector.load %arg14[%c0_208, %c32] : memref<128x128xf32, #tpu.memory_space<vmem>>, vector<8x4xf32>
    tpu.vector_store %arg14[%c0_208, %c32], %157 {strides = array<i32>} : memref<128x128xf32, #tpu.memory_space<vmem>>, vector<8x4xf32>,
    %c0_209 = arith.constant 0 : index
    %c2_210 = arith.constant 2 : index
    %c0_211 = arith.constant 0 : index
    %c0_212 = arith.constant 0 : index
    %159 = vector.load %arg10[%c0_209, %c2_210, %c0_211, %c0_212] : memref<2x18x18x4xf32, #tpu.memory_space<vmem>>, vector<1x1x8x4xf32>
    %160 = vector.shape_cast %159 : vector<1x1x8x4xf32> to vector<8x4xf32>
    %c8_213 = arith.constant 8 : index
    %c0_214 = arith.constant 0 : index
    %161 = vector.load %arg14[%c8_213, %c0_214] : memref<128x128xf32, #tpu.memory_space<vmem>>, vector<8x4xf32>
    tpu.vector_store %arg14[%c8_213, %c0_214], %160 {strides = array<i32>} : memref<128x128xf32, #tpu.memory_space<vmem>>, vector<8x4xf32>,
    %c0_215 = arith.constant 0 : index
    %c2_216 = arith.constant 2 : index
    %c9_217 = arith.constant 9 : index
    %c0_218 = arith.constant 0 : index
    %162 = vector.load %arg10[%c0_215, %c2_216, %c9_217, %c0_218] : memref<2x18x18x4xf32, #tpu.memory_space<vmem>>, vector<1x1x8x4xf32>
    %163 = vector.shape_cast %162 : vector<1x1x8x4xf32> to vector<8x4xf32>
    %c8_219 = arith.constant 8 : index
    %c4_220 = arith.constant 4 : index
    %164 = vector.load %arg14[%c8_219, %c4_220] : memref<128x128xf32, #tpu.memory_space<vmem>>, vector<8x4xf32>
    tpu.vector_store %arg14[%c8_219, %c4_220], %163 {strides = array<i32>} : memref<128x128xf32, #tpu.memory_space<vmem>>, vector<8x4xf32>,
    %c0_221 = arith.constant 0 : index
    %c2_222 = arith.constant 2 : index
    %c1_223 = arith.constant 1 : index
    %c0_224 = arith.constant 0 : index
    %165 = vector.load %arg10[%c0_221, %c2_222, %c1_223, %c0_224] : memref<2x18x18x4xf32, #tpu.memory_space<vmem>>, vector<1x1x8x4xf32>
    %166 = vector.shape_cast %165 : vector<1x1x8x4xf32> to vector<8x4xf32>
    %c8_225 = arith.constant 8 : index
    %c8_226 = arith.constant 8 : index
    %167 = vector.load %arg14[%c8_225, %c8_226] : memref<128x128xf32, #tpu.memory_space<vmem>>, vector<8x4xf32>
    tpu.vector_store %arg14[%c8_225, %c8_226], %166 {strides = array<i32>} : memref<128x128xf32, #tpu.memory_space<vmem>>, vector<8x4xf32>,
    %c0_227 = arith.constant 0 : index
    %c3_228 = arith.constant 3 : index
    %c0_229 = arith.constant 0 : index
    %c0_230 = arith.constant 0 : index
    %168 = vector.load %arg10[%c0_227, %c3_228, %c0_229, %c0_230] : memref<2x18x18x4xf32, #tpu.memory_space<vmem>>, vector<1x1x8x4xf32>
    %169 = vector.shape_cast %168 : vector<1x1x8x4xf32> to vector<8x4xf32>
    %c8_231 = arith.constant 8 : index
    %c12_232 = arith.constant 12 : index
    %170 = vector.load %arg14[%c8_231, %c12_232] : memref<128x128xf32, #tpu.memory_space<vmem>>, vector<8x4xf32>
    tpu.vector_store %arg14[%c8_231, %c12_232], %169 {strides = array<i32>} : memref<128x128xf32, #tpu.memory_space<vmem>>, vector<8x4xf32>,
    %c0_233 = arith.constant 0 : index
    %c3_234 = arith.constant 3 : index
    %c9_235 = arith.constant 9 : index
    %c0_236 = arith.constant 0 : index
    %171 = vector.load %arg10[%c0_233, %c3_234, %c9_235, %c0_236] : memref<2x18x18x4xf32, #tpu.memory_space<vmem>>, vector<1x1x8x4xf32>
    %172 = vector.shape_cast %171 : vector<1x1x8x4xf32> to vector<8x4xf32>
    %c8_237 = arith.constant 8 : index
    %c16_238 = arith.constant 16 : index
    %173 = vector.load %arg14[%c8_237, %c16_238] : memref<128x128xf32, #tpu.memory_space<vmem>>, vector<8x4xf32>
    tpu.vector_store %arg14[%c8_237, %c16_238], %172 {strides = array<i32>} : memref<128x128xf32, #tpu.memory_space<vmem>>, vector<8x4xf32>,
    %c0_239 = arith.constant 0 : index
    %c3_240 = arith.constant 3 : index
    %c1_241 = arith.constant 1 : index
    %c0_242 = arith.constant 0 : index
    %174 = vector.load %arg10[%c0_239, %c3_240, %c1_241, %c0_242] : memref<2x18x18x4xf32, #tpu.memory_space<vmem>>, vector<1x1x8x4xf32>
    %175 = vector.shape_cast %174 : vector<1x1x8x4xf32> to vector<8x4xf32>
    %c8_243 = arith.constant 8 : index
    %c20_244 = arith.constant 20 : index
    %176 = vector.load %arg14[%c8_243, %c20_244] : memref<128x128xf32, #tpu.memory_space<vmem>>, vector<8x4xf32>
    tpu.vector_store %arg14[%c8_243, %c20_244], %175 {strides = array<i32>} : memref<128x128xf32, #tpu.memory_space<vmem>>, vector<8x4xf32>,
    %c0_245 = arith.constant 0 : index
    %c4_246 = arith.constant 4 : index
    %c0_247 = arith.constant 0 : index
    %c0_248 = arith.constant 0 : index
    %177 = vector.load %arg10[%c0_245, %c4_246, %c0_247, %c0_248] : memref<2x18x18x4xf32, #tpu.memory_space<vmem>>, vector<1x1x8x4xf32>
    %178 = vector.shape_cast %177 : vector<1x1x8x4xf32> to vector<8x4xf32>
    %c8_249 = arith.constant 8 : index
    %c24_250 = arith.constant 24 : index
    %179 = vector.load %arg14[%c8_249, %c24_250] : memref<128x128xf32, #tpu.memory_space<vmem>>, vector<8x4xf32>
    tpu.vector_store %arg14[%c8_249, %c24_250], %178 {strides = array<i32>} : memref<128x128xf32, #tpu.memory_space<vmem>>, vector<8x4xf32>,
    %c0_251 = arith.constant 0 : index
    %c4_252 = arith.constant 4 : index
    %c9_253 = arith.constant 9 : index
    %c0_254 = arith.constant 0 : index
    %180 = vector.load %arg10[%c0_251, %c4_252, %c9_253, %c0_254] : memref<2x18x18x4xf32, #tpu.memory_space<vmem>>, vector<1x1x8x4xf32>
    %181 = vector.shape_cast %180 : vector<1x1x8x4xf32> to vector<8x4xf32>
    %c8_255 = arith.constant 8 : index
    %c28_256 = arith.constant 28 : index
    %182 = vector.load %arg14[%c8_255, %c28_256] : memref<128x128xf32, #tpu.memory_space<vmem>>, vector<8x4xf32>
    tpu.vector_store %arg14[%c8_255, %c28_256], %181 {strides = array<i32>} : memref<128x128xf32, #tpu.memory_space<vmem>>, vector<8x4xf32>,
    %c0_257 = arith.constant 0 : index
    %c4_258 = arith.constant 4 : index
    %c1_259 = arith.constant 1 : index
    %c0_260 = arith.constant 0 : index
    %183 = vector.load %arg10[%c0_257, %c4_258, %c1_259, %c0_260] : memref<2x18x18x4xf32, #tpu.memory_space<vmem>>, vector<1x1x8x4xf32>
    %184 = vector.shape_cast %183 : vector<1x1x8x4xf32> to vector<8x4xf32>
    %c8_261 = arith.constant 8 : index
    %c32_262 = arith.constant 32 : index
    %185 = vector.load %arg14[%c8_261, %c32_262] : memref<128x128xf32, #tpu.memory_space<vmem>>, vector<8x4xf32>
    tpu.vector_store %arg14[%c8_261, %c32_262], %184 {strides = array<i32>} : memref<128x128xf32, #tpu.memory_space<vmem>>, vector<8x4xf32>,
    %c0_263 = arith.constant 0 : index
    %c4_264 = arith.constant 4 : index
    %c0_265 = arith.constant 0 : index
    %c0_266 = arith.constant 0 : index
    %186 = vector.load %arg10[%c0_263, %c4_264, %c0_265, %c0_266] : memref<2x18x18x4xf32, #tpu.memory_space<vmem>>, vector<1x1x8x4xf32>
    %187 = vector.shape_cast %186 : vector<1x1x8x4xf32> to vector<8x4xf32>
    %c16_267 = arith.constant 16 : index
    %c0_268 = arith.constant 0 : index
    %188 = vector.load %arg14[%c16_267, %c0_268] : memref<128x128xf32, #tpu.memory_space<vmem>>, vector<8x4xf32>
    tpu.vector_store %arg14[%c16_267, %c0_268], %187 {strides = array<i32>} : memref<128x128xf32, #tpu.memory_space<vmem>>, vector<8x4xf32>,
    %c0_269 = arith.constant 0 : index
    %c4_270 = arith.constant 4 : index
    %c9_271 = arith.constant 9 : index
    %c0_272 = arith.constant 0 : index
    %189 = vector.load %arg10[%c0_269, %c4_270, %c9_271, %c0_272] : memref<2x18x18x4xf32, #tpu.memory_space<vmem>>, vector<1x1x8x4xf32>
    %190 = vector.shape_cast %189 : vector<1x1x8x4xf32> to vector<8x4xf32>
    %c16_273 = arith.constant 16 : index
    %c4_274 = arith.constant 4 : index
    %191 = vector.load %arg14[%c16_273, %c4_274] : memref<128x128xf32, #tpu.memory_space<vmem>>, vector<8x4xf32>
    tpu.vector_store %arg14[%c16_273, %c4_274], %190 {strides = array<i32>} : memref<128x128xf32, #tpu.memory_space<vmem>>, vector<8x4xf32>,
    %c0_275 = arith.constant 0 : index
    %c4_276 = arith.constant 4 : index
    %c1_277 = arith.constant 1 : index
    %c0_278 = arith.constant 0 : index
    %192 = vector.load %arg10[%c0_275, %c4_276, %c1_277, %c0_278] : memref<2x18x18x4xf32, #tpu.memory_space<vmem>>, vector<1x1x8x4xf32>
    %193 = vector.shape_cast %192 : vector<1x1x8x4xf32> to vector<8x4xf32>
    %c16_279 = arith.constant 16 : index
    %c8_280 = arith.constant 8 : index
    %194 = vector.load %arg14[%c16_279, %c8_280] : memref<128x128xf32, #tpu.memory_space<vmem>>, vector<8x4xf32>
    tpu.vector_store %arg14[%c16_279, %c8_280], %193 {strides = array<i32>} : memref<128x128xf32, #tpu.memory_space<vmem>>, vector<8x4xf32>,
    %c0_281 = arith.constant 0 : index
    %c5_282 = arith.constant 5 : index
    %c0_283 = arith.constant 0 : index
    %c0_284 = arith.constant 0 : index
    %195 = vector.load %arg10[%c0_281, %c5_282, %c0_283, %c0_284] : memref<2x18x18x4xf32, #tpu.memory_space<vmem>>, vector<1x1x8x4xf32>
    %196 = vector.shape_cast %195 : vector<1x1x8x4xf32> to vector<8x4xf32>
    %c16_285 = arith.constant 16 : index
    %c12_286 = arith.constant 12 : index
    %197 = vector.load %arg14[%c16_285, %c12_286] : memref<128x128xf32, #tpu.memory_space<vmem>>, vector<8x4xf32>
    tpu.vector_store %arg14[%c16_285, %c12_286], %196 {strides = array<i32>} : memref<128x128xf32, #tpu.memory_space<vmem>>, vector<8x4xf32>,
    %c0_287 = arith.constant 0 : index
    %c5_288 = arith.constant 5 : index
    %c9_289 = arith.constant 9 : index
    %c0_290 = arith.constant 0 : index
    %198 = vector.load %arg10[%c0_287, %c5_288, %c9_289, %c0_290] : memref<2x18x18x4xf32, #tpu.memory_space<vmem>>, vector<1x1x8x4xf32>
    %199 = vector.shape_cast %198 : vector<1x1x8x4xf32> to vector<8x4xf32>
    %c16_291 = arith.constant 16 : index
    %c16_292 = arith.constant 16 : index
    %200 = vector.load %arg14[%c16_291, %c16_292] : memref<128x128xf32, #tpu.memory_space<vmem>>, vector<8x4xf32>
    tpu.vector_store %arg14[%c16_291, %c16_292], %199 {strides = array<i32>} : memref<128x128xf32, #tpu.memory_space<vmem>>, vector<8x4xf32>,
    %c0_293 = arith.constant 0 : index
    %c5_294 = arith.constant 5 : index
    %c1_295 = arith.constant 1 : index
    %c0_296 = arith.constant 0 : index
    %201 = vector.load %arg10[%c0_293, %c5_294, %c1_295, %c0_296] : memref<2x18x18x4xf32, #tpu.memory_space<vmem>>, vector<1x1x8x4xf32>
    %202 = vector.shape_cast %201 : vector<1x1x8x4xf32> to vector<8x4xf32>
    %c16_297 = arith.constant 16 : index
    %c20_298 = arith.constant 20 : index
    %203 = vector.load %arg14[%c16_297, %c20_298] : memref<128x128xf32, #tpu.memory_space<vmem>>, vector<8x4xf32>
    tpu.vector_store %arg14[%c16_297, %c20_298], %202 {strides = array<i32>} : memref<128x128xf32, #tpu.memory_space<vmem>>, vector<8x4xf32>,
    %c0_299 = arith.constant 0 : index
    %c6 = arith.constant 6 : index
    %c0_300 = arith.constant 0 : index
    %c0_301 = arith.constant 0 : index
    %204 = vector.load %arg10[%c0_299, %c6, %c0_300, %c0_301] : memref<2x18x18x4xf32, #tpu.memory_space<vmem>>, vector<1x1x8x4xf32>
    %205 = vector.shape_cast %204 : vector<1x1x8x4xf32> to vector<8x4xf32>
    %c16_302 = arith.constant 16 : index
    %c24_303 = arith.constant 24 : index
    %206 = vector.load %arg14[%c16_302, %c24_303] : memref<128x128xf32, #tpu.memory_space<vmem>>, vector<8x4xf32>
    tpu.vector_store %arg14[%c16_302, %c24_303], %205 {strides = array<i32>} : memref<128x128xf32, #tpu.memory_space<vmem>>, vector<8x4xf32>,
    %c0_304 = arith.constant 0 : index
    %c6_305 = arith.constant 6 : index
    %c9_306 = arith.constant 9 : index
    %c0_307 = arith.constant 0 : index
    %207 = vector.load %arg10[%c0_304, %c6_305, %c9_306, %c0_307] : memref<2x18x18x4xf32, #tpu.memory_space<vmem>>, vector<1x1x8x4xf32>
    %208 = vector.shape_cast %207 : vector<1x1x8x4xf32> to vector<8x4xf32>
    %c16_308 = arith.constant 16 : index
    %c28_309 = arith.constant 28 : index
    %209 = vector.load %arg14[%c16_308, %c28_309] : memref<128x128xf32, #tpu.memory_space<vmem>>, vector<8x4xf32>
    tpu.vector_store %arg14[%c16_308, %c28_309], %208 {strides = array<i32>} : memref<128x128xf32, #tpu.memory_space<vmem>>, vector<8x4xf32>,
    %c0_310 = arith.constant 0 : index
    %c6_311 = arith.constant 6 : index
    %c1_312 = arith.constant 1 : index
    %c0_313 = arith.constant 0 : index
    %210 = vector.load %arg10[%c0_310, %c6_311, %c1_312, %c0_313] : memref<2x18x18x4xf32, #tpu.memory_space<vmem>>, vector<1x1x8x4xf32>
    %211 = vector.shape_cast %210 : vector<1x1x8x4xf32> to vector<8x4xf32>
    %c16_314 = arith.constant 16 : index
    %c32_315 = arith.constant 32 : index
    %212 = vector.load %arg14[%c16_314, %c32_315] : memref<128x128xf32, #tpu.memory_space<vmem>>, vector<8x4xf32>
    tpu.vector_store %arg14[%c16_314, %c32_315], %211 {strides = array<i32>} : memref<128x128xf32, #tpu.memory_space<vmem>>, vector<8x4xf32>,
    %c0_316 = arith.constant 0 : index
    %c6_317 = arith.constant 6 : index
    %c0_318 = arith.constant 0 : index
    %c0_319 = arith.constant 0 : index
    %213 = vector.load %arg10[%c0_316, %c6_317, %c0_318, %c0_319] : memref<2x18x18x4xf32, #tpu.memory_space<vmem>>, vector<1x1x8x4xf32>
    %214 = vector.shape_cast %213 : vector<1x1x8x4xf32> to vector<8x4xf32>
    %c24_320 = arith.constant 24 : index
    %c0_321 = arith.constant 0 : index
    %215 = vector.load %arg14[%c24_320, %c0_321] : memref<128x128xf32, #tpu.memory_space<vmem>>, vector<8x4xf32>
    tpu.vector_store %arg14[%c24_320, %c0_321], %214 {strides = array<i32>} : memref<128x128xf32, #tpu.memory_space<vmem>>, vector<8x4xf32>,
    %c0_322 = arith.constant 0 : index
    %c6_323 = arith.constant 6 : index
    %c9_324 = arith.constant 9 : index
    %c0_325 = arith.constant 0 : index
    %216 = vector.load %arg10[%c0_322, %c6_323, %c9_324, %c0_325] : memref<2x18x18x4xf32, #tpu.memory_space<vmem>>, vector<1x1x8x4xf32>
    %217 = vector.shape_cast %216 : vector<1x1x8x4xf32> to vector<8x4xf32>
    %c24_326 = arith.constant 24 : index
    %c4_327 = arith.constant 4 : index
    %218 = vector.load %arg14[%c24_326, %c4_327] : memref<128x128xf32, #tpu.memory_space<vmem>>, vector<8x4xf32>
    tpu.vector_store %arg14[%c24_326, %c4_327], %217 {strides = array<i32>} : memref<128x128xf32, #tpu.memory_space<vmem>>, vector<8x4xf32>,
    %c0_328 = arith.constant 0 : index
    %c6_329 = arith.constant 6 : index
    %c1_330 = arith.constant 1 : index
    %c0_331 = arith.constant 0 : index
    %219 = vector.load %arg10[%c0_328, %c6_329, %c1_330, %c0_331] : memref<2x18x18x4xf32, #tpu.memory_space<vmem>>, vector<1x1x8x4xf32>
    %220 = vector.shape_cast %219 : vector<1x1x8x4xf32> to vector<8x4xf32>
    %c24_332 = arith.constant 24 : index
    %c8_333 = arith.constant 8 : index
    %221 = vector.load %arg14[%c24_332, %c8_333] : memref<128x128xf32, #tpu.memory_space<vmem>>, vector<8x4xf32>
    tpu.vector_store %arg14[%c24_332, %c8_333], %220 {strides = array<i32>} : memref<128x128xf32, #tpu.memory_space<vmem>>, vector<8x4xf32>,
    %c0_334 = arith.constant 0 : index
    %c7 = arith.constant 7 : index
    %c0_335 = arith.constant 0 : index
    %c0_336 = arith.constant 0 : index
    %222 = vector.load %arg10[%c0_334, %c7, %c0_335, %c0_336] : memref<2x18x18x4xf32, #tpu.memory_space<vmem>>, vector<1x1x8x4xf32>
    %223 = vector.shape_cast %222 : vector<1x1x8x4xf32> to vector<8x4xf32>
    %c24_337 = arith.constant 24 : index
    %c12_338 = arith.constant 12 : index
    %224 = vector.load %arg14[%c24_337, %c12_338] : memref<128x128xf32, #tpu.memory_space<vmem>>, vector<8x4xf32>
    tpu.vector_store %arg14[%c24_337, %c12_338], %223 {strides = array<i32>} : memref<128x128xf32, #tpu.memory_space<vmem>>, vector<8x4xf32>,
    %c0_339 = arith.constant 0 : index
    %c7_340 = arith.constant 7 : index
    %c9_341 = arith.constant 9 : index
    %c0_342 = arith.constant 0 : index
    %225 = vector.load %arg10[%c0_339, %c7_340, %c9_341, %c0_342] : memref<2x18x18x4xf32, #tpu.memory_space<vmem>>, vector<1x1x8x4xf32>
    %226 = vector.shape_cast %225 : vector<1x1x8x4xf32> to vector<8x4xf32>
    %c24_343 = arith.constant 24 : index
    %c16_344 = arith.constant 16 : index
    %227 = vector.load %arg14[%c24_343, %c16_344] : memref<128x128xf32, #tpu.memory_space<vmem>>, vector<8x4xf32>
    tpu.vector_store %arg14[%c24_343, %c16_344], %226 {strides = array<i32>} : memref<128x128xf32, #tpu.memory_space<vmem>>, vector<8x4xf32>,
    %c0_345 = arith.constant 0 : index
    %c7_346 = arith.constant 7 : index
    %c1_347 = arith.constant 1 : index
    %c0_348 = arith.constant 0 : index
    %228 = vector.load %arg10[%c0_345, %c7_346, %c1_347, %c0_348] : memref<2x18x18x4xf32, #tpu.memory_space<vmem>>, vector<1x1x8x4xf32>
    %229 = vector.shape_cast %228 : vector<1x1x8x4xf32> to vector<8x4xf32>
    %c24_349 = arith.constant 24 : index
    %c20_350 = arith.constant 20 : index
    %230 = vector.load %arg14[%c24_349, %c20_350] : memref<128x128xf32, #tpu.memory_space<vmem>>, vector<8x4xf32>
    tpu.vector_store %arg14[%c24_349, %c20_350], %229 {strides = array<i32>} : memref<128x128xf32, #tpu.memory_space<vmem>>, vector<8x4xf32>,
    %c0_351 = arith.constant 0 : index
    %c8_352 = arith.constant 8 : index
    %c0_353 = arith.constant 0 : index
    %c0_354 = arith.constant 0 : index
    %231 = vector.load %arg10[%c0_351, %c8_352, %c0_353, %c0_354] : memref<2x18x18x4xf32, #tpu.memory_space<vmem>>, vector<1x1x8x4xf32>
    %232 = vector.shape_cast %231 : vector<1x1x8x4xf32> to vector<8x4xf32>
    %c24_355 = arith.constant 24 : index
    %c24_356 = arith.constant 24 : index
    %233 = vector.load %arg14[%c24_355, %c24_356] : memref<128x128xf32, #tpu.memory_space<vmem>>, vector<8x4xf32>
    tpu.vector_store %arg14[%c24_355, %c24_356], %232 {strides = array<i32>} : memref<128x128xf32, #tpu.memory_space<vmem>>, vector<8x4xf32>,
    %c0_357 = arith.constant 0 : index
    %c8_358 = arith.constant 8 : index
    %c9_359 = arith.constant 9 : index
    %c0_360 = arith.constant 0 : index
    %234 = vector.load %arg10[%c0_357, %c8_358, %c9_359, %c0_360] : memref<2x18x18x4xf32, #tpu.memory_space<vmem>>, vector<1x1x8x4xf32>
    %235 = vector.shape_cast %234 : vector<1x1x8x4xf32> to vector<8x4xf32>
    %c24_361 = arith.constant 24 : index
    %c28_362 = arith.constant 28 : index
    %236 = vector.load %arg14[%c24_361, %c28_362] : memref<128x128xf32, #tpu.memory_space<vmem>>, vector<8x4xf32>
    tpu.vector_store %arg14[%c24_361, %c28_362], %235 {strides = array<i32>} : memref<128x128xf32, #tpu.memory_space<vmem>>, vector<8x4xf32>,
    %c0_363 = arith.constant 0 : index
    %c8_364 = arith.constant 8 : index
    %c1_365 = arith.constant 1 : index
    %c0_366 = arith.constant 0 : index
    %237 = vector.load %arg10[%c0_363, %c8_364, %c1_365, %c0_366] : memref<2x18x18x4xf32, #tpu.memory_space<vmem>>, vector<1x1x8x4xf32>
    %238 = vector.shape_cast %237 : vector<1x1x8x4xf32> to vector<8x4xf32>
    %c24_367 = arith.constant 24 : index
    %c32_368 = arith.constant 32 : index
    %239 = vector.load %arg14[%c24_367, %c32_368] : memref<128x128xf32, #tpu.memory_space<vmem>>, vector<8x4xf32>
    tpu.vector_store %arg14[%c24_367, %c32_368], %238 {strides = array<i32>} : memref<128x128xf32, #tpu.memory_space<vmem>>, vector<8x4xf32>,
    %c0_369 = arith.constant 0 : index
    %c8_370 = arith.constant 8 : index
    %c0_371 = arith.constant 0 : index
    %c0_372 = arith.constant 0 : index
    %240 = vector.load %arg10[%c0_369, %c8_370, %c0_371, %c0_372] : memref<2x18x18x4xf32, #tpu.memory_space<vmem>>, vector<1x1x8x4xf32>
    %241 = vector.shape_cast %240 : vector<1x1x8x4xf32> to vector<8x4xf32>
    %c32_373 = arith.constant 32 : index
    %c0_374 = arith.constant 0 : index
    %242 = vector.load %arg14[%c32_373, %c0_374] : memref<128x128xf32, #tpu.memory_space<vmem>>, vector<8x4xf32>
    tpu.vector_store %arg14[%c32_373, %c0_374], %241 {strides = array<i32>} : memref<128x128xf32, #tpu.memory_space<vmem>>, vector<8x4xf32>,
    %c0_375 = arith.constant 0 : index
    %c8_376 = arith.constant 8 : index
    %c9_377 = arith.constant 9 : index
    %c0_378 = arith.constant 0 : index
    %243 = vector.load %arg10[%c0_375, %c8_376, %c9_377, %c0_378] : memref<2x18x18x4xf32, #tpu.memory_space<vmem>>, vector<1x1x8x4xf32>
    %244 = vector.shape_cast %243 : vector<1x1x8x4xf32> to vector<8x4xf32>
    %c32_379 = arith.constant 32 : index
    %c4_380 = arith.constant 4 : index
    %245 = vector.load %arg14[%c32_379, %c4_380] : memref<128x128xf32, #tpu.memory_space<vmem>>, vector<8x4xf32>
    tpu.vector_store %arg14[%c32_379, %c4_380], %244 {strides = array<i32>} : memref<128x128xf32, #tpu.memory_space<vmem>>, vector<8x4xf32>,
    %c0_381 = arith.constant 0 : index
    %c8_382 = arith.constant 8 : index
    %c1_383 = arith.constant 1 : index
    %c0_384 = arith.constant 0 : index
    %246 = vector.load %arg10[%c0_381, %c8_382, %c1_383, %c0_384] : memref<2x18x18x4xf32, #tpu.memory_space<vmem>>, vector<1x1x8x4xf32>
    %247 = vector.shape_cast %246 : vector<1x1x8x4xf32> to vector<8x4xf32>
    %c32_385 = arith.constant 32 : index
    %c8_386 = arith.constant 8 : index
    %248 = vector.load %arg14[%c32_385, %c8_386] : memref<128x128xf32, #tpu.memory_space<vmem>>, vector<8x4xf32>
    tpu.vector_store %arg14[%c32_385, %c8_386], %247 {strides = array<i32>} : memref<128x128xf32, #tpu.memory_space<vmem>>, vector<8x4xf32>,
    %c0_387 = arith.constant 0 : index
    %c9_388 = arith.constant 9 : index
    %c0_389 = arith.constant 0 : index
    %c0_390 = arith.constant 0 : index
    %249 = vector.load %arg10[%c0_387, %c9_388, %c0_389, %c0_390] : memref<2x18x18x4xf32, #tpu.memory_space<vmem>>, vector<1x1x8x4xf32>
    %250 = vector.shape_cast %249 : vector<1x1x8x4xf32> to vector<8x4xf32>
    %c32_391 = arith.constant 32 : index
    %c12_392 = arith.constant 12 : index
    %251 = vector.load %arg14[%c32_391, %c12_392] : memref<128x128xf32, #tpu.memory_space<vmem>>, vector<8x4xf32>
    tpu.vector_store %arg14[%c32_391, %c12_392], %250 {strides = array<i32>} : memref<128x128xf32, #tpu.memory_space<vmem>>, vector<8x4xf32>,
    %c0_393 = arith.constant 0 : index
    %c9_394 = arith.constant 9 : index
    %c9_395 = arith.constant 9 : index
    %c0_396 = arith.constant 0 : index
    %252 = vector.load %arg10[%c0_393, %c9_394, %c9_395, %c0_396] : memref<2x18x18x4xf32, #tpu.memory_space<vmem>>, vector<1x1x8x4xf32>
    %253 = vector.shape_cast %252 : vector<1x1x8x4xf32> to vector<8x4xf32>
    %c32_397 = arith.constant 32 : index
    %c16_398 = arith.constant 16 : index
    %254 = vector.load %arg14[%c32_397, %c16_398] : memref<128x128xf32, #tpu.memory_space<vmem>>, vector<8x4xf32>
    tpu.vector_store %arg14[%c32_397, %c16_398], %253 {strides = array<i32>} : memref<128x128xf32, #tpu.memory_space<vmem>>, vector<8x4xf32>,
    %c0_399 = arith.constant 0 : index
    %c9_400 = arith.constant 9 : index
    %c1_401 = arith.constant 1 : index
    %c0_402 = arith.constant 0 : index
    %255 = vector.load %arg10[%c0_399, %c9_400, %c1_401, %c0_402] : memref<2x18x18x4xf32, #tpu.memory_space<vmem>>, vector<1x1x8x4xf32>
    %256 = vector.shape_cast %255 : vector<1x1x8x4xf32> to vector<8x4xf32>
    %c32_403 = arith.constant 32 : index
    %c20_404 = arith.constant 20 : index
    %257 = vector.load %arg14[%c32_403, %c20_404] : memref<128x128xf32, #tpu.memory_space<vmem>>, vector<8x4xf32>
    tpu.vector_store %arg14[%c32_403, %c20_404], %256 {strides = array<i32>} : memref<128x128xf32, #tpu.memory_space<vmem>>, vector<8x4xf32>,
    %c0_405 = arith.constant 0 : index
    %c10 = arith.constant 10 : index
    %c0_406 = arith.constant 0 : index
    %c0_407 = arith.constant 0 : index
    %258 = vector.load %arg10[%c0_405, %c10, %c0_406, %c0_407] : memref<2x18x18x4xf32, #tpu.memory_space<vmem>>, vector<1x1x8x4xf32>
    %259 = vector.shape_cast %258 : vector<1x1x8x4xf32> to vector<8x4xf32>
    %c32_408 = arith.constant 32 : index
    %c24_409 = arith.constant 24 : index
    %260 = vector.load %arg14[%c32_408, %c24_409] : memref<128x128xf32, #tpu.memory_space<vmem>>, vector<8x4xf32>
    tpu.vector_store %arg14[%c32_408, %c24_409], %259 {strides = array<i32>} : memref<128x128xf32, #tpu.memory_space<vmem>>, vector<8x4xf32>,
    %c0_410 = arith.constant 0 : index
    %c10_411 = arith.constant 10 : index
    %c9_412 = arith.constant 9 : index
    %c0_413 = arith.constant 0 : index
    %261 = vector.load %arg10[%c0_410, %c10_411, %c9_412, %c0_413] : memref<2x18x18x4xf32, #tpu.memory_space<vmem>>, vector<1x1x8x4xf32>
    %262 = vector.shape_cast %261 : vector<1x1x8x4xf32> to vector<8x4xf32>
    %c32_414 = arith.constant 32 : index
    %c28_415 = arith.constant 28 : index
    %263 = vector.load %arg14[%c32_414, %c28_415] : memref<128x128xf32, #tpu.memory_space<vmem>>, vector<8x4xf32>
    tpu.vector_store %arg14[%c32_414, %c28_415], %262 {strides = array<i32>} : memref<128x128xf32, #tpu.memory_space<vmem>>, vector<8x4xf32>,
    %c0_416 = arith.constant 0 : index
    %c10_417 = arith.constant 10 : index
    %c1_418 = arith.constant 1 : index
    %c0_419 = arith.constant 0 : index
    %264 = vector.load %arg10[%c0_416, %c10_417, %c1_418, %c0_419] : memref<2x18x18x4xf32, #tpu.memory_space<vmem>>, vector<1x1x8x4xf32>
    %265 = vector.shape_cast %264 : vector<1x1x8x4xf32> to vector<8x4xf32>
    %c32_420 = arith.constant 32 : index
    %c32_421 = arith.constant 32 : index
    %266 = vector.load %arg14[%c32_420, %c32_421] : memref<128x128xf32, #tpu.memory_space<vmem>>, vector<8x4xf32>
    tpu.vector_store %arg14[%c32_420, %c32_421], %265 {strides = array<i32>} : memref<128x128xf32, #tpu.memory_space<vmem>>, vector<8x4xf32>,
    %c0_422 = arith.constant 0 : index
    %c10_423 = arith.constant 10 : index
    %c0_424 = arith.constant 0 : index
    %c0_425 = arith.constant 0 : index
    %267 = vector.load %arg10[%c0_422, %c10_423, %c0_424, %c0_425] : memref<2x18x18x4xf32, #tpu.memory_space<vmem>>, vector<1x1x8x4xf32>
    %268 = vector.shape_cast %267 : vector<1x1x8x4xf32> to vector<8x4xf32>
    %c40 = arith.constant 40 : index
    %c0_426 = arith.constant 0 : index
    %269 = vector.load %arg14[%c40, %c0_426] : memref<128x128xf32, #tpu.memory_space<vmem>>, vector<8x4xf32>
    tpu.vector_store %arg14[%c40, %c0_426], %268 {strides = array<i32>} : memref<128x128xf32, #tpu.memory_space<vmem>>, vector<8x4xf32>,
    %c0_427 = arith.constant 0 : index
    %c10_428 = arith.constant 10 : index
    %c9_429 = arith.constant 9 : index
    %c0_430 = arith.constant 0 : index
    %270 = vector.load %arg10[%c0_427, %c10_428, %c9_429, %c0_430] : memref<2x18x18x4xf32, #tpu.memory_space<vmem>>, vector<1x1x8x4xf32>
    %271 = vector.shape_cast %270 : vector<1x1x8x4xf32> to vector<8x4xf32>
    %c40_431 = arith.constant 40 : index
    %c4_432 = arith.constant 4 : index
    %272 = vector.load %arg14[%c40_431, %c4_432] : memref<128x128xf32, #tpu.memory_space<vmem>>, vector<8x4xf32>
    tpu.vector_store %arg14[%c40_431, %c4_432], %271 {strides = array<i32>} : memref<128x128xf32, #tpu.memory_space<vmem>>, vector<8x4xf32>,
    %c0_433 = arith.constant 0 : index
    %c10_434 = arith.constant 10 : index
    %c1_435 = arith.constant 1 : index
    %c0_436 = arith.constant 0 : index
    %273 = vector.load %arg10[%c0_433, %c10_434, %c1_435, %c0_436] : memref<2x18x18x4xf32, #tpu.memory_space<vmem>>, vector<1x1x8x4xf32>
    %274 = vector.shape_cast %273 : vector<1x1x8x4xf32> to vector<8x4xf32>
    %c40_437 = arith.constant 40 : index
    %c8_438 = arith.constant 8 : index
    %275 = vector.load %arg14[%c40_437, %c8_438] : memref<128x128xf32, #tpu.memory_space<vmem>>, vector<8x4xf32>
    tpu.vector_store %arg14[%c40_437, %c8_438], %274 {strides = array<i32>} : memref<128x128xf32, #tpu.memory_space<vmem>>, vector<8x4xf32>,
    %c0_439 = arith.constant 0 : index
    %c11 = arith.constant 11 : index
    %c0_440 = arith.constant 0 : index
    %c0_441 = arith.constant 0 : index
    %276 = vector.load %arg10[%c0_439, %c11, %c0_440, %c0_441] : memref<2x18x18x4xf32, #tpu.memory_space<vmem>>, vector<1x1x8x4xf32>
    %277 = vector.shape_cast %276 : vector<1x1x8x4xf32> to vector<8x4xf32>
    %c40_442 = arith.constant 40 : index
    %c12_443 = arith.constant 12 : index
    %278 = vector.load %arg14[%c40_442, %c12_443] : memref<128x128xf32, #tpu.memory_space<vmem>>, vector<8x4xf32>
    tpu.vector_store %arg14[%c40_442, %c12_443], %277 {strides = array<i32>} : memref<128x128xf32, #tpu.memory_space<vmem>>, vector<8x4xf32>,
    %c0_444 = arith.constant 0 : index
    %c11_445 = arith.constant 11 : index
    %c9_446 = arith.constant 9 : index
    %c0_447 = arith.constant 0 : index
    %279 = vector.load %arg10[%c0_444, %c11_445, %c9_446, %c0_447] : memref<2x18x18x4xf32, #tpu.memory_space<vmem>>, vector<1x1x8x4xf32>
    %280 = vector.shape_cast %279 : vector<1x1x8x4xf32> to vector<8x4xf32>
    %c40_448 = arith.constant 40 : index
    %c16_449 = arith.constant 16 : index
    %281 = vector.load %arg14[%c40_448, %c16_449] : memref<128x128xf32, #tpu.memory_space<vmem>>, vector<8x4xf32>
    tpu.vector_store %arg14[%c40_448, %c16_449], %280 {strides = array<i32>} : memref<128x128xf32, #tpu.memory_space<vmem>>, vector<8x4xf32>,
    %c0_450 = arith.constant 0 : index
    %c11_451 = arith.constant 11 : index
    %c1_452 = arith.constant 1 : index
    %c0_453 = arith.constant 0 : index
    %282 = vector.load %arg10[%c0_450, %c11_451, %c1_452, %c0_453] : memref<2x18x18x4xf32, #tpu.memory_space<vmem>>, vector<1x1x8x4xf32>
    %283 = vector.shape_cast %282 : vector<1x1x8x4xf32> to vector<8x4xf32>
    %c40_454 = arith.constant 40 : index
    %c20_455 = arith.constant 20 : index
    %284 = vector.load %arg14[%c40_454, %c20_455] : memref<128x128xf32, #tpu.memory_space<vmem>>, vector<8x4xf32>
    tpu.vector_store %arg14[%c40_454, %c20_455], %283 {strides = array<i32>} : memref<128x128xf32, #tpu.memory_space<vmem>>, vector<8x4xf32>,
    %c0_456 = arith.constant 0 : index
    %c12_457 = arith.constant 12 : index
    %c0_458 = arith.constant 0 : index
    %c0_459 = arith.constant 0 : index
    %285 = vector.load %arg10[%c0_456, %c12_457, %c0_458, %c0_459] : memref<2x18x18x4xf32, #tpu.memory_space<vmem>>, vector<1x1x8x4xf32>
    %286 = vector.shape_cast %285 : vector<1x1x8x4xf32> to vector<8x4xf32>
    %c40_460 = arith.constant 40 : index
    %c24_461 = arith.constant 24 : index
    %287 = vector.load %arg14[%c40_460, %c24_461] : memref<128x128xf32, #tpu.memory_space<vmem>>, vector<8x4xf32>
    tpu.vector_store %arg14[%c40_460, %c24_461], %286 {strides = array<i32>} : memref<128x128xf32, #tpu.memory_space<vmem>>, vector<8x4xf32>,
    %c0_462 = arith.constant 0 : index
    %c12_463 = arith.constant 12 : index
    %c9_464 = arith.constant 9 : index
    %c0_465 = arith.constant 0 : index
    %288 = vector.load %arg10[%c0_462, %c12_463, %c9_464, %c0_465] : memref<2x18x18x4xf32, #tpu.memory_space<vmem>>, vector<1x1x8x4xf32>
    %289 = vector.shape_cast %288 : vector<1x1x8x4xf32> to vector<8x4xf32>
    %c40_466 = arith.constant 40 : index
    %c28_467 = arith.constant 28 : index
    %290 = vector.load %arg14[%c40_466, %c28_467] : memref<128x128xf32, #tpu.memory_space<vmem>>, vector<8x4xf32>
    tpu.vector_store %arg14[%c40_466, %c28_467], %289 {strides = array<i32>} : memref<128x128xf32, #tpu.memory_space<vmem>>, vector<8x4xf32>,
    %c0_468 = arith.constant 0 : index
    %c12_469 = arith.constant 12 : index
    %c1_470 = arith.constant 1 : index
    %c0_471 = arith.constant 0 : index
    %291 = vector.load %arg10[%c0_468, %c12_469, %c1_470, %c0_471] : memref<2x18x18x4xf32, #tpu.memory_space<vmem>>, vector<1x1x8x4xf32>
    %292 = vector.shape_cast %291 : vector<1x1x8x4xf32> to vector<8x4xf32>
    %c40_472 = arith.constant 40 : index
    %c32_473 = arith.constant 32 : index
    %293 = vector.load %arg14[%c40_472, %c32_473] : memref<128x128xf32, #tpu.memory_space<vmem>>, vector<8x4xf32>
    tpu.vector_store %arg14[%c40_472, %c32_473], %292 {strides = array<i32>} : memref<128x128xf32, #tpu.memory_space<vmem>>, vector<8x4xf32>,
    %c0_474 = arith.constant 0 : index
    %c12_475 = arith.constant 12 : index
    %c0_476 = arith.constant 0 : index
    %c0_477 = arith.constant 0 : index
    %294 = vector.load %arg10[%c0_474, %c12_475, %c0_476, %c0_477] : memref<2x18x18x4xf32, #tpu.memory_space<vmem>>, vector<1x1x8x4xf32>
    %295 = vector.shape_cast %294 : vector<1x1x8x4xf32> to vector<8x4xf32>
    %c48 = arith.constant 48 : index
    %c0_478 = arith.constant 0 : index
    %296 = vector.load %arg14[%c48, %c0_478] : memref<128x128xf32, #tpu.memory_space<vmem>>, vector<8x4xf32>
    tpu.vector_store %arg14[%c48, %c0_478], %295 {strides = array<i32>} : memref<128x128xf32, #tpu.memory_space<vmem>>, vector<8x4xf32>,
    %c0_479 = arith.constant 0 : index
    %c12_480 = arith.constant 12 : index
    %c9_481 = arith.constant 9 : index
    %c0_482 = arith.constant 0 : index
    %297 = vector.load %arg10[%c0_479, %c12_480, %c9_481, %c0_482] : memref<2x18x18x4xf32, #tpu.memory_space<vmem>>, vector<1x1x8x4xf32>
    %298 = vector.shape_cast %297 : vector<1x1x8x4xf32> to vector<8x4xf32>
    %c48_483 = arith.constant 48 : index
    %c4_484 = arith.constant 4 : index
    %299 = vector.load %arg14[%c48_483, %c4_484] : memref<128x128xf32, #tpu.memory_space<vmem>>, vector<8x4xf32>
    tpu.vector_store %arg14[%c48_483, %c4_484], %298 {strides = array<i32>} : memref<128x128xf32, #tpu.memory_space<vmem>>, vector<8x4xf32>,
    %c0_485 = arith.constant 0 : index
    %c12_486 = arith.constant 12 : index
    %c1_487 = arith.constant 1 : index
    %c0_488 = arith.constant 0 : index
    %300 = vector.load %arg10[%c0_485, %c12_486, %c1_487, %c0_488] : memref<2x18x18x4xf32, #tpu.memory_space<vmem>>, vector<1x1x8x4xf32>
    %301 = vector.shape_cast %300 : vector<1x1x8x4xf32> to vector<8x4xf32>
    %c48_489 = arith.constant 48 : index
    %c8_490 = arith.constant 8 : index
    %302 = vector.load %arg14[%c48_489, %c8_490] : memref<128x128xf32, #tpu.memory_space<vmem>>, vector<8x4xf32>
    tpu.vector_store %arg14[%c48_489, %c8_490], %301 {strides = array<i32>} : memref<128x128xf32, #tpu.memory_space<vmem>>, vector<8x4xf32>,
    %c0_491 = arith.constant 0 : index
    %c13 = arith.constant 13 : index
    %c0_492 = arith.constant 0 : index
    %c0_493 = arith.constant 0 : index
    %303 = vector.load %arg10[%c0_491, %c13, %c0_492, %c0_493] : memref<2x18x18x4xf32, #tpu.memory_space<vmem>>, vector<1x1x8x4xf32>
    %304 = vector.shape_cast %303 : vector<1x1x8x4xf32> to vector<8x4xf32>
    %c48_494 = arith.constant 48 : index
    %c12_495 = arith.constant 12 : index
    %305 = vector.load %arg14[%c48_494, %c12_495] : memref<128x128xf32, #tpu.memory_space<vmem>>, vector<8x4xf32>
    tpu.vector_store %arg14[%c48_494, %c12_495], %304 {strides = array<i32>} : memref<128x128xf32, #tpu.memory_space<vmem>>, vector<8x4xf32>,
    %c0_496 = arith.constant 0 : index
    %c13_497 = arith.constant 13 : index
    %c9_498 = arith.constant 9 : index
    %c0_499 = arith.constant 0 : index
    %306 = vector.load %arg10[%c0_496, %c13_497, %c9_498, %c0_499] : memref<2x18x18x4xf32, #tpu.memory_space<vmem>>, vector<1x1x8x4xf32>
    %307 = vector.shape_cast %306 : vector<1x1x8x4xf32> to vector<8x4xf32>
    %c48_500 = arith.constant 48 : index
    %c16_501 = arith.constant 16 : index
    %308 = vector.load %arg14[%c48_500, %c16_501] : memref<128x128xf32, #tpu.memory_space<vmem>>, vector<8x4xf32>
    tpu.vector_store %arg14[%c48_500, %c16_501], %307 {strides = array<i32>} : memref<128x128xf32, #tpu.memory_space<vmem>>, vector<8x4xf32>,
    %c0_502 = arith.constant 0 : index
    %c13_503 = arith.constant 13 : index
    %c1_504 = arith.constant 1 : index
    %c0_505 = arith.constant 0 : index
    %309 = vector.load %arg10[%c0_502, %c13_503, %c1_504, %c0_505] : memref<2x18x18x4xf32, #tpu.memory_space<vmem>>, vector<1x1x8x4xf32>
    %310 = vector.shape_cast %309 : vector<1x1x8x4xf32> to vector<8x4xf32>
    %c48_506 = arith.constant 48 : index
    %c20_507 = arith.constant 20 : index
    %311 = vector.load %arg14[%c48_506, %c20_507] : memref<128x128xf32, #tpu.memory_space<vmem>>, vector<8x4xf32>
    tpu.vector_store %arg14[%c48_506, %c20_507], %310 {strides = array<i32>} : memref<128x128xf32, #tpu.memory_space<vmem>>, vector<8x4xf32>,
    %c0_508 = arith.constant 0 : index
    %c14 = arith.constant 14 : index
    %c0_509 = arith.constant 0 : index
    %c0_510 = arith.constant 0 : index
    %312 = vector.load %arg10[%c0_508, %c14, %c0_509, %c0_510] : memref<2x18x18x4xf32, #tpu.memory_space<vmem>>, vector<1x1x8x4xf32>
    %313 = vector.shape_cast %312 : vector<1x1x8x4xf32> to vector<8x4xf32>
    %c48_511 = arith.constant 48 : index
    %c24_512 = arith.constant 24 : index
    %314 = vector.load %arg14[%c48_511, %c24_512] : memref<128x128xf32, #tpu.memory_space<vmem>>, vector<8x4xf32>
    tpu.vector_store %arg14[%c48_511, %c24_512], %313 {strides = array<i32>} : memref<128x128xf32, #tpu.memory_space<vmem>>, vector<8x4xf32>,
    %c0_513 = arith.constant 0 : index
    %c14_514 = arith.constant 14 : index
    %c9_515 = arith.constant 9 : index
    %c0_516 = arith.constant 0 : index
    %315 = vector.load %arg10[%c0_513, %c14_514, %c9_515, %c0_516] : memref<2x18x18x4xf32, #tpu.memory_space<vmem>>, vector<1x1x8x4xf32>
    %316 = vector.shape_cast %315 : vector<1x1x8x4xf32> to vector<8x4xf32>
    %c48_517 = arith.constant 48 : index
    %c28_518 = arith.constant 28 : index
    %317 = vector.load %arg14[%c48_517, %c28_518] : memref<128x128xf32, #tpu.memory_space<vmem>>, vector<8x4xf32>
    tpu.vector_store %arg14[%c48_517, %c28_518], %316 {strides = array<i32>} : memref<128x128xf32, #tpu.memory_space<vmem>>, vector<8x4xf32>,
    %c0_519 = arith.constant 0 : index
    %c14_520 = arith.constant 14 : index
    %c1_521 = arith.constant 1 : index
    %c0_522 = arith.constant 0 : index
    %318 = vector.load %arg10[%c0_519, %c14_520, %c1_521, %c0_522] : memref<2x18x18x4xf32, #tpu.memory_space<vmem>>, vector<1x1x8x4xf32>
    %319 = vector.shape_cast %318 : vector<1x1x8x4xf32> to vector<8x4xf32>
    %c48_523 = arith.constant 48 : index
    %c32_524 = arith.constant 32 : index
    %320 = vector.load %arg14[%c48_523, %c32_524] : memref<128x128xf32, #tpu.memory_space<vmem>>, vector<8x4xf32>
    tpu.vector_store %arg14[%c48_523, %c32_524], %319 {strides = array<i32>} : memref<128x128xf32, #tpu.memory_space<vmem>>, vector<8x4xf32>,
    %c0_525 = arith.constant 0 : index
    %c14_526 = arith.constant 14 : index
    %c0_527 = arith.constant 0 : index
    %c0_528 = arith.constant 0 : index
    %321 = vector.load %arg10[%c0_525, %c14_526, %c0_527, %c0_528] : memref<2x18x18x4xf32, #tpu.memory_space<vmem>>, vector<1x1x8x4xf32>
    %322 = vector.shape_cast %321 : vector<1x1x8x4xf32> to vector<8x4xf32>
    %c56 = arith.constant 56 : index
    %c0_529 = arith.constant 0 : index
    %323 = vector.load %arg14[%c56, %c0_529] : memref<128x128xf32, #tpu.memory_space<vmem>>, vector<8x4xf32>
    tpu.vector_store %arg14[%c56, %c0_529], %322 {strides = array<i32>} : memref<128x128xf32, #tpu.memory_space<vmem>>, vector<8x4xf32>,
    %c0_530 = arith.constant 0 : index
    %c14_531 = arith.constant 14 : index
    %c9_532 = arith.constant 9 : index
    %c0_533 = arith.constant 0 : index
    %324 = vector.load %arg10[%c0_530, %c14_531, %c9_532, %c0_533] : memref<2x18x18x4xf32, #tpu.memory_space<vmem>>, vector<1x1x8x4xf32>
    %325 = vector.shape_cast %324 : vector<1x1x8x4xf32> to vector<8x4xf32>
    %c56_534 = arith.constant 56 : index
    %c4_535 = arith.constant 4 : index
    %326 = vector.load %arg14[%c56_534, %c4_535] : memref<128x128xf32, #tpu.memory_space<vmem>>, vector<8x4xf32>
    tpu.vector_store %arg14[%c56_534, %c4_535], %325 {strides = array<i32>} : memref<128x128xf32, #tpu.memory_space<vmem>>, vector<8x4xf32>,
    %c0_536 = arith.constant 0 : index
    %c14_537 = arith.constant 14 : index
    %c1_538 = arith.constant 1 : index
    %c0_539 = arith.constant 0 : index
    %327 = vector.load %arg10[%c0_536, %c14_537, %c1_538, %c0_539] : memref<2x18x18x4xf32, #tpu.memory_space<vmem>>, vector<1x1x8x4xf32>
    %328 = vector.shape_cast %327 : vector<1x1x8x4xf32> to vector<8x4xf32>
    %c56_540 = arith.constant 56 : index
    %c8_541 = arith.constant 8 : index
    %329 = vector.load %arg14[%c56_540, %c8_541] : memref<128x128xf32, #tpu.memory_space<vmem>>, vector<8x4xf32>
    tpu.vector_store %arg14[%c56_540, %c8_541], %328 {strides = array<i32>} : memref<128x128xf32, #tpu.memory_space<vmem>>, vector<8x4xf32>,
    %c0_542 = arith.constant 0 : index
    %c15 = arith.constant 15 : index
    %c0_543 = arith.constant 0 : index
    %c0_544 = arith.constant 0 : index
    %330 = vector.load %arg10[%c0_542, %c15, %c0_543, %c0_544] : memref<2x18x18x4xf32, #tpu.memory_space<vmem>>, vector<1x1x8x4xf32>
    %331 = vector.shape_cast %330 : vector<1x1x8x4xf32> to vector<8x4xf32>
    %c56_545 = arith.constant 56 : index
    %c12_546 = arith.constant 12 : index
    %332 = vector.load %arg14[%c56_545, %c12_546] : memref<128x128xf32, #tpu.memory_space<vmem>>, vector<8x4xf32>
    tpu.vector_store %arg14[%c56_545, %c12_546], %331 {strides = array<i32>} : memref<128x128xf32, #tpu.memory_space<vmem>>, vector<8x4xf32>,
    %c0_547 = arith.constant 0 : index
    %c15_548 = arith.constant 15 : index
    %c9_549 = arith.constant 9 : index
    %c0_550 = arith.constant 0 : index
    %333 = vector.load %arg10[%c0_547, %c15_548, %c9_549, %c0_550] : memref<2x18x18x4xf32, #tpu.memory_space<vmem>>, vector<1x1x8x4xf32>
    %334 = vector.shape_cast %333 : vector<1x1x8x4xf32> to vector<8x4xf32>
    %c56_551 = arith.constant 56 : index
    %c16_552 = arith.constant 16 : index
    %335 = vector.load %arg14[%c56_551, %c16_552] : memref<128x128xf32, #tpu.memory_space<vmem>>, vector<8x4xf32>
    tpu.vector_store %arg14[%c56_551, %c16_552], %334 {strides = array<i32>} : memref<128x128xf32, #tpu.memory_space<vmem>>, vector<8x4xf32>,
    %c0_553 = arith.constant 0 : index
    %c15_554 = arith.constant 15 : index
    %c1_555 = arith.constant 1 : index
    %c0_556 = arith.constant 0 : index
    %336 = vector.load %arg10[%c0_553, %c15_554, %c1_555, %c0_556] : memref<2x18x18x4xf32, #tpu.memory_space<vmem>>, vector<1x1x8x4xf32>
    %337 = vector.shape_cast %336 : vector<1x1x8x4xf32> to vector<8x4xf32>
    %c56_557 = arith.constant 56 : index
    %c20_558 = arith.constant 20 : index
    %338 = vector.load %arg14[%c56_557, %c20_558] : memref<128x128xf32, #tpu.memory_space<vmem>>, vector<8x4xf32>
    tpu.vector_store %arg14[%c56_557, %c20_558], %337 {strides = array<i32>} : memref<128x128xf32, #tpu.memory_space<vmem>>, vector<8x4xf32>,
    %c0_559 = arith.constant 0 : index
    %c16_560 = arith.constant 16 : index
    %c0_561 = arith.constant 0 : index
    %c0_562 = arith.constant 0 : index
    %339 = vector.load %arg10[%c0_559, %c16_560, %c0_561, %c0_562] : memref<2x18x18x4xf32, #tpu.memory_space<vmem>>, vector<1x1x8x4xf32>
    %340 = vector.shape_cast %339 : vector<1x1x8x4xf32> to vector<8x4xf32>
    %c56_563 = arith.constant 56 : index
    %c24_564 = arith.constant 24 : index
    %341 = vector.load %arg14[%c56_563, %c24_564] : memref<128x128xf32, #tpu.memory_space<vmem>>, vector<8x4xf32>
    tpu.vector_store %arg14[%c56_563, %c24_564], %340 {strides = array<i32>} : memref<128x128xf32, #tpu.memory_space<vmem>>, vector<8x4xf32>,
    %c0_565 = arith.constant 0 : index
    %c16_566 = arith.constant 16 : index
    %c9_567 = arith.constant 9 : index
    %c0_568 = arith.constant 0 : index
    %342 = vector.load %arg10[%c0_565, %c16_566, %c9_567, %c0_568] : memref<2x18x18x4xf32, #tpu.memory_space<vmem>>, vector<1x1x8x4xf32>
    %343 = vector.shape_cast %342 : vector<1x1x8x4xf32> to vector<8x4xf32>
    %c56_569 = arith.constant 56 : index
    %c28_570 = arith.constant 28 : index
    %344 = vector.load %arg14[%c56_569, %c28_570] : memref<128x128xf32, #tpu.memory_space<vmem>>, vector<8x4xf32>
    tpu.vector_store %arg14[%c56_569, %c28_570], %343 {strides = array<i32>} : memref<128x128xf32, #tpu.memory_space<vmem>>, vector<8x4xf32>,
    %c0_571 = arith.constant 0 : index
    %c16_572 = arith.constant 16 : index
    %c1_573 = arith.constant 1 : index
    %c0_574 = arith.constant 0 : index
    %345 = vector.load %arg10[%c0_571, %c16_572, %c1_573, %c0_574] : memref<2x18x18x4xf32, #tpu.memory_space<vmem>>, vector<1x1x8x4xf32>
    %346 = vector.shape_cast %345 : vector<1x1x8x4xf32> to vector<8x4xf32>
    %c56_575 = arith.constant 56 : index
    %c32_576 = arith.constant 32 : index
    %347 = vector.load %arg14[%c56_575, %c32_576] : memref<128x128xf32, #tpu.memory_space<vmem>>, vector<8x4xf32>
    tpu.vector_store %arg14[%c56_575, %c32_576], %346 {strides = array<i32>} : memref<128x128xf32, #tpu.memory_space<vmem>>, vector<8x4xf32>,
    %c1_577 = arith.constant 1 : index
    %c0_578 = arith.constant 0 : index
    %c0_579 = arith.constant 0 : index
    %c0_580 = arith.constant 0 : index
    %348 = vector.load %arg10[%c1_577, %c0_578, %c0_579, %c0_580] : memref<2x18x18x4xf32, #tpu.memory_space<vmem>>, vector<1x1x8x4xf32>
    %349 = vector.shape_cast %348 : vector<1x1x8x4xf32> to vector<8x4xf32>
    %c64 = arith.constant 64 : index
    %c0_581 = arith.constant 0 : index
    %350 = vector.load %arg14[%c64, %c0_581] : memref<128x128xf32, #tpu.memory_space<vmem>>, vector<8x4xf32>
    tpu.vector_store %arg14[%c64, %c0_581], %349 {strides = array<i32>} : memref<128x128xf32, #tpu.memory_space<vmem>>, vector<8x4xf32>,
    %c1_582 = arith.constant 1 : index
    %c0_583 = arith.constant 0 : index
    %c9_584 = arith.constant 9 : index
    %c0_585 = arith.constant 0 : index
    %351 = vector.load %arg10[%c1_582, %c0_583, %c9_584, %c0_585] : memref<2x18x18x4xf32, #tpu.memory_space<vmem>>, vector<1x1x8x4xf32>
    %352 = vector.shape_cast %351 : vector<1x1x8x4xf32> to vector<8x4xf32>
    %c64_586 = arith.constant 64 : index
    %c4_587 = arith.constant 4 : index
    %353 = vector.load %arg14[%c64_586, %c4_587] : memref<128x128xf32, #tpu.memory_space<vmem>>, vector<8x4xf32>
    tpu.vector_store %arg14[%c64_586, %c4_587], %352 {strides = array<i32>} : memref<128x128xf32, #tpu.memory_space<vmem>>, vector<8x4xf32>,
    %c1_588 = arith.constant 1 : index
    %c0_589 = arith.constant 0 : index
    %c1_590 = arith.constant 1 : index
    %c0_591 = arith.constant 0 : index
    %354 = vector.load %arg10[%c1_588, %c0_589, %c1_590, %c0_591] : memref<2x18x18x4xf32, #tpu.memory_space<vmem>>, vector<1x1x8x4xf32>
    %355 = vector.shape_cast %354 : vector<1x1x8x4xf32> to vector<8x4xf32>
    %c64_592 = arith.constant 64 : index
    %c8_593 = arith.constant 8 : index
    %356 = vector.load %arg14[%c64_592, %c8_593] : memref<128x128xf32, #tpu.memory_space<vmem>>, vector<8x4xf32>
    tpu.vector_store %arg14[%c64_592, %c8_593], %355 {strides = array<i32>} : memref<128x128xf32, #tpu.memory_space<vmem>>, vector<8x4xf32>,
    %c1_594 = arith.constant 1 : index
    %c1_595 = arith.constant 1 : index
    %c0_596 = arith.constant 0 : index
    %c0_597 = arith.constant 0 : index
    %357 = vector.load %arg10[%c1_594, %c1_595, %c0_596, %c0_597] : memref<2x18x18x4xf32, #tpu.memory_space<vmem>>, vector<1x1x8x4xf32>
    %358 = vector.shape_cast %357 : vector<1x1x8x4xf32> to vector<8x4xf32>
    %c64_598 = arith.constant 64 : index
    %c12_599 = arith.constant 12 : index
    %359 = vector.load %arg14[%c64_598, %c12_599] : memref<128x128xf32, #tpu.memory_space<vmem>>, vector<8x4xf32>
    tpu.vector_store %arg14[%c64_598, %c12_599], %358 {strides = array<i32>} : memref<128x128xf32, #tpu.memory_space<vmem>>, vector<8x4xf32>,
    %c1_600 = arith.constant 1 : index
    %c1_601 = arith.constant 1 : index
    %c9_602 = arith.constant 9 : index
    %c0_603 = arith.constant 0 : index
    %360 = vector.load %arg10[%c1_600, %c1_601, %c9_602, %c0_603] : memref<2x18x18x4xf32, #tpu.memory_space<vmem>>, vector<1x1x8x4xf32>
    %361 = vector.shape_cast %360 : vector<1x1x8x4xf32> to vector<8x4xf32>
    %c64_604 = arith.constant 64 : index
    %c16_605 = arith.constant 16 : index
    %362 = vector.load %arg14[%c64_604, %c16_605] : memref<128x128xf32, #tpu.memory_space<vmem>>, vector<8x4xf32>
    tpu.vector_store %arg14[%c64_604, %c16_605], %361 {strides = array<i32>} : memref<128x128xf32, #tpu.memory_space<vmem>>, vector<8x4xf32>,
    %c1_606 = arith.constant 1 : index
    %c1_607 = arith.constant 1 : index
    %c1_608 = arith.constant 1 : index
    %c0_609 = arith.constant 0 : index
    %363 = vector.load %arg10[%c1_606, %c1_607, %c1_608, %c0_609] : memref<2x18x18x4xf32, #tpu.memory_space<vmem>>, vector<1x1x8x4xf32>
    %364 = vector.shape_cast %363 : vector<1x1x8x4xf32> to vector<8x4xf32>
    %c64_610 = arith.constant 64 : index
    %c20_611 = arith.constant 20 : index
    %365 = vector.load %arg14[%c64_610, %c20_611] : memref<128x128xf32, #tpu.memory_space<vmem>>, vector<8x4xf32>
    tpu.vector_store %arg14[%c64_610, %c20_611], %364 {strides = array<i32>} : memref<128x128xf32, #tpu.memory_space<vmem>>, vector<8x4xf32>,
    %c1_612 = arith.constant 1 : index
    %c2_613 = arith.constant 2 : index
    %c0_614 = arith.constant 0 : index
    %c0_615 = arith.constant 0 : index
    %366 = vector.load %arg10[%c1_612, %c2_613, %c0_614, %c0_615] : memref<2x18x18x4xf32, #tpu.memory_space<vmem>>, vector<1x1x8x4xf32>
    %367 = vector.shape_cast %366 : vector<1x1x8x4xf32> to vector<8x4xf32>
    %c64_616 = arith.constant 64 : index
    %c24_617 = arith.constant 24 : index
    %368 = vector.load %arg14[%c64_616, %c24_617] : memref<128x128xf32, #tpu.memory_space<vmem>>, vector<8x4xf32>
    tpu.vector_store %arg14[%c64_616, %c24_617], %367 {strides = array<i32>} : memref<128x128xf32, #tpu.memory_space<vmem>>, vector<8x4xf32>,
    %c1_618 = arith.constant 1 : index
    %c2_619 = arith.constant 2 : index
    %c9_620 = arith.constant 9 : index
    %c0_621 = arith.constant 0 : index
    %369 = vector.load %arg10[%c1_618, %c2_619, %c9_620, %c0_621] : memref<2x18x18x4xf32, #tpu.memory_space<vmem>>, vector<1x1x8x4xf32>
    %370 = vector.shape_cast %369 : vector<1x1x8x4xf32> to vector<8x4xf32>
    %c64_622 = arith.constant 64 : index
    %c28_623 = arith.constant 28 : index
    %371 = vector.load %arg14[%c64_622, %c28_623] : memref<128x128xf32, #tpu.memory_space<vmem>>, vector<8x4xf32>
    tpu.vector_store %arg14[%c64_622, %c28_623], %370 {strides = array<i32>} : memref<128x128xf32, #tpu.memory_space<vmem>>, vector<8x4xf32>,
    %c1_624 = arith.constant 1 : index
    %c2_625 = arith.constant 2 : index
    %c1_626 = arith.constant 1 : index
    %c0_627 = arith.constant 0 : index
    %372 = vector.load %arg10[%c1_624, %c2_625, %c1_626, %c0_627] : memref<2x18x18x4xf32, #tpu.memory_space<vmem>>, vector<1x1x8x4xf32>
    %373 = vector.shape_cast %372 : vector<1x1x8x4xf32> to vector<8x4xf32>
    %c64_628 = arith.constant 64 : index
    %c32_629 = arith.constant 32 : index
    %374 = vector.load %arg14[%c64_628, %c32_629] : memref<128x128xf32, #tpu.memory_space<vmem>>, vector<8x4xf32>
    tpu.vector_store %arg14[%c64_628, %c32_629], %373 {strides = array<i32>} : memref<128x128xf32, #tpu.memory_space<vmem>>, vector<8x4xf32>,
    %c1_630 = arith.constant 1 : index
    %c2_631 = arith.constant 2 : index
    %c0_632 = arith.constant 0 : index
    %c0_633 = arith.constant 0 : index
    %375 = vector.load %arg10[%c1_630, %c2_631, %c0_632, %c0_633] : memref<2x18x18x4xf32, #tpu.memory_space<vmem>>, vector<1x1x8x4xf32>
    %376 = vector.shape_cast %375 : vector<1x1x8x4xf32> to vector<8x4xf32>
    %c72 = arith.constant 72 : index
    %c0_634 = arith.constant 0 : index
    %377 = vector.load %arg14[%c72, %c0_634] : memref<128x128xf32, #tpu.memory_space<vmem>>, vector<8x4xf32>
    tpu.vector_store %arg14[%c72, %c0_634], %376 {strides = array<i32>} : memref<128x128xf32, #tpu.memory_space<vmem>>, vector<8x4xf32>,
    %c1_635 = arith.constant 1 : index
    %c2_636 = arith.constant 2 : index
    %c9_637 = arith.constant 9 : index
    %c0_638 = arith.constant 0 : index
    %378 = vector.load %arg10[%c1_635, %c2_636, %c9_637, %c0_638] : memref<2x18x18x4xf32, #tpu.memory_space<vmem>>, vector<1x1x8x4xf32>
    %379 = vector.shape_cast %378 : vector<1x1x8x4xf32> to vector<8x4xf32>
    %c72_639 = arith.constant 72 : index
    %c4_640 = arith.constant 4 : index
    %380 = vector.load %arg14[%c72_639, %c4_640] : memref<128x128xf32, #tpu.memory_space<vmem>>, vector<8x4xf32>
    tpu.vector_store %arg14[%c72_639, %c4_640], %379 {strides = array<i32>} : memref<128x128xf32, #tpu.memory_space<vmem>>, vector<8x4xf32>,
    %c1_641 = arith.constant 1 : index
    %c2_642 = arith.constant 2 : index
    %c1_643 = arith.constant 1 : index
    %c0_644 = arith.constant 0 : index
    %381 = vector.load %arg10[%c1_641, %c2_642, %c1_643, %c0_644] : memref<2x18x18x4xf32, #tpu.memory_space<vmem>>, vector<1x1x8x4xf32>
    %382 = vector.shape_cast %381 : vector<1x1x8x4xf32> to vector<8x4xf32>
    %c72_645 = arith.constant 72 : index
    %c8_646 = arith.constant 8 : index
    %383 = vector.load %arg14[%c72_645, %c8_646] : memref<128x128xf32, #tpu.memory_space<vmem>>, vector<8x4xf32>
    tpu.vector_store %arg14[%c72_645, %c8_646], %382 {strides = array<i32>} : memref<128x128xf32, #tpu.memory_space<vmem>>, vector<8x4xf32>,
    %c1_647 = arith.constant 1 : index
    %c3_648 = arith.constant 3 : index
    %c0_649 = arith.constant 0 : index
    %c0_650 = arith.constant 0 : index
    %384 = vector.load %arg10[%c1_647, %c3_648, %c0_649, %c0_650] : memref<2x18x18x4xf32, #tpu.memory_space<vmem>>, vector<1x1x8x4xf32>
    %385 = vector.shape_cast %384 : vector<1x1x8x4xf32> to vector<8x4xf32>
    %c72_651 = arith.constant 72 : index
    %c12_652 = arith.constant 12 : index
    %386 = vector.load %arg14[%c72_651, %c12_652] : memref<128x128xf32, #tpu.memory_space<vmem>>, vector<8x4xf32>
    tpu.vector_store %arg14[%c72_651, %c12_652], %385 {strides = array<i32>} : memref<128x128xf32, #tpu.memory_space<vmem>>, vector<8x4xf32>,
    %c1_653 = arith.constant 1 : index
    %c3_654 = arith.constant 3 : index
    %c9_655 = arith.constant 9 : index
    %c0_656 = arith.constant 0 : index
    %387 = vector.load %arg10[%c1_653, %c3_654, %c9_655, %c0_656] : memref<2x18x18x4xf32, #tpu.memory_space<vmem>>, vector<1x1x8x4xf32>
    %388 = vector.shape_cast %387 : vector<1x1x8x4xf32> to vector<8x4xf32>
    %c72_657 = arith.constant 72 : index
    %c16_658 = arith.constant 16 : index
    %389 = vector.load %arg14[%c72_657, %c16_658] : memref<128x128xf32, #tpu.memory_space<vmem>>, vector<8x4xf32>
    tpu.vector_store %arg14[%c72_657, %c16_658], %388 {strides = array<i32>} : memref<128x128xf32, #tpu.memory_space<vmem>>, vector<8x4xf32>,
    %c1_659 = arith.constant 1 : index
    %c3_660 = arith.constant 3 : index
    %c1_661 = arith.constant 1 : index
    %c0_662 = arith.constant 0 : index
    %390 = vector.load %arg10[%c1_659, %c3_660, %c1_661, %c0_662] : memref<2x18x18x4xf32, #tpu.memory_space<vmem>>, vector<1x1x8x4xf32>
    %391 = vector.shape_cast %390 : vector<1x1x8x4xf32> to vector<8x4xf32>
    %c72_663 = arith.constant 72 : index
    %c20_664 = arith.constant 20 : index
    %392 = vector.load %arg14[%c72_663, %c20_664] : memref<128x128xf32, #tpu.memory_space<vmem>>, vector<8x4xf32>
    tpu.vector_store %arg14[%c72_663, %c20_664], %391 {strides = array<i32>} : memref<128x128xf32, #tpu.memory_space<vmem>>, vector<8x4xf32>,
    %c1_665 = arith.constant 1 : index
    %c4_666 = arith.constant 4 : index
    %c0_667 = arith.constant 0 : index
    %c0_668 = arith.constant 0 : index
    %393 = vector.load %arg10[%c1_665, %c4_666, %c0_667, %c0_668] : memref<2x18x18x4xf32, #tpu.memory_space<vmem>>, vector<1x1x8x4xf32>
    %394 = vector.shape_cast %393 : vector<1x1x8x4xf32> to vector<8x4xf32>
    %c72_669 = arith.constant 72 : index
    %c24_670 = arith.constant 24 : index
    %395 = vector.load %arg14[%c72_669, %c24_670] : memref<128x128xf32, #tpu.memory_space<vmem>>, vector<8x4xf32>
    tpu.vector_store %arg14[%c72_669, %c24_670], %394 {strides = array<i32>} : memref<128x128xf32, #tpu.memory_space<vmem>>, vector<8x4xf32>,
    %c1_671 = arith.constant 1 : index
    %c4_672 = arith.constant 4 : index
    %c9_673 = arith.constant 9 : index
    %c0_674 = arith.constant 0 : index
    %396 = vector.load %arg10[%c1_671, %c4_672, %c9_673, %c0_674] : memref<2x18x18x4xf32, #tpu.memory_space<vmem>>, vector<1x1x8x4xf32>
    %397 = vector.shape_cast %396 : vector<1x1x8x4xf32> to vector<8x4xf32>
    %c72_675 = arith.constant 72 : index
    %c28_676 = arith.constant 28 : index
    %398 = vector.load %arg14[%c72_675, %c28_676] : memref<128x128xf32, #tpu.memory_space<vmem>>, vector<8x4xf32>
    tpu.vector_store %arg14[%c72_675, %c28_676], %397 {strides = array<i32>} : memref<128x128xf32, #tpu.memory_space<vmem>>, vector<8x4xf32>,
    %c1_677 = arith.constant 1 : index
    %c4_678 = arith.constant 4 : index
    %c1_679 = arith.constant 1 : index
    %c0_680 = arith.constant 0 : index
    %399 = vector.load %arg10[%c1_677, %c4_678, %c1_679, %c0_680] : memref<2x18x18x4xf32, #tpu.memory_space<vmem>>, vector<1x1x8x4xf32>
    %400 = vector.shape_cast %399 : vector<1x1x8x4xf32> to vector<8x4xf32>
    %c72_681 = arith.constant 72 : index
    %c32_682 = arith.constant 32 : index
    %401 = vector.load %arg14[%c72_681, %c32_682] : memref<128x128xf32, #tpu.memory_space<vmem>>, vector<8x4xf32>
    tpu.vector_store %arg14[%c72_681, %c32_682], %400 {strides = array<i32>} : memref<128x128xf32, #tpu.memory_space<vmem>>, vector<8x4xf32>,
    %c1_683 = arith.constant 1 : index
    %c4_684 = arith.constant 4 : index
    %c0_685 = arith.constant 0 : index
    %c0_686 = arith.constant 0 : index
    %402 = vector.load %arg10[%c1_683, %c4_684, %c0_685, %c0_686] : memref<2x18x18x4xf32, #tpu.memory_space<vmem>>, vector<1x1x8x4xf32>
    %403 = vector.shape_cast %402 : vector<1x1x8x4xf32> to vector<8x4xf32>
    %c80 = arith.constant 80 : index
    %c0_687 = arith.constant 0 : index
    %404 = vector.load %arg14[%c80, %c0_687] : memref<128x128xf32, #tpu.memory_space<vmem>>, vector<8x4xf32>
    tpu.vector_store %arg14[%c80, %c0_687], %403 {strides = array<i32>} : memref<128x128xf32, #tpu.memory_space<vmem>>, vector<8x4xf32>,
    %c1_688 = arith.constant 1 : index
    %c4_689 = arith.constant 4 : index
    %c9_690 = arith.constant 9 : index
    %c0_691 = arith.constant 0 : index
    %405 = vector.load %arg10[%c1_688, %c4_689, %c9_690, %c0_691] : memref<2x18x18x4xf32, #tpu.memory_space<vmem>>, vector<1x1x8x4xf32>
    %406 = vector.shape_cast %405 : vector<1x1x8x4xf32> to vector<8x4xf32>
    %c80_692 = arith.constant 80 : index
    %c4_693 = arith.constant 4 : index
    %407 = vector.load %arg14[%c80_692, %c4_693] : memref<128x128xf32, #tpu.memory_space<vmem>>, vector<8x4xf32>
    tpu.vector_store %arg14[%c80_692, %c4_693], %406 {strides = array<i32>} : memref<128x128xf32, #tpu.memory_space<vmem>>, vector<8x4xf32>,
    %c1_694 = arith.constant 1 : index
    %c4_695 = arith.constant 4 : index
    %c1_696 = arith.constant 1 : index
    %c0_697 = arith.constant 0 : index
    %408 = vector.load %arg10[%c1_694, %c4_695, %c1_696, %c0_697] : memref<2x18x18x4xf32, #tpu.memory_space<vmem>>, vector<1x1x8x4xf32>
    %409 = vector.shape_cast %408 : vector<1x1x8x4xf32> to vector<8x4xf32>
    %c80_698 = arith.constant 80 : index
    %c8_699 = arith.constant 8 : index
    %410 = vector.load %arg14[%c80_698, %c8_699] : memref<128x128xf32, #tpu.memory_space<vmem>>, vector<8x4xf32>
    tpu.vector_store %arg14[%c80_698, %c8_699], %409 {strides = array<i32>} : memref<128x128xf32, #tpu.memory_space<vmem>>, vector<8x4xf32>,
    %c1_700 = arith.constant 1 : index
    %c5_701 = arith.constant 5 : index
    %c0_702 = arith.constant 0 : index
    %c0_703 = arith.constant 0 : index
    %411 = vector.load %arg10[%c1_700, %c5_701, %c0_702, %c0_703] : memref<2x18x18x4xf32, #tpu.memory_space<vmem>>, vector<1x1x8x4xf32>
    %412 = vector.shape_cast %411 : vector<1x1x8x4xf32> to vector<8x4xf32>
    %c80_704 = arith.constant 80 : index
    %c12_705 = arith.constant 12 : index
    %413 = vector.load %arg14[%c80_704, %c12_705] : memref<128x128xf32, #tpu.memory_space<vmem>>, vector<8x4xf32>
    tpu.vector_store %arg14[%c80_704, %c12_705], %412 {strides = array<i32>} : memref<128x128xf32, #tpu.memory_space<vmem>>, vector<8x4xf32>,
    %c1_706 = arith.constant 1 : index
    %c5_707 = arith.constant 5 : index
    %c9_708 = arith.constant 9 : index
    %c0_709 = arith.constant 0 : index
    %414 = vector.load %arg10[%c1_706, %c5_707, %c9_708, %c0_709] : memref<2x18x18x4xf32, #tpu.memory_space<vmem>>, vector<1x1x8x4xf32>
    %415 = vector.shape_cast %414 : vector<1x1x8x4xf32> to vector<8x4xf32>
    %c80_710 = arith.constant 80 : index
    %c16_711 = arith.constant 16 : index
    %416 = vector.load %arg14[%c80_710, %c16_711] : memref<128x128xf32, #tpu.memory_space<vmem>>, vector<8x4xf32>
    tpu.vector_store %arg14[%c80_710, %c16_711], %415 {strides = array<i32>} : memref<128x128xf32, #tpu.memory_space<vmem>>, vector<8x4xf32>,
    %c1_712 = arith.constant 1 : index
    %c5_713 = arith.constant 5 : index
    %c1_714 = arith.constant 1 : index
    %c0_715 = arith.constant 0 : index
    %417 = vector.load %arg10[%c1_712, %c5_713, %c1_714, %c0_715] : memref<2x18x18x4xf32, #tpu.memory_space<vmem>>, vector<1x1x8x4xf32>
    %418 = vector.shape_cast %417 : vector<1x1x8x4xf32> to vector<8x4xf32>
    %c80_716 = arith.constant 80 : index
    %c20_717 = arith.constant 20 : index
    %419 = vector.load %arg14[%c80_716, %c20_717] : memref<128x128xf32, #tpu.memory_space<vmem>>, vector<8x4xf32>
    tpu.vector_store %arg14[%c80_716, %c20_717], %418 {strides = array<i32>} : memref<128x128xf32, #tpu.memory_space<vmem>>, vector<8x4xf32>,
    %c1_718 = arith.constant 1 : index
    %c6_719 = arith.constant 6 : index
    %c0_720 = arith.constant 0 : index
    %c0_721 = arith.constant 0 : index
    %420 = vector.load %arg10[%c1_718, %c6_719, %c0_720, %c0_721] : memref<2x18x18x4xf32, #tpu.memory_space<vmem>>, vector<1x1x8x4xf32>
    %421 = vector.shape_cast %420 : vector<1x1x8x4xf32> to vector<8x4xf32>
    %c80_722 = arith.constant 80 : index
    %c24_723 = arith.constant 24 : index
    %422 = vector.load %arg14[%c80_722, %c24_723] : memref<128x128xf32, #tpu.memory_space<vmem>>, vector<8x4xf32>
    tpu.vector_store %arg14[%c80_722, %c24_723], %421 {strides = array<i32>} : memref<128x128xf32, #tpu.memory_space<vmem>>, vector<8x4xf32>,
    %c1_724 = arith.constant 1 : index
    %c6_725 = arith.constant 6 : index
    %c9_726 = arith.constant 9 : index
    %c0_727 = arith.constant 0 : index
    %423 = vector.load %arg10[%c1_724, %c6_725, %c9_726, %c0_727] : memref<2x18x18x4xf32, #tpu.memory_space<vmem>>, vector<1x1x8x4xf32>
    %424 = vector.shape_cast %423 : vector<1x1x8x4xf32> to vector<8x4xf32>
    %c80_728 = arith.constant 80 : index
    %c28_729 = arith.constant 28 : index
    %425 = vector.load %arg14[%c80_728, %c28_729] : memref<128x128xf32, #tpu.memory_space<vmem>>, vector<8x4xf32>
    tpu.vector_store %arg14[%c80_728, %c28_729], %424 {strides = array<i32>} : memref<128x128xf32, #tpu.memory_space<vmem>>, vector<8x4xf32>,
    %c1_730 = arith.constant 1 : index
    %c6_731 = arith.constant 6 : index
    %c1_732 = arith.constant 1 : index
    %c0_733 = arith.constant 0 : index
    %426 = vector.load %arg10[%c1_730, %c6_731, %c1_732, %c0_733] : memref<2x18x18x4xf32, #tpu.memory_space<vmem>>, vector<1x1x8x4xf32>
    %427 = vector.shape_cast %426 : vector<1x1x8x4xf32> to vector<8x4xf32>
    %c80_734 = arith.constant 80 : index
    %c32_735 = arith.constant 32 : index
    %428 = vector.load %arg14[%c80_734, %c32_735] : memref<128x128xf32, #tpu.memory_space<vmem>>, vector<8x4xf32>
    tpu.vector_store %arg14[%c80_734, %c32_735], %427 {strides = array<i32>} : memref<128x128xf32, #tpu.memory_space<vmem>>, vector<8x4xf32>,
    %c1_736 = arith.constant 1 : index
    %c6_737 = arith.constant 6 : index
    %c0_738 = arith.constant 0 : index
    %c0_739 = arith.constant 0 : index
    %429 = vector.load %arg10[%c1_736, %c6_737, %c0_738, %c0_739] : memref<2x18x18x4xf32, #tpu.memory_space<vmem>>, vector<1x1x8x4xf32>
    %430 = vector.shape_cast %429 : vector<1x1x8x4xf32> to vector<8x4xf32>
    %c88 = arith.constant 88 : index
    %c0_740 = arith.constant 0 : index
    %431 = vector.load %arg14[%c88, %c0_740] : memref<128x128xf32, #tpu.memory_space<vmem>>, vector<8x4xf32>
    tpu.vector_store %arg14[%c88, %c0_740], %430 {strides = array<i32>} : memref<128x128xf32, #tpu.memory_space<vmem>>, vector<8x4xf32>,
    %c1_741 = arith.constant 1 : index
    %c6_742 = arith.constant 6 : index
    %c9_743 = arith.constant 9 : index
    %c0_744 = arith.constant 0 : index
    %432 = vector.load %arg10[%c1_741, %c6_742, %c9_743, %c0_744] : memref<2x18x18x4xf32, #tpu.memory_space<vmem>>, vector<1x1x8x4xf32>
    %433 = vector.shape_cast %432 : vector<1x1x8x4xf32> to vector<8x4xf32>
    %c88_745 = arith.constant 88 : index
    %c4_746 = arith.constant 4 : index
    %434 = vector.load %arg14[%c88_745, %c4_746] : memref<128x128xf32, #tpu.memory_space<vmem>>, vector<8x4xf32>
    tpu.vector_store %arg14[%c88_745, %c4_746], %433 {strides = array<i32>} : memref<128x128xf32, #tpu.memory_space<vmem>>, vector<8x4xf32>,
    %c1_747 = arith.constant 1 : index
    %c6_748 = arith.constant 6 : index
    %c1_749 = arith.constant 1 : index
    %c0_750 = arith.constant 0 : index
    %435 = vector.load %arg10[%c1_747, %c6_748, %c1_749, %c0_750] : memref<2x18x18x4xf32, #tpu.memory_space<vmem>>, vector<1x1x8x4xf32>
    %436 = vector.shape_cast %435 : vector<1x1x8x4xf32> to vector<8x4xf32>
    %c88_751 = arith.constant 88 : index
    %c8_752 = arith.constant 8 : index
    %437 = vector.load %arg14[%c88_751, %c8_752] : memref<128x128xf32, #tpu.memory_space<vmem>>, vector<8x4xf32>
    tpu.vector_store %arg14[%c88_751, %c8_752], %436 {strides = array<i32>} : memref<128x128xf32, #tpu.memory_space<vmem>>, vector<8x4xf32>,
    %c1_753 = arith.constant 1 : index
    %c7_754 = arith.constant 7 : index
    %c0_755 = arith.constant 0 : index
    %c0_756 = arith.constant 0 : index
    %438 = vector.load %arg10[%c1_753, %c7_754, %c0_755, %c0_756] : memref<2x18x18x4xf32, #tpu.memory_space<vmem>>, vector<1x1x8x4xf32>
    %439 = vector.shape_cast %438 : vector<1x1x8x4xf32> to vector<8x4xf32>
    %c88_757 = arith.constant 88 : index
    %c12_758 = arith.constant 12 : index
    %440 = vector.load %arg14[%c88_757, %c12_758] : memref<128x128xf32, #tpu.memory_space<vmem>>, vector<8x4xf32>
    tpu.vector_store %arg14[%c88_757, %c12_758], %439 {strides = array<i32>} : memref<128x128xf32, #tpu.memory_space<vmem>>, vector<8x4xf32>,
    %c1_759 = arith.constant 1 : index
    %c7_760 = arith.constant 7 : index
    %c9_761 = arith.constant 9 : index
    %c0_762 = arith.constant 0 : index
    %441 = vector.load %arg10[%c1_759, %c7_760, %c9_761, %c0_762] : memref<2x18x18x4xf32, #tpu.memory_space<vmem>>, vector<1x1x8x4xf32>
    %442 = vector.shape_cast %441 : vector<1x1x8x4xf32> to vector<8x4xf32>
    %c88_763 = arith.constant 88 : index
    %c16_764 = arith.constant 16 : index
    %443 = vector.load %arg14[%c88_763, %c16_764] : memref<128x128xf32, #tpu.memory_space<vmem>>, vector<8x4xf32>
    tpu.vector_store %arg14[%c88_763, %c16_764], %442 {strides = array<i32>} : memref<128x128xf32, #tpu.memory_space<vmem>>, vector<8x4xf32>,
    %c1_765 = arith.constant 1 : index
    %c7_766 = arith.constant 7 : index
    %c1_767 = arith.constant 1 : index
    %c0_768 = arith.constant 0 : index
    %444 = vector.load %arg10[%c1_765, %c7_766, %c1_767, %c0_768] : memref<2x18x18x4xf32, #tpu.memory_space<vmem>>, vector<1x1x8x4xf32>
    %445 = vector.shape_cast %444 : vector<1x1x8x4xf32> to vector<8x4xf32>
    %c88_769 = arith.constant 88 : index
    %c20_770 = arith.constant 20 : index
    %446 = vector.load %arg14[%c88_769, %c20_770] : memref<128x128xf32, #tpu.memory_space<vmem>>, vector<8x4xf32>
    tpu.vector_store %arg14[%c88_769, %c20_770], %445 {strides = array<i32>} : memref<128x128xf32, #tpu.memory_space<vmem>>, vector<8x4xf32>,
    %c1_771 = arith.constant 1 : index
    %c8_772 = arith.constant 8 : index
    %c0_773 = arith.constant 0 : index
    %c0_774 = arith.constant 0 : index
    %447 = vector.load %arg10[%c1_771, %c8_772, %c0_773, %c0_774] : memref<2x18x18x4xf32, #tpu.memory_space<vmem>>, vector<1x1x8x4xf32>
    %448 = vector.shape_cast %447 : vector<1x1x8x4xf32> to vector<8x4xf32>
    %c88_775 = arith.constant 88 : index
    %c24_776 = arith.constant 24 : index
    %449 = vector.load %arg14[%c88_775, %c24_776] : memref<128x128xf32, #tpu.memory_space<vmem>>, vector<8x4xf32>
    tpu.vector_store %arg14[%c88_775, %c24_776], %448 {strides = array<i32>} : memref<128x128xf32, #tpu.memory_space<vmem>>, vector<8x4xf32>,
    %c1_777 = arith.constant 1 : index
    %c8_778 = arith.constant 8 : index
    %c9_779 = arith.constant 9 : index
    %c0_780 = arith.constant 0 : index
    %450 = vector.load %arg10[%c1_777, %c8_778, %c9_779, %c0_780] : memref<2x18x18x4xf32, #tpu.memory_space<vmem>>, vector<1x1x8x4xf32>
    %451 = vector.shape_cast %450 : vector<1x1x8x4xf32> to vector<8x4xf32>
    %c88_781 = arith.constant 88 : index
    %c28_782 = arith.constant 28 : index
    %452 = vector.load %arg14[%c88_781, %c28_782] : memref<128x128xf32, #tpu.memory_space<vmem>>, vector<8x4xf32>
    tpu.vector_store %arg14[%c88_781, %c28_782], %451 {strides = array<i32>} : memref<128x128xf32, #tpu.memory_space<vmem>>, vector<8x4xf32>,
    %c1_783 = arith.constant 1 : index
    %c8_784 = arith.constant 8 : index
    %c1_785 = arith.constant 1 : index
    %c0_786 = arith.constant 0 : index
    %453 = vector.load %arg10[%c1_783, %c8_784, %c1_785, %c0_786] : memref<2x18x18x4xf32, #tpu.memory_space<vmem>>, vector<1x1x8x4xf32>
    %454 = vector.shape_cast %453 : vector<1x1x8x4xf32> to vector<8x4xf32>
    %c88_787 = arith.constant 88 : index
    %c32_788 = arith.constant 32 : index
    %455 = vector.load %arg14[%c88_787, %c32_788] : memref<128x128xf32, #tpu.memory_space<vmem>>, vector<8x4xf32>
    tpu.vector_store %arg14[%c88_787, %c32_788], %454 {strides = array<i32>} : memref<128x128xf32, #tpu.memory_space<vmem>>, vector<8x4xf32>,
    %c1_789 = arith.constant 1 : index
    %c8_790 = arith.constant 8 : index
    %c0_791 = arith.constant 0 : index
    %c0_792 = arith.constant 0 : index
    %456 = vector.load %arg10[%c1_789, %c8_790, %c0_791, %c0_792] : memref<2x18x18x4xf32, #tpu.memory_space<vmem>>, vector<1x1x8x4xf32>
    %457 = vector.shape_cast %456 : vector<1x1x8x4xf32> to vector<8x4xf32>
    %c96 = arith.constant 96 : index
    %c0_793 = arith.constant 0 : index
    %458 = vector.load %arg14[%c96, %c0_793] : memref<128x128xf32, #tpu.memory_space<vmem>>, vector<8x4xf32>
    tpu.vector_store %arg14[%c96, %c0_793], %457 {strides = array<i32>} : memref<128x128xf32, #tpu.memory_space<vmem>>, vector<8x4xf32>,
    %c1_794 = arith.constant 1 : index
    %c8_795 = arith.constant 8 : index
    %c9_796 = arith.constant 9 : index
    %c0_797 = arith.constant 0 : index
    %459 = vector.load %arg10[%c1_794, %c8_795, %c9_796, %c0_797] : memref<2x18x18x4xf32, #tpu.memory_space<vmem>>, vector<1x1x8x4xf32>
    %460 = vector.shape_cast %459 : vector<1x1x8x4xf32> to vector<8x4xf32>
    %c96_798 = arith.constant 96 : index
    %c4_799 = arith.constant 4 : index
    %461 = vector.load %arg14[%c96_798, %c4_799] : memref<128x128xf32, #tpu.memory_space<vmem>>, vector<8x4xf32>
    tpu.vector_store %arg14[%c96_798, %c4_799], %460 {strides = array<i32>} : memref<128x128xf32, #tpu.memory_space<vmem>>, vector<8x4xf32>,
    %c1_800 = arith.constant 1 : index
    %c8_801 = arith.constant 8 : index
    %c1_802 = arith.constant 1 : index
    %c0_803 = arith.constant 0 : index
    %462 = vector.load %arg10[%c1_800, %c8_801, %c1_802, %c0_803] : memref<2x18x18x4xf32, #tpu.memory_space<vmem>>, vector<1x1x8x4xf32>
    %463 = vector.shape_cast %462 : vector<1x1x8x4xf32> to vector<8x4xf32>
    %c96_804 = arith.constant 96 : index
    %c8_805 = arith.constant 8 : index
    %464 = vector.load %arg14[%c96_804, %c8_805] : memref<128x128xf32, #tpu.memory_space<vmem>>, vector<8x4xf32>
    tpu.vector_store %arg14[%c96_804, %c8_805], %463 {strides = array<i32>} : memref<128x128xf32, #tpu.memory_space<vmem>>, vector<8x4xf32>,
    %c1_806 = arith.constant 1 : index
    %c9_807 = arith.constant 9 : index
    %c0_808 = arith.constant 0 : index
    %c0_809 = arith.constant 0 : index
    %465 = vector.load %arg10[%c1_806, %c9_807, %c0_808, %c0_809] : memref<2x18x18x4xf32, #tpu.memory_space<vmem>>, vector<1x1x8x4xf32>
    %466 = vector.shape_cast %465 : vector<1x1x8x4xf32> to vector<8x4xf32>
    %c96_810 = arith.constant 96 : index
    %c12_811 = arith.constant 12 : index
    %467 = vector.load %arg14[%c96_810, %c12_811] : memref<128x128xf32, #tpu.memory_space<vmem>>, vector<8x4xf32>
    tpu.vector_store %arg14[%c96_810, %c12_811], %466 {strides = array<i32>} : memref<128x128xf32, #tpu.memory_space<vmem>>, vector<8x4xf32>,
    %c1_812 = arith.constant 1 : index
    %c9_813 = arith.constant 9 : index
    %c9_814 = arith.constant 9 : index
    %c0_815 = arith.constant 0 : index
    %468 = vector.load %arg10[%c1_812, %c9_813, %c9_814, %c0_815] : memref<2x18x18x4xf32, #tpu.memory_space<vmem>>, vector<1x1x8x4xf32>
    %469 = vector.shape_cast %468 : vector<1x1x8x4xf32> to vector<8x4xf32>
    %c96_816 = arith.constant 96 : index
    %c16_817 = arith.constant 16 : index
    %470 = vector.load %arg14[%c96_816, %c16_817] : memref<128x128xf32, #tpu.memory_space<vmem>>, vector<8x4xf32>
    tpu.vector_store %arg14[%c96_816, %c16_817], %469 {strides = array<i32>} : memref<128x128xf32, #tpu.memory_space<vmem>>, vector<8x4xf32>,
    %c1_818 = arith.constant 1 : index
    %c9_819 = arith.constant 9 : index
    %c1_820 = arith.constant 1 : index
    %c0_821 = arith.constant 0 : index
    %471 = vector.load %arg10[%c1_818, %c9_819, %c1_820, %c0_821] : memref<2x18x18x4xf32, #tpu.memory_space<vmem>>, vector<1x1x8x4xf32>
    %472 = vector.shape_cast %471 : vector<1x1x8x4xf32> to vector<8x4xf32>
    %c96_822 = arith.constant 96 : index
    %c20_823 = arith.constant 20 : index
    %473 = vector.load %arg14[%c96_822, %c20_823] : memref<128x128xf32, #tpu.memory_space<vmem>>, vector<8x4xf32>
    tpu.vector_store %arg14[%c96_822, %c20_823], %472 {strides = array<i32>} : memref<128x128xf32, #tpu.memory_space<vmem>>, vector<8x4xf32>,
    %c1_824 = arith.constant 1 : index
    %c10_825 = arith.constant 10 : index
    %c0_826 = arith.constant 0 : index
    %c0_827 = arith.constant 0 : index
    %474 = vector.load %arg10[%c1_824, %c10_825, %c0_826, %c0_827] : memref<2x18x18x4xf32, #tpu.memory_space<vmem>>, vector<1x1x8x4xf32>
    %475 = vector.shape_cast %474 : vector<1x1x8x4xf32> to vector<8x4xf32>
    %c96_828 = arith.constant 96 : index
    %c24_829 = arith.constant 24 : index
    %476 = vector.load %arg14[%c96_828, %c24_829] : memref<128x128xf32, #tpu.memory_space<vmem>>, vector<8x4xf32>
    tpu.vector_store %arg14[%c96_828, %c24_829], %475 {strides = array<i32>} : memref<128x128xf32, #tpu.memory_space<vmem>>, vector<8x4xf32>,
    %c1_830 = arith.constant 1 : index
    %c10_831 = arith.constant 10 : index
    %c9_832 = arith.constant 9 : index
    %c0_833 = arith.constant 0 : index
    %477 = vector.load %arg10[%c1_830, %c10_831, %c9_832, %c0_833] : memref<2x18x18x4xf32, #tpu.memory_space<vmem>>, vector<1x1x8x4xf32>
    %478 = vector.shape_cast %477 : vector<1x1x8x4xf32> to vector<8x4xf32>
    %c96_834 = arith.constant 96 : index
    %c28_835 = arith.constant 28 : index
    %479 = vector.load %arg14[%c96_834, %c28_835] : memref<128x128xf32, #tpu.memory_space<vmem>>, vector<8x4xf32>
    tpu.vector_store %arg14[%c96_834, %c28_835], %478 {strides = array<i32>} : memref<128x128xf32, #tpu.memory_space<vmem>>, vector<8x4xf32>,
    %c1_836 = arith.constant 1 : index
    %c10_837 = arith.constant 10 : index
    %c1_838 = arith.constant 1 : index
    %c0_839 = arith.constant 0 : index
    %480 = vector.load %arg10[%c1_836, %c10_837, %c1_838, %c0_839] : memref<2x18x18x4xf32, #tpu.memory_space<vmem>>, vector<1x1x8x4xf32>
    %481 = vector.shape_cast %480 : vector<1x1x8x4xf32> to vector<8x4xf32>
    %c96_840 = arith.constant 96 : index
    %c32_841 = arith.constant 32 : index
    %482 = vector.load %arg14[%c96_840, %c32_841] : memref<128x128xf32, #tpu.memory_space<vmem>>, vector<8x4xf32>
    tpu.vector_store %arg14[%c96_840, %c32_841], %481 {strides = array<i32>} : memref<128x128xf32, #tpu.memory_space<vmem>>, vector<8x4xf32>,
    %c1_842 = arith.constant 1 : index
    %c10_843 = arith.constant 10 : index
    %c0_844 = arith.constant 0 : index
    %c0_845 = arith.constant 0 : index
    %483 = vector.load %arg10[%c1_842, %c10_843, %c0_844, %c0_845] : memref<2x18x18x4xf32, #tpu.memory_space<vmem>>, vector<1x1x8x4xf32>
    %484 = vector.shape_cast %483 : vector<1x1x8x4xf32> to vector<8x4xf32>
    %c104 = arith.constant 104 : index
    %c0_846 = arith.constant 0 : index
    %485 = vector.load %arg14[%c104, %c0_846] : memref<128x128xf32, #tpu.memory_space<vmem>>, vector<8x4xf32>
    tpu.vector_store %arg14[%c104, %c0_846], %484 {strides = array<i32>} : memref<128x128xf32, #tpu.memory_space<vmem>>, vector<8x4xf32>,
    %c1_847 = arith.constant 1 : index
    %c10_848 = arith.constant 10 : index
    %c9_849 = arith.constant 9 : index
    %c0_850 = arith.constant 0 : index
    %486 = vector.load %arg10[%c1_847, %c10_848, %c9_849, %c0_850] : memref<2x18x18x4xf32, #tpu.memory_space<vmem>>, vector<1x1x8x4xf32>
    %487 = vector.shape_cast %486 : vector<1x1x8x4xf32> to vector<8x4xf32>
    %c104_851 = arith.constant 104 : index
    %c4_852 = arith.constant 4 : index
    %488 = vector.load %arg14[%c104_851, %c4_852] : memref<128x128xf32, #tpu.memory_space<vmem>>, vector<8x4xf32>
    tpu.vector_store %arg14[%c104_851, %c4_852], %487 {strides = array<i32>} : memref<128x128xf32, #tpu.memory_space<vmem>>, vector<8x4xf32>,
    %c1_853 = arith.constant 1 : index
    %c10_854 = arith.constant 10 : index
    %c1_855 = arith.constant 1 : index
    %c0_856 = arith.constant 0 : index
    %489 = vector.load %arg10[%c1_853, %c10_854, %c1_855, %c0_856] : memref<2x18x18x4xf32, #tpu.memory_space<vmem>>, vector<1x1x8x4xf32>
    %490 = vector.shape_cast %489 : vector<1x1x8x4xf32> to vector<8x4xf32>
    %c104_857 = arith.constant 104 : index
    %c8_858 = arith.constant 8 : index
    %491 = vector.load %arg14[%c104_857, %c8_858] : memref<128x128xf32, #tpu.memory_space<vmem>>, vector<8x4xf32>
    tpu.vector_store %arg14[%c104_857, %c8_858], %490 {strides = array<i32>} : memref<128x128xf32, #tpu.memory_space<vmem>>, vector<8x4xf32>,
    %c1_859 = arith.constant 1 : index
    %c11_860 = arith.constant 11 : index
    %c0_861 = arith.constant 0 : index
    %c0_862 = arith.constant 0 : index
    %492 = vector.load %arg10[%c1_859, %c11_860, %c0_861, %c0_862] : memref<2x18x18x4xf32, #tpu.memory_space<vmem>>, vector<1x1x8x4xf32>
    %493 = vector.shape_cast %492 : vector<1x1x8x4xf32> to vector<8x4xf32>
    %c104_863 = arith.constant 104 : index
    %c12_864 = arith.constant 12 : index
    %494 = vector.load %arg14[%c104_863, %c12_864] : memref<128x128xf32, #tpu.memory_space<vmem>>, vector<8x4xf32>
    tpu.vector_store %arg14[%c104_863, %c12_864], %493 {strides = array<i32>} : memref<128x128xf32, #tpu.memory_space<vmem>>, vector<8x4xf32>,
    %c1_865 = arith.constant 1 : index
    %c11_866 = arith.constant 11 : index
    %c9_867 = arith.constant 9 : index
    %c0_868 = arith.constant 0 : index
    %495 = vector.load %arg10[%c1_865, %c11_866, %c9_867, %c0_868] : memref<2x18x18x4xf32, #tpu.memory_space<vmem>>, vector<1x1x8x4xf32>
    %496 = vector.shape_cast %495 : vector<1x1x8x4xf32> to vector<8x4xf32>
    %c104_869 = arith.constant 104 : index
    %c16_870 = arith.constant 16 : index
    %497 = vector.load %arg14[%c104_869, %c16_870] : memref<128x128xf32, #tpu.memory_space<vmem>>, vector<8x4xf32>
    tpu.vector_store %arg14[%c104_869, %c16_870], %496 {strides = array<i32>} : memref<128x128xf32, #tpu.memory_space<vmem>>, vector<8x4xf32>,
    %c1_871 = arith.constant 1 : index
    %c11_872 = arith.constant 11 : index
    %c1_873 = arith.constant 1 : index
    %c0_874 = arith.constant 0 : index
    %498 = vector.load %arg10[%c1_871, %c11_872, %c1_873, %c0_874] : memref<2x18x18x4xf32, #tpu.memory_space<vmem>>, vector<1x1x8x4xf32>
    %499 = vector.shape_cast %498 : vector<1x1x8x4xf32> to vector<8x4xf32>
    %c104_875 = arith.constant 104 : index
    %c20_876 = arith.constant 20 : index
    %500 = vector.load %arg14[%c104_875, %c20_876] : memref<128x128xf32, #tpu.memory_space<vmem>>, vector<8x4xf32>
    tpu.vector_store %arg14[%c104_875, %c20_876], %499 {strides = array<i32>} : memref<128x128xf32, #tpu.memory_space<vmem>>, vector<8x4xf32>,
    %c1_877 = arith.constant 1 : index
    %c12_878 = arith.constant 12 : index
    %c0_879 = arith.constant 0 : index
    %c0_880 = arith.constant 0 : index
    %501 = vector.load %arg10[%c1_877, %c12_878, %c0_879, %c0_880] : memref<2x18x18x4xf32, #tpu.memory_space<vmem>>, vector<1x1x8x4xf32>
    %502 = vector.shape_cast %501 : vector<1x1x8x4xf32> to vector<8x4xf32>
    %c104_881 = arith.constant 104 : index
    %c24_882 = arith.constant 24 : index
    %503 = vector.load %arg14[%c104_881, %c24_882] : memref<128x128xf32, #tpu.memory_space<vmem>>, vector<8x4xf32>
    tpu.vector_store %arg14[%c104_881, %c24_882], %502 {strides = array<i32>} : memref<128x128xf32, #tpu.memory_space<vmem>>, vector<8x4xf32>,
    %c1_883 = arith.constant 1 : index
    %c12_884 = arith.constant 12 : index
    %c9_885 = arith.constant 9 : index
    %c0_886 = arith.constant 0 : index
    %504 = vector.load %arg10[%c1_883, %c12_884, %c9_885, %c0_886] : memref<2x18x18x4xf32, #tpu.memory_space<vmem>>, vector<1x1x8x4xf32>
    %505 = vector.shape_cast %504 : vector<1x1x8x4xf32> to vector<8x4xf32>
    %c104_887 = arith.constant 104 : index
    %c28_888 = arith.constant 28 : index
    %506 = vector.load %arg14[%c104_887, %c28_888] : memref<128x128xf32, #tpu.memory_space<vmem>>, vector<8x4xf32>
    tpu.vector_store %arg14[%c104_887, %c28_888], %505 {strides = array<i32>} : memref<128x128xf32, #tpu.memory_space<vmem>>, vector<8x4xf32>,
    %c1_889 = arith.constant 1 : index
    %c12_890 = arith.constant 12 : index
    %c1_891 = arith.constant 1 : index
    %c0_892 = arith.constant 0 : index
    %507 = vector.load %arg10[%c1_889, %c12_890, %c1_891, %c0_892] : memref<2x18x18x4xf32, #tpu.memory_space<vmem>>, vector<1x1x8x4xf32>
    %508 = vector.shape_cast %507 : vector<1x1x8x4xf32> to vector<8x4xf32>
    %c104_893 = arith.constant 104 : index
    %c32_894 = arith.constant 32 : index
    %509 = vector.load %arg14[%c104_893, %c32_894] : memref<128x128xf32, #tpu.memory_space<vmem>>, vector<8x4xf32>
    tpu.vector_store %arg14[%c104_893, %c32_894], %508 {strides = array<i32>} : memref<128x128xf32, #tpu.memory_space<vmem>>, vector<8x4xf32>,
    %c1_895 = arith.constant 1 : index
    %c12_896 = arith.constant 12 : index
    %c0_897 = arith.constant 0 : index
    %c0_898 = arith.constant 0 : index
    %510 = vector.load %arg10[%c1_895, %c12_896, %c0_897, %c0_898] : memref<2x18x18x4xf32, #tpu.memory_space<vmem>>, vector<1x1x8x4xf32>
    %511 = vector.shape_cast %510 : vector<1x1x8x4xf32> to vector<8x4xf32>
    %c112 = arith.constant 112 : index
    %c0_899 = arith.constant 0 : index
    %512 = vector.load %arg14[%c112, %c0_899] : memref<128x128xf32, #tpu.memory_space<vmem>>, vector<8x4xf32>
    tpu.vector_store %arg14[%c112, %c0_899], %511 {strides = array<i32>} : memref<128x128xf32, #tpu.memory_space<vmem>>, vector<8x4xf32>,
    %c1_900 = arith.constant 1 : index
    %c12_901 = arith.constant 12 : index
    %c9_902 = arith.constant 9 : index
    %c0_903 = arith.constant 0 : index
    %513 = vector.load %arg10[%c1_900, %c12_901, %c9_902, %c0_903] : memref<2x18x18x4xf32, #tpu.memory_space<vmem>>, vector<1x1x8x4xf32>
    %514 = vector.shape_cast %513 : vector<1x1x8x4xf32> to vector<8x4xf32>
    %c112_904 = arith.constant 112 : index
    %c4_905 = arith.constant 4 : index
    %515 = vector.load %arg14[%c112_904, %c4_905] : memref<128x128xf32, #tpu.memory_space<vmem>>, vector<8x4xf32>
    tpu.vector_store %arg14[%c112_904, %c4_905], %514 {strides = array<i32>} : memref<128x128xf32, #tpu.memory_space<vmem>>, vector<8x4xf32>,
    %c1_906 = arith.constant 1 : index
    %c12_907 = arith.constant 12 : index
    %c1_908 = arith.constant 1 : index
    %c0_909 = arith.constant 0 : index
    %516 = vector.load %arg10[%c1_906, %c12_907, %c1_908, %c0_909] : memref<2x18x18x4xf32, #tpu.memory_space<vmem>>, vector<1x1x8x4xf32>
    %517 = vector.shape_cast %516 : vector<1x1x8x4xf32> to vector<8x4xf32>
    %c112_910 = arith.constant 112 : index
    %c8_911 = arith.constant 8 : index
    %518 = vector.load %arg14[%c112_910, %c8_911] : memref<128x128xf32, #tpu.memory_space<vmem>>, vector<8x4xf32>
    tpu.vector_store %arg14[%c112_910, %c8_911], %517 {strides = array<i32>} : memref<128x128xf32, #tpu.memory_space<vmem>>, vector<8x4xf32>,
    %c1_912 = arith.constant 1 : index
    %c13_913 = arith.constant 13 : index
    %c0_914 = arith.constant 0 : index
    %c0_915 = arith.constant 0 : index
    %519 = vector.load %arg10[%c1_912, %c13_913, %c0_914, %c0_915] : memref<2x18x18x4xf32, #tpu.memory_space<vmem>>, vector<1x1x8x4xf32>
    %520 = vector.shape_cast %519 : vector<1x1x8x4xf32> to vector<8x4xf32>
    %c112_916 = arith.constant 112 : index
    %c12_917 = arith.constant 12 : index
    %521 = vector.load %arg14[%c112_916, %c12_917] : memref<128x128xf32, #tpu.memory_space<vmem>>, vector<8x4xf32>
    tpu.vector_store %arg14[%c112_916, %c12_917], %520 {strides = array<i32>} : memref<128x128xf32, #tpu.memory_space<vmem>>, vector<8x4xf32>,
    %c1_918 = arith.constant 1 : index
    %c13_919 = arith.constant 13 : index
    %c9_920 = arith.constant 9 : index
    %c0_921 = arith.constant 0 : index
    %522 = vector.load %arg10[%c1_918, %c13_919, %c9_920, %c0_921] : memref<2x18x18x4xf32, #tpu.memory_space<vmem>>, vector<1x1x8x4xf32>
    %523 = vector.shape_cast %522 : vector<1x1x8x4xf32> to vector<8x4xf32>
    %c112_922 = arith.constant 112 : index
    %c16_923 = arith.constant 16 : index
    %524 = vector.load %arg14[%c112_922, %c16_923] : memref<128x128xf32, #tpu.memory_space<vmem>>, vector<8x4xf32>
    tpu.vector_store %arg14[%c112_922, %c16_923], %523 {strides = array<i32>} : memref<128x128xf32, #tpu.memory_space<vmem>>, vector<8x4xf32>,
    %c1_924 = arith.constant 1 : index
    %c13_925 = arith.constant 13 : index
    %c1_926 = arith.constant 1 : index
    %c0_927 = arith.constant 0 : index
    %525 = vector.load %arg10[%c1_924, %c13_925, %c1_926, %c0_927] : memref<2x18x18x4xf32, #tpu.memory_space<vmem>>, vector<1x1x8x4xf32>
    %526 = vector.shape_cast %525 : vector<1x1x8x4xf32> to vector<8x4xf32>
    %c112_928 = arith.constant 112 : index
    %c20_929 = arith.constant 20 : index
    %527 = vector.load %arg14[%c112_928, %c20_929] : memref<128x128xf32, #tpu.memory_space<vmem>>, vector<8x4xf32>
    tpu.vector_store %arg14[%c112_928, %c20_929], %526 {strides = array<i32>} : memref<128x128xf32, #tpu.memory_space<vmem>>, vector<8x4xf32>,
    %c1_930 = arith.constant 1 : index
    %c14_931 = arith.constant 14 : index
    %c0_932 = arith.constant 0 : index
    %c0_933 = arith.constant 0 : index
    %528 = vector.load %arg10[%c1_930, %c14_931, %c0_932, %c0_933] : memref<2x18x18x4xf32, #tpu.memory_space<vmem>>, vector<1x1x8x4xf32>
    %529 = vector.shape_cast %528 : vector<1x1x8x4xf32> to vector<8x4xf32>
    %c112_934 = arith.constant 112 : index
    %c24_935 = arith.constant 24 : index
    %530 = vector.load %arg14[%c112_934, %c24_935] : memref<128x128xf32, #tpu.memory_space<vmem>>, vector<8x4xf32>
    tpu.vector_store %arg14[%c112_934, %c24_935], %529 {strides = array<i32>} : memref<128x128xf32, #tpu.memory_space<vmem>>, vector<8x4xf32>,
    %c1_936 = arith.constant 1 : index
    %c14_937 = arith.constant 14 : index
    %c9_938 = arith.constant 9 : index
    %c0_939 = arith.constant 0 : index
    %531 = vector.load %arg10[%c1_936, %c14_937, %c9_938, %c0_939] : memref<2x18x18x4xf32, #tpu.memory_space<vmem>>, vector<1x1x8x4xf32>
    %532 = vector.shape_cast %531 : vector<1x1x8x4xf32> to vector<8x4xf32>
    %c112_940 = arith.constant 112 : index
    %c28_941 = arith.constant 28 : index
    %533 = vector.load %arg14[%c112_940, %c28_941] : memref<128x128xf32, #tpu.memory_space<vmem>>, vector<8x4xf32>
    tpu.vector_store %arg14[%c112_940, %c28_941], %532 {strides = array<i32>} : memref<128x128xf32, #tpu.memory_space<vmem>>, vector<8x4xf32>,
    %c1_942 = arith.constant 1 : index
    %c14_943 = arith.constant 14 : index
    %c1_944 = arith.constant 1 : index
    %c0_945 = arith.constant 0 : index
    %534 = vector.load %arg10[%c1_942, %c14_943, %c1_944, %c0_945] : memref<2x18x18x4xf32, #tpu.memory_space<vmem>>, vector<1x1x8x4xf32>
    %535 = vector.shape_cast %534 : vector<1x1x8x4xf32> to vector<8x4xf32>
    %c112_946 = arith.constant 112 : index
    %c32_947 = arith.constant 32 : index
    %536 = vector.load %arg14[%c112_946, %c32_947] : memref<128x128xf32, #tpu.memory_space<vmem>>, vector<8x4xf32>
    tpu.vector_store %arg14[%c112_946, %c32_947], %535 {strides = array<i32>} : memref<128x128xf32, #tpu.memory_space<vmem>>, vector<8x4xf32>,
    %c1_948 = arith.constant 1 : index
    %c14_949 = arith.constant 14 : index
    %c0_950 = arith.constant 0 : index
    %c0_951 = arith.constant 0 : index
    %537 = vector.load %arg10[%c1_948, %c14_949, %c0_950, %c0_951] : memref<2x18x18x4xf32, #tpu.memory_space<vmem>>, vector<1x1x8x4xf32>
    %538 = vector.shape_cast %537 : vector<1x1x8x4xf32> to vector<8x4xf32>
    %c120 = arith.constant 120 : index
    %c0_952 = arith.constant 0 : index
    %539 = vector.load %arg14[%c120, %c0_952] : memref<128x128xf32, #tpu.memory_space<vmem>>, vector<8x4xf32>
    tpu.vector_store %arg14[%c120, %c0_952], %538 {strides = array<i32>} : memref<128x128xf32, #tpu.memory_space<vmem>>, vector<8x4xf32>,
    %c1_953 = arith.constant 1 : index
    %c14_954 = arith.constant 14 : index
    %c9_955 = arith.constant 9 : index
    %c0_956 = arith.constant 0 : index
    %540 = vector.load %arg10[%c1_953, %c14_954, %c9_955, %c0_956] : memref<2x18x18x4xf32, #tpu.memory_space<vmem>>, vector<1x1x8x4xf32>
    %541 = vector.shape_cast %540 : vector<1x1x8x4xf32> to vector<8x4xf32>
    %c120_957 = arith.constant 120 : index
    %c4_958 = arith.constant 4 : index
    %542 = vector.load %arg14[%c120_957, %c4_958] : memref<128x128xf32, #tpu.memory_space<vmem>>, vector<8x4xf32>
    tpu.vector_store %arg14[%c120_957, %c4_958], %541 {strides = array<i32>} : memref<128x128xf32, #tpu.memory_space<vmem>>, vector<8x4xf32>,
    %c1_959 = arith.constant 1 : index
    %c14_960 = arith.constant 14 : index
    %c1_961 = arith.constant 1 : index
    %c0_962 = arith.constant 0 : index
    %543 = vector.load %arg10[%c1_959, %c14_960, %c1_961, %c0_962] : memref<2x18x18x4xf32, #tpu.memory_space<vmem>>, vector<1x1x8x4xf32>
    %544 = vector.shape_cast %543 : vector<1x1x8x4xf32> to vector<8x4xf32>
    %c120_963 = arith.constant 120 : index
    %c8_964 = arith.constant 8 : index
    %545 = vector.load %arg14[%c120_963, %c8_964] : memref<128x128xf32, #tpu.memory_space<vmem>>, vector<8x4xf32>
    tpu.vector_store %arg14[%c120_963, %c8_964], %544 {strides = array<i32>} : memref<128x128xf32, #tpu.memory_space<vmem>>, vector<8x4xf32>,
    %c1_965 = arith.constant 1 : index
    %c15_966 = arith.constant 15 : index
    %c0_967 = arith.constant 0 : index
    %c0_968 = arith.constant 0 : index
    %546 = vector.load %arg10[%c1_965, %c15_966, %c0_967, %c0_968] : memref<2x18x18x4xf32, #tpu.memory_space<vmem>>, vector<1x1x8x4xf32>
    %547 = vector.shape_cast %546 : vector<1x1x8x4xf32> to vector<8x4xf32>
    %c120_969 = arith.constant 120 : index
    %c12_970 = arith.constant 12 : index
    %548 = vector.load %arg14[%c120_969, %c12_970] : memref<128x128xf32, #tpu.memory_space<vmem>>, vector<8x4xf32>
    tpu.vector_store %arg14[%c120_969, %c12_970], %547 {strides = array<i32>} : memref<128x128xf32, #tpu.memory_space<vmem>>, vector<8x4xf32>,
    %c1_971 = arith.constant 1 : index
    %c15_972 = arith.constant 15 : index
    %c9_973 = arith.constant 9 : index
    %c0_974 = arith.constant 0 : index
    %549 = vector.load %arg10[%c1_971, %c15_972, %c9_973, %c0_974] : memref<2x18x18x4xf32, #tpu.memory_space<vmem>>, vector<1x1x8x4xf32>
    %550 = vector.shape_cast %549 : vector<1x1x8x4xf32> to vector<8x4xf32>
    %c120_975 = arith.constant 120 : index
    %c16_976 = arith.constant 16 : index
    %551 = vector.load %arg14[%c120_975, %c16_976] : memref<128x128xf32, #tpu.memory_space<vmem>>, vector<8x4xf32>
    tpu.vector_store %arg14[%c120_975, %c16_976], %550 {strides = array<i32>} : memref<128x128xf32, #tpu.memory_space<vmem>>, vector<8x4xf32>,
    %c1_977 = arith.constant 1 : index
    %c15_978 = arith.constant 15 : index
    %c1_979 = arith.constant 1 : index
    %c0_980 = arith.constant 0 : index
    %552 = vector.load %arg10[%c1_977, %c15_978, %c1_979, %c0_980] : memref<2x18x18x4xf32, #tpu.memory_space<vmem>>, vector<1x1x8x4xf32>
    %553 = vector.shape_cast %552 : vector<1x1x8x4xf32> to vector<8x4xf32>
    %c120_981 = arith.constant 120 : index
    %c20_982 = arith.constant 20 : index
    %554 = vector.load %arg14[%c120_981, %c20_982] : memref<128x128xf32, #tpu.memory_space<vmem>>, vector<8x4xf32>
    tpu.vector_store %arg14[%c120_981, %c20_982], %553 {strides = array<i32>} : memref<128x128xf32, #tpu.memory_space<vmem>>, vector<8x4xf32>,
    %c1_983 = arith.constant 1 : index
    %c16_984 = arith.constant 16 : index
    %c0_985 = arith.constant 0 : index
    %c0_986 = arith.constant 0 : index
    %555 = vector.load %arg10[%c1_983, %c16_984, %c0_985, %c0_986] : memref<2x18x18x4xf32, #tpu.memory_space<vmem>>, vector<1x1x8x4xf32>
    %556 = vector.shape_cast %555 : vector<1x1x8x4xf32> to vector<8x4xf32>
    %c120_987 = arith.constant 120 : index
    %c24_988 = arith.constant 24 : index
    %557 = vector.load %arg14[%c120_987, %c24_988] : memref<128x128xf32, #tpu.memory_space<vmem>>, vector<8x4xf32>
    tpu.vector_store %arg14[%c120_987, %c24_988], %556 {strides = array<i32>} : memref<128x128xf32, #tpu.memory_space<vmem>>, vector<8x4xf32>,
    %c1_989 = arith.constant 1 : index
    %c16_990 = arith.constant 16 : index
    %c9_991 = arith.constant 9 : index
    %c0_992 = arith.constant 0 : index
    %558 = vector.load %arg10[%c1_989, %c16_990, %c9_991, %c0_992] : memref<2x18x18x4xf32, #tpu.memory_space<vmem>>, vector<1x1x8x4xf32>
    %559 = vector.shape_cast %558 : vector<1x1x8x4xf32> to vector<8x4xf32>
    %c120_993 = arith.constant 120 : index
    %c28_994 = arith.constant 28 : index
    %560 = vector.load %arg14[%c120_993, %c28_994] : memref<128x128xf32, #tpu.memory_space<vmem>>, vector<8x4xf32>
    tpu.vector_store %arg14[%c120_993, %c28_994], %559 {strides = array<i32>} : memref<128x128xf32, #tpu.memory_space<vmem>>, vector<8x4xf32>,
    %c1_995 = arith.constant 1 : index
    %c16_996 = arith.constant 16 : index
    %c1_997 = arith.constant 1 : index
    %c0_998 = arith.constant 0 : index
    %561 = vector.load %arg10[%c1_995, %c16_996, %c1_997, %c0_998] : memref<2x18x18x4xf32, #tpu.memory_space<vmem>>, vector<1x1x8x4xf32>
    %562 = vector.shape_cast %561 : vector<1x1x8x4xf32> to vector<8x4xf32>
    %c120_999 = arith.constant 120 : index
    %c32_1000 = arith.constant 32 : index
    %563 = vector.load %arg14[%c120_999, %c32_1000] : memref<128x128xf32, #tpu.memory_space<vmem>>, vector<8x4xf32>
    tpu.vector_store %arg14[%c120_999, %c32_1000], %562 {strides = array<i32>} : memref<128x128xf32, #tpu.memory_space<vmem>>, vector<8x4xf32>,
    %c0_1001 = arith.constant 0 : index
    %c0_1002 = arith.constant 0 : index
    %564 = vector.load %arg14[%c0_1001, %c0_1002] : memref<128x128xf32, #tpu.memory_space<vmem>>, vector<128x128xf32>
    %565 = arith.truncf %564 : vector<128x128xf32> to vector<128x128xbf16>
    %c0_1003 = arith.constant 0 : index
    %c0_1004 = arith.constant 0 : index
    %c0_1005 = arith.constant 0 : index
    %566 = vector.load %arg2[%c0_1003, %c0_1004, %c0_1005] : memref<4x128x128xbf16, #tpu.memory_space<vmem>>, vector<1x128x128xbf16>
    %567 = vector.shape_cast %566 : vector<1x128x128xbf16> to vector<128x128xbf16>
    %cst_1006 = arith.constant dense<0.000000e+00> : vector<128x128xf32>
    %568 = tpu.matmul %565, %567, %cst_1006 {dimension_numbers = #tpu.dot_dimension_numbers<[1], [0], [0], [1], [0, 0, 1, 1], [], []>} : vector<128x128xbf16>, vector<128x128xbf16>, vector<128x128xf32> -> vector<128x128xf32>
    %c0_1007 = arith.constant 0 : index
    %c0_1008 = arith.constant 0 : index
    %c0_1009 = arith.constant 0 : index
    %569 = vector.load %arg3[%c0_1007, %c0_1008, %c0_1009] : memref<4x1x128xf32, #tpu.memory_space<vmem>>, vector<1x1x128xf32>
    %570 = vector.shape_cast %569 : vector<1x1x128xf32> to vector<1x128xf32>
    %571 = vector.broadcast %570 : vector<1x128xf32> to vector<128x128xf32>
    %572 = arith.addf %568, %571 : vector<128x128xf32>
    %cst_1010 = arith.constant 0.000000e+00 : f32
    %573 = vector.broadcast %cst_1010 : f32 to vector<128x128xf32>
    %574 = arith.maximumf %572, %573 : vector<128x128xf32>
    %cst_1011 = arith.constant dense<0.000000e+00> : vector<128xf32>
    %575 = vector.multi_reduction <add>, %574, %cst_1011 [0] : vector<128x128xf32> to vector<128xf32>
    %576 = vector.shape_cast %575 : vector<128xf32> to vector<1x128xf32>
    %577 = arith.mulf %574, %574 : vector<128x128xf32>
    %cst_1012 = arith.constant dense<0.000000e+00> : vector<128xf32>
    %578 = vector.multi_reduction <add>, %577, %cst_1012 [0] : vector<128x128xf32> to vector<128xf32>
    %579 = vector.shape_cast %578 : vector<128xf32> to vector<1x128xf32>
    %cst_1013 = arith.constant 7.812500e-03 : f32
    %580 = vector.broadcast %cst_1013 : f32 to vector<1x128xf32>
    %581 = arith.mulf %576, %580 : vector<1x128xf32>
    %cst_1014 = arith.constant 7.812500e-03 : f32
    %582 = vector.broadcast %cst_1014 : f32 to vector<1x128xf32>
    %583 = arith.mulf %579, %582 : vector<1x128xf32>
    %584 = arith.mulf %581, %581 : vector<1x128xf32>
    %585 = arith.subf %583, %584 : vector<1x128xf32>
    %cst_1015 = arith.constant 0.000000e+00 : f32
    %586 = vector.broadcast %cst_1015 : f32 to vector<1x128xf32>
    %587 = arith.maximumf %585, %586 : vector<1x128xf32>
    %cst_1016 = arith.constant 9.99999974E-6 : f32
    %588 = vector.broadcast %cst_1016 : f32 to vector<1x128xf32>
    %589 = arith.addf %587, %588 : vector<1x128xf32>
    %590 = math.rsqrt %589 : vector<1x128xf32>
    %c0_1017 = arith.constant 0 : index
    %c0_1018 = arith.constant 0 : index
    %c0_1019 = arith.constant 0 : index
    %591 = vector.load %arg4[%c0_1017, %c0_1018, %c0_1019] : memref<4x1x128xf32, #tpu.memory_space<vmem>>, vector<1x1x128xf32>
    %592 = vector.shape_cast %591 : vector<1x1x128xf32> to vector<1x128xf32>
    %593 = arith.mulf %592, %590 : vector<1x128xf32>
    %c0_1020 = arith.constant 0 : index
    %c0_1021 = arith.constant 0 : index
    %c0_1022 = arith.constant 0 : index
    %594 = vector.load %arg5[%c0_1020, %c0_1021, %c0_1022] : memref<4x1x128xf32, #tpu.memory_space<vmem>>, vector<1x1x128xf32>
    %595 = vector.shape_cast %594 : vector<1x1x128xf32> to vector<1x128xf32>
    %596 = arith.mulf %581, %593 : vector<1x128xf32>
    %597 = arith.subf %595, %596 : vector<1x128xf32>
    %598 = vector.broadcast %593 : vector<1x128xf32> to vector<128x128xf32>
    %599 = arith.mulf %574, %598 : vector<128x128xf32>
    %600 = vector.broadcast %597 : vector<1x128xf32> to vector<128x128xf32>
    %601 = arith.addf %599, %600 : vector<128x128xf32>
    %c0_1023 = arith.constant 0 : index
    %c0_1024 = arith.constant 0 : index
    %602 = vector.load %arg6[%c0_1023, %c0_1024] : memref<128x128xbf16, #tpu.memory_space<vmem>>, vector<128x128xbf16>
    %603 = arith.truncf %601 : vector<128x128xf32> to vector<128x128xbf16>
    %cst_1025 = arith.constant dense<0.000000e+00> : vector<128x128xf32>
    %604 = tpu.matmul %602, %603, %cst_1025 {dimension_numbers = #tpu.dot_dimension_numbers<[1], [0], [0], [1], [0, 0, 1, 1], [], []>} : vector<128x128xbf16>, vector<128x128xbf16>, vector<128x128xf32> -> vector<128x128xf32>
    %605 = vector.extract_strided_slice %604 {offsets = [0, 0], sizes = [4, 8], strides = [1, 1]} : vector<128x128xf32> to vector<4x8xf32>
    %c0_1026 = arith.constant 0 : index
    %c1_1027 = arith.constant 1 : index
    %c5_1028 = arith.constant 5 : index
    %c0_1029 = arith.constant 0 : index
    %606 = vector.load %arg11[%c0_1026, %c1_1027, %c5_1028, %c0_1029] : memref<2x10x10x8xf32, #tpu.memory_space<vmem>>, vector<1x1x4x8xf32>
    %607 = vector.shape_cast %606 : vector<1x1x4x8xf32> to vector<4x8xf32>
    %608 = vector.shape_cast %605 : vector<4x8xf32> to vector<1x1x4x8xf32>
    tpu.vector_store %arg11[%c0_1026, %c1_1027, %c5_1028, %c0_1029], %608 {strides = array<i32>} : memref<2x10x10x8xf32, #tpu.memory_space<vmem>>, vector<1x1x4x8xf32>,
    %609 = vector.extract_strided_slice %604 {offsets = [4, 0], sizes = [4, 8], strides = [1, 1]} : vector<128x128xf32> to vector<4x8xf32>
    %c0_1030 = arith.constant 0 : index
    %c1_1031 = arith.constant 1 : index
    %c1_1032 = arith.constant 1 : index
    %c0_1033 = arith.constant 0 : index
    %610 = vector.load %arg11[%c0_1030, %c1_1031, %c1_1032, %c0_1033] : memref<2x10x10x8xf32, #tpu.memory_space<vmem>>, vector<1x1x4x8xf32>
    %611 = vector.shape_cast %610 : vector<1x1x4x8xf32> to vector<4x8xf32>
    %612 = vector.shape_cast %609 : vector<4x8xf32> to vector<1x1x4x8xf32>
    tpu.vector_store %arg11[%c0_1030, %c1_1031, %c1_1032, %c0_1033], %612 {strides = array<i32>} : memref<2x10x10x8xf32, #tpu.memory_space<vmem>>, vector<1x1x4x8xf32>,
    %613 = vector.extract_strided_slice %604 {offsets = [8, 0], sizes = [4, 8], strides = [1, 1]} : vector<128x128xf32> to vector<4x8xf32>
    %c0_1034 = arith.constant 0 : index
    %c2_1035 = arith.constant 2 : index
    %c5_1036 = arith.constant 5 : index
    %c0_1037 = arith.constant 0 : index
    %614 = vector.load %arg11[%c0_1034, %c2_1035, %c5_1036, %c0_1037] : memref<2x10x10x8xf32, #tpu.memory_space<vmem>>, vector<1x1x4x8xf32>
    %615 = vector.shape_cast %614 : vector<1x1x4x8xf32> to vector<4x8xf32>
    %616 = vector.shape_cast %613 : vector<4x8xf32> to vector<1x1x4x8xf32>
    tpu.vector_store %arg11[%c0_1034, %c2_1035, %c5_1036, %c0_1037], %616 {strides = array<i32>} : memref<2x10x10x8xf32, #tpu.memory_space<vmem>>, vector<1x1x4x8xf32>,
    %617 = vector.extract_strided_slice %604 {offsets = [12, 0], sizes = [4, 8], strides = [1, 1]} : vector<128x128xf32> to vector<4x8xf32>
    %c0_1038 = arith.constant 0 : index
    %c2_1039 = arith.constant 2 : index
    %c1_1040 = arith.constant 1 : index
    %c0_1041 = arith.constant 0 : index
    %618 = vector.load %arg11[%c0_1038, %c2_1039, %c1_1040, %c0_1041] : memref<2x10x10x8xf32, #tpu.memory_space<vmem>>, vector<1x1x4x8xf32>
    %619 = vector.shape_cast %618 : vector<1x1x4x8xf32> to vector<4x8xf32>
    %620 = vector.shape_cast %617 : vector<4x8xf32> to vector<1x1x4x8xf32>
    tpu.vector_store %arg11[%c0_1038, %c2_1039, %c1_1040, %c0_1041], %620 {strides = array<i32>} : memref<2x10x10x8xf32, #tpu.memory_space<vmem>>, vector<1x1x4x8xf32>,
    %621 = vector.extract_strided_slice %604 {offsets = [16, 0], sizes = [4, 8], strides = [1, 1]} : vector<128x128xf32> to vector<4x8xf32>
    %c0_1042 = arith.constant 0 : index
    %c3_1043 = arith.constant 3 : index
    %c5_1044 = arith.constant 5 : index
    %c0_1045 = arith.constant 0 : index
    %622 = vector.load %arg11[%c0_1042, %c3_1043, %c5_1044, %c0_1045] : memref<2x10x10x8xf32, #tpu.memory_space<vmem>>, vector<1x1x4x8xf32>
    %623 = vector.shape_cast %622 : vector<1x1x4x8xf32> to vector<4x8xf32>
    %624 = vector.shape_cast %621 : vector<4x8xf32> to vector<1x1x4x8xf32>
    tpu.vector_store %arg11[%c0_1042, %c3_1043, %c5_1044, %c0_1045], %624 {strides = array<i32>} : memref<2x10x10x8xf32, #tpu.memory_space<vmem>>, vector<1x1x4x8xf32>,
    %625 = vector.extract_strided_slice %604 {offsets = [20, 0], sizes = [4, 8], strides = [1, 1]} : vector<128x128xf32> to vector<4x8xf32>
    %c0_1046 = arith.constant 0 : index
    %c3_1047 = arith.constant 3 : index
    %c1_1048 = arith.constant 1 : index
    %c0_1049 = arith.constant 0 : index
    %626 = vector.load %arg11[%c0_1046, %c3_1047, %c1_1048, %c0_1049] : memref<2x10x10x8xf32, #tpu.memory_space<vmem>>, vector<1x1x4x8xf32>
    %627 = vector.shape_cast %626 : vector<1x1x4x8xf32> to vector<4x8xf32>
    %628 = vector.shape_cast %625 : vector<4x8xf32> to vector<1x1x4x8xf32>
    tpu.vector_store %arg11[%c0_1046, %c3_1047, %c1_1048, %c0_1049], %628 {strides = array<i32>} : memref<2x10x10x8xf32, #tpu.memory_space<vmem>>, vector<1x1x4x8xf32>,
    %629 = vector.extract_strided_slice %604 {offsets = [24, 0], sizes = [4, 8], strides = [1, 1]} : vector<128x128xf32> to vector<4x8xf32>
    %c0_1050 = arith.constant 0 : index
    %c4_1051 = arith.constant 4 : index
    %c5_1052 = arith.constant 5 : index
    %c0_1053 = arith.constant 0 : index
    %630 = vector.load %arg11[%c0_1050, %c4_1051, %c5_1052, %c0_1053] : memref<2x10x10x8xf32, #tpu.memory_space<vmem>>, vector<1x1x4x8xf32>
    %631 = vector.shape_cast %630 : vector<1x1x4x8xf32> to vector<4x8xf32>
    %632 = vector.shape_cast %629 : vector<4x8xf32> to vector<1x1x4x8xf32>
    tpu.vector_store %arg11[%c0_1050, %c4_1051, %c5_1052, %c0_1053], %632 {strides = array<i32>} : memref<2x10x10x8xf32, #tpu.memory_space<vmem>>, vector<1x1x4x8xf32>,
    %633 = vector.extract_strided_slice %604 {offsets = [28, 0], sizes = [4, 8], strides = [1, 1]} : vector<128x128xf32> to vector<4x8xf32>
    %c0_1054 = arith.constant 0 : index
    %c4_1055 = arith.constant 4 : index
    %c1_1056 = arith.constant 1 : index
    %c0_1057 = arith.constant 0 : index
    %634 = vector.load %arg11[%c0_1054, %c4_1055, %c1_1056, %c0_1057] : memref<2x10x10x8xf32, #tpu.memory_space<vmem>>, vector<1x1x4x8xf32>
    %635 = vector.shape_cast %634 : vector<1x1x4x8xf32> to vector<4x8xf32>
    %636 = vector.shape_cast %633 : vector<4x8xf32> to vector<1x1x4x8xf32>
    tpu.vector_store %arg11[%c0_1054, %c4_1055, %c1_1056, %c0_1057], %636 {strides = array<i32>} : memref<2x10x10x8xf32, #tpu.memory_space<vmem>>, vector<1x1x4x8xf32>,
    %637 = vector.extract_strided_slice %604 {offsets = [32, 0], sizes = [4, 8], strides = [1, 1]} : vector<128x128xf32> to vector<4x8xf32>
    %c0_1058 = arith.constant 0 : index
    %c5_1059 = arith.constant 5 : index
    %c5_1060 = arith.constant 5 : index
    %c0_1061 = arith.constant 0 : index
    %638 = vector.load %arg11[%c0_1058, %c5_1059, %c5_1060, %c0_1061] : memref<2x10x10x8xf32, #tpu.memory_space<vmem>>, vector<1x1x4x8xf32>
    %639 = vector.shape_cast %638 : vector<1x1x4x8xf32> to vector<4x8xf32>
    %640 = vector.shape_cast %637 : vector<4x8xf32> to vector<1x1x4x8xf32>
    tpu.vector_store %arg11[%c0_1058, %c5_1059, %c5_1060, %c0_1061], %640 {strides = array<i32>} : memref<2x10x10x8xf32, #tpu.memory_space<vmem>>, vector<1x1x4x8xf32>,
    %641 = vector.extract_strided_slice %604 {offsets = [36, 0], sizes = [4, 8], strides = [1, 1]} : vector<128x128xf32> to vector<4x8xf32>
    %c0_1062 = arith.constant 0 : index
    %c5_1063 = arith.constant 5 : index
    %c1_1064 = arith.constant 1 : index
    %c0_1065 = arith.constant 0 : index
    %642 = vector.load %arg11[%c0_1062, %c5_1063, %c1_1064, %c0_1065] : memref<2x10x10x8xf32, #tpu.memory_space<vmem>>, vector<1x1x4x8xf32>
    %643 = vector.shape_cast %642 : vector<1x1x4x8xf32> to vector<4x8xf32>
    %644 = vector.shape_cast %641 : vector<4x8xf32> to vector<1x1x4x8xf32>
    tpu.vector_store %arg11[%c0_1062, %c5_1063, %c1_1064, %c0_1065], %644 {strides = array<i32>} : memref<2x10x10x8xf32, #tpu.memory_space<vmem>>, vector<1x1x4x8xf32>,
    %645 = vector.extract_strided_slice %604 {offsets = [40, 0], sizes = [4, 8], strides = [1, 1]} : vector<128x128xf32> to vector<4x8xf32>
    %c0_1066 = arith.constant 0 : index
    %c6_1067 = arith.constant 6 : index
    %c5_1068 = arith.constant 5 : index
    %c0_1069 = arith.constant 0 : index
    %646 = vector.load %arg11[%c0_1066, %c6_1067, %c5_1068, %c0_1069] : memref<2x10x10x8xf32, #tpu.memory_space<vmem>>, vector<1x1x4x8xf32>
    %647 = vector.shape_cast %646 : vector<1x1x4x8xf32> to vector<4x8xf32>
    %648 = vector.shape_cast %645 : vector<4x8xf32> to vector<1x1x4x8xf32>
    tpu.vector_store %arg11[%c0_1066, %c6_1067, %c5_1068, %c0_1069], %648 {strides = array<i32>} : memref<2x10x10x8xf32, #tpu.memory_space<vmem>>, vector<1x1x4x8xf32>,
    %649 = vector.extract_strided_slice %604 {offsets = [44, 0], sizes = [4, 8], strides = [1, 1]} : vector<128x128xf32> to vector<4x8xf32>
    %c0_1070 = arith.constant 0 : index
    %c6_1071 = arith.constant 6 : index
    %c1_1072 = arith.constant 1 : index
    %c0_1073 = arith.constant 0 : index
    %650 = vector.load %arg11[%c0_1070, %c6_1071, %c1_1072, %c0_1073] : memref<2x10x10x8xf32, #tpu.memory_space<vmem>>, vector<1x1x4x8xf32>
    %651 = vector.shape_cast %650 : vector<1x1x4x8xf32> to vector<4x8xf32>
    %652 = vector.shape_cast %649 : vector<4x8xf32> to vector<1x1x4x8xf32>
    tpu.vector_store %arg11[%c0_1070, %c6_1071, %c1_1072, %c0_1073], %652 {strides = array<i32>} : memref<2x10x10x8xf32, #tpu.memory_space<vmem>>, vector<1x1x4x8xf32>,
    %653 = vector.extract_strided_slice %604 {offsets = [48, 0], sizes = [4, 8], strides = [1, 1]} : vector<128x128xf32> to vector<4x8xf32>
    %c0_1074 = arith.constant 0 : index
    %c7_1075 = arith.constant 7 : index
    %c5_1076 = arith.constant 5 : index
    %c0_1077 = arith.constant 0 : index
    %654 = vector.load %arg11[%c0_1074, %c7_1075, %c5_1076, %c0_1077] : memref<2x10x10x8xf32, #tpu.memory_space<vmem>>, vector<1x1x4x8xf32>
    %655 = vector.shape_cast %654 : vector<1x1x4x8xf32> to vector<4x8xf32>
    %656 = vector.shape_cast %653 : vector<4x8xf32> to vector<1x1x4x8xf32>
    tpu.vector_store %arg11[%c0_1074, %c7_1075, %c5_1076, %c0_1077], %656 {strides = array<i32>} : memref<2x10x10x8xf32, #tpu.memory_space<vmem>>, vector<1x1x4x8xf32>,
    %657 = vector.extract_strided_slice %604 {offsets = [52, 0], sizes = [4, 8], strides = [1, 1]} : vector<128x128xf32> to vector<4x8xf32>
    %c0_1078 = arith.constant 0 : index
    %c7_1079 = arith.constant 7 : index
    %c1_1080 = arith.constant 1 : index
    %c0_1081 = arith.constant 0 : index
    %658 = vector.load %arg11[%c0_1078, %c7_1079, %c1_1080, %c0_1081] : memref<2x10x10x8xf32, #tpu.memory_space<vmem>>, vector<1x1x4x8xf32>
    %659 = vector.shape_cast %658 : vector<1x1x4x8xf32> to vector<4x8xf32>
    %660 = vector.shape_cast %657 : vector<4x8xf32> to vector<1x1x4x8xf32>
    tpu.vector_store %arg11[%c0_1078, %c7_1079, %c1_1080, %c0_1081], %660 {strides = array<i32>} : memref<2x10x10x8xf32, #tpu.memory_space<vmem>>, vector<1x1x4x8xf32>,
    %661 = vector.extract_strided_slice %604 {offsets = [56, 0], sizes = [4, 8], strides = [1, 1]} : vector<128x128xf32> to vector<4x8xf32>
    %c0_1082 = arith.constant 0 : index
    %c8_1083 = arith.constant 8 : index
    %c5_1084 = arith.constant 5 : index
    %c0_1085 = arith.constant 0 : index
    %662 = vector.load %arg11[%c0_1082, %c8_1083, %c5_1084, %c0_1085] : memref<2x10x10x8xf32, #tpu.memory_space<vmem>>, vector<1x1x4x8xf32>
    %663 = vector.shape_cast %662 : vector<1x1x4x8xf32> to vector<4x8xf32>
    %664 = vector.shape_cast %661 : vector<4x8xf32> to vector<1x1x4x8xf32>
    tpu.vector_store %arg11[%c0_1082, %c8_1083, %c5_1084, %c0_1085], %664 {strides = array<i32>} : memref<2x10x10x8xf32, #tpu.memory_space<vmem>>, vector<1x1x4x8xf32>,
    %665 = vector.extract_strided_slice %604 {offsets = [60, 0], sizes = [4, 8], strides = [1, 1]} : vector<128x128xf32> to vector<4x8xf32>
    %c0_1086 = arith.constant 0 : index
    %c8_1087 = arith.constant 8 : index
    %c1_1088 = arith.constant 1 : index
    %c0_1089 = arith.constant 0 : index
    %666 = vector.load %arg11[%c0_1086, %c8_1087, %c1_1088, %c0_1089] : memref<2x10x10x8xf32, #tpu.memory_space<vmem>>, vector<1x1x4x8xf32>
    %667 = vector.shape_cast %666 : vector<1x1x4x8xf32> to vector<4x8xf32>
    %668 = vector.shape_cast %665 : vector<4x8xf32> to vector<1x1x4x8xf32>
    tpu.vector_store %arg11[%c0_1086, %c8_1087, %c1_1088, %c0_1089], %668 {strides = array<i32>} : memref<2x10x10x8xf32, #tpu.memory_space<vmem>>, vector<1x1x4x8xf32>,
    %669 = vector.extract_strided_slice %604 {offsets = [64, 0], sizes = [4, 8], strides = [1, 1]} : vector<128x128xf32> to vector<4x8xf32>
    %c1_1090 = arith.constant 1 : index
    %c1_1091 = arith.constant 1 : index
    %c5_1092 = arith.constant 5 : index
    %c0_1093 = arith.constant 0 : index
    %670 = vector.load %arg11[%c1_1090, %c1_1091, %c5_1092, %c0_1093] : memref<2x10x10x8xf32, #tpu.memory_space<vmem>>, vector<1x1x4x8xf32>
    %671 = vector.shape_cast %670 : vector<1x1x4x8xf32> to vector<4x8xf32>
    %672 = vector.shape_cast %669 : vector<4x8xf32> to vector<1x1x4x8xf32>
    tpu.vector_store %arg11[%c1_1090, %c1_1091, %c5_1092, %c0_1093], %672 {strides = array<i32>} : memref<2x10x10x8xf32, #tpu.memory_space<vmem>>, vector<1x1x4x8xf32>,
    %673 = vector.extract_strided_slice %604 {offsets = [68, 0], sizes = [4, 8], strides = [1, 1]} : vector<128x128xf32> to vector<4x8xf32>
    %c1_1094 = arith.constant 1 : index
    %c1_1095 = arith.constant 1 : index
    %c1_1096 = arith.constant 1 : index
    %c0_1097 = arith.constant 0 : index
    %674 = vector.load %arg11[%c1_1094, %c1_1095, %c1_1096, %c0_1097] : memref<2x10x10x8xf32, #tpu.memory_space<vmem>>, vector<1x1x4x8xf32>
    %675 = vector.shape_cast %674 : vector<1x1x4x8xf32> to vector<4x8xf32>
    %676 = vector.shape_cast %673 : vector<4x8xf32> to vector<1x1x4x8xf32>
    tpu.vector_store %arg11[%c1_1094, %c1_1095, %c1_1096, %c0_1097], %676 {strides = array<i32>} : memref<2x10x10x8xf32, #tpu.memory_space<vmem>>, vector<1x1x4x8xf32>,
    %677 = vector.extract_strided_slice %604 {offsets = [72, 0], sizes = [4, 8], strides = [1, 1]} : vector<128x128xf32> to vector<4x8xf32>
    %c1_1098 = arith.constant 1 : index
    %c2_1099 = arith.constant 2 : index
    %c5_1100 = arith.constant 5 : index
    %c0_1101 = arith.constant 0 : index
    %678 = vector.load %arg11[%c1_1098, %c2_1099, %c5_1100, %c0_1101] : memref<2x10x10x8xf32, #tpu.memory_space<vmem>>, vector<1x1x4x8xf32>
    %679 = vector.shape_cast %678 : vector<1x1x4x8xf32> to vector<4x8xf32>
    %680 = vector.shape_cast %677 : vector<4x8xf32> to vector<1x1x4x8xf32>
    tpu.vector_store %arg11[%c1_1098, %c2_1099, %c5_1100, %c0_1101], %680 {strides = array<i32>} : memref<2x10x10x8xf32, #tpu.memory_space<vmem>>, vector<1x1x4x8xf32>,
    %681 = vector.extract_strided_slice %604 {offsets = [76, 0], sizes = [4, 8], strides = [1, 1]} : vector<128x128xf32> to vector<4x8xf32>
    %c1_1102 = arith.constant 1 : index
    %c2_1103 = arith.constant 2 : index
    %c1_1104 = arith.constant 1 : index
    %c0_1105 = arith.constant 0 : index
    %682 = vector.load %arg11[%c1_1102, %c2_1103, %c1_1104, %c0_1105] : memref<2x10x10x8xf32, #tpu.memory_space<vmem>>, vector<1x1x4x8xf32>
    %683 = vector.shape_cast %682 : vector<1x1x4x8xf32> to vector<4x8xf32>
    %684 = vector.shape_cast %681 : vector<4x8xf32> to vector<1x1x4x8xf32>
    tpu.vector_store %arg11[%c1_1102, %c2_1103, %c1_1104, %c0_1105], %684 {strides = array<i32>} : memref<2x10x10x8xf32, #tpu.memory_space<vmem>>, vector<1x1x4x8xf32>,
    %685 = vector.extract_strided_slice %604 {offsets = [80, 0], sizes = [4, 8], strides = [1, 1]} : vector<128x128xf32> to vector<4x8xf32>
    %c1_1106 = arith.constant 1 : index
    %c3_1107 = arith.constant 3 : index
    %c5_1108 = arith.constant 5 : index
    %c0_1109 = arith.constant 0 : index
    %686 = vector.load %arg11[%c1_1106, %c3_1107, %c5_1108, %c0_1109] : memref<2x10x10x8xf32, #tpu.memory_space<vmem>>, vector<1x1x4x8xf32>
    %687 = vector.shape_cast %686 : vector<1x1x4x8xf32> to vector<4x8xf32>
    %688 = vector.shape_cast %685 : vector<4x8xf32> to vector<1x1x4x8xf32>
    tpu.vector_store %arg11[%c1_1106, %c3_1107, %c5_1108, %c0_1109], %688 {strides = array<i32>} : memref<2x10x10x8xf32, #tpu.memory_space<vmem>>, vector<1x1x4x8xf32>,
    %689 = vector.extract_strided_slice %604 {offsets = [84, 0], sizes = [4, 8], strides = [1, 1]} : vector<128x128xf32> to vector<4x8xf32>
    %c1_1110 = arith.constant 1 : index
    %c3_1111 = arith.constant 3 : index
    %c1_1112 = arith.constant 1 : index
    %c0_1113 = arith.constant 0 : index
    %690 = vector.load %arg11[%c1_1110, %c3_1111, %c1_1112, %c0_1113] : memref<2x10x10x8xf32, #tpu.memory_space<vmem>>, vector<1x1x4x8xf32>
    %691 = vector.shape_cast %690 : vector<1x1x4x8xf32> to vector<4x8xf32>
    %692 = vector.shape_cast %689 : vector<4x8xf32> to vector<1x1x4x8xf32>
    tpu.vector_store %arg11[%c1_1110, %c3_1111, %c1_1112, %c0_1113], %692 {strides = array<i32>} : memref<2x10x10x8xf32, #tpu.memory_space<vmem>>, vector<1x1x4x8xf32>,
    %693 = vector.extract_strided_slice %604 {offsets = [88, 0], sizes = [4, 8], strides = [1, 1]} : vector<128x128xf32> to vector<4x8xf32>
    %c1_1114 = arith.constant 1 : index
    %c4_1115 = arith.constant 4 : index
    %c5_1116 = arith.constant 5 : index
    %c0_1117 = arith.constant 0 : index
    %694 = vector.load %arg11[%c1_1114, %c4_1115, %c5_1116, %c0_1117] : memref<2x10x10x8xf32, #tpu.memory_space<vmem>>, vector<1x1x4x8xf32>
    %695 = vector.shape_cast %694 : vector<1x1x4x8xf32> to vector<4x8xf32>
    %696 = vector.shape_cast %693 : vector<4x8xf32> to vector<1x1x4x8xf32>
    tpu.vector_store %arg11[%c1_1114, %c4_1115, %c5_1116, %c0_1117], %696 {strides = array<i32>} : memref<2x10x10x8xf32, #tpu.memory_space<vmem>>, vector<1x1x4x8xf32>,
    %697 = vector.extract_strided_slice %604 {offsets = [92, 0], sizes = [4, 8], strides = [1, 1]} : vector<128x128xf32> to vector<4x8xf32>
    %c1_1118 = arith.constant 1 : index
    %c4_1119 = arith.constant 4 : index
    %c1_1120 = arith.constant 1 : index
    %c0_1121 = arith.constant 0 : index
    %698 = vector.load %arg11[%c1_1118, %c4_1119, %c1_1120, %c0_1121] : memref<2x10x10x8xf32, #tpu.memory_space<vmem>>, vector<1x1x4x8xf32>
    %699 = vector.shape_cast %698 : vector<1x1x4x8xf32> to vector<4x8xf32>
    %700 = vector.shape_cast %697 : vector<4x8xf32> to vector<1x1x4x8xf32>
    tpu.vector_store %arg11[%c1_1118, %c4_1119, %c1_1120, %c0_1121], %700 {strides = array<i32>} : memref<2x10x10x8xf32, #tpu.memory_space<vmem>>, vector<1x1x4x8xf32>,
    %701 = vector.extract_strided_slice %604 {offsets = [96, 0], sizes = [4, 8], strides = [1, 1]} : vector<128x128xf32> to vector<4x8xf32>
    %c1_1122 = arith.constant 1 : index
    %c5_1123 = arith.constant 5 : index
    %c5_1124 = arith.constant 5 : index
    %c0_1125 = arith.constant 0 : index
    %702 = vector.load %arg11[%c1_1122, %c5_1123, %c5_1124, %c0_1125] : memref<2x10x10x8xf32, #tpu.memory_space<vmem>>, vector<1x1x4x8xf32>
    %703 = vector.shape_cast %702 : vector<1x1x4x8xf32> to vector<4x8xf32>
    %704 = vector.shape_cast %701 : vector<4x8xf32> to vector<1x1x4x8xf32>
    tpu.vector_store %arg11[%c1_1122, %c5_1123, %c5_1124, %c0_1125], %704 {strides = array<i32>} : memref<2x10x10x8xf32, #tpu.memory_space<vmem>>, vector<1x1x4x8xf32>,
    %705 = vector.extract_strided_slice %604 {offsets = [100, 0], sizes = [4, 8], strides = [1, 1]} : vector<128x128xf32> to vector<4x8xf32>
    %c1_1126 = arith.constant 1 : index
    %c5_1127 = arith.constant 5 : index
    %c1_1128 = arith.constant 1 : index
    %c0_1129 = arith.constant 0 : index
    %706 = vector.load %arg11[%c1_1126, %c5_1127, %c1_1128, %c0_1129] : memref<2x10x10x8xf32, #tpu.memory_space<vmem>>, vector<1x1x4x8xf32>
    %707 = vector.shape_cast %706 : vector<1x1x4x8xf32> to vector<4x8xf32>
    %708 = vector.shape_cast %705 : vector<4x8xf32> to vector<1x1x4x8xf32>
    tpu.vector_store %arg11[%c1_1126, %c5_1127, %c1_1128, %c0_1129], %708 {strides = array<i32>} : memref<2x10x10x8xf32, #tpu.memory_space<vmem>>, vector<1x1x4x8xf32>,
    %709 = vector.extract_strided_slice %604 {offsets = [104, 0], sizes = [4, 8], strides = [1, 1]} : vector<128x128xf32> to vector<4x8xf32>
    %c1_1130 = arith.constant 1 : index
    %c6_1131 = arith.constant 6 : index
    %c5_1132 = arith.constant 5 : index
    %c0_1133 = arith.constant 0 : index
    %710 = vector.load %arg11[%c1_1130, %c6_1131, %c5_1132, %c0_1133] : memref<2x10x10x8xf32, #tpu.memory_space<vmem>>, vector<1x1x4x8xf32>
    %711 = vector.shape_cast %710 : vector<1x1x4x8xf32> to vector<4x8xf32>
    %712 = vector.shape_cast %709 : vector<4x8xf32> to vector<1x1x4x8xf32>
    tpu.vector_store %arg11[%c1_1130, %c6_1131, %c5_1132, %c0_1133], %712 {strides = array<i32>} : memref<2x10x10x8xf32, #tpu.memory_space<vmem>>, vector<1x1x4x8xf32>,
    %713 = vector.extract_strided_slice %604 {offsets = [108, 0], sizes = [4, 8], strides = [1, 1]} : vector<128x128xf32> to vector<4x8xf32>
    %c1_1134 = arith.constant 1 : index
    %c6_1135 = arith.constant 6 : index
    %c1_1136 = arith.constant 1 : index
    %c0_1137 = arith.constant 0 : index
    %714 = vector.load %arg11[%c1_1134, %c6_1135, %c1_1136, %c0_1137] : memref<2x10x10x8xf32, #tpu.memory_space<vmem>>, vector<1x1x4x8xf32>
    %715 = vector.shape_cast %714 : vector<1x1x4x8xf32> to vector<4x8xf32>
    %716 = vector.shape_cast %713 : vector<4x8xf32> to vector<1x1x4x8xf32>
    tpu.vector_store %arg11[%c1_1134, %c6_1135, %c1_1136, %c0_1137], %716 {strides = array<i32>} : memref<2x10x10x8xf32, #tpu.memory_space<vmem>>, vector<1x1x4x8xf32>,
    %717 = vector.extract_strided_slice %604 {offsets = [112, 0], sizes = [4, 8], strides = [1, 1]} : vector<128x128xf32> to vector<4x8xf32>
    %c1_1138 = arith.constant 1 : index
    %c7_1139 = arith.constant 7 : index
    %c5_1140 = arith.constant 5 : index
    %c0_1141 = arith.constant 0 : index
    %718 = vector.load %arg11[%c1_1138, %c7_1139, %c5_1140, %c0_1141] : memref<2x10x10x8xf32, #tpu.memory_space<vmem>>, vector<1x1x4x8xf32>
    %719 = vector.shape_cast %718 : vector<1x1x4x8xf32> to vector<4x8xf32>
    %720 = vector.shape_cast %717 : vector<4x8xf32> to vector<1x1x4x8xf32>
    tpu.vector_store %arg11[%c1_1138, %c7_1139, %c5_1140, %c0_1141], %720 {strides = array<i32>} : memref<2x10x10x8xf32, #tpu.memory_space<vmem>>, vector<1x1x4x8xf32>,
    %721 = vector.extract_strided_slice %604 {offsets = [116, 0], sizes = [4, 8], strides = [1, 1]} : vector<128x128xf32> to vector<4x8xf32>
    %c1_1142 = arith.constant 1 : index
    %c7_1143 = arith.constant 7 : index
    %c1_1144 = arith.constant 1 : index
    %c0_1145 = arith.constant 0 : index
    %722 = vector.load %arg11[%c1_1142, %c7_1143, %c1_1144, %c0_1145] : memref<2x10x10x8xf32, #tpu.memory_space<vmem>>, vector<1x1x4x8xf32>
    %723 = vector.shape_cast %722 : vector<1x1x4x8xf32> to vector<4x8xf32>
    %724 = vector.shape_cast %721 : vector<4x8xf32> to vector<1x1x4x8xf32>
    tpu.vector_store %arg11[%c1_1142, %c7_1143, %c1_1144, %c0_1145], %724 {strides = array<i32>} : memref<2x10x10x8xf32, #tpu.memory_space<vmem>>, vector<1x1x4x8xf32>,
    %725 = vector.extract_strided_slice %604 {offsets = [120, 0], sizes = [4, 8], strides = [1, 1]} : vector<128x128xf32> to vector<4x8xf32>
    %c1_1146 = arith.constant 1 : index
    %c8_1147 = arith.constant 8 : index
    %c5_1148 = arith.constant 5 : index
    %c0_1149 = arith.constant 0 : index
    %726 = vector.load %arg11[%c1_1146, %c8_1147, %c5_1148, %c0_1149] : memref<2x10x10x8xf32, #tpu.memory_space<vmem>>, vector<1x1x4x8xf32>
    %727 = vector.shape_cast %726 : vector<1x1x4x8xf32> to vector<4x8xf32>
    %728 = vector.shape_cast %725 : vector<4x8xf32> to vector<1x1x4x8xf32>
    tpu.vector_store %arg11[%c1_1146, %c8_1147, %c5_1148, %c0_1149], %728 {strides = array<i32>} : memref<2x10x10x8xf32, #tpu.memory_space<vmem>>, vector<1x1x4x8xf32>,
    %729 = vector.extract_strided_slice %604 {offsets = [124, 0], sizes = [4, 8], strides = [1, 1]} : vector<128x128xf32> to vector<4x8xf32>
    %c1_1150 = arith.constant 1 : index
    %c8_1151 = arith.constant 8 : index
    %c1_1152 = arith.constant 1 : index
    %c0_1153 = arith.constant 0 : index
    %730 = vector.load %arg11[%c1_1150, %c8_1151, %c1_1152, %c0_1153] : memref<2x10x10x8xf32, #tpu.memory_space<vmem>>, vector<1x1x4x8xf32>
    %731 = vector.shape_cast %730 : vector<1x1x4x8xf32> to vector<4x8xf32>
    %732 = vector.shape_cast %729 : vector<4x8xf32> to vector<1x1x4x8xf32>
    tpu.vector_store %arg11[%c1_1150, %c8_1151, %c1_1152, %c0_1153], %732 {strides = array<i32>} : memref<2x10x10x8xf32, #tpu.memory_space<vmem>>, vector<1x1x4x8xf32>,
    %c0_1154 = arith.constant 0 : index
    %c0_1155 = arith.constant 0 : index
    %c0_1156 = arith.constant 0 : index
    %c0_1157 = arith.constant 0 : index
    %733 = vector.load %arg11[%c0_1154, %c0_1155, %c0_1156, %c0_1157] : memref<2x10x10x8xf32, #tpu.memory_space<vmem>>, vector<1x1x4x8xf32>
    %734 = vector.shape_cast %733 : vector<1x1x4x8xf32> to vector<4x8xf32>
    %c0_1158 = arith.constant 0 : index
    %c0_1159 = arith.constant 0 : index
    %735 = vector.load %arg14[%c0_1158, %c0_1159] : memref<128x128xf32, #tpu.memory_space<vmem>>, vector<4x8xf32>
    tpu.vector_store %arg14[%c0_1158, %c0_1159], %734 {strides = array<i32>} : memref<128x128xf32, #tpu.memory_space<vmem>>, vector<4x8xf32>,
    %c0_1160 = arith.constant 0 : index
    %c0_1161 = arith.constant 0 : index
    %c5_1162 = arith.constant 5 : index
    %c0_1163 = arith.constant 0 : index
    %736 = vector.load %arg11[%c0_1160, %c0_1161, %c5_1162, %c0_1163] : memref<2x10x10x8xf32, #tpu.memory_space<vmem>>, vector<1x1x4x8xf32>
    %737 = vector.shape_cast %736 : vector<1x1x4x8xf32> to vector<4x8xf32>
    %c0_1164 = arith.constant 0 : index
    %c8_1165 = arith.constant 8 : index
    %738 = vector.load %arg14[%c0_1164, %c8_1165] : memref<128x128xf32, #tpu.memory_space<vmem>>, vector<4x8xf32>
    tpu.vector_store %arg14[%c0_1164, %c8_1165], %737 {strides = array<i32>} : memref<128x128xf32, #tpu.memory_space<vmem>>, vector<4x8xf32>,
    %c0_1166 = arith.constant 0 : index
    %c0_1167 = arith.constant 0 : index
    %c1_1168 = arith.constant 1 : index
    %c0_1169 = arith.constant 0 : index
    %739 = vector.load %arg11[%c0_1166, %c0_1167, %c1_1168, %c0_1169] : memref<2x10x10x8xf32, #tpu.memory_space<vmem>>, vector<1x1x4x8xf32>
    %740 = vector.shape_cast %739 : vector<1x1x4x8xf32> to vector<4x8xf32>
    %c0_1170 = arith.constant 0 : index
    %c16_1171 = arith.constant 16 : index
    %741 = vector.load %arg14[%c0_1170, %c16_1171] : memref<128x128xf32, #tpu.memory_space<vmem>>, vector<4x8xf32>
    tpu.vector_store %arg14[%c0_1170, %c16_1171], %740 {strides = array<i32>} : memref<128x128xf32, #tpu.memory_space<vmem>>, vector<4x8xf32>,
    %c0_1172 = arith.constant 0 : index
    %c1_1173 = arith.constant 1 : index
    %c0_1174 = arith.constant 0 : index
    %c0_1175 = arith.constant 0 : index
    %742 = vector.load %arg11[%c0_1172, %c1_1173, %c0_1174, %c0_1175] : memref<2x10x10x8xf32, #tpu.memory_space<vmem>>, vector<1x1x4x8xf32>
    %743 = vector.shape_cast %742 : vector<1x1x4x8xf32> to vector<4x8xf32>
    %c0_1176 = arith.constant 0 : index
    %c24_1177 = arith.constant 24 : index
    %744 = vector.load %arg14[%c0_1176, %c24_1177] : memref<128x128xf32, #tpu.memory_space<vmem>>, vector<4x8xf32>
    tpu.vector_store %arg14[%c0_1176, %c24_1177], %743 {strides = array<i32>} : memref<128x128xf32, #tpu.memory_space<vmem>>, vector<4x8xf32>,
    %c0_1178 = arith.constant 0 : index
    %c1_1179 = arith.constant 1 : index
    %c5_1180 = arith.constant 5 : index
    %c0_1181 = arith.constant 0 : index
    %745 = vector.load %arg11[%c0_1178, %c1_1179, %c5_1180, %c0_1181] : memref<2x10x10x8xf32, #tpu.memory_space<vmem>>, vector<1x1x4x8xf32>
    %746 = vector.shape_cast %745 : vector<1x1x4x8xf32> to vector<4x8xf32>
    %c0_1182 = arith.constant 0 : index
    %c32_1183 = arith.constant 32 : index
    %747 = vector.load %arg14[%c0_1182, %c32_1183] : memref<128x128xf32, #tpu.memory_space<vmem>>, vector<4x8xf32>
    tpu.vector_store %arg14[%c0_1182, %c32_1183], %746 {strides = array<i32>} : memref<128x128xf32, #tpu.memory_space<vmem>>, vector<4x8xf32>,
    %c0_1184 = arith.constant 0 : index
    %c1_1185 = arith.constant 1 : index
    %c1_1186 = arith.constant 1 : index
    %c0_1187 = arith.constant 0 : index
    %748 = vector.load %arg11[%c0_1184, %c1_1185, %c1_1186, %c0_1187] : memref<2x10x10x8xf32, #tpu.memory_space<vmem>>, vector<1x1x4x8xf32>
    %749 = vector.shape_cast %748 : vector<1x1x4x8xf32> to vector<4x8xf32>
    %c0_1188 = arith.constant 0 : index
    %c40_1189 = arith.constant 40 : index
    %750 = vector.load %arg14[%c0_1188, %c40_1189] : memref<128x128xf32, #tpu.memory_space<vmem>>, vector<4x8xf32>
    tpu.vector_store %arg14[%c0_1188, %c40_1189], %749 {strides = array<i32>} : memref<128x128xf32, #tpu.memory_space<vmem>>, vector<4x8xf32>,
    %c0_1190 = arith.constant 0 : index
    %c2_1191 = arith.constant 2 : index
    %c0_1192 = arith.constant 0 : index
    %c0_1193 = arith.constant 0 : index
    %751 = vector.load %arg11[%c0_1190, %c2_1191, %c0_1192, %c0_1193] : memref<2x10x10x8xf32, #tpu.memory_space<vmem>>, vector<1x1x4x8xf32>
    %752 = vector.shape_cast %751 : vector<1x1x4x8xf32> to vector<4x8xf32>
    %c0_1194 = arith.constant 0 : index
    %c48_1195 = arith.constant 48 : index
    %753 = vector.load %arg14[%c0_1194, %c48_1195] : memref<128x128xf32, #tpu.memory_space<vmem>>, vector<4x8xf32>
    tpu.vector_store %arg14[%c0_1194, %c48_1195], %752 {strides = array<i32>} : memref<128x128xf32, #tpu.memory_space<vmem>>, vector<4x8xf32>,
    %c0_1196 = arith.constant 0 : index
    %c2_1197 = arith.constant 2 : index
    %c5_1198 = arith.constant 5 : index
    %c0_1199 = arith.constant 0 : index
    %754 = vector.load %arg11[%c0_1196, %c2_1197, %c5_1198, %c0_1199] : memref<2x10x10x8xf32, #tpu.memory_space<vmem>>, vector<1x1x4x8xf32>
    %755 = vector.shape_cast %754 : vector<1x1x4x8xf32> to vector<4x8xf32>
    %c0_1200 = arith.constant 0 : index
    %c56_1201 = arith.constant 56 : index
    %756 = vector.load %arg14[%c0_1200, %c56_1201] : memref<128x128xf32, #tpu.memory_space<vmem>>, vector<4x8xf32>
    tpu.vector_store %arg14[%c0_1200, %c56_1201], %755 {strides = array<i32>} : memref<128x128xf32, #tpu.memory_space<vmem>>, vector<4x8xf32>,
    %c0_1202 = arith.constant 0 : index
    %c2_1203 = arith.constant 2 : index
    %c1_1204 = arith.constant 1 : index
    %c0_1205 = arith.constant 0 : index
    %757 = vector.load %arg11[%c0_1202, %c2_1203, %c1_1204, %c0_1205] : memref<2x10x10x8xf32, #tpu.memory_space<vmem>>, vector<1x1x4x8xf32>
    %758 = vector.shape_cast %757 : vector<1x1x4x8xf32> to vector<4x8xf32>
    %c0_1206 = arith.constant 0 : index
    %c64_1207 = arith.constant 64 : index
    %759 = vector.load %arg14[%c0_1206, %c64_1207] : memref<128x128xf32, #tpu.memory_space<vmem>>, vector<4x8xf32>
    tpu.vector_store %arg14[%c0_1206, %c64_1207], %758 {strides = array<i32>} : memref<128x128xf32, #tpu.memory_space<vmem>>, vector<4x8xf32>,
    %c0_1208 = arith.constant 0 : index
    %c2_1209 = arith.constant 2 : index
    %c0_1210 = arith.constant 0 : index
    %c0_1211 = arith.constant 0 : index
    %760 = vector.load %arg11[%c0_1208, %c2_1209, %c0_1210, %c0_1211] : memref<2x10x10x8xf32, #tpu.memory_space<vmem>>, vector<1x1x4x8xf32>
    %761 = vector.shape_cast %760 : vector<1x1x4x8xf32> to vector<4x8xf32>
    %c4_1212 = arith.constant 4 : index
    %c0_1213 = arith.constant 0 : index
    %762 = vector.load %arg14[%c4_1212, %c0_1213] : memref<128x128xf32, #tpu.memory_space<vmem>>, vector<4x8xf32>
    tpu.vector_store %arg14[%c4_1212, %c0_1213], %761 {strides = array<i32>} : memref<128x128xf32, #tpu.memory_space<vmem>>, vector<4x8xf32>,
    %c0_1214 = arith.constant 0 : index
    %c2_1215 = arith.constant 2 : index
    %c5_1216 = arith.constant 5 : index
    %c0_1217 = arith.constant 0 : index
    %763 = vector.load %arg11[%c0_1214, %c2_1215, %c5_1216, %c0_1217] : memref<2x10x10x8xf32, #tpu.memory_space<vmem>>, vector<1x1x4x8xf32>
    %764 = vector.shape_cast %763 : vector<1x1x4x8xf32> to vector<4x8xf32>
    %c4_1218 = arith.constant 4 : index
    %c8_1219 = arith.constant 8 : index
    %765 = vector.load %arg14[%c4_1218, %c8_1219] : memref<128x128xf32, #tpu.memory_space<vmem>>, vector<4x8xf32>
    tpu.vector_store %arg14[%c4_1218, %c8_1219], %764 {strides = array<i32>} : memref<128x128xf32, #tpu.memory_space<vmem>>, vector<4x8xf32>,
    %c0_1220 = arith.constant 0 : index
    %c2_1221 = arith.constant 2 : index
    %c1_1222 = arith.constant 1 : index
    %c0_1223 = arith.constant 0 : index
    %766 = vector.load %arg11[%c0_1220, %c2_1221, %c1_1222, %c0_1223] : memref<2x10x10x8xf32, #tpu.memory_space<vmem>>, vector<1x1x4x8xf32>
    %767 = vector.shape_cast %766 : vector<1x1x4x8xf32> to vector<4x8xf32>
    %c4_1224 = arith.constant 4 : index
    %c16_1225 = arith.constant 16 : index
    %768 = vector.load %arg14[%c4_1224, %c16_1225] : memref<128x128xf32, #tpu.memory_space<vmem>>, vector<4x8xf32>
    tpu.vector_store %arg14[%c4_1224, %c16_1225], %767 {strides = array<i32>} : memref<128x128xf32, #tpu.memory_space<vmem>>, vector<4x8xf32>,
    %c0_1226 = arith.constant 0 : index
    %c3_1227 = arith.constant 3 : index
    %c0_1228 = arith.constant 0 : index
    %c0_1229 = arith.constant 0 : index
    %769 = vector.load %arg11[%c0_1226, %c3_1227, %c0_1228, %c0_1229] : memref<2x10x10x8xf32, #tpu.memory_space<vmem>>, vector<1x1x4x8xf32>
    %770 = vector.shape_cast %769 : vector<1x1x4x8xf32> to vector<4x8xf32>
    %c4_1230 = arith.constant 4 : index
    %c24_1231 = arith.constant 24 : index
    %771 = vector.load %arg14[%c4_1230, %c24_1231] : memref<128x128xf32, #tpu.memory_space<vmem>>, vector<4x8xf32>
    tpu.vector_store %arg14[%c4_1230, %c24_1231], %770 {strides = array<i32>} : memref<128x128xf32, #tpu.memory_space<vmem>>, vector<4x8xf32>,
    %c0_1232 = arith.constant 0 : index
    %c3_1233 = arith.constant 3 : index
    %c5_1234 = arith.constant 5 : index
    %c0_1235 = arith.constant 0 : index
    %772 = vector.load %arg11[%c0_1232, %c3_1233, %c5_1234, %c0_1235] : memref<2x10x10x8xf32, #tpu.memory_space<vmem>>, vector<1x1x4x8xf32>
    %773 = vector.shape_cast %772 : vector<1x1x4x8xf32> to vector<4x8xf32>
    %c4_1236 = arith.constant 4 : index
    %c32_1237 = arith.constant 32 : index
    %774 = vector.load %arg14[%c4_1236, %c32_1237] : memref<128x128xf32, #tpu.memory_space<vmem>>, vector<4x8xf32>
    tpu.vector_store %arg14[%c4_1236, %c32_1237], %773 {strides = array<i32>} : memref<128x128xf32, #tpu.memory_space<vmem>>, vector<4x8xf32>,
    %c0_1238 = arith.constant 0 : index
    %c3_1239 = arith.constant 3 : index
    %c1_1240 = arith.constant 1 : index
    %c0_1241 = arith.constant 0 : index
    %775 = vector.load %arg11[%c0_1238, %c3_1239, %c1_1240, %c0_1241] : memref<2x10x10x8xf32, #tpu.memory_space<vmem>>, vector<1x1x4x8xf32>
    %776 = vector.shape_cast %775 : vector<1x1x4x8xf32> to vector<4x8xf32>
    %c4_1242 = arith.constant 4 : index
    %c40_1243 = arith.constant 40 : index
    %777 = vector.load %arg14[%c4_1242, %c40_1243] : memref<128x128xf32, #tpu.memory_space<vmem>>, vector<4x8xf32>
    tpu.vector_store %arg14[%c4_1242, %c40_1243], %776 {strides = array<i32>} : memref<128x128xf32, #tpu.memory_space<vmem>>, vector<4x8xf32>,
    %c0_1244 = arith.constant 0 : index
    %c4_1245 = arith.constant 4 : index
    %c0_1246 = arith.constant 0 : index
    %c0_1247 = arith.constant 0 : index
    %778 = vector.load %arg11[%c0_1244, %c4_1245, %c0_1246, %c0_1247] : memref<2x10x10x8xf32, #tpu.memory_space<vmem>>, vector<1x1x4x8xf32>
    %779 = vector.shape_cast %778 : vector<1x1x4x8xf32> to vector<4x8xf32>
    %c4_1248 = arith.constant 4 : index
    %c48_1249 = arith.constant 48 : index
    %780 = vector.load %arg14[%c4_1248, %c48_1249] : memref<128x128xf32, #tpu.memory_space<vmem>>, vector<4x8xf32>
    tpu.vector_store %arg14[%c4_1248, %c48_1249], %779 {strides = array<i32>} : memref<128x128xf32, #tpu.memory_space<vmem>>, vector<4x8xf32>,
    %c0_1250 = arith.constant 0 : index
    %c4_1251 = arith.constant 4 : index
    %c5_1252 = arith.constant 5 : index
    %c0_1253 = arith.constant 0 : index
    %781 = vector.load %arg11[%c0_1250, %c4_1251, %c5_1252, %c0_1253] : memref<2x10x10x8xf32, #tpu.memory_space<vmem>>, vector<1x1x4x8xf32>
    %782 = vector.shape_cast %781 : vector<1x1x4x8xf32> to vector<4x8xf32>
    %c4_1254 = arith.constant 4 : index
    %c56_1255 = arith.constant 56 : index
    %783 = vector.load %arg14[%c4_1254, %c56_1255] : memref<128x128xf32, #tpu.memory_space<vmem>>, vector<4x8xf32>
    tpu.vector_store %arg14[%c4_1254, %c56_1255], %782 {strides = array<i32>} : memref<128x128xf32, #tpu.memory_space<vmem>>, vector<4x8xf32>,
    %c0_1256 = arith.constant 0 : index
    %c4_1257 = arith.constant 4 : index
    %c1_1258 = arith.constant 1 : index
    %c0_1259 = arith.constant 0 : index
    %784 = vector.load %arg11[%c0_1256, %c4_1257, %c1_1258, %c0_1259] : memref<2x10x10x8xf32, #tpu.memory_space<vmem>>, vector<1x1x4x8xf32>
    %785 = vector.shape_cast %784 : vector<1x1x4x8xf32> to vector<4x8xf32>
    %c4_1260 = arith.constant 4 : index
    %c64_1261 = arith.constant 64 : index
    %786 = vector.load %arg14[%c4_1260, %c64_1261] : memref<128x128xf32, #tpu.memory_space<vmem>>, vector<4x8xf32>
    tpu.vector_store %arg14[%c4_1260, %c64_1261], %785 {strides = array<i32>} : memref<128x128xf32, #tpu.memory_space<vmem>>, vector<4x8xf32>,
    %c0_1262 = arith.constant 0 : index
    %c4_1263 = arith.constant 4 : index
    %c0_1264 = arith.constant 0 : index
    %c0_1265 = arith.constant 0 : index
    %787 = vector.load %arg11[%c0_1262, %c4_1263, %c0_1264, %c0_1265] : memref<2x10x10x8xf32, #tpu.memory_space<vmem>>, vector<1x1x4x8xf32>
    %788 = vector.shape_cast %787 : vector<1x1x4x8xf32> to vector<4x8xf32>
    %c8_1266 = arith.constant 8 : index
    %c0_1267 = arith.constant 0 : index
    %789 = vector.load %arg14[%c8_1266, %c0_1267] : memref<128x128xf32, #tpu.memory_space<vmem>>, vector<4x8xf32>
    tpu.vector_store %arg14[%c8_1266, %c0_1267], %788 {strides = array<i32>} : memref<128x128xf32, #tpu.memory_space<vmem>>, vector<4x8xf32>,
    %c0_1268 = arith.constant 0 : index
    %c4_1269 = arith.constant 4 : index
    %c5_1270 = arith.constant 5 : index
    %c0_1271 = arith.constant 0 : index
    %790 = vector.load %arg11[%c0_1268, %c4_1269, %c5_1270, %c0_1271] : memref<2x10x10x8xf32, #tpu.memory_space<vmem>>, vector<1x1x4x8xf32>
    %791 = vector.shape_cast %790 : vector<1x1x4x8xf32> to vector<4x8xf32>
    %c8_1272 = arith.constant 8 : index
    %c8_1273 = arith.constant 8 : index
    %792 = vector.load %arg14[%c8_1272, %c8_1273] : memref<128x128xf32, #tpu.memory_space<vmem>>, vector<4x8xf32>
    tpu.vector_store %arg14[%c8_1272, %c8_1273], %791 {strides = array<i32>} : memref<128x128xf32, #tpu.memory_space<vmem>>, vector<4x8xf32>,
    %c0_1274 = arith.constant 0 : index
    %c4_1275 = arith.constant 4 : index
    %c1_1276 = arith.constant 1 : index
    %c0_1277 = arith.constant 0 : index
    %793 = vector.load %arg11[%c0_1274, %c4_1275, %c1_1276, %c0_1277] : memref<2x10x10x8xf32, #tpu.memory_space<vmem>>, vector<1x1x4x8xf32>
    %794 = vector.shape_cast %793 : vector<1x1x4x8xf32> to vector<4x8xf32>
    %c8_1278 = arith.constant 8 : index
    %c16_1279 = arith.constant 16 : index
    %795 = vector.load %arg14[%c8_1278, %c16_1279] : memref<128x128xf32, #tpu.memory_space<vmem>>, vector<4x8xf32>
    tpu.vector_store %arg14[%c8_1278, %c16_1279], %794 {strides = array<i32>} : memref<128x128xf32, #tpu.memory_space<vmem>>, vector<4x8xf32>,
    %c0_1280 = arith.constant 0 : index
    %c5_1281 = arith.constant 5 : index
    %c0_1282 = arith.constant 0 : index
    %c0_1283 = arith.constant 0 : index
    %796 = vector.load %arg11[%c0_1280, %c5_1281, %c0_1282, %c0_1283] : memref<2x10x10x8xf32, #tpu.memory_space<vmem>>, vector<1x1x4x8xf32>
    %797 = vector.shape_cast %796 : vector<1x1x4x8xf32> to vector<4x8xf32>
    %c8_1284 = arith.constant 8 : index
    %c24_1285 = arith.constant 24 : index
    %798 = vector.load %arg14[%c8_1284, %c24_1285] : memref<128x128xf32, #tpu.memory_space<vmem>>, vector<4x8xf32>
    tpu.vector_store %arg14[%c8_1284, %c24_1285], %797 {strides = array<i32>} : memref<128x128xf32, #tpu.memory_space<vmem>>, vector<4x8xf32>,
    %c0_1286 = arith.constant 0 : index
    %c5_1287 = arith.constant 5 : index
    %c5_1288 = arith.constant 5 : index
    %c0_1289 = arith.constant 0 : index
    %799 = vector.load %arg11[%c0_1286, %c5_1287, %c5_1288, %c0_1289] : memref<2x10x10x8xf32, #tpu.memory_space<vmem>>, vector<1x1x4x8xf32>
    %800 = vector.shape_cast %799 : vector<1x1x4x8xf32> to vector<4x8xf32>
    %c8_1290 = arith.constant 8 : index
    %c32_1291 = arith.constant 32 : index
    %801 = vector.load %arg14[%c8_1290, %c32_1291] : memref<128x128xf32, #tpu.memory_space<vmem>>, vector<4x8xf32>
    tpu.vector_store %arg14[%c8_1290, %c32_1291], %800 {strides = array<i32>} : memref<128x128xf32, #tpu.memory_space<vmem>>, vector<4x8xf32>,
    %c0_1292 = arith.constant 0 : index
    %c5_1293 = arith.constant 5 : index
    %c1_1294 = arith.constant 1 : index
    %c0_1295 = arith.constant 0 : index
    %802 = vector.load %arg11[%c0_1292, %c5_1293, %c1_1294, %c0_1295] : memref<2x10x10x8xf32, #tpu.memory_space<vmem>>, vector<1x1x4x8xf32>
    %803 = vector.shape_cast %802 : vector<1x1x4x8xf32> to vector<4x8xf32>
    %c8_1296 = arith.constant 8 : index
    %c40_1297 = arith.constant 40 : index
    %804 = vector.load %arg14[%c8_1296, %c40_1297] : memref<128x128xf32, #tpu.memory_space<vmem>>, vector<4x8xf32>
    tpu.vector_store %arg14[%c8_1296, %c40_1297], %803 {strides = array<i32>} : memref<128x128xf32, #tpu.memory_space<vmem>>, vector<4x8xf32>,
    %c0_1298 = arith.constant 0 : index
    %c6_1299 = arith.constant 6 : index
    %c0_1300 = arith.constant 0 : index
    %c0_1301 = arith.constant 0 : index
    %805 = vector.load %arg11[%c0_1298, %c6_1299, %c0_1300, %c0_1301] : memref<2x10x10x8xf32, #tpu.memory_space<vmem>>, vector<1x1x4x8xf32>
    %806 = vector.shape_cast %805 : vector<1x1x4x8xf32> to vector<4x8xf32>
    %c8_1302 = arith.constant 8 : index
    %c48_1303 = arith.constant 48 : index
    %807 = vector.load %arg14[%c8_1302, %c48_1303] : memref<128x128xf32, #tpu.memory_space<vmem>>, vector<4x8xf32>
    tpu.vector_store %arg14[%c8_1302, %c48_1303], %806 {strides = array<i32>} : memref<128x128xf32, #tpu.memory_space<vmem>>, vector<4x8xf32>,
    %c0_1304 = arith.constant 0 : index
    %c6_1305 = arith.constant 6 : index
    %c5_1306 = arith.constant 5 : index
    %c0_1307 = arith.constant 0 : index
    %808 = vector.load %arg11[%c0_1304, %c6_1305, %c5_1306, %c0_1307] : memref<2x10x10x8xf32, #tpu.memory_space<vmem>>, vector<1x1x4x8xf32>
    %809 = vector.shape_cast %808 : vector<1x1x4x8xf32> to vector<4x8xf32>
    %c8_1308 = arith.constant 8 : index
    %c56_1309 = arith.constant 56 : index
    %810 = vector.load %arg14[%c8_1308, %c56_1309] : memref<128x128xf32, #tpu.memory_space<vmem>>, vector<4x8xf32>
    tpu.vector_store %arg14[%c8_1308, %c56_1309], %809 {strides = array<i32>} : memref<128x128xf32, #tpu.memory_space<vmem>>, vector<4x8xf32>,
    %c0_1310 = arith.constant 0 : index
    %c6_1311 = arith.constant 6 : index
    %c1_1312 = arith.constant 1 : index
    %c0_1313 = arith.constant 0 : index
    %811 = vector.load %arg11[%c0_1310, %c6_1311, %c1_1312, %c0_1313] : memref<2x10x10x8xf32, #tpu.memory_space<vmem>>, vector<1x1x4x8xf32>
    %812 = vector.shape_cast %811 : vector<1x1x4x8xf32> to vector<4x8xf32>
    %c8_1314 = arith.constant 8 : index
    %c64_1315 = arith.constant 64 : index
    %813 = vector.load %arg14[%c8_1314, %c64_1315] : memref<128x128xf32, #tpu.memory_space<vmem>>, vector<4x8xf32>
    tpu.vector_store %arg14[%c8_1314, %c64_1315], %812 {strides = array<i32>} : memref<128x128xf32, #tpu.memory_space<vmem>>, vector<4x8xf32>,
    %c0_1316 = arith.constant 0 : index
    %c6_1317 = arith.constant 6 : index
    %c0_1318 = arith.constant 0 : index
    %c0_1319 = arith.constant 0 : index
    %814 = vector.load %arg11[%c0_1316, %c6_1317, %c0_1318, %c0_1319] : memref<2x10x10x8xf32, #tpu.memory_space<vmem>>, vector<1x1x4x8xf32>
    %815 = vector.shape_cast %814 : vector<1x1x4x8xf32> to vector<4x8xf32>
    %c12_1320 = arith.constant 12 : index
    %c0_1321 = arith.constant 0 : index
    %816 = vector.load %arg14[%c12_1320, %c0_1321] : memref<128x128xf32, #tpu.memory_space<vmem>>, vector<4x8xf32>
    tpu.vector_store %arg14[%c12_1320, %c0_1321], %815 {strides = array<i32>} : memref<128x128xf32, #tpu.memory_space<vmem>>, vector<4x8xf32>,
    %c0_1322 = arith.constant 0 : index
    %c6_1323 = arith.constant 6 : index
    %c5_1324 = arith.constant 5 : index
    %c0_1325 = arith.constant 0 : index
    %817 = vector.load %arg11[%c0_1322, %c6_1323, %c5_1324, %c0_1325] : memref<2x10x10x8xf32, #tpu.memory_space<vmem>>, vector<1x1x4x8xf32>
    %818 = vector.shape_cast %817 : vector<1x1x4x8xf32> to vector<4x8xf32>
    %c12_1326 = arith.constant 12 : index
    %c8_1327 = arith.constant 8 : index
    %819 = vector.load %arg14[%c12_1326, %c8_1327] : memref<128x128xf32, #tpu.memory_space<vmem>>, vector<4x8xf32>
    tpu.vector_store %arg14[%c12_1326, %c8_1327], %818 {strides = array<i32>} : memref<128x128xf32, #tpu.memory_space<vmem>>, vector<4x8xf32>,
    %c0_1328 = arith.constant 0 : index
    %c6_1329 = arith.constant 6 : index
    %c1_1330 = arith.constant 1 : index
    %c0_1331 = arith.constant 0 : index
    %820 = vector.load %arg11[%c0_1328, %c6_1329, %c1_1330, %c0_1331] : memref<2x10x10x8xf32, #tpu.memory_space<vmem>>, vector<1x1x4x8xf32>
    %821 = vector.shape_cast %820 : vector<1x1x4x8xf32> to vector<4x8xf32>
    %c12_1332 = arith.constant 12 : index
    %c16_1333 = arith.constant 16 : index
    %822 = vector.load %arg14[%c12_1332, %c16_1333] : memref<128x128xf32, #tpu.memory_space<vmem>>, vector<4x8xf32>
    tpu.vector_store %arg14[%c12_1332, %c16_1333], %821 {strides = array<i32>} : memref<128x128xf32, #tpu.memory_space<vmem>>, vector<4x8xf32>,
    %c0_1334 = arith.constant 0 : index
    %c7_1335 = arith.constant 7 : index
    %c0_1336 = arith.constant 0 : index
    %c0_1337 = arith.constant 0 : index
    %823 = vector.load %arg11[%c0_1334, %c7_1335, %c0_1336, %c0_1337] : memref<2x10x10x8xf32, #tpu.memory_space<vmem>>, vector<1x1x4x8xf32>
    %824 = vector.shape_cast %823 : vector<1x1x4x8xf32> to vector<4x8xf32>
    %c12_1338 = arith.constant 12 : index
    %c24_1339 = arith.constant 24 : index
    %825 = vector.load %arg14[%c12_1338, %c24_1339] : memref<128x128xf32, #tpu.memory_space<vmem>>, vector<4x8xf32>
    tpu.vector_store %arg14[%c12_1338, %c24_1339], %824 {strides = array<i32>} : memref<128x128xf32, #tpu.memory_space<vmem>>, vector<4x8xf32>,
    %c0_1340 = arith.constant 0 : index
    %c7_1341 = arith.constant 7 : index
    %c5_1342 = arith.constant 5 : index
    %c0_1343 = arith.constant 0 : index
    %826 = vector.load %arg11[%c0_1340, %c7_1341, %c5_1342, %c0_1343] : memref<2x10x10x8xf32, #tpu.memory_space<vmem>>, vector<1x1x4x8xf32>
    %827 = vector.shape_cast %826 : vector<1x1x4x8xf32> to vector<4x8xf32>
    %c12_1344 = arith.constant 12 : index
    %c32_1345 = arith.constant 32 : index
    %828 = vector.load %arg14[%c12_1344, %c32_1345] : memref<128x128xf32, #tpu.memory_space<vmem>>, vector<4x8xf32>
    tpu.vector_store %arg14[%c12_1344, %c32_1345], %827 {strides = array<i32>} : memref<128x128xf32, #tpu.memory_space<vmem>>, vector<4x8xf32>,
    %c0_1346 = arith.constant 0 : index
    %c7_1347 = arith.constant 7 : index
    %c1_1348 = arith.constant 1 : index
    %c0_1349 = arith.constant 0 : index
    %829 = vector.load %arg11[%c0_1346, %c7_1347, %c1_1348, %c0_1349] : memref<2x10x10x8xf32, #tpu.memory_space<vmem>>, vector<1x1x4x8xf32>
    %830 = vector.shape_cast %829 : vector<1x1x4x8xf32> to vector<4x8xf32>
    %c12_1350 = arith.constant 12 : index
    %c40_1351 = arith.constant 40 : index
    %831 = vector.load %arg14[%c12_1350, %c40_1351] : memref<128x128xf32, #tpu.memory_space<vmem>>, vector<4x8xf32>
    tpu.vector_store %arg14[%c12_1350, %c40_1351], %830 {strides = array<i32>} : memref<128x128xf32, #tpu.memory_space<vmem>>, vector<4x8xf32>,
    %c0_1352 = arith.constant 0 : index
    %c8_1353 = arith.constant 8 : index
    %c0_1354 = arith.constant 0 : index
    %c0_1355 = arith.constant 0 : index
    %832 = vector.load %arg11[%c0_1352, %c8_1353, %c0_1354, %c0_1355] : memref<2x10x10x8xf32, #tpu.memory_space<vmem>>, vector<1x1x4x8xf32>
    %833 = vector.shape_cast %832 : vector<1x1x4x8xf32> to vector<4x8xf32>
    %c12_1356 = arith.constant 12 : index
    %c48_1357 = arith.constant 48 : index
    %834 = vector.load %arg14[%c12_1356, %c48_1357] : memref<128x128xf32, #tpu.memory_space<vmem>>, vector<4x8xf32>
    tpu.vector_store %arg14[%c12_1356, %c48_1357], %833 {strides = array<i32>} : memref<128x128xf32, #tpu.memory_space<vmem>>, vector<4x8xf32>,
    %c0_1358 = arith.constant 0 : index
    %c8_1359 = arith.constant 8 : index
    %c5_1360 = arith.constant 5 : index
    %c0_1361 = arith.constant 0 : index
    %835 = vector.load %arg11[%c0_1358, %c8_1359, %c5_1360, %c0_1361] : memref<2x10x10x8xf32, #tpu.memory_space<vmem>>, vector<1x1x4x8xf32>
    %836 = vector.shape_cast %835 : vector<1x1x4x8xf32> to vector<4x8xf32>
    %c12_1362 = arith.constant 12 : index
    %c56_1363 = arith.constant 56 : index
    %837 = vector.load %arg14[%c12_1362, %c56_1363] : memref<128x128xf32, #tpu.memory_space<vmem>>, vector<4x8xf32>
    tpu.vector_store %arg14[%c12_1362, %c56_1363], %836 {strides = array<i32>} : memref<128x128xf32, #tpu.memory_space<vmem>>, vector<4x8xf32>,
    %c0_1364 = arith.constant 0 : index
    %c8_1365 = arith.constant 8 : index
    %c1_1366 = arith.constant 1 : index
    %c0_1367 = arith.constant 0 : index
    %838 = vector.load %arg11[%c0_1364, %c8_1365, %c1_1366, %c0_1367] : memref<2x10x10x8xf32, #tpu.memory_space<vmem>>, vector<1x1x4x8xf32>
    %839 = vector.shape_cast %838 : vector<1x1x4x8xf32> to vector<4x8xf32>
    %c12_1368 = arith.constant 12 : index
    %c64_1369 = arith.constant 64 : index
    %840 = vector.load %arg14[%c12_1368, %c64_1369] : memref<128x128xf32, #tpu.memory_space<vmem>>, vector<4x8xf32>
    tpu.vector_store %arg14[%c12_1368, %c64_1369], %839 {strides = array<i32>} : memref<128x128xf32, #tpu.memory_space<vmem>>, vector<4x8xf32>,
    %c1_1370 = arith.constant 1 : index
    %c0_1371 = arith.constant 0 : index
    %c0_1372 = arith.constant 0 : index
    %c0_1373 = arith.constant 0 : index
    %841 = vector.load %arg11[%c1_1370, %c0_1371, %c0_1372, %c0_1373] : memref<2x10x10x8xf32, #tpu.memory_space<vmem>>, vector<1x1x4x8xf32>
    %842 = vector.shape_cast %841 : vector<1x1x4x8xf32> to vector<4x8xf32>
    %c16_1374 = arith.constant 16 : index
    %c0_1375 = arith.constant 0 : index
    %843 = vector.load %arg14[%c16_1374, %c0_1375] : memref<128x128xf32, #tpu.memory_space<vmem>>, vector<4x8xf32>
    tpu.vector_store %arg14[%c16_1374, %c0_1375], %842 {strides = array<i32>} : memref<128x128xf32, #tpu.memory_space<vmem>>, vector<4x8xf32>,
    %c1_1376 = arith.constant 1 : index
    %c0_1377 = arith.constant 0 : index
    %c5_1378 = arith.constant 5 : index
    %c0_1379 = arith.constant 0 : index
    %844 = vector.load %arg11[%c1_1376, %c0_1377, %c5_1378, %c0_1379] : memref<2x10x10x8xf32, #tpu.memory_space<vmem>>, vector<1x1x4x8xf32>
    %845 = vector.shape_cast %844 : vector<1x1x4x8xf32> to vector<4x8xf32>
    %c16_1380 = arith.constant 16 : index
    %c8_1381 = arith.constant 8 : index
    %846 = vector.load %arg14[%c16_1380, %c8_1381] : memref<128x128xf32, #tpu.memory_space<vmem>>, vector<4x8xf32>
    tpu.vector_store %arg14[%c16_1380, %c8_1381], %845 {strides = array<i32>} : memref<128x128xf32, #tpu.memory_space<vmem>>, vector<4x8xf32>,
    %c1_1382 = arith.constant 1 : index
    %c0_1383 = arith.constant 0 : index
    %c1_1384 = arith.constant 1 : index
    %c0_1385 = arith.constant 0 : index
    %847 = vector.load %arg11[%c1_1382, %c0_1383, %c1_1384, %c0_1385] : memref<2x10x10x8xf32, #tpu.memory_space<vmem>>, vector<1x1x4x8xf32>
    %848 = vector.shape_cast %847 : vector<1x1x4x8xf32> to vector<4x8xf32>
    %c16_1386 = arith.constant 16 : index
    %c16_1387 = arith.constant 16 : index
    %849 = vector.load %arg14[%c16_1386, %c16_1387] : memref<128x128xf32, #tpu.memory_space<vmem>>, vector<4x8xf32>
    tpu.vector_store %arg14[%c16_1386, %c16_1387], %848 {strides = array<i32>} : memref<128x128xf32, #tpu.memory_space<vmem>>, vector<4x8xf32>,
    %c1_1388 = arith.constant 1 : index
    %c1_1389 = arith.constant 1 : index
    %c0_1390 = arith.constant 0 : index
    %c0_1391 = arith.constant 0 : index
    %850 = vector.load %arg11[%c1_1388, %c1_1389, %c0_1390, %c0_1391] : memref<2x10x10x8xf32, #tpu.memory_space<vmem>>, vector<1x1x4x8xf32>
    %851 = vector.shape_cast %850 : vector<1x1x4x8xf32> to vector<4x8xf32>
    %c16_1392 = arith.constant 16 : index
    %c24_1393 = arith.constant 24 : index
    %852 = vector.load %arg14[%c16_1392, %c24_1393] : memref<128x128xf32, #tpu.memory_space<vmem>>, vector<4x8xf32>
    tpu.vector_store %arg14[%c16_1392, %c24_1393], %851 {strides = array<i32>} : memref<128x128xf32, #tpu.memory_space<vmem>>, vector<4x8xf32>,
    %c1_1394 = arith.constant 1 : index
    %c1_1395 = arith.constant 1 : index
    %c5_1396 = arith.constant 5 : index
    %c0_1397 = arith.constant 0 : index
    %853 = vector.load %arg11[%c1_1394, %c1_1395, %c5_1396, %c0_1397] : memref<2x10x10x8xf32, #tpu.memory_space<vmem>>, vector<1x1x4x8xf32>
    %854 = vector.shape_cast %853 : vector<1x1x4x8xf32> to vector<4x8xf32>
    %c16_1398 = arith.constant 16 : index
    %c32_1399 = arith.constant 32 : index
    %855 = vector.load %arg14[%c16_1398, %c32_1399] : memref<128x128xf32, #tpu.memory_space<vmem>>, vector<4x8xf32>
    tpu.vector_store %arg14[%c16_1398, %c32_1399], %854 {strides = array<i32>} : memref<128x128xf32, #tpu.memory_space<vmem>>, vector<4x8xf32>,
    %c1_1400 = arith.constant 1 : index
    %c1_1401 = arith.constant 1 : index
    %c1_1402 = arith.constant 1 : index
    %c0_1403 = arith.constant 0 : index
    %856 = vector.load %arg11[%c1_1400, %c1_1401, %c1_1402, %c0_1403] : memref<2x10x10x8xf32, #tpu.memory_space<vmem>>, vector<1x1x4x8xf32>
    %857 = vector.shape_cast %856 : vector<1x1x4x8xf32> to vector<4x8xf32>
    %c16_1404 = arith.constant 16 : index
    %c40_1405 = arith.constant 40 : index
    %858 = vector.load %arg14[%c16_1404, %c40_1405] : memref<128x128xf32, #tpu.memory_space<vmem>>, vector<4x8xf32>
    tpu.vector_store %arg14[%c16_1404, %c40_1405], %857 {strides = array<i32>} : memref<128x128xf32, #tpu.memory_space<vmem>>, vector<4x8xf32>,
    %c1_1406 = arith.constant 1 : index
    %c2_1407 = arith.constant 2 : index
    %c0_1408 = arith.constant 0 : index
    %c0_1409 = arith.constant 0 : index
    %859 = vector.load %arg11[%c1_1406, %c2_1407, %c0_1408, %c0_1409] : memref<2x10x10x8xf32, #tpu.memory_space<vmem>>, vector<1x1x4x8xf32>
    %860 = vector.shape_cast %859 : vector<1x1x4x8xf32> to vector<4x8xf32>
    %c16_1410 = arith.constant 16 : index
    %c48_1411 = arith.constant 48 : index
    %861 = vector.load %arg14[%c16_1410, %c48_1411] : memref<128x128xf32, #tpu.memory_space<vmem>>, vector<4x8xf32>
    tpu.vector_store %arg14[%c16_1410, %c48_1411], %860 {strides = array<i32>} : memref<128x128xf32, #tpu.memory_space<vmem>>, vector<4x8xf32>,
    %c1_1412 = arith.constant 1 : index
    %c2_1413 = arith.constant 2 : index
    %c5_1414 = arith.constant 5 : index
    %c0_1415 = arith.constant 0 : index
    %862 = vector.load %arg11[%c1_1412, %c2_1413, %c5_1414, %c0_1415] : memref<2x10x10x8xf32, #tpu.memory_space<vmem>>, vector<1x1x4x8xf32>
    %863 = vector.shape_cast %862 : vector<1x1x4x8xf32> to vector<4x8xf32>
    %c16_1416 = arith.constant 16 : index
    %c56_1417 = arith.constant 56 : index
    %864 = vector.load %arg14[%c16_1416, %c56_1417] : memref<128x128xf32, #tpu.memory_space<vmem>>, vector<4x8xf32>
    tpu.vector_store %arg14[%c16_1416, %c56_1417], %863 {strides = array<i32>} : memref<128x128xf32, #tpu.memory_space<vmem>>, vector<4x8xf32>,
    %c1_1418 = arith.constant 1 : index
    %c2_1419 = arith.constant 2 : index
    %c1_1420 = arith.constant 1 : index
    %c0_1421 = arith.constant 0 : index
    %865 = vector.load %arg11[%c1_1418, %c2_1419, %c1_1420, %c0_1421] : memref<2x10x10x8xf32, #tpu.memory_space<vmem>>, vector<1x1x4x8xf32>
    %866 = vector.shape_cast %865 : vector<1x1x4x8xf32> to vector<4x8xf32>
    %c16_1422 = arith.constant 16 : index
    %c64_1423 = arith.constant 64 : index
    %867 = vector.load %arg14[%c16_1422, %c64_1423] : memref<128x128xf32, #tpu.memory_space<vmem>>, vector<4x8xf32>
    tpu.vector_store %arg14[%c16_1422, %c64_1423], %866 {strides = array<i32>} : memref<128x128xf32, #tpu.memory_space<vmem>>, vector<4x8xf32>,
    %c1_1424 = arith.constant 1 : index
    %c2_1425 = arith.constant 2 : index
    %c0_1426 = arith.constant 0 : index
    %c0_1427 = arith.constant 0 : index
    %868 = vector.load %arg11[%c1_1424, %c2_1425, %c0_1426, %c0_1427] : memref<2x10x10x8xf32, #tpu.memory_space<vmem>>, vector<1x1x4x8xf32>
    %869 = vector.shape_cast %868 : vector<1x1x4x8xf32> to vector<4x8xf32>
    %c20_1428 = arith.constant 20 : index
    %c0_1429 = arith.constant 0 : index
    %870 = vector.load %arg14[%c20_1428, %c0_1429] : memref<128x128xf32, #tpu.memory_space<vmem>>, vector<4x8xf32>
    tpu.vector_store %arg14[%c20_1428, %c0_1429], %869 {strides = array<i32>} : memref<128x128xf32, #tpu.memory_space<vmem>>, vector<4x8xf32>,
    %c1_1430 = arith.constant 1 : index
    %c2_1431 = arith.constant 2 : index
    %c5_1432 = arith.constant 5 : index
    %c0_1433 = arith.constant 0 : index
    %871 = vector.load %arg11[%c1_1430, %c2_1431, %c5_1432, %c0_1433] : memref<2x10x10x8xf32, #tpu.memory_space<vmem>>, vector<1x1x4x8xf32>
    %872 = vector.shape_cast %871 : vector<1x1x4x8xf32> to vector<4x8xf32>
    %c20_1434 = arith.constant 20 : index
    %c8_1435 = arith.constant 8 : index
    %873 = vector.load %arg14[%c20_1434, %c8_1435] : memref<128x128xf32, #tpu.memory_space<vmem>>, vector<4x8xf32>
    tpu.vector_store %arg14[%c20_1434, %c8_1435], %872 {strides = array<i32>} : memref<128x128xf32, #tpu.memory_space<vmem>>, vector<4x8xf32>,
    %c1_1436 = arith.constant 1 : index
    %c2_1437 = arith.constant 2 : index
    %c1_1438 = arith.constant 1 : index
    %c0_1439 = arith.constant 0 : index
    %874 = vector.load %arg11[%c1_1436, %c2_1437, %c1_1438, %c0_1439] : memref<2x10x10x8xf32, #tpu.memory_space<vmem>>, vector<1x1x4x8xf32>
    %875 = vector.shape_cast %874 : vector<1x1x4x8xf32> to vector<4x8xf32>
    %c20_1440 = arith.constant 20 : index
    %c16_1441 = arith.constant 16 : index
    %876 = vector.load %arg14[%c20_1440, %c16_1441] : memref<128x128xf32, #tpu.memory_space<vmem>>, vector<4x8xf32>
    tpu.vector_store %arg14[%c20_1440, %c16_1441], %875 {strides = array<i32>} : memref<128x128xf32, #tpu.memory_space<vmem>>, vector<4x8xf32>,
    %c1_1442 = arith.constant 1 : index
    %c3_1443 = arith.constant 3 : index
    %c0_1444 = arith.constant 0 : index
    %c0_1445 = arith.constant 0 : index
    %877 = vector.load %arg11[%c1_1442, %c3_1443, %c0_1444, %c0_1445] : memref<2x10x10x8xf32, #tpu.memory_space<vmem>>, vector<1x1x4x8xf32>
    %878 = vector.shape_cast %877 : vector<1x1x4x8xf32> to vector<4x8xf32>
    %c20_1446 = arith.constant 20 : index
    %c24_1447 = arith.constant 24 : index
    %879 = vector.load %arg14[%c20_1446, %c24_1447] : memref<128x128xf32, #tpu.memory_space<vmem>>, vector<4x8xf32>
    tpu.vector_store %arg14[%c20_1446, %c24_1447], %878 {strides = array<i32>} : memref<128x128xf32, #tpu.memory_space<vmem>>, vector<4x8xf32>,
    %c1_1448 = arith.constant 1 : index
    %c3_1449 = arith.constant 3 : index
    %c5_1450 = arith.constant 5 : index
    %c0_1451 = arith.constant 0 : index
    %880 = vector.load %arg11[%c1_1448, %c3_1449, %c5_1450, %c0_1451] : memref<2x10x10x8xf32, #tpu.memory_space<vmem>>, vector<1x1x4x8xf32>
    %881 = vector.shape_cast %880 : vector<1x1x4x8xf32> to vector<4x8xf32>
    %c20_1452 = arith.constant 20 : index
    %c32_1453 = arith.constant 32 : index
    %882 = vector.load %arg14[%c20_1452, %c32_1453] : memref<128x128xf32, #tpu.memory_space<vmem>>, vector<4x8xf32>
    tpu.vector_store %arg14[%c20_1452, %c32_1453], %881 {strides = array<i32>} : memref<128x128xf32, #tpu.memory_space<vmem>>, vector<4x8xf32>,
    %c1_1454 = arith.constant 1 : index
    %c3_1455 = arith.constant 3 : index
    %c1_1456 = arith.constant 1 : index
    %c0_1457 = arith.constant 0 : index
    %883 = vector.load %arg11[%c1_1454, %c3_1455, %c1_1456, %c0_1457] : memref<2x10x10x8xf32, #tpu.memory_space<vmem>>, vector<1x1x4x8xf32>
    %884 = vector.shape_cast %883 : vector<1x1x4x8xf32> to vector<4x8xf32>
    %c20_1458 = arith.constant 20 : index
    %c40_1459 = arith.constant 40 : index
    %885 = vector.load %arg14[%c20_1458, %c40_1459] : memref<128x128xf32, #tpu.memory_space<vmem>>, vector<4x8xf32>
    tpu.vector_store %arg14[%c20_1458, %c40_1459], %884 {strides = array<i32>} : memref<128x128xf32, #tpu.memory_space<vmem>>, vector<4x8xf32>,
    %c1_1460 = arith.constant 1 : index
    %c4_1461 = arith.constant 4 : index
    %c0_1462 = arith.constant 0 : index
    %c0_1463 = arith.constant 0 : index
    %886 = vector.load %arg11[%c1_1460, %c4_1461, %c0_1462, %c0_1463] : memref<2x10x10x8xf32, #tpu.memory_space<vmem>>, vector<1x1x4x8xf32>
    %887 = vector.shape_cast %886 : vector<1x1x4x8xf32> to vector<4x8xf32>
    %c20_1464 = arith.constant 20 : index
    %c48_1465 = arith.constant 48 : index
    %888 = vector.load %arg14[%c20_1464, %c48_1465] : memref<128x128xf32, #tpu.memory_space<vmem>>, vector<4x8xf32>
    tpu.vector_store %arg14[%c20_1464, %c48_1465], %887 {strides = array<i32>} : memref<128x128xf32, #tpu.memory_space<vmem>>, vector<4x8xf32>,
    %c1_1466 = arith.constant 1 : index
    %c4_1467 = arith.constant 4 : index
    %c5_1468 = arith.constant 5 : index
    %c0_1469 = arith.constant 0 : index
    %889 = vector.load %arg11[%c1_1466, %c4_1467, %c5_1468, %c0_1469] : memref<2x10x10x8xf32, #tpu.memory_space<vmem>>, vector<1x1x4x8xf32>
    %890 = vector.shape_cast %889 : vector<1x1x4x8xf32> to vector<4x8xf32>
    %c20_1470 = arith.constant 20 : index
    %c56_1471 = arith.constant 56 : index
    %891 = vector.load %arg14[%c20_1470, %c56_1471] : memref<128x128xf32, #tpu.memory_space<vmem>>, vector<4x8xf32>
    tpu.vector_store %arg14[%c20_1470, %c56_1471], %890 {strides = array<i32>} : memref<128x128xf32, #tpu.memory_space<vmem>>, vector<4x8xf32>,
    %c1_1472 = arith.constant 1 : index
    %c4_1473 = arith.constant 4 : index
    %c1_1474 = arith.constant 1 : index
    %c0_1475 = arith.constant 0 : index
    %892 = vector.load %arg11[%c1_1472, %c4_1473, %c1_1474, %c0_1475] : memref<2x10x10x8xf32, #tpu.memory_space<vmem>>, vector<1x1x4x8xf32>
    %893 = vector.shape_cast %892 : vector<1x1x4x8xf32> to vector<4x8xf32>
    %c20_1476 = arith.constant 20 : index
    %c64_1477 = arith.constant 64 : index
    %894 = vector.load %arg14[%c20_1476, %c64_1477] : memref<128x128xf32, #tpu.memory_space<vmem>>, vector<4x8xf32>
    tpu.vector_store %arg14[%c20_1476, %c64_1477], %893 {strides = array<i32>} : memref<128x128xf32, #tpu.memory_space<vmem>>, vector<4x8xf32>,
    %c1_1478 = arith.constant 1 : index
    %c4_1479 = arith.constant 4 : index
    %c0_1480 = arith.constant 0 : index
    %c0_1481 = arith.constant 0 : index
    %895 = vector.load %arg11[%c1_1478, %c4_1479, %c0_1480, %c0_1481] : memref<2x10x10x8xf32, #tpu.memory_space<vmem>>, vector<1x1x4x8xf32>
    %896 = vector.shape_cast %895 : vector<1x1x4x8xf32> to vector<4x8xf32>
    %c24_1482 = arith.constant 24 : index
    %c0_1483 = arith.constant 0 : index
    %897 = vector.load %arg14[%c24_1482, %c0_1483] : memref<128x128xf32, #tpu.memory_space<vmem>>, vector<4x8xf32>
    tpu.vector_store %arg14[%c24_1482, %c0_1483], %896 {strides = array<i32>} : memref<128x128xf32, #tpu.memory_space<vmem>>, vector<4x8xf32>,
    %c1_1484 = arith.constant 1 : index
    %c4_1485 = arith.constant 4 : index
    %c5_1486 = arith.constant 5 : index
    %c0_1487 = arith.constant 0 : index
    %898 = vector.load %arg11[%c1_1484, %c4_1485, %c5_1486, %c0_1487] : memref<2x10x10x8xf32, #tpu.memory_space<vmem>>, vector<1x1x4x8xf32>
    %899 = vector.shape_cast %898 : vector<1x1x4x8xf32> to vector<4x8xf32>
    %c24_1488 = arith.constant 24 : index
    %c8_1489 = arith.constant 8 : index
    %900 = vector.load %arg14[%c24_1488, %c8_1489] : memref<128x128xf32, #tpu.memory_space<vmem>>, vector<4x8xf32>
    tpu.vector_store %arg14[%c24_1488, %c8_1489], %899 {strides = array<i32>} : memref<128x128xf32, #tpu.memory_space<vmem>>, vector<4x8xf32>,
    %c1_1490 = arith.constant 1 : index
    %c4_1491 = arith.constant 4 : index
    %c1_1492 = arith.constant 1 : index
    %c0_1493 = arith.constant 0 : index
    %901 = vector.load %arg11[%c1_1490, %c4_1491, %c1_1492, %c0_1493] : memref<2x10x10x8xf32, #tpu.memory_space<vmem>>, vector<1x1x4x8xf32>
    %902 = vector.shape_cast %901 : vector<1x1x4x8xf32> to vector<4x8xf32>
    %c24_1494 = arith.constant 24 : index
    %c16_1495 = arith.constant 16 : index
    %903 = vector.load %arg14[%c24_1494, %c16_1495] : memref<128x128xf32, #tpu.memory_space<vmem>>, vector<4x8xf32>
    tpu.vector_store %arg14[%c24_1494, %c16_1495], %902 {strides = array<i32>} : memref<128x128xf32, #tpu.memory_space<vmem>>, vector<4x8xf32>,
    %c1_1496 = arith.constant 1 : index
    %c5_1497 = arith.constant 5 : index
    %c0_1498 = arith.constant 0 : index
    %c0_1499 = arith.constant 0 : index
    %904 = vector.load %arg11[%c1_1496, %c5_1497, %c0_1498, %c0_1499] : memref<2x10x10x8xf32, #tpu.memory_space<vmem>>, vector<1x1x4x8xf32>
    %905 = vector.shape_cast %904 : vector<1x1x4x8xf32> to vector<4x8xf32>
    %c24_1500 = arith.constant 24 : index
    %c24_1501 = arith.constant 24 : index
    %906 = vector.load %arg14[%c24_1500, %c24_1501] : memref<128x128xf32, #tpu.memory_space<vmem>>, vector<4x8xf32>
    tpu.vector_store %arg14[%c24_1500, %c24_1501], %905 {strides = array<i32>} : memref<128x128xf32, #tpu.memory_space<vmem>>, vector<4x8xf32>,
    %c1_1502 = arith.constant 1 : index
    %c5_1503 = arith.constant 5 : index
    %c5_1504 = arith.constant 5 : index
    %c0_1505 = arith.constant 0 : index
    %907 = vector.load %arg11[%c1_1502, %c5_1503, %c5_1504, %c0_1505] : memref<2x10x10x8xf32, #tpu.memory_space<vmem>>, vector<1x1x4x8xf32>
    %908 = vector.shape_cast %907 : vector<1x1x4x8xf32> to vector<4x8xf32>
    %c24_1506 = arith.constant 24 : index
    %c32_1507 = arith.constant 32 : index
    %909 = vector.load %arg14[%c24_1506, %c32_1507] : memref<128x128xf32, #tpu.memory_space<vmem>>, vector<4x8xf32>
    tpu.vector_store %arg14[%c24_1506, %c32_1507], %908 {strides = array<i32>} : memref<128x128xf32, #tpu.memory_space<vmem>>, vector<4x8xf32>,
    %c1_1508 = arith.constant 1 : index
    %c5_1509 = arith.constant 5 : index
    %c1_1510 = arith.constant 1 : index
    %c0_1511 = arith.constant 0 : index
    %910 = vector.load %arg11[%c1_1508, %c5_1509, %c1_1510, %c0_1511] : memref<2x10x10x8xf32, #tpu.memory_space<vmem>>, vector<1x1x4x8xf32>
    %911 = vector.shape_cast %910 : vector<1x1x4x8xf32> to vector<4x8xf32>
    %c24_1512 = arith.constant 24 : index
    %c40_1513 = arith.constant 40 : index
    %912 = vector.load %arg14[%c24_1512, %c40_1513] : memref<128x128xf32, #tpu.memory_space<vmem>>, vector<4x8xf32>
    tpu.vector_store %arg14[%c24_1512, %c40_1513], %911 {strides = array<i32>} : memref<128x128xf32, #tpu.memory_space<vmem>>, vector<4x8xf32>,
    %c1_1514 = arith.constant 1 : index
    %c6_1515 = arith.constant 6 : index
    %c0_1516 = arith.constant 0 : index
    %c0_1517 = arith.constant 0 : index
    %913 = vector.load %arg11[%c1_1514, %c6_1515, %c0_1516, %c0_1517] : memref<2x10x10x8xf32, #tpu.memory_space<vmem>>, vector<1x1x4x8xf32>
    %914 = vector.shape_cast %913 : vector<1x1x4x8xf32> to vector<4x8xf32>
    %c24_1518 = arith.constant 24 : index
    %c48_1519 = arith.constant 48 : index
    %915 = vector.load %arg14[%c24_1518, %c48_1519] : memref<128x128xf32, #tpu.memory_space<vmem>>, vector<4x8xf32>
    tpu.vector_store %arg14[%c24_1518, %c48_1519], %914 {strides = array<i32>} : memref<128x128xf32, #tpu.memory_space<vmem>>, vector<4x8xf32>,
    %c1_1520 = arith.constant 1 : index
    %c6_1521 = arith.constant 6 : index
    %c5_1522 = arith.constant 5 : index
    %c0_1523 = arith.constant 0 : index
    %916 = vector.load %arg11[%c1_1520, %c6_1521, %c5_1522, %c0_1523] : memref<2x10x10x8xf32, #tpu.memory_space<vmem>>, vector<1x1x4x8xf32>
    %917 = vector.shape_cast %916 : vector<1x1x4x8xf32> to vector<4x8xf32>
    %c24_1524 = arith.constant 24 : index
    %c56_1525 = arith.constant 56 : index
    %918 = vector.load %arg14[%c24_1524, %c56_1525] : memref<128x128xf32, #tpu.memory_space<vmem>>, vector<4x8xf32>
    tpu.vector_store %arg14[%c24_1524, %c56_1525], %917 {strides = array<i32>} : memref<128x128xf32, #tpu.memory_space<vmem>>, vector<4x8xf32>,
    %c1_1526 = arith.constant 1 : index
    %c6_1527 = arith.constant 6 : index
    %c1_1528 = arith.constant 1 : index
    %c0_1529 = arith.constant 0 : index
    %919 = vector.load %arg11[%c1_1526, %c6_1527, %c1_1528, %c0_1529] : memref<2x10x10x8xf32, #tpu.memory_space<vmem>>, vector<1x1x4x8xf32>
    %920 = vector.shape_cast %919 : vector<1x1x4x8xf32> to vector<4x8xf32>
    %c24_1530 = arith.constant 24 : index
    %c64_1531 = arith.constant 64 : index
    %921 = vector.load %arg14[%c24_1530, %c64_1531] : memref<128x128xf32, #tpu.memory_space<vmem>>, vector<4x8xf32>
    tpu.vector_store %arg14[%c24_1530, %c64_1531], %920 {strides = array<i32>} : memref<128x128xf32, #tpu.memory_space<vmem>>, vector<4x8xf32>,
    %c1_1532 = arith.constant 1 : index
    %c6_1533 = arith.constant 6 : index
    %c0_1534 = arith.constant 0 : index
    %c0_1535 = arith.constant 0 : index
    %922 = vector.load %arg11[%c1_1532, %c6_1533, %c0_1534, %c0_1535] : memref<2x10x10x8xf32, #tpu.memory_space<vmem>>, vector<1x1x4x8xf32>
    %923 = vector.shape_cast %922 : vector<1x1x4x8xf32> to vector<4x8xf32>
    %c28_1536 = arith.constant 28 : index
    %c0_1537 = arith.constant 0 : index
    %924 = vector.load %arg14[%c28_1536, %c0_1537] : memref<128x128xf32, #tpu.memory_space<vmem>>, vector<4x8xf32>
    tpu.vector_store %arg14[%c28_1536, %c0_1537], %923 {strides = array<i32>} : memref<128x128xf32, #tpu.memory_space<vmem>>, vector<4x8xf32>,
    %c1_1538 = arith.constant 1 : index
    %c6_1539 = arith.constant 6 : index
    %c5_1540 = arith.constant 5 : index
    %c0_1541 = arith.constant 0 : index
    %925 = vector.load %arg11[%c1_1538, %c6_1539, %c5_1540, %c0_1541] : memref<2x10x10x8xf32, #tpu.memory_space<vmem>>, vector<1x1x4x8xf32>
    %926 = vector.shape_cast %925 : vector<1x1x4x8xf32> to vector<4x8xf32>
    %c28_1542 = arith.constant 28 : index
    %c8_1543 = arith.constant 8 : index
    %927 = vector.load %arg14[%c28_1542, %c8_1543] : memref<128x128xf32, #tpu.memory_space<vmem>>, vector<4x8xf32>
    tpu.vector_store %arg14[%c28_1542, %c8_1543], %926 {strides = array<i32>} : memref<128x128xf32, #tpu.memory_space<vmem>>, vector<4x8xf32>,
    %c1_1544 = arith.constant 1 : index
    %c6_1545 = arith.constant 6 : index
    %c1_1546 = arith.constant 1 : index
    %c0_1547 = arith.constant 0 : index
    %928 = vector.load %arg11[%c1_1544, %c6_1545, %c1_1546, %c0_1547] : memref<2x10x10x8xf32, #tpu.memory_space<vmem>>, vector<1x1x4x8xf32>
    %929 = vector.shape_cast %928 : vector<1x1x4x8xf32> to vector<4x8xf32>
    %c28_1548 = arith.constant 28 : index
    %c16_1549 = arith.constant 16 : index
    %930 = vector.load %arg14[%c28_1548, %c16_1549] : memref<128x128xf32, #tpu.memory_space<vmem>>, vector<4x8xf32>
    tpu.vector_store %arg14[%c28_1548, %c16_1549], %929 {strides = array<i32>} : memref<128x128xf32, #tpu.memory_space<vmem>>, vector<4x8xf32>,
    %c1_1550 = arith.constant 1 : index
    %c7_1551 = arith.constant 7 : index
    %c0_1552 = arith.constant 0 : index
    %c0_1553 = arith.constant 0 : index
    %931 = vector.load %arg11[%c1_1550, %c7_1551, %c0_1552, %c0_1553] : memref<2x10x10x8xf32, #tpu.memory_space<vmem>>, vector<1x1x4x8xf32>
    %932 = vector.shape_cast %931 : vector<1x1x4x8xf32> to vector<4x8xf32>
    %c28_1554 = arith.constant 28 : index
    %c24_1555 = arith.constant 24 : index
    %933 = vector.load %arg14[%c28_1554, %c24_1555] : memref<128x128xf32, #tpu.memory_space<vmem>>, vector<4x8xf32>
    tpu.vector_store %arg14[%c28_1554, %c24_1555], %932 {strides = array<i32>} : memref<128x128xf32, #tpu.memory_space<vmem>>, vector<4x8xf32>,
    %c1_1556 = arith.constant 1 : index
    %c7_1557 = arith.constant 7 : index
    %c5_1558 = arith.constant 5 : index
    %c0_1559 = arith.constant 0 : index
    %934 = vector.load %arg11[%c1_1556, %c7_1557, %c5_1558, %c0_1559] : memref<2x10x10x8xf32, #tpu.memory_space<vmem>>, vector<1x1x4x8xf32>
    %935 = vector.shape_cast %934 : vector<1x1x4x8xf32> to vector<4x8xf32>
    %c28_1560 = arith.constant 28 : index
    %c32_1561 = arith.constant 32 : index
    %936 = vector.load %arg14[%c28_1560, %c32_1561] : memref<128x128xf32, #tpu.memory_space<vmem>>, vector<4x8xf32>
    tpu.vector_store %arg14[%c28_1560, %c32_1561], %935 {strides = array<i32>} : memref<128x128xf32, #tpu.memory_space<vmem>>, vector<4x8xf32>,
    %c1_1562 = arith.constant 1 : index
    %c7_1563 = arith.constant 7 : index
    %c1_1564 = arith.constant 1 : index
    %c0_1565 = arith.constant 0 : index
    %937 = vector.load %arg11[%c1_1562, %c7_1563, %c1_1564, %c0_1565] : memref<2x10x10x8xf32, #tpu.memory_space<vmem>>, vector<1x1x4x8xf32>
    %938 = vector.shape_cast %937 : vector<1x1x4x8xf32> to vector<4x8xf32>
    %c28_1566 = arith.constant 28 : index
    %c40_1567 = arith.constant 40 : index
    %939 = vector.load %arg14[%c28_1566, %c40_1567] : memref<128x128xf32, #tpu.memory_space<vmem>>, vector<4x8xf32>
    tpu.vector_store %arg14[%c28_1566, %c40_1567], %938 {strides = array<i32>} : memref<128x128xf32, #tpu.memory_space<vmem>>, vector<4x8xf32>,
    %c1_1568 = arith.constant 1 : index
    %c8_1569 = arith.constant 8 : index
    %c0_1570 = arith.constant 0 : index
    %c0_1571 = arith.constant 0 : index
    %940 = vector.load %arg11[%c1_1568, %c8_1569, %c0_1570, %c0_1571] : memref<2x10x10x8xf32, #tpu.memory_space<vmem>>, vector<1x1x4x8xf32>
    %941 = vector.shape_cast %940 : vector<1x1x4x8xf32> to vector<4x8xf32>
    %c28_1572 = arith.constant 28 : index
    %c48_1573 = arith.constant 48 : index
    %942 = vector.load %arg14[%c28_1572, %c48_1573] : memref<128x128xf32, #tpu.memory_space<vmem>>, vector<4x8xf32>
    tpu.vector_store %arg14[%c28_1572, %c48_1573], %941 {strides = array<i32>} : memref<128x128xf32, #tpu.memory_space<vmem>>, vector<4x8xf32>,
    %c1_1574 = arith.constant 1 : index
    %c8_1575 = arith.constant 8 : index
    %c5_1576 = arith.constant 5 : index
    %c0_1577 = arith.constant 0 : index
    %943 = vector.load %arg11[%c1_1574, %c8_1575, %c5_1576, %c0_1577] : memref<2x10x10x8xf32, #tpu.memory_space<vmem>>, vector<1x1x4x8xf32>
    %944 = vector.shape_cast %943 : vector<1x1x4x8xf32> to vector<4x8xf32>
    %c28_1578 = arith.constant 28 : index
    %c56_1579 = arith.constant 56 : index
    %945 = vector.load %arg14[%c28_1578, %c56_1579] : memref<128x128xf32, #tpu.memory_space<vmem>>, vector<4x8xf32>
    tpu.vector_store %arg14[%c28_1578, %c56_1579], %944 {strides = array<i32>} : memref<128x128xf32, #tpu.memory_space<vmem>>, vector<4x8xf32>,
    %c1_1580 = arith.constant 1 : index
    %c8_1581 = arith.constant 8 : index
    %c1_1582 = arith.constant 1 : index
    %c0_1583 = arith.constant 0 : index
    %946 = vector.load %arg11[%c1_1580, %c8_1581, %c1_1582, %c0_1583] : memref<2x10x10x8xf32, #tpu.memory_space<vmem>>, vector<1x1x4x8xf32>
    %947 = vector.shape_cast %946 : vector<1x1x4x8xf32> to vector<4x8xf32>
    %c28_1584 = arith.constant 28 : index
    %c64_1585 = arith.constant 64 : index
    %948 = vector.load %arg14[%c28_1584, %c64_1585] : memref<128x128xf32, #tpu.memory_space<vmem>>, vector<4x8xf32>
    tpu.vector_store %arg14[%c28_1584, %c64_1585], %947 {strides = array<i32>} : memref<128x128xf32, #tpu.memory_space<vmem>>, vector<4x8xf32>,
    %c0_1586 = arith.constant 0 : index
    %c0_1587 = arith.constant 0 : index
    %949 = vector.load %arg14[%c0_1586, %c0_1587] : memref<128x128xf32, #tpu.memory_space<vmem>>, vector<32x128xf32>
    %950 = arith.truncf %949 : vector<32x128xf32> to vector<32x128xbf16>
    %c1_1588 = arith.constant 1 : index
    %c0_1589 = arith.constant 0 : index
    %c0_1590 = arith.constant 0 : index
    %951 = vector.load %arg2[%c1_1588, %c0_1589, %c0_1590] : memref<4x128x128xbf16, #tpu.memory_space<vmem>>, vector<1x128x128xbf16>
    %952 = vector.shape_cast %951 : vector<1x128x128xbf16> to vector<128x128xbf16>
    %cst_1591 = arith.constant dense<0.000000e+00> : vector<32x128xf32>
    %953 = tpu.matmul %950, %952, %cst_1591 {dimension_numbers = #tpu.dot_dimension_numbers<[1], [0], [0], [1], [0, 0, 1, 1], [], []>} : vector<32x128xbf16>, vector<128x128xbf16>, vector<32x128xf32> -> vector<32x128xf32>
    %c1_1592 = arith.constant 1 : index
    %c0_1593 = arith.constant 0 : index
    %c0_1594 = arith.constant 0 : index
    %954 = vector.load %arg3[%c1_1592, %c0_1593, %c0_1594] : memref<4x1x128xf32, #tpu.memory_space<vmem>>, vector<1x1x128xf32>
    %955 = vector.shape_cast %954 : vector<1x1x128xf32> to vector<1x128xf32>
    %956 = vector.broadcast %955 : vector<1x128xf32> to vector<32x128xf32>
    %957 = arith.addf %953, %956 : vector<32x128xf32>
    %cst_1595 = arith.constant 0.000000e+00 : f32
    %958 = vector.broadcast %cst_1595 : f32 to vector<32x128xf32>
    %959 = arith.maximumf %957, %958 : vector<32x128xf32>
    %cst_1596 = arith.constant dense<0.000000e+00> : vector<128xf32>
    %960 = vector.multi_reduction <add>, %959, %cst_1596 [0] : vector<32x128xf32> to vector<128xf32>
    %961 = vector.shape_cast %960 : vector<128xf32> to vector<1x128xf32>
    %962 = arith.mulf %959, %959 : vector<32x128xf32>
    %cst_1597 = arith.constant dense<0.000000e+00> : vector<128xf32>
    %963 = vector.multi_reduction <add>, %962, %cst_1597 [0] : vector<32x128xf32> to vector<128xf32>
    %964 = vector.shape_cast %963 : vector<128xf32> to vector<1x128xf32>
    %cst_1598 = arith.constant 3.125000e-02 : f32
    %965 = vector.broadcast %cst_1598 : f32 to vector<1x128xf32>
    %966 = arith.mulf %961, %965 : vector<1x128xf32>
    %cst_1599 = arith.constant 3.125000e-02 : f32
    %967 = vector.broadcast %cst_1599 : f32 to vector<1x128xf32>
    %968 = arith.mulf %964, %967 : vector<1x128xf32>
    %969 = arith.mulf %966, %966 : vector<1x128xf32>
    %970 = arith.subf %968, %969 : vector<1x128xf32>
    %cst_1600 = arith.constant 0.000000e+00 : f32
    %971 = vector.broadcast %cst_1600 : f32 to vector<1x128xf32>
    %972 = arith.maximumf %970, %971 : vector<1x128xf32>
    %cst_1601 = arith.constant 9.99999974E-6 : f32
    %973 = vector.broadcast %cst_1601 : f32 to vector<1x128xf32>
    %974 = arith.addf %972, %973 : vector<1x128xf32>
    %975 = math.rsqrt %974 : vector<1x128xf32>
    %c1_1602 = arith.constant 1 : index
    %c0_1603 = arith.constant 0 : index
    %c0_1604 = arith.constant 0 : index
    %976 = vector.load %arg4[%c1_1602, %c0_1603, %c0_1604] : memref<4x1x128xf32, #tpu.memory_space<vmem>>, vector<1x1x128xf32>
    %977 = vector.shape_cast %976 : vector<1x1x128xf32> to vector<1x128xf32>
    %978 = arith.mulf %977, %975 : vector<1x128xf32>
    %c1_1605 = arith.constant 1 : index
    %c0_1606 = arith.constant 0 : index
    %c0_1607 = arith.constant 0 : index
    %979 = vector.load %arg5[%c1_1605, %c0_1606, %c0_1607] : memref<4x1x128xf32, #tpu.memory_space<vmem>>, vector<1x1x128xf32>
    %980 = vector.shape_cast %979 : vector<1x1x128xf32> to vector<1x128xf32>
    %981 = arith.mulf %966, %978 : vector<1x128xf32>
    %982 = arith.subf %980, %981 : vector<1x128xf32>
    %983 = vector.broadcast %978 : vector<1x128xf32> to vector<32x128xf32>
    %984 = arith.mulf %959, %983 : vector<32x128xf32>
    %985 = vector.broadcast %982 : vector<1x128xf32> to vector<32x128xf32>
    %986 = arith.addf %984, %985 : vector<32x128xf32>
    %c0_1608 = arith.constant 0 : index
    %c0_1609 = arith.constant 0 : index
    %987 = vector.load %arg7[%c0_1608, %c0_1609] : memref<32x32xbf16, #tpu.memory_space<vmem>>, vector<32x32xbf16>
    %988 = arith.truncf %986 : vector<32x128xf32> to vector<32x128xbf16>
    %cst_1610 = arith.constant dense<0.000000e+00> : vector<32x128xf32>
    %989 = tpu.matmul %987, %988, %cst_1610 {dimension_numbers = #tpu.dot_dimension_numbers<[1], [0], [0], [1], [0, 0, 1, 1], [], []>} : vector<32x32xbf16>, vector<32x128xbf16>, vector<32x128xf32> -> vector<32x128xf32>
    %990 = vector.extract_strided_slice %989 {offsets = [0, 0], sizes = [2, 8], strides = [1, 1]} : vector<32x128xf32> to vector<2x8xf32>
    %c0_1611 = arith.constant 0 : index
    %c1_1612 = arith.constant 1 : index
    %c3_1613 = arith.constant 3 : index
    %c0_1614 = arith.constant 0 : index
    %991 = vector.load %arg12[%c0_1611, %c1_1612, %c3_1613, %c0_1614] : memref<2x6x6x8xf32, #tpu.memory_space<vmem>>, vector<1x1x2x8xf32>
    %992 = vector.shape_cast %991 : vector<1x1x2x8xf32> to vector<2x8xf32>
    %993 = vector.shape_cast %990 : vector<2x8xf32> to vector<1x1x2x8xf32>
    tpu.vector_store %arg12[%c0_1611, %c1_1612, %c3_1613, %c0_1614], %993 {strides = array<i32>} : memref<2x6x6x8xf32, #tpu.memory_space<vmem>>, vector<1x1x2x8xf32>,
    %994 = vector.extract_strided_slice %989 {offsets = [2, 0], sizes = [2, 8], strides = [1, 1]} : vector<32x128xf32> to vector<2x8xf32>
    %c0_1615 = arith.constant 0 : index
    %c1_1616 = arith.constant 1 : index
    %c1_1617 = arith.constant 1 : index
    %c0_1618 = arith.constant 0 : index
    %995 = vector.load %arg12[%c0_1615, %c1_1616, %c1_1617, %c0_1618] : memref<2x6x6x8xf32, #tpu.memory_space<vmem>>, vector<1x1x2x8xf32>
    %996 = vector.shape_cast %995 : vector<1x1x2x8xf32> to vector<2x8xf32>
    %997 = vector.shape_cast %994 : vector<2x8xf32> to vector<1x1x2x8xf32>
    tpu.vector_store %arg12[%c0_1615, %c1_1616, %c1_1617, %c0_1618], %997 {strides = array<i32>} : memref<2x6x6x8xf32, #tpu.memory_space<vmem>>, vector<1x1x2x8xf32>,
    %998 = vector.extract_strided_slice %989 {offsets = [4, 0], sizes = [2, 8], strides = [1, 1]} : vector<32x128xf32> to vector<2x8xf32>
    %c0_1619 = arith.constant 0 : index
    %c2_1620 = arith.constant 2 : index
    %c3_1621 = arith.constant 3 : index
    %c0_1622 = arith.constant 0 : index
    %999 = vector.load %arg12[%c0_1619, %c2_1620, %c3_1621, %c0_1622] : memref<2x6x6x8xf32, #tpu.memory_space<vmem>>, vector<1x1x2x8xf32>
    %1000 = vector.shape_cast %999 : vector<1x1x2x8xf32> to vector<2x8xf32>
    %1001 = vector.shape_cast %998 : vector<2x8xf32> to vector<1x1x2x8xf32>
    tpu.vector_store %arg12[%c0_1619, %c2_1620, %c3_1621, %c0_1622], %1001 {strides = array<i32>} : memref<2x6x6x8xf32, #tpu.memory_space<vmem>>, vector<1x1x2x8xf32>,
    %1002 = vector.extract_strided_slice %989 {offsets = [6, 0], sizes = [2, 8], strides = [1, 1]} : vector<32x128xf32> to vector<2x8xf32>
    %c0_1623 = arith.constant 0 : index
    %c2_1624 = arith.constant 2 : index
    %c1_1625 = arith.constant 1 : index
    %c0_1626 = arith.constant 0 : index
    %1003 = vector.load %arg12[%c0_1623, %c2_1624, %c1_1625, %c0_1626] : memref<2x6x6x8xf32, #tpu.memory_space<vmem>>, vector<1x1x2x8xf32>
    %1004 = vector.shape_cast %1003 : vector<1x1x2x8xf32> to vector<2x8xf32>
    %1005 = vector.shape_cast %1002 : vector<2x8xf32> to vector<1x1x2x8xf32>
    tpu.vector_store %arg12[%c0_1623, %c2_1624, %c1_1625, %c0_1626], %1005 {strides = array<i32>} : memref<2x6x6x8xf32, #tpu.memory_space<vmem>>, vector<1x1x2x8xf32>,
    %1006 = vector.extract_strided_slice %989 {offsets = [8, 0], sizes = [2, 8], strides = [1, 1]} : vector<32x128xf32> to vector<2x8xf32>
    %c0_1627 = arith.constant 0 : index
    %c3_1628 = arith.constant 3 : index
    %c3_1629 = arith.constant 3 : index
    %c0_1630 = arith.constant 0 : index
    %1007 = vector.load %arg12[%c0_1627, %c3_1628, %c3_1629, %c0_1630] : memref<2x6x6x8xf32, #tpu.memory_space<vmem>>, vector<1x1x2x8xf32>
    %1008 = vector.shape_cast %1007 : vector<1x1x2x8xf32> to vector<2x8xf32>
    %1009 = vector.shape_cast %1006 : vector<2x8xf32> to vector<1x1x2x8xf32>
    tpu.vector_store %arg12[%c0_1627, %c3_1628, %c3_1629, %c0_1630], %1009 {strides = array<i32>} : memref<2x6x6x8xf32, #tpu.memory_space<vmem>>, vector<1x1x2x8xf32>,
    %1010 = vector.extract_strided_slice %989 {offsets = [10, 0], sizes = [2, 8], strides = [1, 1]} : vector<32x128xf32> to vector<2x8xf32>
    %c0_1631 = arith.constant 0 : index
    %c3_1632 = arith.constant 3 : index
    %c1_1633 = arith.constant 1 : index
    %c0_1634 = arith.constant 0 : index
    %1011 = vector.load %arg12[%c0_1631, %c3_1632, %c1_1633, %c0_1634] : memref<2x6x6x8xf32, #tpu.memory_space<vmem>>, vector<1x1x2x8xf32>
    %1012 = vector.shape_cast %1011 : vector<1x1x2x8xf32> to vector<2x8xf32>
    %1013 = vector.shape_cast %1010 : vector<2x8xf32> to vector<1x1x2x8xf32>
    tpu.vector_store %arg12[%c0_1631, %c3_1632, %c1_1633, %c0_1634], %1013 {strides = array<i32>} : memref<2x6x6x8xf32, #tpu.memory_space<vmem>>, vector<1x1x2x8xf32>,
    %1014 = vector.extract_strided_slice %989 {offsets = [12, 0], sizes = [2, 8], strides = [1, 1]} : vector<32x128xf32> to vector<2x8xf32>
    %c0_1635 = arith.constant 0 : index
    %c4_1636 = arith.constant 4 : index
    %c3_1637 = arith.constant 3 : index
    %c0_1638 = arith.constant 0 : index
    %1015 = vector.load %arg12[%c0_1635, %c4_1636, %c3_1637, %c0_1638] : memref<2x6x6x8xf32, #tpu.memory_space<vmem>>, vector<1x1x2x8xf32>
    %1016 = vector.shape_cast %1015 : vector<1x1x2x8xf32> to vector<2x8xf32>
    %1017 = vector.shape_cast %1014 : vector<2x8xf32> to vector<1x1x2x8xf32>
    tpu.vector_store %arg12[%c0_1635, %c4_1636, %c3_1637, %c0_1638], %1017 {strides = array<i32>} : memref<2x6x6x8xf32, #tpu.memory_space<vmem>>, vector<1x1x2x8xf32>,
    %1018 = vector.extract_strided_slice %989 {offsets = [14, 0], sizes = [2, 8], strides = [1, 1]} : vector<32x128xf32> to vector<2x8xf32>
    %c0_1639 = arith.constant 0 : index
    %c4_1640 = arith.constant 4 : index
    %c1_1641 = arith.constant 1 : index
    %c0_1642 = arith.constant 0 : index
    %1019 = vector.load %arg12[%c0_1639, %c4_1640, %c1_1641, %c0_1642] : memref<2x6x6x8xf32, #tpu.memory_space<vmem>>, vector<1x1x2x8xf32>
    %1020 = vector.shape_cast %1019 : vector<1x1x2x8xf32> to vector<2x8xf32>
    %1021 = vector.shape_cast %1018 : vector<2x8xf32> to vector<1x1x2x8xf32>
    tpu.vector_store %arg12[%c0_1639, %c4_1640, %c1_1641, %c0_1642], %1021 {strides = array<i32>} : memref<2x6x6x8xf32, #tpu.memory_space<vmem>>, vector<1x1x2x8xf32>,
    %1022 = vector.extract_strided_slice %989 {offsets = [16, 0], sizes = [2, 8], strides = [1, 1]} : vector<32x128xf32> to vector<2x8xf32>
    %c1_1643 = arith.constant 1 : index
    %c1_1644 = arith.constant 1 : index
    %c3_1645 = arith.constant 3 : index
    %c0_1646 = arith.constant 0 : index
    %1023 = vector.load %arg12[%c1_1643, %c1_1644, %c3_1645, %c0_1646] : memref<2x6x6x8xf32, #tpu.memory_space<vmem>>, vector<1x1x2x8xf32>
    %1024 = vector.shape_cast %1023 : vector<1x1x2x8xf32> to vector<2x8xf32>
    %1025 = vector.shape_cast %1022 : vector<2x8xf32> to vector<1x1x2x8xf32>
    tpu.vector_store %arg12[%c1_1643, %c1_1644, %c3_1645, %c0_1646], %1025 {strides = array<i32>} : memref<2x6x6x8xf32, #tpu.memory_space<vmem>>, vector<1x1x2x8xf32>,
    %1026 = vector.extract_strided_slice %989 {offsets = [18, 0], sizes = [2, 8], strides = [1, 1]} : vector<32x128xf32> to vector<2x8xf32>
    %c1_1647 = arith.constant 1 : index
    %c1_1648 = arith.constant 1 : index
    %c1_1649 = arith.constant 1 : index
    %c0_1650 = arith.constant 0 : index
    %1027 = vector.load %arg12[%c1_1647, %c1_1648, %c1_1649, %c0_1650] : memref<2x6x6x8xf32, #tpu.memory_space<vmem>>, vector<1x1x2x8xf32>
    %1028 = vector.shape_cast %1027 : vector<1x1x2x8xf32> to vector<2x8xf32>
    %1029 = vector.shape_cast %1026 : vector<2x8xf32> to vector<1x1x2x8xf32>
    tpu.vector_store %arg12[%c1_1647, %c1_1648, %c1_1649, %c0_1650], %1029 {strides = array<i32>} : memref<2x6x6x8xf32, #tpu.memory_space<vmem>>, vector<1x1x2x8xf32>,
    %1030 = vector.extract_strided_slice %989 {offsets = [20, 0], sizes = [2, 8], strides = [1, 1]} : vector<32x128xf32> to vector<2x8xf32>
    %c1_1651 = arith.constant 1 : index
    %c2_1652 = arith.constant 2 : index
    %c3_1653 = arith.constant 3 : index
    %c0_1654 = arith.constant 0 : index
    %1031 = vector.load %arg12[%c1_1651, %c2_1652, %c3_1653, %c0_1654] : memref<2x6x6x8xf32, #tpu.memory_space<vmem>>, vector<1x1x2x8xf32>
    %1032 = vector.shape_cast %1031 : vector<1x1x2x8xf32> to vector<2x8xf32>
    %1033 = vector.shape_cast %1030 : vector<2x8xf32> to vector<1x1x2x8xf32>
    tpu.vector_store %arg12[%c1_1651, %c2_1652, %c3_1653, %c0_1654], %1033 {strides = array<i32>} : memref<2x6x6x8xf32, #tpu.memory_space<vmem>>, vector<1x1x2x8xf32>,
    %1034 = vector.extract_strided_slice %989 {offsets = [22, 0], sizes = [2, 8], strides = [1, 1]} : vector<32x128xf32> to vector<2x8xf32>
    %c1_1655 = arith.constant 1 : index
    %c2_1656 = arith.constant 2 : index
    %c1_1657 = arith.constant 1 : index
    %c0_1658 = arith.constant 0 : index
    %1035 = vector.load %arg12[%c1_1655, %c2_1656, %c1_1657, %c0_1658] : memref<2x6x6x8xf32, #tpu.memory_space<vmem>>, vector<1x1x2x8xf32>
    %1036 = vector.shape_cast %1035 : vector<1x1x2x8xf32> to vector<2x8xf32>
    %1037 = vector.shape_cast %1034 : vector<2x8xf32> to vector<1x1x2x8xf32>
    tpu.vector_store %arg12[%c1_1655, %c2_1656, %c1_1657, %c0_1658], %1037 {strides = array<i32>} : memref<2x6x6x8xf32, #tpu.memory_space<vmem>>, vector<1x1x2x8xf32>,
    %1038 = vector.extract_strided_slice %989 {offsets = [24, 0], sizes = [2, 8], strides = [1, 1]} : vector<32x128xf32> to vector<2x8xf32>
    %c1_1659 = arith.constant 1 : index
    %c3_1660 = arith.constant 3 : index
    %c3_1661 = arith.constant 3 : index
    %c0_1662 = arith.constant 0 : index
    %1039 = vector.load %arg12[%c1_1659, %c3_1660, %c3_1661, %c0_1662] : memref<2x6x6x8xf32, #tpu.memory_space<vmem>>, vector<1x1x2x8xf32>
    %1040 = vector.shape_cast %1039 : vector<1x1x2x8xf32> to vector<2x8xf32>
    %1041 = vector.shape_cast %1038 : vector<2x8xf32> to vector<1x1x2x8xf32>
    tpu.vector_store %arg12[%c1_1659, %c3_1660, %c3_1661, %c0_1662], %1041 {strides = array<i32>} : memref<2x6x6x8xf32, #tpu.memory_space<vmem>>, vector<1x1x2x8xf32>,
    %1042 = vector.extract_strided_slice %989 {offsets = [26, 0], sizes = [2, 8], strides = [1, 1]} : vector<32x128xf32> to vector<2x8xf32>
    %c1_1663 = arith.constant 1 : index
    %c3_1664 = arith.constant 3 : index
    %c1_1665 = arith.constant 1 : index
    %c0_1666 = arith.constant 0 : index
    %1043 = vector.load %arg12[%c1_1663, %c3_1664, %c1_1665, %c0_1666] : memref<2x6x6x8xf32, #tpu.memory_space<vmem>>, vector<1x1x2x8xf32>
    %1044 = vector.shape_cast %1043 : vector<1x1x2x8xf32> to vector<2x8xf32>
    %1045 = vector.shape_cast %1042 : vector<2x8xf32> to vector<1x1x2x8xf32>
    tpu.vector_store %arg12[%c1_1663, %c3_1664, %c1_1665, %c0_1666], %1045 {strides = array<i32>} : memref<2x6x6x8xf32, #tpu.memory_space<vmem>>, vector<1x1x2x8xf32>,
    %1046 = vector.extract_strided_slice %989 {offsets = [28, 0], sizes = [2, 8], strides = [1, 1]} : vector<32x128xf32> to vector<2x8xf32>
    %c1_1667 = arith.constant 1 : index
    %c4_1668 = arith.constant 4 : index
    %c3_1669 = arith.constant 3 : index
    %c0_1670 = arith.constant 0 : index
    %1047 = vector.load %arg12[%c1_1667, %c4_1668, %c3_1669, %c0_1670] : memref<2x6x6x8xf32, #tpu.memory_space<vmem>>, vector<1x1x2x8xf32>
    %1048 = vector.shape_cast %1047 : vector<1x1x2x8xf32> to vector<2x8xf32>
    %1049 = vector.shape_cast %1046 : vector<2x8xf32> to vector<1x1x2x8xf32>
    tpu.vector_store %arg12[%c1_1667, %c4_1668, %c3_1669, %c0_1670], %1049 {strides = array<i32>} : memref<2x6x6x8xf32, #tpu.memory_space<vmem>>, vector<1x1x2x8xf32>,
    %1050 = vector.extract_strided_slice %989 {offsets = [30, 0], sizes = [2, 8], strides = [1, 1]} : vector<32x128xf32> to vector<2x8xf32>
    %c1_1671 = arith.constant 1 : index
    %c4_1672 = arith.constant 4 : index
    %c1_1673 = arith.constant 1 : index
    %c0_1674 = arith.constant 0 : index
    %1051 = vector.load %arg12[%c1_1671, %c4_1672, %c1_1673, %c0_1674] : memref<2x6x6x8xf32, #tpu.memory_space<vmem>>, vector<1x1x2x8xf32>
    %1052 = vector.shape_cast %1051 : vector<1x1x2x8xf32> to vector<2x8xf32>
    %1053 = vector.shape_cast %1050 : vector<2x8xf32> to vector<1x1x2x8xf32>
    tpu.vector_store %arg12[%c1_1671, %c4_1672, %c1_1673, %c0_1674], %1053 {strides = array<i32>} : memref<2x6x6x8xf32, #tpu.memory_space<vmem>>, vector<1x1x2x8xf32>,
    %c0_1675 = arith.constant 0 : index
    %c0_1676 = arith.constant 0 : index
    %c0_1677 = arith.constant 0 : index
    %c0_1678 = arith.constant 0 : index
    %1054 = vector.load %arg12[%c0_1675, %c0_1676, %c0_1677, %c0_1678] : memref<2x6x6x8xf32, #tpu.memory_space<vmem>>, vector<1x1x2x8xf32>
    %1055 = vector.shape_cast %1054 : vector<1x1x2x8xf32> to vector<2x8xf32>
    %c0_1679 = arith.constant 0 : index
    %c0_1680 = arith.constant 0 : index
    %1056 = vector.load %arg14[%c0_1679, %c0_1680] : memref<128x128xf32, #tpu.memory_space<vmem>>, vector<2x8xf32>
    tpu.vector_store %arg14[%c0_1679, %c0_1680], %1055 {strides = array<i32>} : memref<128x128xf32, #tpu.memory_space<vmem>>, vector<2x8xf32>,
    %c0_1681 = arith.constant 0 : index
    %c0_1682 = arith.constant 0 : index
    %c3_1683 = arith.constant 3 : index
    %c0_1684 = arith.constant 0 : index
    %1057 = vector.load %arg12[%c0_1681, %c0_1682, %c3_1683, %c0_1684] : memref<2x6x6x8xf32, #tpu.memory_space<vmem>>, vector<1x1x2x8xf32>
    %1058 = vector.shape_cast %1057 : vector<1x1x2x8xf32> to vector<2x8xf32>
    %c0_1685 = arith.constant 0 : index
    %c8_1686 = arith.constant 8 : index
    %1059 = vector.load %arg14[%c0_1685, %c8_1686] : memref<128x128xf32, #tpu.memory_space<vmem>>, vector<2x8xf32>
    tpu.vector_store %arg14[%c0_1685, %c8_1686], %1058 {strides = array<i32>} : memref<128x128xf32, #tpu.memory_space<vmem>>, vector<2x8xf32>,
    %c0_1687 = arith.constant 0 : index
    %c0_1688 = arith.constant 0 : index
    %c1_1689 = arith.constant 1 : index
    %c0_1690 = arith.constant 0 : index
    %1060 = vector.load %arg12[%c0_1687, %c0_1688, %c1_1689, %c0_1690] : memref<2x6x6x8xf32, #tpu.memory_space<vmem>>, vector<1x1x2x8xf32>
    %1061 = vector.shape_cast %1060 : vector<1x1x2x8xf32> to vector<2x8xf32>
    %c0_1691 = arith.constant 0 : index
    %c16_1692 = arith.constant 16 : index
    %1062 = vector.load %arg14[%c0_1691, %c16_1692] : memref<128x128xf32, #tpu.memory_space<vmem>>, vector<2x8xf32>
    tpu.vector_store %arg14[%c0_1691, %c16_1692], %1061 {strides = array<i32>} : memref<128x128xf32, #tpu.memory_space<vmem>>, vector<2x8xf32>,
    %c0_1693 = arith.constant 0 : index
    %c1_1694 = arith.constant 1 : index
    %c0_1695 = arith.constant 0 : index
    %c0_1696 = arith.constant 0 : index
    %1063 = vector.load %arg12[%c0_1693, %c1_1694, %c0_1695, %c0_1696] : memref<2x6x6x8xf32, #tpu.memory_space<vmem>>, vector<1x1x2x8xf32>
    %1064 = vector.shape_cast %1063 : vector<1x1x2x8xf32> to vector<2x8xf32>
    %c0_1697 = arith.constant 0 : index
    %c24_1698 = arith.constant 24 : index
    %1065 = vector.load %arg14[%c0_1697, %c24_1698] : memref<128x128xf32, #tpu.memory_space<vmem>>, vector<2x8xf32>
    tpu.vector_store %arg14[%c0_1697, %c24_1698], %1064 {strides = array<i32>} : memref<128x128xf32, #tpu.memory_space<vmem>>, vector<2x8xf32>,
    %c0_1699 = arith.constant 0 : index
    %c1_1700 = arith.constant 1 : index
    %c3_1701 = arith.constant 3 : index
    %c0_1702 = arith.constant 0 : index
    %1066 = vector.load %arg12[%c0_1699, %c1_1700, %c3_1701, %c0_1702] : memref<2x6x6x8xf32, #tpu.memory_space<vmem>>, vector<1x1x2x8xf32>
    %1067 = vector.shape_cast %1066 : vector<1x1x2x8xf32> to vector<2x8xf32>
    %c0_1703 = arith.constant 0 : index
    %c32_1704 = arith.constant 32 : index
    %1068 = vector.load %arg14[%c0_1703, %c32_1704] : memref<128x128xf32, #tpu.memory_space<vmem>>, vector<2x8xf32>
    tpu.vector_store %arg14[%c0_1703, %c32_1704], %1067 {strides = array<i32>} : memref<128x128xf32, #tpu.memory_space<vmem>>, vector<2x8xf32>,
    %c0_1705 = arith.constant 0 : index
    %c1_1706 = arith.constant 1 : index
    %c1_1707 = arith.constant 1 : index
    %c0_1708 = arith.constant 0 : index
    %1069 = vector.load %arg12[%c0_1705, %c1_1706, %c1_1707, %c0_1708] : memref<2x6x6x8xf32, #tpu.memory_space<vmem>>, vector<1x1x2x8xf32>
    %1070 = vector.shape_cast %1069 : vector<1x1x2x8xf32> to vector<2x8xf32>
    %c0_1709 = arith.constant 0 : index
    %c40_1710 = arith.constant 40 : index
    %1071 = vector.load %arg14[%c0_1709, %c40_1710] : memref<128x128xf32, #tpu.memory_space<vmem>>, vector<2x8xf32>
    tpu.vector_store %arg14[%c0_1709, %c40_1710], %1070 {strides = array<i32>} : memref<128x128xf32, #tpu.memory_space<vmem>>, vector<2x8xf32>,
    %c0_1711 = arith.constant 0 : index
    %c2_1712 = arith.constant 2 : index
    %c0_1713 = arith.constant 0 : index
    %c0_1714 = arith.constant 0 : index
    %1072 = vector.load %arg12[%c0_1711, %c2_1712, %c0_1713, %c0_1714] : memref<2x6x6x8xf32, #tpu.memory_space<vmem>>, vector<1x1x2x8xf32>
    %1073 = vector.shape_cast %1072 : vector<1x1x2x8xf32> to vector<2x8xf32>
    %c0_1715 = arith.constant 0 : index
    %c48_1716 = arith.constant 48 : index
    %1074 = vector.load %arg14[%c0_1715, %c48_1716] : memref<128x128xf32, #tpu.memory_space<vmem>>, vector<2x8xf32>
    tpu.vector_store %arg14[%c0_1715, %c48_1716], %1073 {strides = array<i32>} : memref<128x128xf32, #tpu.memory_space<vmem>>, vector<2x8xf32>,
    %c0_1717 = arith.constant 0 : index
    %c2_1718 = arith.constant 2 : index
    %c3_1719 = arith.constant 3 : index
    %c0_1720 = arith.constant 0 : index
    %1075 = vector.load %arg12[%c0_1717, %c2_1718, %c3_1719, %c0_1720] : memref<2x6x6x8xf32, #tpu.memory_space<vmem>>, vector<1x1x2x8xf32>
    %1076 = vector.shape_cast %1075 : vector<1x1x2x8xf32> to vector<2x8xf32>
    %c0_1721 = arith.constant 0 : index
    %c56_1722 = arith.constant 56 : index
    %1077 = vector.load %arg14[%c0_1721, %c56_1722] : memref<128x128xf32, #tpu.memory_space<vmem>>, vector<2x8xf32>
    tpu.vector_store %arg14[%c0_1721, %c56_1722], %1076 {strides = array<i32>} : memref<128x128xf32, #tpu.memory_space<vmem>>, vector<2x8xf32>,
    %c0_1723 = arith.constant 0 : index
    %c2_1724 = arith.constant 2 : index
    %c1_1725 = arith.constant 1 : index
    %c0_1726 = arith.constant 0 : index
    %1078 = vector.load %arg12[%c0_1723, %c2_1724, %c1_1725, %c0_1726] : memref<2x6x6x8xf32, #tpu.memory_space<vmem>>, vector<1x1x2x8xf32>
    %1079 = vector.shape_cast %1078 : vector<1x1x2x8xf32> to vector<2x8xf32>
    %c0_1727 = arith.constant 0 : index
    %c64_1728 = arith.constant 64 : index
    %1080 = vector.load %arg14[%c0_1727, %c64_1728] : memref<128x128xf32, #tpu.memory_space<vmem>>, vector<2x8xf32>
    tpu.vector_store %arg14[%c0_1727, %c64_1728], %1079 {strides = array<i32>} : memref<128x128xf32, #tpu.memory_space<vmem>>, vector<2x8xf32>,
    %c0_1729 = arith.constant 0 : index
    %c2_1730 = arith.constant 2 : index
    %c0_1731 = arith.constant 0 : index
    %c0_1732 = arith.constant 0 : index
    %1081 = vector.load %arg12[%c0_1729, %c2_1730, %c0_1731, %c0_1732] : memref<2x6x6x8xf32, #tpu.memory_space<vmem>>, vector<1x1x2x8xf32>
    %1082 = vector.shape_cast %1081 : vector<1x1x2x8xf32> to vector<2x8xf32>
    %c2_1733 = arith.constant 2 : index
    %c0_1734 = arith.constant 0 : index
    %1083 = vector.load %arg14[%c2_1733, %c0_1734] : memref<128x128xf32, #tpu.memory_space<vmem>>, vector<2x8xf32>
    tpu.vector_store %arg14[%c2_1733, %c0_1734], %1082 {strides = array<i32>} : memref<128x128xf32, #tpu.memory_space<vmem>>, vector<2x8xf32>,
    %c0_1735 = arith.constant 0 : index
    %c2_1736 = arith.constant 2 : index
    %c3_1737 = arith.constant 3 : index
    %c0_1738 = arith.constant 0 : index
    %1084 = vector.load %arg12[%c0_1735, %c2_1736, %c3_1737, %c0_1738] : memref<2x6x6x8xf32, #tpu.memory_space<vmem>>, vector<1x1x2x8xf32>
    %1085 = vector.shape_cast %1084 : vector<1x1x2x8xf32> to vector<2x8xf32>
    %c2_1739 = arith.constant 2 : index
    %c8_1740 = arith.constant 8 : index
    %1086 = vector.load %arg14[%c2_1739, %c8_1740] : memref<128x128xf32, #tpu.memory_space<vmem>>, vector<2x8xf32>
    tpu.vector_store %arg14[%c2_1739, %c8_1740], %1085 {strides = array<i32>} : memref<128x128xf32, #tpu.memory_space<vmem>>, vector<2x8xf32>,
    %c0_1741 = arith.constant 0 : index
    %c2_1742 = arith.constant 2 : index
    %c1_1743 = arith.constant 1 : index
    %c0_1744 = arith.constant 0 : index
    %1087 = vector.load %arg12[%c0_1741, %c2_1742, %c1_1743, %c0_1744] : memref<2x6x6x8xf32, #tpu.memory_space<vmem>>, vector<1x1x2x8xf32>
    %1088 = vector.shape_cast %1087 : vector<1x1x2x8xf32> to vector<2x8xf32>
    %c2_1745 = arith.constant 2 : index
    %c16_1746 = arith.constant 16 : index
    %1089 = vector.load %arg14[%c2_1745, %c16_1746] : memref<128x128xf32, #tpu.memory_space<vmem>>, vector<2x8xf32>
    tpu.vector_store %arg14[%c2_1745, %c16_1746], %1088 {strides = array<i32>} : memref<128x128xf32, #tpu.memory_space<vmem>>, vector<2x8xf32>,
    %c0_1747 = arith.constant 0 : index
    %c3_1748 = arith.constant 3 : index
    %c0_1749 = arith.constant 0 : index
    %c0_1750 = arith.constant 0 : index
    %1090 = vector.load %arg12[%c0_1747, %c3_1748, %c0_1749, %c0_1750] : memref<2x6x6x8xf32, #tpu.memory_space<vmem>>, vector<1x1x2x8xf32>
    %1091 = vector.shape_cast %1090 : vector<1x1x2x8xf32> to vector<2x8xf32>
    %c2_1751 = arith.constant 2 : index
    %c24_1752 = arith.constant 24 : index
    %1092 = vector.load %arg14[%c2_1751, %c24_1752] : memref<128x128xf32, #tpu.memory_space<vmem>>, vector<2x8xf32>
    tpu.vector_store %arg14[%c2_1751, %c24_1752], %1091 {strides = array<i32>} : memref<128x128xf32, #tpu.memory_space<vmem>>, vector<2x8xf32>,
    %c0_1753 = arith.constant 0 : index
    %c3_1754 = arith.constant 3 : index
    %c3_1755 = arith.constant 3 : index
    %c0_1756 = arith.constant 0 : index
    %1093 = vector.load %arg12[%c0_1753, %c3_1754, %c3_1755, %c0_1756] : memref<2x6x6x8xf32, #tpu.memory_space<vmem>>, vector<1x1x2x8xf32>
    %1094 = vector.shape_cast %1093 : vector<1x1x2x8xf32> to vector<2x8xf32>
    %c2_1757 = arith.constant 2 : index
    %c32_1758 = arith.constant 32 : index
    %1095 = vector.load %arg14[%c2_1757, %c32_1758] : memref<128x128xf32, #tpu.memory_space<vmem>>, vector<2x8xf32>
    tpu.vector_store %arg14[%c2_1757, %c32_1758], %1094 {strides = array<i32>} : memref<128x128xf32, #tpu.memory_space<vmem>>, vector<2x8xf32>,
    %c0_1759 = arith.constant 0 : index
    %c3_1760 = arith.constant 3 : index
    %c1_1761 = arith.constant 1 : index
    %c0_1762 = arith.constant 0 : index
    %1096 = vector.load %arg12[%c0_1759, %c3_1760, %c1_1761, %c0_1762] : memref<2x6x6x8xf32, #tpu.memory_space<vmem>>, vector<1x1x2x8xf32>
    %1097 = vector.shape_cast %1096 : vector<1x1x2x8xf32> to vector<2x8xf32>
    %c2_1763 = arith.constant 2 : index
    %c40_1764 = arith.constant 40 : index
    %1098 = vector.load %arg14[%c2_1763, %c40_1764] : memref<128x128xf32, #tpu.memory_space<vmem>>, vector<2x8xf32>
    tpu.vector_store %arg14[%c2_1763, %c40_1764], %1097 {strides = array<i32>} : memref<128x128xf32, #tpu.memory_space<vmem>>, vector<2x8xf32>,
    %c0_1765 = arith.constant 0 : index
    %c4_1766 = arith.constant 4 : index
    %c0_1767 = arith.constant 0 : index
    %c0_1768 = arith.constant 0 : index
    %1099 = vector.load %arg12[%c0_1765, %c4_1766, %c0_1767, %c0_1768] : memref<2x6x6x8xf32, #tpu.memory_space<vmem>>, vector<1x1x2x8xf32>
    %1100 = vector.shape_cast %1099 : vector<1x1x2x8xf32> to vector<2x8xf32>
    %c2_1769 = arith.constant 2 : index
    %c48_1770 = arith.constant 48 : index
    %1101 = vector.load %arg14[%c2_1769, %c48_1770] : memref<128x128xf32, #tpu.memory_space<vmem>>, vector<2x8xf32>
    tpu.vector_store %arg14[%c2_1769, %c48_1770], %1100 {strides = array<i32>} : memref<128x128xf32, #tpu.memory_space<vmem>>, vector<2x8xf32>,
    %c0_1771 = arith.constant 0 : index
    %c4_1772 = arith.constant 4 : index
    %c3_1773 = arith.constant 3 : index
    %c0_1774 = arith.constant 0 : index
    %1102 = vector.load %arg12[%c0_1771, %c4_1772, %c3_1773, %c0_1774] : memref<2x6x6x8xf32, #tpu.memory_space<vmem>>, vector<1x1x2x8xf32>
    %1103 = vector.shape_cast %1102 : vector<1x1x2x8xf32> to vector<2x8xf32>
    %c2_1775 = arith.constant 2 : index
    %c56_1776 = arith.constant 56 : index
    %1104 = vector.load %arg14[%c2_1775, %c56_1776] : memref<128x128xf32, #tpu.memory_space<vmem>>, vector<2x8xf32>
    tpu.vector_store %arg14[%c2_1775, %c56_1776], %1103 {strides = array<i32>} : memref<128x128xf32, #tpu.memory_space<vmem>>, vector<2x8xf32>,
    %c0_1777 = arith.constant 0 : index
    %c4_1778 = arith.constant 4 : index
    %c1_1779 = arith.constant 1 : index
    %c0_1780 = arith.constant 0 : index
    %1105 = vector.load %arg12[%c0_1777, %c4_1778, %c1_1779, %c0_1780] : memref<2x6x6x8xf32, #tpu.memory_space<vmem>>, vector<1x1x2x8xf32>
    %1106 = vector.shape_cast %1105 : vector<1x1x2x8xf32> to vector<2x8xf32>
    %c2_1781 = arith.constant 2 : index
    %c64_1782 = arith.constant 64 : index
    %1107 = vector.load %arg14[%c2_1781, %c64_1782] : memref<128x128xf32, #tpu.memory_space<vmem>>, vector<2x8xf32>
    tpu.vector_store %arg14[%c2_1781, %c64_1782], %1106 {strides = array<i32>} : memref<128x128xf32, #tpu.memory_space<vmem>>, vector<2x8xf32>,
    %c1_1783 = arith.constant 1 : index
    %c0_1784 = arith.constant 0 : index
    %c0_1785 = arith.constant 0 : index
    %c0_1786 = arith.constant 0 : index
    %1108 = vector.load %arg12[%c1_1783, %c0_1784, %c0_1785, %c0_1786] : memref<2x6x6x8xf32, #tpu.memory_space<vmem>>, vector<1x1x2x8xf32>
    %1109 = vector.shape_cast %1108 : vector<1x1x2x8xf32> to vector<2x8xf32>
    %c4_1787 = arith.constant 4 : index
    %c0_1788 = arith.constant 0 : index
    %1110 = vector.load %arg14[%c4_1787, %c0_1788] : memref<128x128xf32, #tpu.memory_space<vmem>>, vector<2x8xf32>
    tpu.vector_store %arg14[%c4_1787, %c0_1788], %1109 {strides = array<i32>} : memref<128x128xf32, #tpu.memory_space<vmem>>, vector<2x8xf32>,
    %c1_1789 = arith.constant 1 : index
    %c0_1790 = arith.constant 0 : index
    %c3_1791 = arith.constant 3 : index
    %c0_1792 = arith.constant 0 : index
    %1111 = vector.load %arg12[%c1_1789, %c0_1790, %c3_1791, %c0_1792] : memref<2x6x6x8xf32, #tpu.memory_space<vmem>>, vector<1x1x2x8xf32>
    %1112 = vector.shape_cast %1111 : vector<1x1x2x8xf32> to vector<2x8xf32>
    %c4_1793 = arith.constant 4 : index
    %c8_1794 = arith.constant 8 : index
    %1113 = vector.load %arg14[%c4_1793, %c8_1794] : memref<128x128xf32, #tpu.memory_space<vmem>>, vector<2x8xf32>
    tpu.vector_store %arg14[%c4_1793, %c8_1794], %1112 {strides = array<i32>} : memref<128x128xf32, #tpu.memory_space<vmem>>, vector<2x8xf32>,
    %c1_1795 = arith.constant 1 : index
    %c0_1796 = arith.constant 0 : index
    %c1_1797 = arith.constant 1 : index
    %c0_1798 = arith.constant 0 : index
    %1114 = vector.load %arg12[%c1_1795, %c0_1796, %c1_1797, %c0_1798] : memref<2x6x6x8xf32, #tpu.memory_space<vmem>>, vector<1x1x2x8xf32>
    %1115 = vector.shape_cast %1114 : vector<1x1x2x8xf32> to vector<2x8xf32>
    %c4_1799 = arith.constant 4 : index
    %c16_1800 = arith.constant 16 : index
    %1116 = vector.load %arg14[%c4_1799, %c16_1800] : memref<128x128xf32, #tpu.memory_space<vmem>>, vector<2x8xf32>
    tpu.vector_store %arg14[%c4_1799, %c16_1800], %1115 {strides = array<i32>} : memref<128x128xf32, #tpu.memory_space<vmem>>, vector<2x8xf32>,
    %c1_1801 = arith.constant 1 : index
    %c1_1802 = arith.constant 1 : index
    %c0_1803 = arith.constant 0 : index
    %c0_1804 = arith.constant 0 : index
    %1117 = vector.load %arg12[%c1_1801, %c1_1802, %c0_1803, %c0_1804] : memref<2x6x6x8xf32, #tpu.memory_space<vmem>>, vector<1x1x2x8xf32>
    %1118 = vector.shape_cast %1117 : vector<1x1x2x8xf32> to vector<2x8xf32>
    %c4_1805 = arith.constant 4 : index
    %c24_1806 = arith.constant 24 : index
    %1119 = vector.load %arg14[%c4_1805, %c24_1806] : memref<128x128xf32, #tpu.memory_space<vmem>>, vector<2x8xf32>
    tpu.vector_store %arg14[%c4_1805, %c24_1806], %1118 {strides = array<i32>} : memref<128x128xf32, #tpu.memory_space<vmem>>, vector<2x8xf32>,
    %c1_1807 = arith.constant 1 : index
    %c1_1808 = arith.constant 1 : index
    %c3_1809 = arith.constant 3 : index
    %c0_1810 = arith.constant 0 : index
    %1120 = vector.load %arg12[%c1_1807, %c1_1808, %c3_1809, %c0_1810] : memref<2x6x6x8xf32, #tpu.memory_space<vmem>>, vector<1x1x2x8xf32>
    %1121 = vector.shape_cast %1120 : vector<1x1x2x8xf32> to vector<2x8xf32>
    %c4_1811 = arith.constant 4 : index
    %c32_1812 = arith.constant 32 : index
    %1122 = vector.load %arg14[%c4_1811, %c32_1812] : memref<128x128xf32, #tpu.memory_space<vmem>>, vector<2x8xf32>
    tpu.vector_store %arg14[%c4_1811, %c32_1812], %1121 {strides = array<i32>} : memref<128x128xf32, #tpu.memory_space<vmem>>, vector<2x8xf32>,
    %c1_1813 = arith.constant 1 : index
    %c1_1814 = arith.constant 1 : index
    %c1_1815 = arith.constant 1 : index
    %c0_1816 = arith.constant 0 : index
    %1123 = vector.load %arg12[%c1_1813, %c1_1814, %c1_1815, %c0_1816] : memref<2x6x6x8xf32, #tpu.memory_space<vmem>>, vector<1x1x2x8xf32>
    %1124 = vector.shape_cast %1123 : vector<1x1x2x8xf32> to vector<2x8xf32>
    %c4_1817 = arith.constant 4 : index
    %c40_1818 = arith.constant 40 : index
    %1125 = vector.load %arg14[%c4_1817, %c40_1818] : memref<128x128xf32, #tpu.memory_space<vmem>>, vector<2x8xf32>
    tpu.vector_store %arg14[%c4_1817, %c40_1818], %1124 {strides = array<i32>} : memref<128x128xf32, #tpu.memory_space<vmem>>, vector<2x8xf32>,
    %c1_1819 = arith.constant 1 : index
    %c2_1820 = arith.constant 2 : index
    %c0_1821 = arith.constant 0 : index
    %c0_1822 = arith.constant 0 : index
    %1126 = vector.load %arg12[%c1_1819, %c2_1820, %c0_1821, %c0_1822] : memref<2x6x6x8xf32, #tpu.memory_space<vmem>>, vector<1x1x2x8xf32>
    %1127 = vector.shape_cast %1126 : vector<1x1x2x8xf32> to vector<2x8xf32>
    %c4_1823 = arith.constant 4 : index
    %c48_1824 = arith.constant 48 : index
    %1128 = vector.load %arg14[%c4_1823, %c48_1824] : memref<128x128xf32, #tpu.memory_space<vmem>>, vector<2x8xf32>
    tpu.vector_store %arg14[%c4_1823, %c48_1824], %1127 {strides = array<i32>} : memref<128x128xf32, #tpu.memory_space<vmem>>, vector<2x8xf32>,
    %c1_1825 = arith.constant 1 : index
    %c2_1826 = arith.constant 2 : index
    %c3_1827 = arith.constant 3 : index
    %c0_1828 = arith.constant 0 : index
    %1129 = vector.load %arg12[%c1_1825, %c2_1826, %c3_1827, %c0_1828] : memref<2x6x6x8xf32, #tpu.memory_space<vmem>>, vector<1x1x2x8xf32>
    %1130 = vector.shape_cast %1129 : vector<1x1x2x8xf32> to vector<2x8xf32>
    %c4_1829 = arith.constant 4 : index
    %c56_1830 = arith.constant 56 : index
    %1131 = vector.load %arg14[%c4_1829, %c56_1830] : memref<128x128xf32, #tpu.memory_space<vmem>>, vector<2x8xf32>
    tpu.vector_store %arg14[%c4_1829, %c56_1830], %1130 {strides = array<i32>} : memref<128x128xf32, #tpu.memory_space<vmem>>, vector<2x8xf32>,
    %c1_1831 = arith.constant 1 : index
    %c2_1832 = arith.constant 2 : index
    %c1_1833 = arith.constant 1 : index
    %c0_1834 = arith.constant 0 : index
    %1132 = vector.load %arg12[%c1_1831, %c2_1832, %c1_1833, %c0_1834] : memref<2x6x6x8xf32, #tpu.memory_space<vmem>>, vector<1x1x2x8xf32>
    %1133 = vector.shape_cast %1132 : vector<1x1x2x8xf32> to vector<2x8xf32>
    %c4_1835 = arith.constant 4 : index
    %c64_1836 = arith.constant 64 : index
    %1134 = vector.load %arg14[%c4_1835, %c64_1836] : memref<128x128xf32, #tpu.memory_space<vmem>>, vector<2x8xf32>
    tpu.vector_store %arg14[%c4_1835, %c64_1836], %1133 {strides = array<i32>} : memref<128x128xf32, #tpu.memory_space<vmem>>, vector<2x8xf32>,
    %c1_1837 = arith.constant 1 : index
    %c2_1838 = arith.constant 2 : index
    %c0_1839 = arith.constant 0 : index
    %c0_1840 = arith.constant 0 : index
    %1135 = vector.load %arg12[%c1_1837, %c2_1838, %c0_1839, %c0_1840] : memref<2x6x6x8xf32, #tpu.memory_space<vmem>>, vector<1x1x2x8xf32>
    %1136 = vector.shape_cast %1135 : vector<1x1x2x8xf32> to vector<2x8xf32>
    %c6_1841 = arith.constant 6 : index
    %c0_1842 = arith.constant 0 : index
    %1137 = vector.load %arg14[%c6_1841, %c0_1842] : memref<128x128xf32, #tpu.memory_space<vmem>>, vector<2x8xf32>
    tpu.vector_store %arg14[%c6_1841, %c0_1842], %1136 {strides = array<i32>} : memref<128x128xf32, #tpu.memory_space<vmem>>, vector<2x8xf32>,
    %c1_1843 = arith.constant 1 : index
    %c2_1844 = arith.constant 2 : index
    %c3_1845 = arith.constant 3 : index
    %c0_1846 = arith.constant 0 : index
    %1138 = vector.load %arg12[%c1_1843, %c2_1844, %c3_1845, %c0_1846] : memref<2x6x6x8xf32, #tpu.memory_space<vmem>>, vector<1x1x2x8xf32>
    %1139 = vector.shape_cast %1138 : vector<1x1x2x8xf32> to vector<2x8xf32>
    %c6_1847 = arith.constant 6 : index
    %c8_1848 = arith.constant 8 : index
    %1140 = vector.load %arg14[%c6_1847, %c8_1848] : memref<128x128xf32, #tpu.memory_space<vmem>>, vector<2x8xf32>
    tpu.vector_store %arg14[%c6_1847, %c8_1848], %1139 {strides = array<i32>} : memref<128x128xf32, #tpu.memory_space<vmem>>, vector<2x8xf32>,
    %c1_1849 = arith.constant 1 : index
    %c2_1850 = arith.constant 2 : index
    %c1_1851 = arith.constant 1 : index
    %c0_1852 = arith.constant 0 : index
    %1141 = vector.load %arg12[%c1_1849, %c2_1850, %c1_1851, %c0_1852] : memref<2x6x6x8xf32, #tpu.memory_space<vmem>>, vector<1x1x2x8xf32>
    %1142 = vector.shape_cast %1141 : vector<1x1x2x8xf32> to vector<2x8xf32>
    %c6_1853 = arith.constant 6 : index
    %c16_1854 = arith.constant 16 : index
    %1143 = vector.load %arg14[%c6_1853, %c16_1854] : memref<128x128xf32, #tpu.memory_space<vmem>>, vector<2x8xf32>
    tpu.vector_store %arg14[%c6_1853, %c16_1854], %1142 {strides = array<i32>} : memref<128x128xf32, #tpu.memory_space<vmem>>, vector<2x8xf32>,
    %c1_1855 = arith.constant 1 : index
    %c3_1856 = arith.constant 3 : index
    %c0_1857 = arith.constant 0 : index
    %c0_1858 = arith.constant 0 : index
    %1144 = vector.load %arg12[%c1_1855, %c3_1856, %c0_1857, %c0_1858] : memref<2x6x6x8xf32, #tpu.memory_space<vmem>>, vector<1x1x2x8xf32>
    %1145 = vector.shape_cast %1144 : vector<1x1x2x8xf32> to vector<2x8xf32>
    %c6_1859 = arith.constant 6 : index
    %c24_1860 = arith.constant 24 : index
    %1146 = vector.load %arg14[%c6_1859, %c24_1860] : memref<128x128xf32, #tpu.memory_space<vmem>>, vector<2x8xf32>
    tpu.vector_store %arg14[%c6_1859, %c24_1860], %1145 {strides = array<i32>} : memref<128x128xf32, #tpu.memory_space<vmem>>, vector<2x8xf32>,
    %c1_1861 = arith.constant 1 : index
    %c3_1862 = arith.constant 3 : index
    %c3_1863 = arith.constant 3 : index
    %c0_1864 = arith.constant 0 : index
    %1147 = vector.load %arg12[%c1_1861, %c3_1862, %c3_1863, %c0_1864] : memref<2x6x6x8xf32, #tpu.memory_space<vmem>>, vector<1x1x2x8xf32>
    %1148 = vector.shape_cast %1147 : vector<1x1x2x8xf32> to vector<2x8xf32>
    %c6_1865 = arith.constant 6 : index
    %c32_1866 = arith.constant 32 : index
    %1149 = vector.load %arg14[%c6_1865, %c32_1866] : memref<128x128xf32, #tpu.memory_space<vmem>>, vector<2x8xf32>
    tpu.vector_store %arg14[%c6_1865, %c32_1866], %1148 {strides = array<i32>} : memref<128x128xf32, #tpu.memory_space<vmem>>, vector<2x8xf32>,
    %c1_1867 = arith.constant 1 : index
    %c3_1868 = arith.constant 3 : index
    %c1_1869 = arith.constant 1 : index
    %c0_1870 = arith.constant 0 : index
    %1150 = vector.load %arg12[%c1_1867, %c3_1868, %c1_1869, %c0_1870] : memref<2x6x6x8xf32, #tpu.memory_space<vmem>>, vector<1x1x2x8xf32>
    %1151 = vector.shape_cast %1150 : vector<1x1x2x8xf32> to vector<2x8xf32>
    %c6_1871 = arith.constant 6 : index
    %c40_1872 = arith.constant 40 : index
    %1152 = vector.load %arg14[%c6_1871, %c40_1872] : memref<128x128xf32, #tpu.memory_space<vmem>>, vector<2x8xf32>
    tpu.vector_store %arg14[%c6_1871, %c40_1872], %1151 {strides = array<i32>} : memref<128x128xf32, #tpu.memory_space<vmem>>, vector<2x8xf32>,
    %c1_1873 = arith.constant 1 : index
    %c4_1874 = arith.constant 4 : index
    %c0_1875 = arith.constant 0 : index
    %c0_1876 = arith.constant 0 : index
    %1153 = vector.load %arg12[%c1_1873, %c4_1874, %c0_1875, %c0_1876] : memref<2x6x6x8xf32, #tpu.memory_space<vmem>>, vector<1x1x2x8xf32>
    %1154 = vector.shape_cast %1153 : vector<1x1x2x8xf32> to vector<2x8xf32>
    %c6_1877 = arith.constant 6 : index
    %c48_1878 = arith.constant 48 : index
    %1155 = vector.load %arg14[%c6_1877, %c48_1878] : memref<128x128xf32, #tpu.memory_space<vmem>>, vector<2x8xf32>
    tpu.vector_store %arg14[%c6_1877, %c48_1878], %1154 {strides = array<i32>} : memref<128x128xf32, #tpu.memory_space<vmem>>, vector<2x8xf32>,
    %c1_1879 = arith.constant 1 : index
    %c4_1880 = arith.constant 4 : index
    %c3_1881 = arith.constant 3 : index
    %c0_1882 = arith.constant 0 : index
    %1156 = vector.load %arg12[%c1_1879, %c4_1880, %c3_1881, %c0_1882] : memref<2x6x6x8xf32, #tpu.memory_space<vmem>>, vector<1x1x2x8xf32>
    %1157 = vector.shape_cast %1156 : vector<1x1x2x8xf32> to vector<2x8xf32>
    %c6_1883 = arith.constant 6 : index
    %c56_1884 = arith.constant 56 : index
    %1158 = vector.load %arg14[%c6_1883, %c56_1884] : memref<128x128xf32, #tpu.memory_space<vmem>>, vector<2x8xf32>
    tpu.vector_store %arg14[%c6_1883, %c56_1884], %1157 {strides = array<i32>} : memref<128x128xf32, #tpu.memory_space<vmem>>, vector<2x8xf32>,
    %c1_1885 = arith.constant 1 : index
    %c4_1886 = arith.constant 4 : index
    %c1_1887 = arith.constant 1 : index
    %c0_1888 = arith.constant 0 : index
    %1159 = vector.load %arg12[%c1_1885, %c4_1886, %c1_1887, %c0_1888] : memref<2x6x6x8xf32, #tpu.memory_space<vmem>>, vector<1x1x2x8xf32>
    %1160 = vector.shape_cast %1159 : vector<1x1x2x8xf32> to vector<2x8xf32>
    %c6_1889 = arith.constant 6 : index
    %c64_1890 = arith.constant 64 : index
    %1161 = vector.load %arg14[%c6_1889, %c64_1890] : memref<128x128xf32, #tpu.memory_space<vmem>>, vector<2x8xf32>
    tpu.vector_store %arg14[%c6_1889, %c64_1890], %1160 {strides = array<i32>} : memref<128x128xf32, #tpu.memory_space<vmem>>, vector<2x8xf32>,
    %c0_1891 = arith.constant 0 : index
    %c0_1892 = arith.constant 0 : index
    %1162 = vector.load %arg14[%c0_1891, %c0_1892] : memref<128x128xf32, #tpu.memory_space<vmem>>, vector<8x128xf32>
    %1163 = arith.truncf %1162 : vector<8x128xf32> to vector<8x128xbf16>
    %c2_1893 = arith.constant 2 : index
    %c0_1894 = arith.constant 0 : index
    %c0_1895 = arith.constant 0 : index
    %1164 = vector.load %arg2[%c2_1893, %c0_1894, %c0_1895] : memref<4x128x128xbf16, #tpu.memory_space<vmem>>, vector<1x128x128xbf16>
    %1165 = vector.shape_cast %1164 : vector<1x128x128xbf16> to vector<128x128xbf16>
    %cst_1896 = arith.constant dense<0.000000e+00> : vector<8x128xf32>
    %1166 = tpu.matmul %1163, %1165, %cst_1896 {dimension_numbers = #tpu.dot_dimension_numbers<[1], [0], [0], [1], [0, 0, 1, 1], [], []>} : vector<8x128xbf16>, vector<128x128xbf16>, vector<8x128xf32> -> vector<8x128xf32>
    %c2_1897 = arith.constant 2 : index
    %c0_1898 = arith.constant 0 : index
    %c0_1899 = arith.constant 0 : index
    %1167 = vector.load %arg3[%c2_1897, %c0_1898, %c0_1899] : memref<4x1x128xf32, #tpu.memory_space<vmem>>, vector<1x1x128xf32>
    %1168 = vector.shape_cast %1167 : vector<1x1x128xf32> to vector<1x128xf32>
    %1169 = vector.broadcast %1168 : vector<1x128xf32> to vector<8x128xf32>
    %1170 = arith.addf %1166, %1169 : vector<8x128xf32>
    %cst_1900 = arith.constant 0.000000e+00 : f32
    %1171 = vector.broadcast %cst_1900 : f32 to vector<8x128xf32>
    %1172 = arith.maximumf %1170, %1171 : vector<8x128xf32>
    %cst_1901 = arith.constant dense<0.000000e+00> : vector<128xf32>
    %1173 = vector.multi_reduction <add>, %1172, %cst_1901 [0] : vector<8x128xf32> to vector<128xf32>
    %1174 = vector.shape_cast %1173 : vector<128xf32> to vector<1x128xf32>
    %1175 = arith.mulf %1172, %1172 : vector<8x128xf32>
    %cst_1902 = arith.constant dense<0.000000e+00> : vector<128xf32>
    %1176 = vector.multi_reduction <add>, %1175, %cst_1902 [0] : vector<8x128xf32> to vector<128xf32>
    %1177 = vector.shape_cast %1176 : vector<128xf32> to vector<1x128xf32>
    %cst_1903 = arith.constant 1.250000e-01 : f32
    %1178 = vector.broadcast %cst_1903 : f32 to vector<1x128xf32>
    %1179 = arith.mulf %1174, %1178 : vector<1x128xf32>
    %cst_1904 = arith.constant 1.250000e-01 : f32
    %1180 = vector.broadcast %cst_1904 : f32 to vector<1x128xf32>
    %1181 = arith.mulf %1177, %1180 : vector<1x128xf32>
    %1182 = arith.mulf %1179, %1179 : vector<1x128xf32>
    %1183 = arith.subf %1181, %1182 : vector<1x128xf32>
    %cst_1905 = arith.constant 0.000000e+00 : f32
    %1184 = vector.broadcast %cst_1905 : f32 to vector<1x128xf32>
    %1185 = arith.maximumf %1183, %1184 : vector<1x128xf32>
    %cst_1906 = arith.constant 9.99999974E-6 : f32
    %1186 = vector.broadcast %cst_1906 : f32 to vector<1x128xf32>
    %1187 = arith.addf %1185, %1186 : vector<1x128xf32>
    %1188 = math.rsqrt %1187 : vector<1x128xf32>
    %c2_1907 = arith.constant 2 : index
    %c0_1908 = arith.constant 0 : index
    %c0_1909 = arith.constant 0 : index
    %1189 = vector.load %arg4[%c2_1907, %c0_1908, %c0_1909] : memref<4x1x128xf32, #tpu.memory_space<vmem>>, vector<1x1x128xf32>
    %1190 = vector.shape_cast %1189 : vector<1x1x128xf32> to vector<1x128xf32>
    %1191 = arith.mulf %1190, %1188 : vector<1x128xf32>
    %c2_1910 = arith.constant 2 : index
    %c0_1911 = arith.constant 0 : index
    %c0_1912 = arith.constant 0 : index
    %1192 = vector.load %arg5[%c2_1910, %c0_1911, %c0_1912] : memref<4x1x128xf32, #tpu.memory_space<vmem>>, vector<1x1x128xf32>
    %1193 = vector.shape_cast %1192 : vector<1x1x128xf32> to vector<1x128xf32>
    %1194 = arith.mulf %1179, %1191 : vector<1x128xf32>
    %1195 = arith.subf %1193, %1194 : vector<1x128xf32>
    %1196 = vector.broadcast %1191 : vector<1x128xf32> to vector<8x128xf32>
    %1197 = arith.mulf %1172, %1196 : vector<8x128xf32>
    %1198 = vector.broadcast %1195 : vector<1x128xf32> to vector<8x128xf32>
    %1199 = arith.addf %1197, %1198 : vector<8x128xf32>
    %c0_1913 = arith.constant 0 : index
    %c0_1914 = arith.constant 0 : index
    %1200 = vector.load %arg8[%c0_1913, %c0_1914] : memref<8x8xbf16, #tpu.memory_space<vmem>>, vector<8x8xbf16>
    %1201 = arith.truncf %1199 : vector<8x128xf32> to vector<8x128xbf16>
    %cst_1915 = arith.constant dense<0.000000e+00> : vector<8x128xf32>
    %1202 = tpu.matmul %1200, %1201, %cst_1915 {dimension_numbers = #tpu.dot_dimension_numbers<[1], [0], [0], [1], [0, 0, 1, 1], [], []>} : vector<8x8xbf16>, vector<8x128xbf16>, vector<8x128xf32> -> vector<8x128xf32>
    %1203 = vector.extract_strided_slice %1202 {offsets = [0, 0], sizes = [1, 8], strides = [1, 1]} : vector<8x128xf32> to vector<1x8xf32>
    %c0_1916 = arith.constant 0 : index
    %c1_1917 = arith.constant 1 : index
    %c2_1918 = arith.constant 2 : index
    %c0_1919 = arith.constant 0 : index
    %1204 = vector.load %arg13[%c0_1916, %c1_1917, %c2_1918, %c0_1919] : memref<2x4x4x8xf32, #tpu.memory_space<vmem>>, vector<1x1x1x8xf32>
    %1205 = vector.shape_cast %1204 : vector<1x1x1x8xf32> to vector<1x8xf32>
    %1206 = vector.shape_cast %1203 : vector<1x8xf32> to vector<1x1x1x8xf32>
    tpu.vector_store %arg13[%c0_1916, %c1_1917, %c2_1918, %c0_1919], %1206 {strides = array<i32>} : memref<2x4x4x8xf32, #tpu.memory_space<vmem>>, vector<1x1x1x8xf32>,
    %1207 = vector.extract_strided_slice %1202 {offsets = [1, 0], sizes = [1, 8], strides = [1, 1]} : vector<8x128xf32> to vector<1x8xf32>
    %c0_1920 = arith.constant 0 : index
    %c1_1921 = arith.constant 1 : index
    %c1_1922 = arith.constant 1 : index
    %c0_1923 = arith.constant 0 : index
    %1208 = vector.load %arg13[%c0_1920, %c1_1921, %c1_1922, %c0_1923] : memref<2x4x4x8xf32, #tpu.memory_space<vmem>>, vector<1x1x1x8xf32>
    %1209 = vector.shape_cast %1208 : vector<1x1x1x8xf32> to vector<1x8xf32>
    %1210 = vector.shape_cast %1207 : vector<1x8xf32> to vector<1x1x1x8xf32>
    tpu.vector_store %arg13[%c0_1920, %c1_1921, %c1_1922, %c0_1923], %1210 {strides = array<i32>} : memref<2x4x4x8xf32, #tpu.memory_space<vmem>>, vector<1x1x1x8xf32>,
    %1211 = vector.extract_strided_slice %1202 {offsets = [2, 0], sizes = [1, 8], strides = [1, 1]} : vector<8x128xf32> to vector<1x8xf32>
    %c0_1924 = arith.constant 0 : index
    %c2_1925 = arith.constant 2 : index
    %c2_1926 = arith.constant 2 : index
    %c0_1927 = arith.constant 0 : index
    %1212 = vector.load %arg13[%c0_1924, %c2_1925, %c2_1926, %c0_1927] : memref<2x4x4x8xf32, #tpu.memory_space<vmem>>, vector<1x1x1x8xf32>
    %1213 = vector.shape_cast %1212 : vector<1x1x1x8xf32> to vector<1x8xf32>
    %1214 = vector.shape_cast %1211 : vector<1x8xf32> to vector<1x1x1x8xf32>
    tpu.vector_store %arg13[%c0_1924, %c2_1925, %c2_1926, %c0_1927], %1214 {strides = array<i32>} : memref<2x4x4x8xf32, #tpu.memory_space<vmem>>, vector<1x1x1x8xf32>,
    %1215 = vector.extract_strided_slice %1202 {offsets = [3, 0], sizes = [1, 8], strides = [1, 1]} : vector<8x128xf32> to vector<1x8xf32>
    %c0_1928 = arith.constant 0 : index
    %c2_1929 = arith.constant 2 : index
    %c1_1930 = arith.constant 1 : index
    %c0_1931 = arith.constant 0 : index
    %1216 = vector.load %arg13[%c0_1928, %c2_1929, %c1_1930, %c0_1931] : memref<2x4x4x8xf32, #tpu.memory_space<vmem>>, vector<1x1x1x8xf32>
    %1217 = vector.shape_cast %1216 : vector<1x1x1x8xf32> to vector<1x8xf32>
    %1218 = vector.shape_cast %1215 : vector<1x8xf32> to vector<1x1x1x8xf32>
    tpu.vector_store %arg13[%c0_1928, %c2_1929, %c1_1930, %c0_1931], %1218 {strides = array<i32>} : memref<2x4x4x8xf32, #tpu.memory_space<vmem>>, vector<1x1x1x8xf32>,
    %1219 = vector.extract_strided_slice %1202 {offsets = [4, 0], sizes = [1, 8], strides = [1, 1]} : vector<8x128xf32> to vector<1x8xf32>
    %c1_1932 = arith.constant 1 : index
    %c1_1933 = arith.constant 1 : index
    %c2_1934 = arith.constant 2 : index
    %c0_1935 = arith.constant 0 : index
    %1220 = vector.load %arg13[%c1_1932, %c1_1933, %c2_1934, %c0_1935] : memref<2x4x4x8xf32, #tpu.memory_space<vmem>>, vector<1x1x1x8xf32>
    %1221 = vector.shape_cast %1220 : vector<1x1x1x8xf32> to vector<1x8xf32>
    %1222 = vector.shape_cast %1219 : vector<1x8xf32> to vector<1x1x1x8xf32>
    tpu.vector_store %arg13[%c1_1932, %c1_1933, %c2_1934, %c0_1935], %1222 {strides = array<i32>} : memref<2x4x4x8xf32, #tpu.memory_space<vmem>>, vector<1x1x1x8xf32>,
    %1223 = vector.extract_strided_slice %1202 {offsets = [5, 0], sizes = [1, 8], strides = [1, 1]} : vector<8x128xf32> to vector<1x8xf32>
    %c1_1936 = arith.constant 1 : index
    %c1_1937 = arith.constant 1 : index
    %c1_1938 = arith.constant 1 : index
    %c0_1939 = arith.constant 0 : index
    %1224 = vector.load %arg13[%c1_1936, %c1_1937, %c1_1938, %c0_1939] : memref<2x4x4x8xf32, #tpu.memory_space<vmem>>, vector<1x1x1x8xf32>
    %1225 = vector.shape_cast %1224 : vector<1x1x1x8xf32> to vector<1x8xf32>
    %1226 = vector.shape_cast %1223 : vector<1x8xf32> to vector<1x1x1x8xf32>
    tpu.vector_store %arg13[%c1_1936, %c1_1937, %c1_1938, %c0_1939], %1226 {strides = array<i32>} : memref<2x4x4x8xf32, #tpu.memory_space<vmem>>, vector<1x1x1x8xf32>,
    %1227 = vector.extract_strided_slice %1202 {offsets = [6, 0], sizes = [1, 8], strides = [1, 1]} : vector<8x128xf32> to vector<1x8xf32>
    %c1_1940 = arith.constant 1 : index
    %c2_1941 = arith.constant 2 : index
    %c2_1942 = arith.constant 2 : index
    %c0_1943 = arith.constant 0 : index
    %1228 = vector.load %arg13[%c1_1940, %c2_1941, %c2_1942, %c0_1943] : memref<2x4x4x8xf32, #tpu.memory_space<vmem>>, vector<1x1x1x8xf32>
    %1229 = vector.shape_cast %1228 : vector<1x1x1x8xf32> to vector<1x8xf32>
    %1230 = vector.shape_cast %1227 : vector<1x8xf32> to vector<1x1x1x8xf32>
    tpu.vector_store %arg13[%c1_1940, %c2_1941, %c2_1942, %c0_1943], %1230 {strides = array<i32>} : memref<2x4x4x8xf32, #tpu.memory_space<vmem>>, vector<1x1x1x8xf32>,
    %1231 = vector.extract_strided_slice %1202 {offsets = [7, 0], sizes = [1, 8], strides = [1, 1]} : vector<8x128xf32> to vector<1x8xf32>
    %c1_1944 = arith.constant 1 : index
    %c2_1945 = arith.constant 2 : index
    %c1_1946 = arith.constant 1 : index
    %c0_1947 = arith.constant 0 : index
    %1232 = vector.load %arg13[%c1_1944, %c2_1945, %c1_1946, %c0_1947] : memref<2x4x4x8xf32, #tpu.memory_space<vmem>>, vector<1x1x1x8xf32>
    %1233 = vector.shape_cast %1232 : vector<1x1x1x8xf32> to vector<1x8xf32>
    %1234 = vector.shape_cast %1231 : vector<1x8xf32> to vector<1x1x1x8xf32>
    tpu.vector_store %arg13[%c1_1944, %c2_1945, %c1_1946, %c0_1947], %1234 {strides = array<i32>} : memref<2x4x4x8xf32, #tpu.memory_space<vmem>>, vector<1x1x1x8xf32>,
    %c0_1948 = arith.constant 0 : index
    %c0_1949 = arith.constant 0 : index
    %c0_1950 = arith.constant 0 : index
    %c0_1951 = arith.constant 0 : index
    %1235 = vector.load %arg13[%c0_1948, %c0_1949, %c0_1950, %c0_1951] : memref<2x4x4x8xf32, #tpu.memory_space<vmem>>, vector<1x1x1x8xf32>
    %1236 = vector.shape_cast %1235 : vector<1x1x1x8xf32> to vector<1x8xf32>
    %c0_1952 = arith.constant 0 : index
    %c0_1953 = arith.constant 0 : index
    %1237 = vector.load %arg14[%c0_1952, %c0_1953] : memref<128x128xf32, #tpu.memory_space<vmem>>, vector<1x8xf32>
    tpu.vector_store %arg14[%c0_1952, %c0_1953], %1236 {strides = array<i32>} : memref<128x128xf32, #tpu.memory_space<vmem>>, vector<1x8xf32>,
    %c0_1954 = arith.constant 0 : index
    %c0_1955 = arith.constant 0 : index
    %c2_1956 = arith.constant 2 : index
    %c0_1957 = arith.constant 0 : index
    %1238 = vector.load %arg13[%c0_1954, %c0_1955, %c2_1956, %c0_1957] : memref<2x4x4x8xf32, #tpu.memory_space<vmem>>, vector<1x1x1x8xf32>
    %1239 = vector.shape_cast %1238 : vector<1x1x1x8xf32> to vector<1x8xf32>
    %c0_1958 = arith.constant 0 : index
    %c8_1959 = arith.constant 8 : index
    %1240 = vector.load %arg14[%c0_1958, %c8_1959] : memref<128x128xf32, #tpu.memory_space<vmem>>, vector<1x8xf32>
    tpu.vector_store %arg14[%c0_1958, %c8_1959], %1239 {strides = array<i32>} : memref<128x128xf32, #tpu.memory_space<vmem>>, vector<1x8xf32>,
    %c0_1960 = arith.constant 0 : index
    %c0_1961 = arith.constant 0 : index
    %c1_1962 = arith.constant 1 : index
    %c0_1963 = arith.constant 0 : index
    %1241 = vector.load %arg13[%c0_1960, %c0_1961, %c1_1962, %c0_1963] : memref<2x4x4x8xf32, #tpu.memory_space<vmem>>, vector<1x1x1x8xf32>
    %1242 = vector.shape_cast %1241 : vector<1x1x1x8xf32> to vector<1x8xf32>
    %c0_1964 = arith.constant 0 : index
    %c16_1965 = arith.constant 16 : index
    %1243 = vector.load %arg14[%c0_1964, %c16_1965] : memref<128x128xf32, #tpu.memory_space<vmem>>, vector<1x8xf32>
    tpu.vector_store %arg14[%c0_1964, %c16_1965], %1242 {strides = array<i32>} : memref<128x128xf32, #tpu.memory_space<vmem>>, vector<1x8xf32>,
    %c0_1966 = arith.constant 0 : index
    %c1_1967 = arith.constant 1 : index
    %c0_1968 = arith.constant 0 : index
    %c0_1969 = arith.constant 0 : index
    %1244 = vector.load %arg13[%c0_1966, %c1_1967, %c0_1968, %c0_1969] : memref<2x4x4x8xf32, #tpu.memory_space<vmem>>, vector<1x1x1x8xf32>
    %1245 = vector.shape_cast %1244 : vector<1x1x1x8xf32> to vector<1x8xf32>
    %c0_1970 = arith.constant 0 : index
    %c24_1971 = arith.constant 24 : index
    %1246 = vector.load %arg14[%c0_1970, %c24_1971] : memref<128x128xf32, #tpu.memory_space<vmem>>, vector<1x8xf32>
    tpu.vector_store %arg14[%c0_1970, %c24_1971], %1245 {strides = array<i32>} : memref<128x128xf32, #tpu.memory_space<vmem>>, vector<1x8xf32>,
    %c0_1972 = arith.constant 0 : index
    %c1_1973 = arith.constant 1 : index
    %c2_1974 = arith.constant 2 : index
    %c0_1975 = arith.constant 0 : index
    %1247 = vector.load %arg13[%c0_1972, %c1_1973, %c2_1974, %c0_1975] : memref<2x4x4x8xf32, #tpu.memory_space<vmem>>, vector<1x1x1x8xf32>
    %1248 = vector.shape_cast %1247 : vector<1x1x1x8xf32> to vector<1x8xf32>
    %c0_1976 = arith.constant 0 : index
    %c32_1977 = arith.constant 32 : index
    %1249 = vector.load %arg14[%c0_1976, %c32_1977] : memref<128x128xf32, #tpu.memory_space<vmem>>, vector<1x8xf32>
    tpu.vector_store %arg14[%c0_1976, %c32_1977], %1248 {strides = array<i32>} : memref<128x128xf32, #tpu.memory_space<vmem>>, vector<1x8xf32>,
    %c0_1978 = arith.constant 0 : index
    %c1_1979 = arith.constant 1 : index
    %c1_1980 = arith.constant 1 : index
    %c0_1981 = arith.constant 0 : index
    %1250 = vector.load %arg13[%c0_1978, %c1_1979, %c1_1980, %c0_1981] : memref<2x4x4x8xf32, #tpu.memory_space<vmem>>, vector<1x1x1x8xf32>
    %1251 = vector.shape_cast %1250 : vector<1x1x1x8xf32> to vector<1x8xf32>
    %c0_1982 = arith.constant 0 : index
    %c40_1983 = arith.constant 40 : index
    %1252 = vector.load %arg14[%c0_1982, %c40_1983] : memref<128x128xf32, #tpu.memory_space<vmem>>, vector<1x8xf32>
    tpu.vector_store %arg14[%c0_1982, %c40_1983], %1251 {strides = array<i32>} : memref<128x128xf32, #tpu.memory_space<vmem>>, vector<1x8xf32>,
    %c0_1984 = arith.constant 0 : index
    %c2_1985 = arith.constant 2 : index
    %c0_1986 = arith.constant 0 : index
    %c0_1987 = arith.constant 0 : index
    %1253 = vector.load %arg13[%c0_1984, %c2_1985, %c0_1986, %c0_1987] : memref<2x4x4x8xf32, #tpu.memory_space<vmem>>, vector<1x1x1x8xf32>
    %1254 = vector.shape_cast %1253 : vector<1x1x1x8xf32> to vector<1x8xf32>
    %c0_1988 = arith.constant 0 : index
    %c48_1989 = arith.constant 48 : index
    %1255 = vector.load %arg14[%c0_1988, %c48_1989] : memref<128x128xf32, #tpu.memory_space<vmem>>, vector<1x8xf32>
    tpu.vector_store %arg14[%c0_1988, %c48_1989], %1254 {strides = array<i32>} : memref<128x128xf32, #tpu.memory_space<vmem>>, vector<1x8xf32>,
    %c0_1990 = arith.constant 0 : index
    %c2_1991 = arith.constant 2 : index
    %c2_1992 = arith.constant 2 : index
    %c0_1993 = arith.constant 0 : index
    %1256 = vector.load %arg13[%c0_1990, %c2_1991, %c2_1992, %c0_1993] : memref<2x4x4x8xf32, #tpu.memory_space<vmem>>, vector<1x1x1x8xf32>
    %1257 = vector.shape_cast %1256 : vector<1x1x1x8xf32> to vector<1x8xf32>
    %c0_1994 = arith.constant 0 : index
    %c56_1995 = arith.constant 56 : index
    %1258 = vector.load %arg14[%c0_1994, %c56_1995] : memref<128x128xf32, #tpu.memory_space<vmem>>, vector<1x8xf32>
    tpu.vector_store %arg14[%c0_1994, %c56_1995], %1257 {strides = array<i32>} : memref<128x128xf32, #tpu.memory_space<vmem>>, vector<1x8xf32>,
    %c0_1996 = arith.constant 0 : index
    %c2_1997 = arith.constant 2 : index
    %c1_1998 = arith.constant 1 : index
    %c0_1999 = arith.constant 0 : index
    %1259 = vector.load %arg13[%c0_1996, %c2_1997, %c1_1998, %c0_1999] : memref<2x4x4x8xf32, #tpu.memory_space<vmem>>, vector<1x1x1x8xf32>
    %1260 = vector.shape_cast %1259 : vector<1x1x1x8xf32> to vector<1x8xf32>
    %c0_2000 = arith.constant 0 : index
    %c64_2001 = arith.constant 64 : index
    %1261 = vector.load %arg14[%c0_2000, %c64_2001] : memref<128x128xf32, #tpu.memory_space<vmem>>, vector<1x8xf32>
    tpu.vector_store %arg14[%c0_2000, %c64_2001], %1260 {strides = array<i32>} : memref<128x128xf32, #tpu.memory_space<vmem>>, vector<1x8xf32>,
    %c1_2002 = arith.constant 1 : index
    %c0_2003 = arith.constant 0 : index
    %c0_2004 = arith.constant 0 : index
    %c0_2005 = arith.constant 0 : index
    %1262 = vector.load %arg13[%c1_2002, %c0_2003, %c0_2004, %c0_2005] : memref<2x4x4x8xf32, #tpu.memory_space<vmem>>, vector<1x1x1x8xf32>
    %1263 = vector.shape_cast %1262 : vector<1x1x1x8xf32> to vector<1x8xf32>
    %c1_2006 = arith.constant 1 : index
    %c0_2007 = arith.constant 0 : index
    %1264 = vector.load %arg14[%c1_2006, %c0_2007] : memref<128x128xf32, #tpu.memory_space<vmem>>, vector<1x8xf32>
    tpu.vector_store %arg14[%c1_2006, %c0_2007], %1263 {strides = array<i32>} : memref<128x128xf32, #tpu.memory_space<vmem>>, vector<1x8xf32>,
    %c1_2008 = arith.constant 1 : index
    %c0_2009 = arith.constant 0 : index
    %c2_2010 = arith.constant 2 : index
    %c0_2011 = arith.constant 0 : index
    %1265 = vector.load %arg13[%c1_2008, %c0_2009, %c2_2010, %c0_2011] : memref<2x4x4x8xf32, #tpu.memory_space<vmem>>, vector<1x1x1x8xf32>
    %1266 = vector.shape_cast %1265 : vector<1x1x1x8xf32> to vector<1x8xf32>
    %c1_2012 = arith.constant 1 : index
    %c8_2013 = arith.constant 8 : index
    %1267 = vector.load %arg14[%c1_2012, %c8_2013] : memref<128x128xf32, #tpu.memory_space<vmem>>, vector<1x8xf32>
    tpu.vector_store %arg14[%c1_2012, %c8_2013], %1266 {strides = array<i32>} : memref<128x128xf32, #tpu.memory_space<vmem>>, vector<1x8xf32>,
    %c1_2014 = arith.constant 1 : index
    %c0_2015 = arith.constant 0 : index
    %c1_2016 = arith.constant 1 : index
    %c0_2017 = arith.constant 0 : index
    %1268 = vector.load %arg13[%c1_2014, %c0_2015, %c1_2016, %c0_2017] : memref<2x4x4x8xf32, #tpu.memory_space<vmem>>, vector<1x1x1x8xf32>
    %1269 = vector.shape_cast %1268 : vector<1x1x1x8xf32> to vector<1x8xf32>
    %c1_2018 = arith.constant 1 : index
    %c16_2019 = arith.constant 16 : index
    %1270 = vector.load %arg14[%c1_2018, %c16_2019] : memref<128x128xf32, #tpu.memory_space<vmem>>, vector<1x8xf32>
    tpu.vector_store %arg14[%c1_2018, %c16_2019], %1269 {strides = array<i32>} : memref<128x128xf32, #tpu.memory_space<vmem>>, vector<1x8xf32>,
    %c1_2020 = arith.constant 1 : index
    %c1_2021 = arith.constant 1 : index
    %c0_2022 = arith.constant 0 : index
    %c0_2023 = arith.constant 0 : index
    %1271 = vector.load %arg13[%c1_2020, %c1_2021, %c0_2022, %c0_2023] : memref<2x4x4x8xf32, #tpu.memory_space<vmem>>, vector<1x1x1x8xf32>
    %1272 = vector.shape_cast %1271 : vector<1x1x1x8xf32> to vector<1x8xf32>
    %c1_2024 = arith.constant 1 : index
    %c24_2025 = arith.constant 24 : index
    %1273 = vector.load %arg14[%c1_2024, %c24_2025] : memref<128x128xf32, #tpu.memory_space<vmem>>, vector<1x8xf32>
    tpu.vector_store %arg14[%c1_2024, %c24_2025], %1272 {strides = array<i32>} : memref<128x128xf32, #tpu.memory_space<vmem>>, vector<1x8xf32>,
    %c1_2026 = arith.constant 1 : index
    %c1_2027 = arith.constant 1 : index
    %c2_2028 = arith.constant 2 : index
    %c0_2029 = arith.constant 0 : index
    %1274 = vector.load %arg13[%c1_2026, %c1_2027, %c2_2028, %c0_2029] : memref<2x4x4x8xf32, #tpu.memory_space<vmem>>, vector<1x1x1x8xf32>
    %1275 = vector.shape_cast %1274 : vector<1x1x1x8xf32> to vector<1x8xf32>
    %c1_2030 = arith.constant 1 : index
    %c32_2031 = arith.constant 32 : index
    %1276 = vector.load %arg14[%c1_2030, %c32_2031] : memref<128x128xf32, #tpu.memory_space<vmem>>, vector<1x8xf32>
    tpu.vector_store %arg14[%c1_2030, %c32_2031], %1275 {strides = array<i32>} : memref<128x128xf32, #tpu.memory_space<vmem>>, vector<1x8xf32>,
    %c1_2032 = arith.constant 1 : index
    %c1_2033 = arith.constant 1 : index
    %c1_2034 = arith.constant 1 : index
    %c0_2035 = arith.constant 0 : index
    %1277 = vector.load %arg13[%c1_2032, %c1_2033, %c1_2034, %c0_2035] : memref<2x4x4x8xf32, #tpu.memory_space<vmem>>, vector<1x1x1x8xf32>
    %1278 = vector.shape_cast %1277 : vector<1x1x1x8xf32> to vector<1x8xf32>
    %c1_2036 = arith.constant 1 : index
    %c40_2037 = arith.constant 40 : index
    %1279 = vector.load %arg14[%c1_2036, %c40_2037] : memref<128x128xf32, #tpu.memory_space<vmem>>, vector<1x8xf32>
    tpu.vector_store %arg14[%c1_2036, %c40_2037], %1278 {strides = array<i32>} : memref<128x128xf32, #tpu.memory_space<vmem>>, vector<1x8xf32>,
    %c1_2038 = arith.constant 1 : index
    %c2_2039 = arith.constant 2 : index
    %c0_2040 = arith.constant 0 : index
    %c0_2041 = arith.constant 0 : index
    %1280 = vector.load %arg13[%c1_2038, %c2_2039, %c0_2040, %c0_2041] : memref<2x4x4x8xf32, #tpu.memory_space<vmem>>, vector<1x1x1x8xf32>
    %1281 = vector.shape_cast %1280 : vector<1x1x1x8xf32> to vector<1x8xf32>
    %c1_2042 = arith.constant 1 : index
    %c48_2043 = arith.constant 48 : index
    %1282 = vector.load %arg14[%c1_2042, %c48_2043] : memref<128x128xf32, #tpu.memory_space<vmem>>, vector<1x8xf32>
    tpu.vector_store %arg14[%c1_2042, %c48_2043], %1281 {strides = array<i32>} : memref<128x128xf32, #tpu.memory_space<vmem>>, vector<1x8xf32>,
    %c1_2044 = arith.constant 1 : index
    %c2_2045 = arith.constant 2 : index
    %c2_2046 = arith.constant 2 : index
    %c0_2047 = arith.constant 0 : index
    %1283 = vector.load %arg13[%c1_2044, %c2_2045, %c2_2046, %c0_2047] : memref<2x4x4x8xf32, #tpu.memory_space<vmem>>, vector<1x1x1x8xf32>
    %1284 = vector.shape_cast %1283 : vector<1x1x1x8xf32> to vector<1x8xf32>
    %c1_2048 = arith.constant 1 : index
    %c56_2049 = arith.constant 56 : index
    %1285 = vector.load %arg14[%c1_2048, %c56_2049] : memref<128x128xf32, #tpu.memory_space<vmem>>, vector<1x8xf32>
    tpu.vector_store %arg14[%c1_2048, %c56_2049], %1284 {strides = array<i32>} : memref<128x128xf32, #tpu.memory_space<vmem>>, vector<1x8xf32>,
    %c1_2050 = arith.constant 1 : index
    %c2_2051 = arith.constant 2 : index
    %c1_2052 = arith.constant 1 : index
    %c0_2053 = arith.constant 0 : index
    %1286 = vector.load %arg13[%c1_2050, %c2_2051, %c1_2052, %c0_2053] : memref<2x4x4x8xf32, #tpu.memory_space<vmem>>, vector<1x1x1x8xf32>
    %1287 = vector.shape_cast %1286 : vector<1x1x1x8xf32> to vector<1x8xf32>
    %c1_2054 = arith.constant 1 : index
    %c64_2055 = arith.constant 64 : index
    %1288 = vector.load %arg14[%c1_2054, %c64_2055] : memref<128x128xf32, #tpu.memory_space<vmem>>, vector<1x8xf32>
    tpu.vector_store %arg14[%c1_2054, %c64_2055], %1287 {strides = array<i32>} : memref<128x128xf32, #tpu.memory_space<vmem>>, vector<1x8xf32>,
    %c0_2056 = arith.constant 0 : index
    %c0_2057 = arith.constant 0 : index
    %1289 = vector.load %arg14[%c0_2056, %c0_2057] : memref<128x128xf32, #tpu.memory_space<vmem>>, vector<2x128xf32>
    %1290 = arith.truncf %1289 : vector<2x128xf32> to vector<2x128xbf16>
    %c3_2058 = arith.constant 3 : index
    %c0_2059 = arith.constant 0 : index
    %c0_2060 = arith.constant 0 : index
    %1291 = vector.load %arg2[%c3_2058, %c0_2059, %c0_2060] : memref<4x128x128xbf16, #tpu.memory_space<vmem>>, vector<1x128x128xbf16>
    %1292 = vector.shape_cast %1291 : vector<1x128x128xbf16> to vector<128x128xbf16>
    %cst_2061 = arith.constant dense<0.000000e+00> : vector<2x128xf32>
    %1293 = tpu.matmul %1290, %1292, %cst_2061 {dimension_numbers = #tpu.dot_dimension_numbers<[1], [0], [0], [1], [0, 0, 1, 1], [], []>} : vector<2x128xbf16>, vector<128x128xbf16>, vector<2x128xf32> -> vector<2x128xf32>
    %c3_2062 = arith.constant 3 : index
    %c0_2063 = arith.constant 0 : index
    %c0_2064 = arith.constant 0 : index
    %1294 = vector.load %arg3[%c3_2062, %c0_2063, %c0_2064] : memref<4x1x128xf32, #tpu.memory_space<vmem>>, vector<1x1x128xf32>
    %1295 = vector.shape_cast %1294 : vector<1x1x128xf32> to vector<1x128xf32>
    %1296 = vector.broadcast %1295 : vector<1x128xf32> to vector<2x128xf32>
    %1297 = arith.addf %1293, %1296 : vector<2x128xf32>
    %cst_2065 = arith.constant 0.000000e+00 : f32
    %1298 = vector.broadcast %cst_2065 : f32 to vector<2x128xf32>
    %1299 = arith.maximumf %1297, %1298 : vector<2x128xf32>
    %cst_2066 = arith.constant dense<0.000000e+00> : vector<128xf32>
    %1300 = vector.multi_reduction <add>, %1299, %cst_2066 [0] : vector<2x128xf32> to vector<128xf32>
    %1301 = vector.shape_cast %1300 : vector<128xf32> to vector<1x128xf32>
    %1302 = arith.mulf %1299, %1299 : vector<2x128xf32>
    %cst_2067 = arith.constant dense<0.000000e+00> : vector<128xf32>
    %1303 = vector.multi_reduction <add>, %1302, %cst_2067 [0] : vector<2x128xf32> to vector<128xf32>
    %1304 = vector.shape_cast %1303 : vector<128xf32> to vector<1x128xf32>
    %cst_2068 = arith.constant 5.000000e-01 : f32
    %1305 = vector.broadcast %cst_2068 : f32 to vector<1x128xf32>
    %1306 = arith.mulf %1301, %1305 : vector<1x128xf32>
    %cst_2069 = arith.constant 5.000000e-01 : f32
    %1307 = vector.broadcast %cst_2069 : f32 to vector<1x128xf32>
    %1308 = arith.mulf %1304, %1307 : vector<1x128xf32>
    %1309 = arith.mulf %1306, %1306 : vector<1x128xf32>
    %1310 = arith.subf %1308, %1309 : vector<1x128xf32>
    %cst_2070 = arith.constant 0.000000e+00 : f32
    %1311 = vector.broadcast %cst_2070 : f32 to vector<1x128xf32>
    %1312 = arith.maximumf %1310, %1311 : vector<1x128xf32>
    %cst_2071 = arith.constant 9.99999974E-6 : f32
    %1313 = vector.broadcast %cst_2071 : f32 to vector<1x128xf32>
    %1314 = arith.addf %1312, %1313 : vector<1x128xf32>
    %1315 = math.rsqrt %1314 : vector<1x128xf32>
    %c3_2072 = arith.constant 3 : index
    %c0_2073 = arith.constant 0 : index
    %c0_2074 = arith.constant 0 : index
    %1316 = vector.load %arg4[%c3_2072, %c0_2073, %c0_2074] : memref<4x1x128xf32, #tpu.memory_space<vmem>>, vector<1x1x128xf32>
    %1317 = vector.shape_cast %1316 : vector<1x1x128xf32> to vector<1x128xf32>
    %1318 = arith.mulf %1317, %1315 : vector<1x128xf32>
    %c3_2075 = arith.constant 3 : index
    %c0_2076 = arith.constant 0 : index
    %c0_2077 = arith.constant 0 : index
    %1319 = vector.load %arg5[%c3_2075, %c0_2076, %c0_2077] : memref<4x1x128xf32, #tpu.memory_space<vmem>>, vector<1x1x128xf32>
    %1320 = vector.shape_cast %1319 : vector<1x1x128xf32> to vector<1x128xf32>
    %1321 = arith.mulf %1306, %1318 : vector<1x128xf32>
    %1322 = arith.subf %1320, %1321 : vector<1x128xf32>
    %1323 = vector.broadcast %1318 : vector<1x128xf32> to vector<2x128xf32>
    %1324 = arith.mulf %1299, %1323 : vector<2x128xf32>
    %1325 = vector.broadcast %1322 : vector<1x128xf32> to vector<2x128xf32>
    %1326 = arith.addf %1324, %1325 : vector<2x128xf32>
    %1327 = vector.extract_strided_slice %1326 {offsets = [0, 0], sizes = [1, 128], strides = [1, 1]} : vector<2x128xf32> to vector<1x128xf32>
    %c0_2078 = arith.constant 0 : index
    %c0_2079 = arith.constant 0 : index
    %c0_2080 = arith.constant 0 : index
    %c0_2081 = arith.constant 0 : index
    %1328 = vector.load %arg9[%c0_2078, %c0_2079, %c0_2080, %c0_2081] : memref<2x1x1x128xf32, #tpu.memory_space<vmem>>, vector<1x1x1x128xf32>
    %1329 = vector.shape_cast %1328 : vector<1x1x1x128xf32> to vector<1x128xf32>
    %1330 = vector.shape_cast %1327 : vector<1x128xf32> to vector<1x1x1x128xf32>
    tpu.vector_store %arg9[%c0_2078, %c0_2079, %c0_2080, %c0_2081], %1330 {strides = array<i32>} : memref<2x1x1x128xf32, #tpu.memory_space<vmem>>, vector<1x1x1x128xf32>,
    %1331 = vector.extract_strided_slice %1326 {offsets = [1, 0], sizes = [1, 128], strides = [1, 1]} : vector<2x128xf32> to vector<1x128xf32>
    %c1_2082 = arith.constant 1 : index
    %c0_2083 = arith.constant 0 : index
    %c0_2084 = arith.constant 0 : index
    %c0_2085 = arith.constant 0 : index
    %1332 = vector.load %arg9[%c1_2082, %c0_2083, %c0_2084, %c0_2085] : memref<2x1x1x128xf32, #tpu.memory_space<vmem>>, vector<1x1x1x128xf32>
    %1333 = vector.shape_cast %1332 : vector<1x1x1x128xf32> to vector<1x128xf32>
    %1334 = vector.shape_cast %1331 : vector<1x128xf32> to vector<1x1x1x128xf32>
    tpu.vector_store %arg9[%c1_2082, %c0_2083, %c0_2084, %c0_2085], %1334 {strides = array<i32>} : memref<2x1x1x128xf32, #tpu.memory_space<vmem>>, vector<1x1x1x128xf32>,
    return
  }
  func.func @transform_0(%arg0: i32) -> (i32, i32, i32, i32) {
    %c0_i32 = arith.constant 0 : i32
    %c0_i32_0 = arith.constant 0 : i32
    %c0_i32_1 = arith.constant 0 : i32
    %c0_i32_2 = arith.constant 0 : i32
    %c0_i32_3 = arith.constant 0 : i32
    return %c0_i32, %c0_i32_0, %c0_i32_1, %c0_i32_2 : i32, i32, i32, i32
  }
  func.func @transform_1(%arg0: i32) -> (i32, i32, i32) {
    %c0_i32 = arith.constant 0 : i32
    %c0_i32_0 = arith.constant 0 : i32
    %c0_i32_1 = arith.constant 0 : i32
    %c0_i32_2 = arith.constant 0 : i32
    return %c0_i32, %c0_i32_0, %c0_i32_1 : i32, i32, i32
  }
  func.func @transform_2(%arg0: i32) -> (i32, i32, i32) {
    %c0_i32 = arith.constant 0 : i32
    %c0_i32_0 = arith.constant 0 : i32
    %c0_i32_1 = arith.constant 0 : i32
    %c0_i32_2 = arith.constant 0 : i32
    return %c0_i32, %c0_i32_0, %c0_i32_1 : i32, i32, i32
  }
  func.func @transform_3(%arg0: i32) -> (i32, i32, i32) {
    %c0_i32 = arith.constant 0 : i32
    %c0_i32_0 = arith.constant 0 : i32
    %c0_i32_1 = arith.constant 0 : i32
    %c0_i32_2 = arith.constant 0 : i32
    return %c0_i32, %c0_i32_0, %c0_i32_1 : i32, i32, i32
  }
  func.func @transform_4(%arg0: i32) -> (i32, i32, i32) {
    %c0_i32 = arith.constant 0 : i32
    %c0_i32_0 = arith.constant 0 : i32
    %c0_i32_1 = arith.constant 0 : i32
    %c0_i32_2 = arith.constant 0 : i32
    return %c0_i32, %c0_i32_0, %c0_i32_1 : i32, i32, i32
  }
  func.func @transform_5(%arg0: i32) -> (i32, i32) {
    %c0_i32 = arith.constant 0 : i32
    %c0_i32_0 = arith.constant 0 : i32
    %c0_i32_1 = arith.constant 0 : i32
    return %c0_i32, %c0_i32_0 : i32, i32
  }
  func.func @transform_6(%arg0: i32) -> (i32, i32) {
    %c0_i32 = arith.constant 0 : i32
    %c0_i32_0 = arith.constant 0 : i32
    %c0_i32_1 = arith.constant 0 : i32
    return %c0_i32, %c0_i32_0 : i32, i32
  }
  func.func @transform_7(%arg0: i32) -> (i32, i32) {
    %c0_i32 = arith.constant 0 : i32
    %c0_i32_0 = arith.constant 0 : i32
    %c0_i32_1 = arith.constant 0 : i32
    return %c0_i32, %c0_i32_0 : i32, i32
  }
  func.func @transform_8(%arg0: i32) -> (i32, i32, i32, i32) {
    %c0_i32 = arith.constant 0 : i32
    %c0_i32_0 = arith.constant 0 : i32
    %c0_i32_1 = arith.constant 0 : i32
    %c0_i32_2 = arith.constant 0 : i32
    %c0_i32_3 = arith.constant 0 : i32
    return %c0_i32, %c0_i32_0, %c0_i32_1, %c0_i32_2 : i32, i32, i32, i32
  }
}

</mosaic_0001>

<bundles_post_ra>
// kernel: cnn_forward.1
= control target key start
LH: loop header
LB: loop body
LE: loop exit
PB: predicated region body
PF: predicated region fallthrough
CT: control target
= control target key end

     0   :  { %vm46_vm0 = vcmask 31744   ;;  %vm49_vm1 = vcmask 25600   ;;  %vm55_vm2 = vcmask 24576   ;;  %v3532_v0 = vmov 0.0   ;;  %s3533_s27 = smov 4   ;;  %s3534_s28 = smov 8   ;;  %s5024_s0 = inlined_call_operand.vmem [shape: f32[2,16,16,4], index: 0, kind: input, shape index: {}]   ;;  %s5025_s1 = inlined_call_operand.vmem [shape: bf16[4,128,128], index: 1, kind: input, shape index: {}]   ;;  %s5026_s2 = inlined_call_operand.vmem [shape: f32[4,1,128], index: 2, kind: input, shape index: {}]   ;;  %s5027_s5 = inlined_call_operand.vmem [shape: bf16[128,128], index: 5, kind: input, shape index: {}]   ;;  %s5028_s3 = inlined_call_operand.vmem [shape: f32[4,1,128], index: 3, kind: input, shape index: {}]   ;;  %s5029_s4 = inlined_call_operand.vmem [shape: f32[4,1,128], index: 4, kind: input, shape index: {}]   ;;  %s5030_s6 = inlined_call_operand.vmem [shape: bf16[32,32], index: 6, kind: input, shape index: {}]   ;;  %s5031_s7 = inlined_call_operand.vmem [shape: bf16[8,8], index: 7, kind: input, shape index: {}]   ;;  %s5032_s8 = inlined_call_operand.vmem [shape: f32[2,1,1,128], index: 8, kind: output, shape index: {}]  }
   0x1   :  { %48 = vst.msk [vmem:[#allocation2 + $0x8] sm:$0xff] %vm46_vm0, %v3532_v0  ;;  %30 = vst [vmem:[#allocation6] sm:$0xff] %v3532_v0  ;;  %v249_v1 = vld [vmem:[%s5024_s0 + $0x18] sm:$0xff]  ;;  %v248_v2 = vld [vmem:[%s5024_s0 + $0x10] sm:$0xff]  ;;  %s3535_s19 = smov 12   ;;  %s3536_s23 = smov 16  }
   0x2   :  { %50 = vst.msk [vmem:[#allocation2 + $0x10] sm:$0x3] %vm49_vm1, %v3532_v0  ;;  %31 = vst [vmem:[#allocation6 + $0x8] sm:$0xff] %v3532_v0  ;;  %v253_v3 = vld [vmem:[%s5024_s0 + $0x38] sm:$0xff]  ;;  %v250_v5 = vld [vmem:[%s5024_s0 + $0x20] sm:$0xff]  ;;  %s3537_s16 = smov 20  }
   0x3   :  { %32 = vst [vmem:[#allocation6 + $0x10] sm:$0xff] %v3532_v0  ;;  %33 = vst [vmem:[#allocation6 + $0x18] sm:$0xff] %v3532_v0  ;;  %v257_v4 = vld [vmem:[%s5024_s0 + $0x58] sm:$0xff]  ;;  %v246_v6 = vld [vmem:[%s5024_s0] sm:$0xff]  ;;  %s3538_s9 = smov 24   ;;  %s3539_s17 = smov 28  }
   0x4   :  { %34 = vst [vmem:[#allocation6 + $0x20] sm:$0xff] %v3532_v0  ;;  %35 = vst [vmem:[#allocation6 + $0x28] sm:$0xff] %v3532_v0  ;;  %v256_v7 = vld [vmem:[%s5024_s0 + $0x50] sm:$0xff]  ;;  %v251_v9 = vld [vmem:[%s5024_s0 + $0x28] sm:$0xff]  ;;  %vm136_vm3 = vcmask 64512   ;;  %vm143_vm4 = vcmask 57344  }
   0x5   :  { %36 = vst [vmem:[#allocation6 + $0x30] sm:$0xff] %v3532_v0  ;;  %37 = vst [vmem:[#allocation6 + $0x38] sm:$0xff] %v3532_v0  ;;  %v252_v8 = vld [vmem:[%s5024_s0 + $0x30] sm:$0xff]  ;;  %v247_v10 = vld [vmem:[%s5024_s0 + $0x8] sm:$0xff]  ;;  %vm222_vm5 = vcmask 60416   ;;  %s3540_s26 = smov 32  }
   0x6   :  { %38 = vst [vmem:[#allocation6 + $0x40] sm:$0xff] %v3532_v0  ;;  %39 = vst [vmem:[#allocation6 + $0x48] sm:$0xff] %v3532_v0  ;;  %v258_v11 = vld [vmem:[%s5024_s0 + $0x60] sm:$0xff]  ;;  %v259_v13 = vld [vmem:[%s5024_s0 + $0x68] sm:$0xff]  ;;  %vm382_vm6 = vcmask 64544   ;;  %vm389_vm7 = vcmask 97344  }
   0x7   :  { %40 = vst [vmem:[#allocation6 + $0x50] sm:$0xff] %v3532_v0  ;;  %41 = vst [vmem:[#allocation6 + $0x58] sm:$0xff] %v3532_v0  ;;  %v254_v12 = vld [vmem:[%s5024_s0 + $0x40] sm:$0xff]  ;;  %v255_v14 = vld [vmem:[%s5024_s0 + $0x48] sm:$0xff]  ;;  %vm396_vm8 = vcmask 130144   ;;  %vm403_vm9 = vcmask 162944  }
   0x8   :  { %42 = vst [vmem:[#allocation6 + $0x60] sm:$0xff] %v3532_v0  ;;  %43 = vst [vmem:[#allocation6 + $0x68] sm:$0xff] %v3532_v0  ;;  %v260_v15 = vld [vmem:[%s5024_s0 + $0x70] sm:$0xff]  ;;  %v261_v16 = vld [vmem:[%s5024_s0 + $0x78] sm:$0xff]  ;;  %vm410_vm10 = vcmask 195744   ;;  %vm418_vm11 = vcmask 228544  }
   0x9   :  { %44 = vst [vmem:[#allocation6 + $0x70] sm:$0xff] %v3532_v0  ;;  %45 = vst [vmem:[#allocation6 + $0x78] sm:$0xff] %v3532_v0  ;;  %v265_v17 = vld [vmem:[%s5024_s0 + $0x98] sm:$0xff]  ;;  %v264_v18 = vld [vmem:[%s5024_s0 + $0x90] sm:$0xff]  ;;  %vm425_vm12 = vcmask 261344   ;;  %vm432_vm13 = vcmask 294144  }
   0xa   :  { %47 = vst.msk [vmem:[#allocation2] sm:$0xff] %vm46_vm0, %v3532_v0  ;;  %93 = vst.msk [vmem:[#allocation2 + $0x1b0] sm:$0xff] %vm46_vm0, %v3532_v0  ;;  %v273_v19 = vld [vmem:[%s5024_s0 + $0xd8] sm:$0xff]  ;;  %v266_v21 = vld [vmem:[%s5024_s0 + $0xa0] sm:$0xff]  ;;  %vm138_vm14 = vcmask 58368   ;;  %vm1761_vm15 = vcmask 126016  }
   0xb   :  { %57 = vst.msk [vmem:[#allocation2 + $0x18] sm:$0x1] %vm55_vm2, %v3532_v0  ;;  %58 = vst.msk [vmem:[#allocation2 + $0x30] sm:$0x1] %vm55_vm2, %v3532_v0  ;;  %v269_v20 = vld [vmem:[%s5024_s0 + $0xb8] sm:$0xff]  ;;  %v377_v22 = vld [vmem:[#allocation2 + $0x9] sm:$0xff] }
   0xc   :  { %59 = vst.msk [vmem:[#allocation2 + $0x48] sm:$0x1] %vm55_vm2, %v3532_v0  ;;  %60 = vst.msk [vmem:[#allocation2 + $0x60] sm:$0x1] %vm55_vm2, %v3532_v0  ;;  %v262_v24 = vld [vmem:[%s5024_s0 + $0x80] sm:$0xff]  ;;  %379 = vrot.lane.b32.xlu0 %v377_v22, %s3533_s27  ;;  %v272_v35 = vld [vmem:[%s5024_s0 + $0xd0] sm:$0xff] }
   0xd   :  { %61 = vst.msk [vmem:[#allocation2 + $0x78] sm:$0x1] %vm55_vm2, %v3532_v0  ;;  %62 = vst.msk [vmem:[#allocation2 + $0x90] sm:$0x1] %vm55_vm2, %v3532_v0  ;;  %v268_v36 = vld [vmem:[%s5024_s0 + $0xb0] sm:$0xff]  ;;  %v267_v37 = vld [vmem:[%s5024_s0 + $0xa8] sm:$0xff] }
   0xe   :  { %63 = vst.msk [vmem:[#allocation2 + $0xa8] sm:$0x1] %vm55_vm2, %v3532_v0  ;;  %64 = vst.msk [vmem:[#allocation2 + $0xc0] sm:$0x1] %vm55_vm2, %v3532_v0  ;;  %v263_v38 = vld [vmem:[%s5024_s0 + $0x88] sm:$0xff]  ;;  %v274_v39 = vld [vmem:[%s5024_s0 + $0xe0] sm:$0xff] }
   0xf   :  { %65 = vst.msk [vmem:[#allocation2 + $0xd8] sm:$0x1] %vm55_vm2, %v3532_v0  ;;  %66 = vst.msk [vmem:[#allocation2 + $0xf0] sm:$0x1] %vm55_vm2, %v3532_v0  ;;  %v270_v40 = vld [vmem:[%s5024_s0 + $0xc0] sm:$0xff]  ;;  %v275_v43 = vld [vmem:[%s5024_s0 + $0xe8] sm:$0xff] }
  0x10   :  { %67 = vst.msk [vmem:[#allocation2 + $0x108] sm:$0x1] %vm55_vm2, %v3532_v0  ;;  %68 = vst.msk [vmem:[#allocation2 + $0x120] sm:$0x1] %vm55_vm2, %v3532_v0  ;;  %v271_v44 = vld [vmem:[%s5024_s0 + $0xc8] sm:$0xff]  ;;  %v276_v46 = vld [vmem:[%s5024_s0 + $0xf0] sm:$0xff] }
  0x11   :  { %69 = vst.msk [vmem:[#allocation2 + $0x138] sm:$0x1] %vm55_vm2, %v3532_v0  ;;  %70 = vst.msk [vmem:[#allocation2 + $0x150] sm:$0x1] %vm55_vm2, %v3532_v0  ;;  %v384_v23 = vld [vmem:[#allocation2 + $0x1] sm:$0xff]  ;;  %v277_v48 = vld [vmem:[%s5024_s0 + $0xf8] sm:$0xff] }
  0x12   :  { %71 = vst.msk [vmem:[#allocation2 + $0x168] sm:$0x1] %vm55_vm2, %v3532_v0  ;;  %72 = vst.msk [vmem:[#allocation2 + $0x180] sm:$0x1] %vm55_vm2, %v3532_v0  ;;  %386 = vrot.lane.b32.xlu1 %v384_v23, %s3534_s28  ;;  %v281_v49 = vld [vmem:[%s5024_s0 + $0x118] sm:$0xff]  ;;  %v280_v51 = vld [vmem:[%s5024_s0 + $0x110] sm:$0xff] }
  0x13   :  { %94 = vst.msk [vmem:[#allocation2 + $0x1b8] sm:$0xff] %vm46_vm0, %v3532_v0  ;;  %314 = vst.msk [vmem:[#allocation2 + $0x39] sm:$0xff] %vm46_vm0, %v249_v1  ;;  %v289_v53 = vld [vmem:[%s5024_s0 + $0x158] sm:$0xff]  ;;  %v282_v55 = vld [vmem:[%s5024_s0 + $0x120] sm:$0xff]  ;;  %s3544_s12 = smov 64  }
  0x14   :  { %95 = vst.msk [vmem:[#allocation2 + $0x1c0] sm:$0x3] %vm49_vm1, %v3532_v0  ;;  %v285_v54 = vld [vmem:[%s5024_s0 + $0x138] sm:$0xff]  ;;  %v278_v56 = vld [vmem:[%s5024_s0 + $0x100] sm:$0xff]  ;;  %v288_v57 = vld [vmem:[%s5024_s0 + $0x150] sm:$0xff]  ;;  %vm1707_vm1 = vcmask 64516  }
  0x15   :  { %101 = vst.msk [vmem:[#allocation2 + $0x1c8] sm:$0x1] %vm55_vm2, %v3532_v0  ;;  %102 = vst.msk [vmem:[#allocation2 + $0x1e0] sm:$0x1] %vm55_vm2, %v3532_v0  ;;  %v284_v62 = vld [vmem:[%s5024_s0 + $0x130] sm:$0xff]  ;;  %v283_v63 = vld [vmem:[%s5024_s0 + $0x128] sm:$0xff] }
  0x16   :  { %103 = vst.msk [vmem:[#allocation2 + $0x1f8] sm:$0x1] %vm55_vm2, %v3532_v0  ;;  %104 = vst.msk [vmem:[#allocation2 + $0x210] sm:$0x1] %vm55_vm2, %v3532_v0  ;;  %v3488_v22 = vld [vmem:[%s5025_s1 + $0x30] sm:$0xff]   ;;  %v293_v23 = vld [vmem:[%s5024_s0 + $0x178] sm:$0xff] }
  0x17   :  { %105 = vst.msk [vmem:[#allocation2 + $0x228] sm:$0x1] %vm55_vm2, %v3532_v0  ;;  %106 = vst.msk [vmem:[#allocation2 + $0x240] sm:$0x1] %vm55_vm2, %v3532_v0 }
  0x18   :  { %107 = vst.msk [vmem:[#allocation2 + $0x258] sm:$0x1] %vm55_vm2, %v3532_v0  ;;  %108 = vst.msk [vmem:[#allocation2 + $0x270] sm:$0x1] %vm55_vm2, %v3532_v0 }
  0x19   :  { %109 = vst.msk [vmem:[#allocation2 + $0x288] sm:$0x1] %vm55_vm2, %v3532_v0  ;;  %110 = vst.msk [vmem:[#allocation2 + $0x2a0] sm:$0x1] %vm55_vm2, %v3532_v0 }
  0x1a   :  { %111 = vst.msk [vmem:[#allocation2 + $0x2b8] sm:$0x1] %vm55_vm2, %v3532_v0  ;;  %112 = vst.msk [vmem:[#allocation2 + $0x2d0] sm:$0x1] %vm55_vm2, %v3532_v0  ;;  %v3777_v25 = vld [vmem:[#allocation2 + $0x39] sm:$0xff] }
  0x1b   :  { %113 = vst.msk [vmem:[#allocation2 + $0x2e8] sm:$0x1] %vm55_vm2, %v3532_v0  ;;  %114 = vst.msk [vmem:[#allocation2 + $0x300] sm:$0x1] %vm55_vm2, %v3532_v0  ;;  %438 = vrot.lane.b32.xlu0 %v3777_v25, %s3533_s27 }
  0x1c   :  { %115 = vst.msk [vmem:[#allocation2 + $0x318] sm:$0x1] %vm55_vm2, %v3532_v0  ;;  %116 = vst.msk [vmem:[#allocation2 + $0x330] sm:$0x1] %vm55_vm2, %v3532_v0 }
  0x1d   :  { %56 = vst.msk [vmem:[#allocation2] sm:$0x1] %vm55_vm2, %v3532_v0  ;;  %100 = vst.msk [vmem:[#allocation2 + $0x1b0] sm:$0x1] %vm55_vm2, %v3532_v0  ;;  %vm190_vm2 = vcmask 62464  }
  0x1e   :  { %313 = vst.msk [vmem:[#allocation2 + $0x31] sm:$0xff] %vm46_vm0, %v248_v2  ;;  %318 = vst.msk [vmem:[#allocation2 + $0x69] sm:$0xff] %vm46_vm0, %v253_v3  ;;  %v279_v3 = vld [vmem:[%s5024_s0 + $0x108] sm:$0xff] }
  0x1f   :  { %322 = vst.msk [vmem:[#allocation2 + $0x99] sm:$0xff] %vm46_vm0, %v257_v4  ;;  %315 = vst.msk [vmem:[#allocation2 + $0x49] sm:$0xff] %vm46_vm0, %v250_v5  ;;  %v290_v4 = vld [vmem:[%s5024_s0 + $0x160] sm:$0xff] }
  0x20   :  { %311 = vst.msk [vmem:[#allocation2 + $0x19] sm:$0xff] %vm46_vm0, %v246_v6  ;;  %321 = vst.msk [vmem:[#allocation2 + $0x91] sm:$0xff] %vm46_vm0, %v256_v7  ;;  %v286_v5 = vld [vmem:[%s5024_s0 + $0x140] sm:$0xff] }
  0x21   :  { %317 = vst.msk [vmem:[#allocation2 + $0x61] sm:$0xff] %vm46_vm0, %v252_v8  ;;  %316 = vst.msk [vmem:[#allocation2 + $0x51] sm:$0xff] %vm46_vm0, %v251_v9  ;;  %v3482_v6 = vld [vmem:[%s5025_s1] sm:$0xff]   ;;  %v3483_v9 = vld [vmem:[%s5025_s1 + $0x8] sm:$0xff]  }
  0x22   :  { %312 = vst.msk [vmem:[#allocation2 + $0x21] sm:$0xff] %vm46_vm0, %v247_v10  ;;  %323 = vst.msk [vmem:[#allocation2 + $0xa9] sm:$0xff] %vm46_vm0, %v258_v11  ;;  %3330 = vmatprep.subr.bf16.mxu0 %v3482_v6  ;;  %v291_v10 = vld [vmem:[%s5024_s0 + $0x168] sm:$0xff] }
  0x23   :  { %319 = vst.msk [vmem:[#allocation2 + $0x79] sm:$0xff] %vm46_vm0, %v254_v12  ;;  %324 = vst.msk [vmem:[#allocation2 + $0xb1] sm:$0xff] %vm46_vm0, %v259_v13  ;;  %3331 = vmatpush3.bf16.msra.mxu0 %v3482_v6  ;;  %v287_v11 = vld [vmem:[%s5024_s0 + $0x148] sm:$0xff]  ;;  %v3484_v12 = vld [vmem:[%s5025_s1 + $0x10] sm:$0xff]  }
  0x24   :  { %320 = vst.msk [vmem:[#allocation2 + $0x81] sm:$0xff] %vm46_vm0, %v255_v14  ;;  %325 = vst.msk [vmem:[#allocation2 + $0xc1] sm:$0xff] %vm46_vm0, %v260_v15  ;;  %v375_v47 = vld [vmem:[#allocation2] sm:$0xff]  ;;  %3332 = vmatprep.subr.bf16.mxu0 %v3483_v9  ;;  %v3485_v15 = vld [vmem:[%s5025_s1 + $0x18] sm:$0xff]  }
  0x25   :  { %326 = vst.msk [vmem:[#allocation2 + $0xc9] sm:$0xff] %vm46_vm0, %v261_v16  ;;  %330 = vst.msk [vmem:[#allocation2 + $0xf9] sm:$0xff] %vm46_vm0, %v265_v17  ;;  %v3779_v26 = vld [vmem:[#allocation2 + $0x31] sm:$0xff]  ;;  %v3785_v27 = vld [vmem:[#allocation2 + $0x69] sm:$0xff] }
  0x26   :  { %329 = vst.msk [vmem:[#allocation2 + $0xf1] sm:$0xff] %vm46_vm0, %v264_v18  ;;  %338 = vst.msk [vmem:[#allocation2 + $0x159] sm:$0xff] %vm46_vm0, %v273_v19  ;;  %444 = vrot.lane.b32.xlu1 %v3779_v26, %s3534_s28  ;;  %v3787_v28 = vld [vmem:[#allocation2 + $0x99] sm:$0xff]  ;;  %v3791_v30 = vld [vmem:[#allocation2 + $0x30] sm:$0xff]  ;;  %490 = vrot.lane.b32.xlu0 %v3785_v27, %s3533_s27 }
  0x27   :  { %334 = vst.msk [vmem:[#allocation2 + $0x129] sm:$0xff] %vm46_vm0, %v269_v20  ;;  %331 = vst.msk [vmem:[#allocation2 + $0x109] sm:$0xff] %vm46_vm0, %v266_v21  ;;  %v3799_v32 = vld [vmem:[#allocation2 + $0x90] sm:$0xff]  ;;  %v449_v33 = vld [vmem:[#allocation2 + $0x48] sm:$0xff]  ;;  %3333 = vmatpush3.bf16.msra.mxu0 %v3483_v9 }
  0x28   :  { %327 = vst.msk [vmem:[#allocation2 + $0xd9] sm:$0xff] %vm46_vm0, %v262_v24  ;;  %v3789_v29 = vld [vmem:[#allocation2 + $0x60] sm:$0xff]  ;;  %435 = vst.msk [vmem:[#allocation6 + $0x8] sm:$0xff] %vm46_vm0, %v3791_v30  ;;  %v391_v34 = vld [vmem:[#allocation2 + $0x18] sm:$0xff]  ;;  %3334 = vmatprep.subr.bf16.mxu0 %v3484_v12 }
  0x29   :  { %487 = vst.msk [vmem:[#allocation6 + $0x10] sm:$0xff] %vm46_vm0, %v3789_v29  ;;  %539 = vst.msk [vmem:[#allocation6 + $0x18] sm:$0xff] %vm46_vm0, %v3799_v32  ;;  %v3832_v41 = vld [vmem:[#allocation2 + $0x91] sm:$0xff]  ;;  %v3834_v42 = vld [vmem:[#allocation2 + $0x61] sm:$0xff] }
  0x2a   :  { %542 = vrot.lane.b32.xlu1 %v3787_v28, %s3533_s27  ;;  %337 = vst.msk [vmem:[#allocation2 + $0x151] sm:$0xff] %vm46_vm0, %v272_v35  ;;  %333 = vst.msk [vmem:[#allocation2 + $0x121] sm:$0xff] %vm46_vm0, %v268_v36  ;;  %393 = vrot.lane.b32.xlu0 %v391_v34, %s3535_s19  ;;  %v455_v50 = vld [vmem:[#allocation2 + $0x51] sm:$0xff]  ;;  %v398_v52 = vld [vmem:[#allocation2 + $0x21] sm:$0xff] }
  0x2b   :  { %v3793_v31 = vld [vmem:[#allocation2 + $0xc0] sm:$0xff]  ;;  %332 = vst.msk [vmem:[#allocation2 + $0x111] sm:$0xff] %vm46_vm0, %v267_v37  ;;  %328 = vst.msk [vmem:[#allocation2 + $0xe1] sm:$0xff] %vm46_vm0, %v263_v38  ;;  %v553_v59 = vld [vmem:[#allocation2 + $0xa8] sm:$0xff]  ;;  %3335 = vmatpush3.bf16.msra.mxu0 %v3484_v12 }
  0x2c   :  { %591 = vst.msk [vmem:[#allocation6 + $0x20] sm:$0xff] %vm46_vm0, %v3793_v31  ;;  %339 = vst.msk [vmem:[#allocation2 + $0x169] sm:$0xff] %vm46_vm0, %v274_v39  ;;  %v501_v60 = vld [vmem:[#allocation2 + $0x78] sm:$0xff]  ;;  %v461_v1 = vld [vmem:[#allocation2 + $0x49] sm:$0xff]  ;;  %3336 = vmatprep.subr.bf16.mxu0 %v3485_v15 }
  0x2d   :  { %335 = vst.msk [vmem:[#allocation2 + $0x139] sm:$0xff] %vm46_vm0, %v270_v40  ;;  %340 = vst.msk [vmem:[#allocation2 + $0x171] sm:$0xff] %vm46_vm0, %v275_v43  ;;  %v3846_v45 = vld [vmem:[#allocation2 + $0xf0] sm:$0xff]  ;;  %v405_v2 = vld [vmem:[#allocation2 + $0x19] sm:$0xff] }
  0x2e   :  { %451 = vrot.lane.b32.xlu1 %v449_v33, %s3535_s19  ;;  %336 = vst.msk [vmem:[#allocation2 + $0x141] sm:$0xff] %vm46_vm0, %v271_v44  ;;  %341 = vst.msk [vmem:[#allocation2 + $0x181] sm:$0xff] %vm46_vm0, %v276_v46  ;;  %496 = vrot.lane.b32.xlu0 %v3834_v42, %s3534_s28  ;;  %v559_v7 = vld [vmem:[#allocation2 + $0xb1] sm:$0xff]  ;;  %v507_v8 = vld [vmem:[#allocation2 + $0x81] sm:$0xff] }
  0x2f   :  { %643 = vst.msk [vmem:[#allocation6 + $0x28] sm:$0xff] %vm46_vm0, %v3846_v45  ;;  %376 = vst.msk [vmem:[#allocation6] sm:$0xff] %vm46_vm0, %v375_v47  ;;  %v565_v16 = vld [vmem:[#allocation2 + $0xa9] sm:$0xff]  ;;  %v513_v17 = vld [vmem:[#allocation2 + $0x79] sm:$0xff]  ;;  %3337 = vmatpush3.bf16.msra.mxu0 %v3485_v15 }
  0x30   :  { %342 = vst.msk [vmem:[#allocation2 + $0x189] sm:$0xff] %vm46_vm0, %v277_v48  ;;  %346 = vst.msk [vmem:[#allocation2 + $0x1e9] sm:$0xff] %vm46_vm0, %v281_v49  ;;  %v3486_v18 = vld [vmem:[%s5025_s1 + $0x20] sm:$0xff]   ;;  %v292_v19 = vld [vmem:[%s5024_s0 + $0x170] sm:$0xff] }
  0x31   :  { %345 = vst.msk [vmem:[#allocation2 + $0x1e1] sm:$0xff] %vm46_vm0, %v280_v51  ;;  %354 = vst.msk [vmem:[#allocation2 + $0x249] sm:$0xff] %vm46_vm0, %v289_v53  ;;  %v3894_v58 = vld [vmem:[#allocation2 + $0x120] sm:$0xff]  ;;  %v3898_v61 = vld [vmem:[#allocation2 + $0x150] sm:$0xff]  ;;  %3338 = vmatprep.subr.bf16.mxu0 %v3486_v18 }
  0x32   :  { %548 = vrot.lane.b32.xlu1 %v3832_v41, %s3534_s28  ;;  %350 = vst.msk [vmem:[#allocation2 + $0x219] sm:$0xff] %vm46_vm0, %v285_v54  ;;  %347 = vst.msk [vmem:[#allocation2 + $0x1f9] sm:$0xff] %vm46_vm0, %v282_v55  ;;  %400 = vrot.lane.b32.xlu0 %v398_v52, %s3536_s23  ;;  %v3487_v20 = vld [vmem:[%s5025_s1 + $0x28] sm:$0xff]   ;;  %v4101_v33 = vld [vmem:[#allocation2 + $0xf1] sm:$0xff] }
  0x33   :  { %343 = vst.msk [vmem:[#allocation2 + $0x1c9] sm:$0xff] %vm46_vm0, %v278_v56  ;;  %353 = vst.msk [vmem:[#allocation2 + $0x241] sm:$0xff] %vm46_vm0, %v288_v57  ;;  %3339 = vmatpush3.bf16.msra.mxu0 %v3486_v18  ;;  %v298_v34 = vld [vmem:[%s5024_s0 + $0x1a0] sm:$0xff]  ;;  %v696_v37 = vld [vmem:[#allocation2 + $0x129] sm:$0xff] }
  0x34   :  { %695 = vst.msk [vmem:[#allocation6 + $0x30] sm:$0xff] %vm46_vm0, %v3894_v58  ;;  %747 = vst.msk [vmem:[#allocation6 + $0x38] sm:$0xff] %vm46_vm0, %v3898_v61  ;;  %3340 = vmatprep.subr.bf16.mxu0 %v3487_v20  ;;  %v294_v35 = vld [vmem:[%s5024_s0 + $0x180] sm:$0xff]  ;;  %v304_v38 = vld [vmem:[%s5024_s0 + $0x1d0] sm:$0xff] }
  0x35   :  { %349 = vst.msk [vmem:[#allocation2 + $0x211] sm:$0xff] %vm46_vm0, %v284_v62  ;;  %348 = vst.msk [vmem:[#allocation2 + $0x201] sm:$0xff] %vm46_vm0, %v283_v63  ;;  %v4114_v36 = vld [vmem:[#allocation2 + $0x159] sm:$0xff]  ;;  %v300_v39 = vld [vmem:[%s5024_s0 + $0x1b0] sm:$0xff] }
  0x36   :  { %457 = vrot.lane.b32.xlu1 %v455_v50, %s3536_s23  ;;  %503 = vrot.lane.b32.xlu0 %v501_v60, %s3535_s19  ;;  %344 = vst.msk [vmem:[#allocation2 + $0x1d1] sm:$0xff] %vm46_vm0, %v279_v3  ;;  %355 = vst.msk [vmem:[#allocation2 + $0x259] sm:$0xff] %vm46_vm0, %v290_v4  ;;  %v657_v40 = vld [vmem:[#allocation2 + $0x108] sm:$0xff]  ;;  %v4136_v44 = vld [vmem:[#allocation2 + $0x151] sm:$0xff] }
  0x37   :  { %351 = vst.msk [vmem:[#allocation2 + $0x229] sm:$0xff] %vm46_vm0, %v286_v5  ;;  %356 = vst.msk [vmem:[#allocation2 + $0x261] sm:$0xff] %vm46_vm0, %v291_v10  ;;  %3341 = vmatpush3.bf16.msra.mxu0 %v3487_v20  ;;  %v295_v43 = vld [vmem:[%s5024_s0 + $0x188] sm:$0xff]  ;;  %v306_v47 = vld [vmem:[%s5024_s0 + $0x1e0] sm:$0xff] }
  0x38   :  { %352 = vst.msk [vmem:[#allocation2 + $0x231] sm:$0xff] %vm46_vm0, %v287_v11  ;;  %v3947_v14 = vld [vmem:[#allocation2 + $0x1e0] sm:$0xff]  ;;  %357 = vst.msk [vmem:[#allocation2 + $0x271] sm:$0xff] %vm46_vm0, %v292_v19  ;;  %3342 = vmatprep.subr.bf16.mxu0 %v3488_v22  ;;  %v663_v49 = vld [vmem:[#allocation2 + $0x111] sm:$0xff] }
  0x39   :  { %851 = vst.msk [vmem:[#allocation6 + $0x48] sm:$0xff] %vm46_vm0, %v3947_v14  ;;  %358 = vst.msk [vmem:[#allocation2 + $0x279] sm:$0xff] %vm46_vm0, %v293_v23  ;;  %v702_v46 = vld [vmem:[#allocation2 + $0x121] sm:$0xff]  ;;  %v709_v52 = vld [vmem:[#allocation2 + $0x138] sm:$0xff] }
  0x3a   :  { %555 = vrot.lane.b32.xlu1 %v553_v59, %s3535_s19  ;;  %407 = vrot.lane.b32.xlu0 %v405_v2, %s3537_s16  ;;  %137 = vst.msk [vmem:[#allocation3] sm:$0xff] %vm136_vm3, %v3532_v0  ;;  %165 = vst.msk [vmem:[#allocation3 + $0xa0] sm:$0xff] %vm136_vm3, %v3532_v0  ;;  %v4040_v21 = vld [vmem:[#allocation2 + $0x240] sm:$0xff]  ;;  %v761_v51 = vld [vmem:[#allocation2 + $0x168] sm:$0xff] }
  0x3b   :  { %145 = vst.msk [vmem:[#allocation3 + $0x10] sm:$0x1] %vm143_vm4, %v3532_v0  ;;  %146 = vst.msk [vmem:[#allocation3 + $0x20] sm:$0x1] %vm143_vm4, %v3532_v0  ;;  %3343 = vmatpush3.bf16.msra.mxu0 %v3488_v22  ;;  %v302_v48 = vld [vmem:[%s5024_s0 + $0x1c0] sm:$0xff]  ;;  %v307_v53 = vld [vmem:[%s5024_s0 + $0x1e8] sm:$0xff] }
  0x3c   :  { %v3945_v13 = vld [vmem:[#allocation2 + $0x210] sm:$0xff]  ;;  %147 = vst.msk [vmem:[#allocation3 + $0x30] sm:$0x1] %vm143_vm4, %v3532_v0  ;;  %148 = vst.msk [vmem:[#allocation3 + $0x40] sm:$0x1] %vm143_vm4, %v3532_v0  ;;  %v611_v50 = vld [vmem:[#allocation2 + $0xe1] sm:$0xff] }
  0x3d   :  { %903 = vst.msk [vmem:[#allocation6 + $0x50] sm:$0xff] %vm46_vm0, %v3945_v13  ;;  %955 = vst.msk [vmem:[#allocation6 + $0x58] sm:$0xff] %vm46_vm0, %v4040_v21  ;;  %v303_v54 = vld [vmem:[%s5024_s0 + $0x1c8] sm:$0xff]  ;;  %v617_v56 = vld [vmem:[#allocation2 + $0xd9] sm:$0xff] }
  0x3e   :  { %463 = vrot.lane.b32.xlu1 %v461_v1, %s3537_s16  ;;  %509 = vrot.lane.b32.xlu0 %v507_v8, %s3536_s23  ;;  %149 = vst.msk [vmem:[#allocation3 + $0x50] sm:$0x1] %vm143_vm4, %v3532_v0  ;;  %150 = vst.msk [vmem:[#allocation3 + $0x60] sm:$0x1] %vm143_vm4, %v3532_v0  ;;  %v669_v55 = vld [vmem:[#allocation2 + $0x109] sm:$0xff]  ;;  %v767_v57 = vld [vmem:[#allocation2 + $0x171] sm:$0xff] }
  0x3f   :  { %151 = vst.msk [vmem:[#allocation3 + $0x70] sm:$0x1] %vm143_vm4, %v3532_v0  ;;  %152 = vst.msk [vmem:[#allocation3 + $0x80] sm:$0x1] %vm143_vm4, %v3532_v0  ;;  %v4060_v24 = vld [vmem:[#allocation2 + $0x270] sm:$0xff]  ;;  %v715_v59 = vld [vmem:[#allocation2 + $0x141] sm:$0xff] }
  0x40   :  { %171 = vst.msk [vmem:[#allocation3 + $0xb0] sm:$0x1] %vm143_vm4, %v3532_v0  ;;  %172 = vst.msk [vmem:[#allocation3 + $0xc0] sm:$0x1] %vm143_vm4, %v3532_v0  ;;  %v773_v63 = vld [vmem:[#allocation2 + $0x169] sm:$0xff]  ;;  %v721_v1 = vld [vmem:[#allocation2 + $0x139] sm:$0xff] }
  0x41   :  { %173 = vst.msk [vmem:[#allocation3 + $0xd0] sm:$0x1] %vm143_vm4, %v3532_v0  ;;  %174 = vst.msk [vmem:[#allocation3 + $0xe0] sm:$0x1] %vm143_vm4, %v3532_v0  ;;  %v308_v2 = vld [vmem:[%s5024_s0 + $0x1f0] sm:$0xff]  ;;  %v309_v3 = vld [vmem:[%s5024_s0 + $0x1f8] sm:$0xff] }
  0x42   :  { %561 = vrot.lane.b32.xlu1 %v559_v7, %s3536_s23  ;;  %415 = vrot.lane.b32.xlu0 %v3791_v30, %s3538_s9  ;;  %175 = vst.msk [vmem:[#allocation3 + $0xf0] sm:$0x1] %vm143_vm4, %v3532_v0  ;;  %176 = vst.msk [vmem:[#allocation3 + $0x100] sm:$0x1] %vm143_vm4, %v3532_v0  ;;  %v297_v30 = vld [vmem:[%s5024_s0 + $0x198] sm:$0xff]  ;;  %v798_v4 = vld [vmem:[#allocation2 + $0x1b0] sm:$0xff] }
  0x43   :  { %177 = vst.msk [vmem:[#allocation3 + $0x110] sm:$0x1] %vm143_vm4, %v3532_v0  ;;  %178 = vst.msk [vmem:[#allocation3 + $0x120] sm:$0x1] %vm143_vm4, %v3532_v0  ;;  %v792_v9 = vld [vmem:[#allocation2 + $0x181] sm:$0xff]  ;;  %v4214_v12 = vld [vmem:[#allocation2 + $0x1e9] sm:$0xff] }
  0x44   :  { %195 = vst.msk [vmem:[#allocation4 + $0x8] sm:$0x1] %vm143_vm4, %v3532_v0  ;;  %196 = vst.msk [vmem:[#allocation4 + $0x10] sm:$0x1] %vm143_vm4, %v3532_v0  ;;  %v800_v15 = vld [vmem:[#allocation2 + $0x1b9] sm:$0xff]  ;;  %v4221_v18 = vld [vmem:[#allocation2 + $0x1e1] sm:$0xff] }
  0x45   :  { %197 = vst.msk [vmem:[#allocation4 + $0x18] sm:$0x1] %vm143_vm4, %v3532_v0  ;;  %198 = vst.msk [vmem:[#allocation4 + $0x20] sm:$0x1] %vm143_vm4, %v3532_v0  ;;  %v806_v19 = vld [vmem:[#allocation2 + $0x1b1] sm:$0xff]  ;;  %v4228_v23 = vld [vmem:[#allocation2 + $0x249] sm:$0xff] }
  0x46   :  { %470 = vrot.lane.b32.xlu1 %v3789_v29, %s3538_s9  ;;  %515 = vrot.lane.b32.xlu0 %v513_v17, %s3537_s16  ;;  %211 = vst.msk [vmem:[#allocation4 + $0x38] sm:$0x1] %vm143_vm4, %v3532_v0  ;;  %212 = vst.msk [vmem:[#allocation4 + $0x40] sm:$0x1] %vm143_vm4, %v3532_v0  ;;  %v584_v29 = vld [vmem:[#allocation2 + $0xc1] sm:$0xff] }
  0x47   :  { %213 = vst.msk [vmem:[#allocation4 + $0x48] sm:$0x1] %vm143_vm4, %v3532_v0  ;;  %214 = vst.msk [vmem:[#allocation4 + $0x50] sm:$0x1] %vm143_vm4, %v3532_v0 }
  0x48   :  { %223 = vst.msk [vmem:[#allocation5] sm:$0xf] %vm222_vm5, %v3532_v0  ;;  %235 = vst.msk [vmem:[#allocation5 + $0x10] sm:$0xf] %vm222_vm5, %v3532_v0 }
  0x49   :  { %227 = vst.msk [vmem:[#allocation5 + $0x4] sm:$0x1] %vm143_vm4, %v3532_v0  ;;  %228 = vst.msk [vmem:[#allocation5 + $0x8] sm:$0x1] %vm143_vm4, %v3532_v0 }
  0x4a   :  { %567 = vrot.lane.b32.xlu1 %v565_v16, %s3537_s16  ;;  %422 = vrot.lane.b32.xlu0 %v3777_v25, %s3539_s17  ;;  %239 = vst.msk [vmem:[#allocation5 + $0x14] sm:$0x1] %vm143_vm4, %v3532_v0  ;;  %240 = vst.msk [vmem:[#allocation5 + $0x18] sm:$0x1] %vm143_vm4, %v3532_v0  ;;  %v3489_v25 = vld [vmem:[%s5025_s1 + $0x38] sm:$0xff]  }
  0x4b   :  { %144 = vst.msk [vmem:[#allocation3] sm:$0x1] %vm143_vm4, %v3532_v0  ;;  %170 = vst.msk [vmem:[#allocation3 + $0xa0] sm:$0x1] %vm143_vm4, %v3532_v0  ;;  %3344 = vmatprep.subr.bf16.mxu0 %v3489_v25 }
  0x4c   :  { %226 = vst.msk [vmem:[#allocation5] sm:$0x1] %vm143_vm4, %v3532_v0  ;;  %238 = vst.msk [vmem:[#allocation5 + $0x10] sm:$0x1] %vm143_vm4, %v3532_v0  ;;  %3345 = vmatpush3.bf16.msra.mxu0 %v3489_v25  ;;  %v4230_v25 = vld [vmem:[#allocation2 + $0x219] sm:$0xff] }
  0x4d   :  { %1007 = vst.msk [vmem:[#allocation6 + $0x60] sm:$0xff] %vm46_vm0, %v4060_v24  ;;  %362 = vst.msk [vmem:[#allocation2 + $0x2a9] sm:$0xff] %vm46_vm0, %v297_v30  ;;  %v865_v30 = vld [vmem:[#allocation2 + $0x1f8] sm:$0xff] }
  0x4e   :  { %476 = vrot.lane.b32.xlu1 %v3785_v27, %s3539_s17  ;;  %522 = vrot.lane.b32.xlu0 %v3799_v32, %s3538_s9  ;;  %v578_v27 = vld [vmem:[#allocation2 + $0xc9] sm:$0xff]  ;;  %v301_v32 = vld [vmem:[%s5024_s0 + $0x1b8] sm:$0xff]  ;;  %363 = vst.msk [vmem:[#allocation2 + $0x2b9] sm:$0xff] %vm46_vm0, %v298_v34  ;;  %359 = vst.msk [vmem:[#allocation2 + $0x289] sm:$0xff] %vm46_vm0, %v294_v35 }
  0x4f   :  { %366 = vst.msk [vmem:[#allocation2 + $0x2d9] sm:$0xff] %vm46_vm0, %v301_v32  ;;  %369 = vst.msk [vmem:[#allocation2 + $0x301] sm:$0xff] %vm46_vm0, %v304_v38  ;;  %v4242_v32 = vld [vmem:[#allocation2 + $0x241] sm:$0xff] }
  0x50   :  { %365 = vst.msk [vmem:[#allocation2 + $0x2d1] sm:$0xff] %vm46_vm0, %v300_v39  ;;  %360 = vst.msk [vmem:[#allocation2 + $0x291] sm:$0xff] %vm46_vm0, %v295_v43 }
  0x51   :  { %371 = vst.msk [vmem:[#allocation2 + $0x319] sm:$0xff] %vm46_vm0, %v306_v47  ;;  %367 = vst.msk [vmem:[#allocation2 + $0x2e9] sm:$0xff] %vm46_vm0, %v302_v48 }
  0x52   :  { %574 = vrot.lane.b32.xlu1 %v3793_v31, %s3538_s9  ;;  %429 = vrot.lane.b32.xlu0 %v3779_v26, %s3540_s26  ;;  %v296_v26 = vld [vmem:[%s5024_s0 + $0x190] sm:$0xff]  ;;  %v4087_v31 = vld [vmem:[#allocation2 + $0xf9] sm:$0xff]  ;;  %372 = vst.msk [vmem:[#allocation2 + $0x321] sm:$0xff] %vm46_vm0, %v307_v53  ;;  %368 = vst.msk [vmem:[#allocation2 + $0x2f1] sm:$0xff] %vm46_vm0, %v303_v54 }
  0x53   :  { %361 = vst.msk [vmem:[#allocation2 + $0x2a1] sm:$0xff] %vm46_vm0, %v296_v26  ;;  %373 = vst.msk [vmem:[#allocation2 + $0x331] sm:$0xff] %vm46_vm0, %v308_v2  ;;  %v813_v26 = vld [vmem:[#allocation2 + $0x1c8] sm:$0xff] }
  0x54   :  { %374 = vst.msk [vmem:[#allocation2 + $0x339] sm:$0xff] %vm46_vm0, %v309_v3  ;;  %799 = vst.msk [vmem:[#allocation6 + $0x40] sm:$0xff] %vm46_vm0, %v798_v4 }
  0x55   :  { %139 = vst.msk [vmem:[#allocation3 + $0x8] sm:$0x3] %vm138_vm14, %v3532_v0  ;;  %166 = vst.msk [vmem:[#allocation3 + $0xa8] sm:$0x3] %vm138_vm14, %v3532_v0 }
  0x56   :  { %482 = vrot.lane.b32.xlu1 %v3834_v42, %s3540_s26  ;;  %528 = vrot.lane.b32.xlu0 %v3787_v28, %s3539_s17  ;;  %v305_v28 = vld [vmem:[%s5024_s0 + $0x1d8] sm:$0xff]  ;;  %v299_v42 = vld [vmem:[%s5024_s0 + $0x1a8] sm:$0xff]  ;;  %191 = vst.msk [vmem:[#allocation4] sm:$0x3f] %vm190_vm2, %v3532_v0  ;;  %207 = vst.msk [vmem:[#allocation4 + $0x30] sm:$0x3f] %vm190_vm2, %v3532_v0 }
  0x57   :  { %370 = vst.msk [vmem:[#allocation2 + $0x309] sm:$0xff] %vm46_vm0, %v305_v28  ;;  %364 = vst.msk [vmem:[#allocation2 + $0x2c1] sm:$0xff] %vm46_vm0, %v299_v42  ;;  %v4166_v60 = vld [vmem:[#allocation2 + $0x2d0] sm:$0xff]  ;;  %vm2470_vm2 = vcmask 255168  }
  0x58   :  { %1111 = vst.msk [vmem:[#allocation6 + $0x70] sm:$0xff] %vm46_vm0, %v4166_v60 }
  0x59   :  { %194 = vst.msk [vmem:[#allocation4] sm:$0x1] %vm143_vm4, %v3532_v0  ;;  %210 = vst.msk [vmem:[#allocation4 + $0x30] sm:$0x1] %vm143_vm4, %v3532_v0 }
  0x5a   :  { %580 = vrot.lane.b32.xlu1 %v578_v27, %s3539_s17  ;;  %534 = vrot.lane.b32.xlu0 %v3832_v41, %s3540_s26  ;;  %v605_v41 = vld [vmem:[#allocation2 + $0xd8] sm:$0xff]  ;;  %v4168_v62 = vld [vmem:[#allocation2 + $0x2a0] sm:$0xff] }
  0x5b   :  { %1059 = vst.msk [vmem:[#allocation6 + $0x68] sm:$0xff] %vm46_vm0, %v4168_v62 }
  0x5e   :  { %586 = vrot.lane.b32.xlu1 %v584_v29, %s3540_s26  ;;  %594 = vrot.lane.b32.xlu0 %v578_v27, %s3533_s27 }
  0x62   :  { %646 = vrot.lane.b32.xlu1 %v4087_v31, %s3533_s27  ;;  %600 = vrot.lane.b32.xlu0 %v584_v29, %s3534_s28 }
  0x66   :  { %652 = vrot.lane.b32.xlu1 %v4101_v33, %s3534_s28  ;;  %698 = vrot.lane.b32.xlu0 %v696_v37, %s3533_s27 }
  0x6a   :  { %750 = vrot.lane.b32.xlu1 %v4114_v36, %s3533_s27  ;;  %607 = vrot.lane.b32.xlu0 %v605_v41, %s3535_s19  ;;  %v917_v41 = vld [vmem:[#allocation2 + $0x228] sm:$0xff] }
  0x6e   :  { %659 = vrot.lane.b32.xlu1 %v657_v40, %s3535_s19  ;;  %704 = vrot.lane.b32.xlu0 %v702_v46, %s3534_s28  ;;  %v969_v40 = vld [vmem:[#allocation2 + $0x258] sm:$0xff] }
  0x72   :  { %756 = vrot.lane.b32.xlu1 %v4136_v44, %s3534_s28  ;;  %613 = vrot.lane.b32.xlu0 %v611_v50, %s3536_s23  ;;  %v923_v50 = vld [vmem:[#allocation2 + $0x231] sm:$0xff] }
  0x76   :  { %665 = vrot.lane.b32.xlu1 %v663_v49, %s3536_s23  ;;  %711 = vrot.lane.b32.xlu0 %v709_v52, %s3535_s19  ;;  %v975_v49 = vld [vmem:[#allocation2 + $0x261] sm:$0xff] }
  0x7a   :  { %763 = vrot.lane.b32.xlu1 %v761_v51, %s3535_s19  ;;  %619 = vrot.lane.b32.xlu0 %v617_v56, %s3537_s16  ;;  %v929_v56 = vld [vmem:[#allocation2 + $0x229] sm:$0xff] }
  0x7e   :  { %671 = vrot.lane.b32.xlu1 %v669_v55, %s3537_s16  ;;  %717 = vrot.lane.b32.xlu0 %v715_v59, %s3536_s23  ;;  %v380_v5 = vpop.permute.xlu0 %379  ;;  %v981_v55 = vld [vmem:[#allocation2 + $0x259] sm:$0xff] }
  0x7f   :  { %383 = vst.msk [vmem:[#allocation6] sm:$0xff] %vm382_vm6, %v380_v5 }
  0x82   :  { %769 = vrot.lane.b32.xlu1 %v767_v57, %s3536_s23  ;;  %626 = vrot.lane.b32.xlu0 %v3846_v45, %s3538_s9  ;;  %v780_v45 = vld [vmem:[#allocation2 + $0x180] sm:$0xff] }
  0x84   :  { %v387_v6 = vpop.permute.xlu1 %386 }
  0x85   :  { %390 = vst.msk [vmem:[#allocation6] sm:$0xff] %vm389_vm7, %v387_v6 }
  0x86   :  { %678 = vrot.lane.b32.xlu1 %v3894_v58, %s3538_s9  ;;  %723 = vrot.lane.b32.xlu0 %v721_v1, %s3537_s16  ;;  %v4187_v58 = vld [vmem:[#allocation2 + $0x300] sm:$0xff] }
  0x87   :  { %1163 = vst.msk [vmem:[#allocation6 + $0x78] sm:$0xff] %vm46_vm0, %v4187_v58  ;;  %vm1768_vm0 = vcmask 191616  }
  0x8a   :  { %775 = vrot.lane.b32.xlu1 %v773_v63, %s3537_s16  ;;  %632 = vrot.lane.b32.xlu0 %v4087_v31, %s3539_s17 }
  0x8d   :  { %v439_v7 = vpop.permute.xlu0 %438 }
  0x8e   :  { %684 = vrot.lane.b32.xlu1 %v696_v37, %s3539_s17  ;;  %730 = vrot.lane.b32.xlu0 %v3898_v61, %s3538_s9  ;;  %v786_v61 = vld [vmem:[#allocation2 + $0x189] sm:$0xff]  ;;  %441 = vst.msk [vmem:[#allocation6 + $0x8] sm:$0xff] %vm382_vm6, %v439_v7  ;;  %v819_v37 = vld [vmem:[#allocation2 + $0x1d1] sm:$0xff]  ;;  %v994_v7 = vld [vmem:[#allocation2 + $0x279] sm:$0xff] }
  0x92   :  { %782 = vrot.lane.b32.xlu1 %v780_v45, %s3538_s9  ;;  %638 = vrot.lane.b32.xlu0 %v4101_v33, %s3540_s26  ;;  %v4244_v33 = vld [vmem:[#allocation2 + $0x211] sm:$0xff] }
  0x96   :  { %690 = vrot.lane.b32.xlu1 %v702_v46, %s3540_s26  ;;  %736 = vrot.lane.b32.xlu0 %v4114_v36, %s3539_s17  ;;  %v871_v36 = vld [vmem:[#allocation2 + $0x201] sm:$0xff]  ;;  %v825_v46 = vld [vmem:[#allocation2 + $0x1c9] sm:$0xff] }
  0x98   :  { %v445_v8 = vpop.permute.xlu1 %444  ;;  %v491_v10 = vpop.permute.xlu0 %490 }
  0x99   :  { %447 = vst.msk [vmem:[#allocation6 + $0x8] sm:$0xff] %vm389_vm7, %v445_v8 }
  0x9a   :  { %788 = vrot.lane.b32.xlu1 %v786_v61, %s3539_s17  ;;  %493 = vst.msk [vmem:[#allocation6 + $0x10] sm:$0xff] %vm382_vm6, %v491_v10  ;;  %742 = vrot.lane.b32.xlu0 %v4136_v44, %s3540_s26  ;;  %v877_v44 = vld [vmem:[#allocation2 + $0x1f9] sm:$0xff] }
  0x9b   :  { %v1962_v61 = vld [vmem:[#allocation3 + $0xa0] sm:$0xf] }
  0x9c   :  { %v543_v11 = vpop.permute.xlu1 %542  ;;  %v394_v17 = vpop.permute.xlu0 %393 }
  0x9d   :  { %545 = vst.msk [vmem:[#allocation6 + $0x18] sm:$0xff] %vm382_vm6, %v543_v11  ;;  %v1000_v11 = vld [vmem:[#allocation2 + $0x271] sm:$0xff] }
  0x9e   :  { %794 = vrot.lane.b32.xlu1 %v792_v9, %s3540_s26  ;;  %397 = vst.msk [vmem:[#allocation6] sm:$0xff] %vm396_vm8, %v394_v17  ;;  %802 = vrot.lane.b32.xlu0 %v800_v15, %s3533_s27 }
  0xa0   :  { %v452_v16 = vpop.permute.xlu1 %451  ;;  %v497_v22 = vpop.permute.xlu0 %496 }
  0xa1   :  { %454 = vst.msk [vmem:[#allocation6 + $0x8] sm:$0xff] %vm396_vm8, %v452_v16  ;;  %v4308_v16 = vld [vmem:[#allocation2 + $0x2a9] sm:$0xff] }
  0xa2   :  { %854 = vrot.lane.b32.xlu1 %v4214_v12, %s3533_s27  ;;  %499 = vst.msk [vmem:[#allocation6 + $0x10] sm:$0xff] %vm389_vm7, %v497_v22  ;;  %808 = vrot.lane.b32.xlu0 %v806_v19, %s3534_s28  ;;  %v4315_v19 = vld [vmem:[#allocation2 + $0x2a1] sm:$0xff] }
  0xa4   :  { %v549_v20 = vpop.permute.xlu1 %548  ;;  %v401_v29 = vpop.permute.xlu0 %400 }
  0xa5   :  { %551 = vst.msk [vmem:[#allocation6 + $0x18] sm:$0xff] %vm389_vm7, %v549_v20 }
  0xa6   :  { %860 = vrot.lane.b32.xlu1 %v4221_v18, %s3534_s28  ;;  %404 = vst.msk [vmem:[#allocation6] sm:$0xff] %vm403_vm9, %v401_v29  ;;  %906 = vrot.lane.b32.xlu0 %v4230_v25, %s3533_s27 }
  0xa8   :  { %v458_v27 = vpop.permute.xlu1 %457  ;;  %v504_v28 = vpop.permute.xlu0 %503 }
  0xa9   :  { %460 = vst.msk [vmem:[#allocation6 + $0x8] sm:$0xff] %vm403_vm9, %v458_v27 }
  0xaa   :  { %958 = vrot.lane.b32.xlu1 %v4228_v23, %s3533_s27  ;;  %506 = vst.msk [vmem:[#allocation6 + $0x10] sm:$0xff] %vm396_vm8, %v504_v28  ;;  %815 = vrot.lane.b32.xlu0 %v813_v26, %s3535_s19  ;;  %v1021_v26 = vld [vmem:[#allocation2 + $0x288] sm:$0xff] }
  0xac   :  { %v556_v31 = vpop.permute.xlu1 %555  ;;  %v408_v35 = vpop.permute.xlu0 %407 }
  0xad   :  { %558 = vst.msk [vmem:[#allocation6 + $0x18] sm:$0xff] %vm396_vm8, %v556_v31 }
  0xae   :  { %867 = vrot.lane.b32.xlu1 %v865_v30, %s3535_s19  ;;  %411 = vst.msk [vmem:[#allocation6] sm:$0xff] %vm410_vm10, %v408_v35  ;;  %912 = vrot.lane.b32.xlu0 %v4244_v33, %s3534_s28  ;;  %v1073_v30 = vld [vmem:[#allocation2 + $0x2b8] sm:$0xff] }
  0xb0   :  { %v464_v34 = vpop.permute.xlu1 %463  ;;  %v510_v39 = vpop.permute.xlu0 %509 }
  0xb1   :  { %466 = vst.msk [vmem:[#allocation6 + $0x8] sm:$0xff] %vm410_vm10, %v464_v34 }
  0xb2   :  { %964 = vrot.lane.b32.xlu1 %v4242_v32, %s3534_s28  ;;  %512 = vst.msk [vmem:[#allocation6 + $0x10] sm:$0xff] %vm403_vm9, %v510_v39  ;;  %821 = vrot.lane.b32.xlu0 %v819_v37, %s3536_s23  ;;  %v1027_v37 = vld [vmem:[#allocation2 + $0x291] sm:$0xff] }
  0xb4   :  { %v562_v38 = vpop.permute.xlu1 %561  ;;  %v416_v43 = vpop.permute.xlu0 %415 }
  0xb5   :  { %564 = vst.msk [vmem:[#allocation6 + $0x18] sm:$0xff] %vm403_vm9, %v562_v38 }
  0xb6   :  { %873 = vrot.lane.b32.xlu1 %v871_v36, %s3536_s23  ;;  %419 = vst.msk [vmem:[#allocation6] sm:$0xff] %vm418_vm11, %v416_v43  ;;  %919 = vrot.lane.b32.xlu0 %v917_v41, %s3535_s19  ;;  %v1079_v36 = vld [vmem:[#allocation2 + $0x2c1] sm:$0xff] }
  0xb7   :  { %v1125_v41 = vld [vmem:[#allocation2 + $0x2e8] sm:$0xff] }
  0xb8   :  { %v471_v42 = vpop.permute.xlu1 %470  ;;  %v516_v48 = vpop.permute.xlu0 %515 }
  0xb9   :  { %473 = vst.msk [vmem:[#allocation6 + $0x8] sm:$0xff] %vm418_vm11, %v471_v42 }
  0xba   :  { %971 = vrot.lane.b32.xlu1 %v969_v40, %s3535_s19  ;;  %518 = vst.msk [vmem:[#allocation6 + $0x10] sm:$0xff] %vm410_vm10, %v516_v48  ;;  %827 = vrot.lane.b32.xlu0 %v825_v46, %s3537_s16  ;;  %v1177_v40 = vld [vmem:[#allocation2 + $0x318] sm:$0xff]  ;;  %v1033_v46 = vld [vmem:[#allocation2 + $0x289] sm:$0xff] }
  0xbc   :  { %v568_v47 = vpop.permute.xlu1 %567  ;;  %v423_v52 = vpop.permute.xlu0 %422 }
  0xbd   :  { %570 = vst.msk [vmem:[#allocation6 + $0x18] sm:$0xff] %vm410_vm10, %v568_v47 }
  0xbe   :  { %879 = vrot.lane.b32.xlu1 %v877_v44, %s3537_s16  ;;  %426 = vst.msk [vmem:[#allocation6] sm:$0xff] %vm425_vm12, %v423_v52  ;;  %925 = vrot.lane.b32.xlu0 %v923_v50, %s3536_s23  ;;  %v1085_v44 = vld [vmem:[#allocation2 + $0x2b9] sm:$0xff]  ;;  %v1131_v50 = vld [vmem:[#allocation2 + $0x2f1] sm:$0xff] }
  0xc0   :  { %v477_v51 = vpop.permute.xlu1 %476  ;;  %v523_v54 = vpop.permute.xlu0 %522 }
  0xc1   :  { %479 = vst.msk [vmem:[#allocation6 + $0x8] sm:$0xff] %vm425_vm12, %v477_v51 }
  0xc2   :  { %977 = vrot.lane.b32.xlu1 %v975_v49, %s3536_s23  ;;  %525 = vst.msk [vmem:[#allocation6 + $0x10] sm:$0xff] %vm418_vm11, %v523_v54  ;;  %834 = vrot.lane.b32.xlu0 %v3947_v14, %s3538_s9  ;;  %v1183_v49 = vld [vmem:[#allocation2 + $0x321] sm:$0xff] }
  0xc4   :  { %v575_v53 = vpop.permute.xlu1 %574  ;;  %v430_v59 = vpop.permute.xlu0 %429 }
  0xc5   :  { %577 = vst.msk [vmem:[#allocation6 + $0x18] sm:$0xff] %vm418_vm11, %v575_v53 }
  0xc6   :  { %886 = vrot.lane.b32.xlu1 %v3945_v13, %s3538_s9  ;;  %433 = vst.msk [vmem:[#allocation6] sm:$0xff] %vm432_vm13, %v430_v59  ;;  %931 = vrot.lane.b32.xlu0 %v929_v56, %s3537_s16  ;;  %v1754_v13 = vld [vmem:[#allocation3] sm:$0xf]  ;;  %v1137_v56 = vld [vmem:[#allocation2 + $0x2e9] sm:$0xff] }
  0xc8   :  { %v483_v57 = vpop.permute.xlu1 %482  ;;  %v529_v1 = vpop.permute.xlu0 %528 }
  0xc9   :  { %485 = vst.msk [vmem:[#allocation6 + $0x8] sm:$0xff] %vm432_vm13, %v483_v57 }
  0xca   :  { %983 = vrot.lane.b32.xlu1 %v981_v55, %s3537_s16  ;;  %531 = vst.msk [vmem:[#allocation6 + $0x10] sm:$0xff] %vm425_vm12, %v529_v1  ;;  %840 = vrot.lane.b32.xlu0 %v4214_v12, %s3539_s17  ;;  %v1189_v55 = vld [vmem:[#allocation2 + $0x319] sm:$0xff] }
  0xcc   :  { %v581_v63 = vpop.permute.xlu1 %580  ;;  %v535_v3 = vpop.permute.xlu0 %534 }
  0xcd   :  { %583 = vst.msk [vmem:[#allocation6 + $0x18] sm:$0xff] %vm425_vm12, %v581_v63  ;;  %v1214_v2 = vld [vmem:[#allocation6] sm:$0xff] }
  0xce   :  { %892 = vrot.lane.b32.xlu1 %v4230_v25, %s3539_s17  ;;  %1755 = vst.msk [vmem:[#allocation6] sm:$0xf] %vm222_vm5, %v1754_v13  ;;  %938 = vrot.lane.b32.xlu0 %v4040_v21, %s3538_s9  ;;  %v4324_v25 = vld [vmem:[#allocation2 + $0x2d9] sm:$0xff] }
  0xcf   :  { %537 = vst.msk [vmem:[#allocation6 + $0x10] sm:$0xff] %vm432_vm13, %v535_v3 }
  0xd0   :  { %v1215_v14 = vld [vmem:[#allocation6 + $0x8] sm:$0xff]  ;;  %v587_v45 = vpop.permute.xlu1 %586  ;;  %v595_v6 = vpop.permute.xlu0 %594 }
  0xd1   :  { %589 = vst.msk [vmem:[#allocation6 + $0x18] sm:$0xff] %vm432_vm13, %v587_v45  ;;  %v1230_v4 = vpack.c.bf16 %v1215_v14, %v1214_v2 }
  0xd2   :  { %990 = vrot.lane.b32.xlu1 %v4060_v24, %s3538_s9  ;;  %597 = vst.msk [vmem:[#allocation6 + $0x20] sm:$0xff] %vm382_vm6, %v595_v6  ;;  %846 = vrot.lane.b32.xlu0 %v4221_v18, %s3540_s26 }
  0xd3   :  { %3346 = vmatprep.mubr.bf16.mxu0 %v1230_v4 }
  0xd4   :  { %v647_v5 = vpop.permute.xlu1 %646  ;;  %v601_v10 = vpop.permute.xlu0 %600 }
  0xd5   :  { %649 = vst.msk [vmem:[#allocation6 + $0x28] sm:$0xff] %vm382_vm6, %v647_v5  ;;  %v1202_v5 = vld [vmem:[#allocation2 + $0x339] sm:$0xff] }
  0xd6   :  { %898 = vrot.lane.b32.xlu1 %v4244_v33, %s3540_s26  ;;  %v1216_v24 = vld [vmem:[#allocation6 + $0x10] sm:$0xff]  ;;  %603 = vst.msk [vmem:[#allocation6 + $0x20] sm:$0xff] %vm389_vm7, %v601_v10  ;;  %944 = vrot.lane.b32.xlu0 %v4228_v23, %s3539_s17 }
  0xd7   :  { %1963 = vst.msk [vmem:[#allocation6 + $0x10] sm:$0xf] %vm222_vm5, %v1962_v61  ;;  %v4322_v23 = vld [vmem:[#allocation2 + $0x309] sm:$0xff]  ;;  %v4338_v33 = vld [vmem:[#allocation2 + $0x2d1] sm:$0xff] }
  0xd8   :  { %v1217_v8 = vld [vmem:[#allocation6 + $0x18] sm:$0xff]  ;;  %v653_v9 = vpop.permute.xlu1 %652  ;;  %v699_v15 = vpop.permute.xlu0 %698 }
  0xd9   :  { %655 = vst.msk [vmem:[#allocation6 + $0x28] sm:$0xff] %vm389_vm7, %v653_v9  ;;  %v1231_v21 = vpack.c.bf16 %v1217_v8, %v1216_v24  ;;  %v1208_v24 = vld [vmem:[#allocation2 + $0x331] sm:$0xff] }
  0xda   :  { %996 = vrot.lane.b32.xlu1 %v994_v7, %s3539_s17  ;;  %701 = vst.msk [vmem:[#allocation6 + $0x30] sm:$0xff] %vm382_vm6, %v699_v15  ;;  %950 = vrot.lane.b32.xlu0 %v4242_v32, %s3540_s26  ;;  %v4336_v32 = vld [vmem:[#allocation2 + $0x301] sm:$0xff] }
  0xdb   :  { %3347 = vmatmul.mubr.bf16.vlgmr.msra.gmra.mrb[0].mxu0 %v1231_v21 }
  0xdc   :  { %v751_v12 = vpop.permute.xlu1 %750  ;;  %v608_v18 = vpop.permute.xlu0 %607 }
  0xdd   :  { %753 = vst.msk [vmem:[#allocation6 + $0x38] sm:$0xff] %vm382_vm6, %v751_v12 }
  0xde   :  { %1002 = vrot.lane.b32.xlu1 %v1000_v11, %s3540_s26  ;;  %610 = vst.msk [vmem:[#allocation6 + $0x20] sm:$0xff] %vm396_vm8, %v608_v18  ;;  %1010 = vrot.lane.b32.xlu0 %v994_v7, %s3533_s27 }
  0xe0   :  { %v660_v17 = vpop.permute.xlu1 %659  ;;  %v705_v22 = vpop.permute.xlu0 %704 }
  0xe1   :  { %662 = vst.msk [vmem:[#allocation6 + $0x28] sm:$0xff] %vm396_vm8, %v660_v17 }
  0xe2   :  { %1062 = vrot.lane.b32.xlu1 %v4308_v16, %s3533_s27  ;;  %707 = vst.msk [vmem:[#allocation6 + $0x30] sm:$0xff] %vm389_vm7, %v705_v22  ;;  %1016 = vrot.lane.b32.xlu0 %v1000_v11, %s3534_s28 }
  0xe4   :  { %v757_v20 = vpop.permute.xlu1 %756  ;;  %v614_v29 = vpop.permute.xlu0 %613 }
  0xe5   :  { %759 = vst.msk [vmem:[#allocation6 + $0x38] sm:$0xff] %vm389_vm7, %v757_v20 }
  0xe6   :  { %1068 = vrot.lane.b32.xlu1 %v4315_v19, %s3534_s28  ;;  %616 = vst.msk [vmem:[#allocation6 + $0x20] sm:$0xff] %vm403_vm9, %v614_v29  ;;  %1114 = vrot.lane.b32.xlu0 %v4324_v25, %s3533_s27 }
  0xe8   :  { %v666_v27 = vpop.permute.xlu1 %665  ;;  %v712_v28 = vpop.permute.xlu0 %711 }
  0xe9   :  { %668 = vst.msk [vmem:[#allocation6 + $0x28] sm:$0xff] %vm403_vm9, %v666_v27 }
  0xea   :  { %1166 = vrot.lane.b32.xlu1 %v4322_v23, %s3533_s27  ;;  %714 = vst.msk [vmem:[#allocation6 + $0x30] sm:$0xff] %vm396_vm8, %v712_v28  ;;  %1023 = vrot.lane.b32.xlu0 %v1021_v26, %s3535_s19 }
  0xec   :  { %v764_v31 = vpop.permute.xlu1 %763  ;;  %v620_v35 = vpop.permute.xlu0 %619 }
  0xed   :  { %766 = vst.msk [vmem:[#allocation6 + $0x38] sm:$0xff] %vm396_vm8, %v764_v31 }
  0xee   :  { %1075 = vrot.lane.b32.xlu1 %v1073_v30, %s3535_s19  ;;  %622 = vst.msk [vmem:[#allocation6 + $0x20] sm:$0xff] %vm410_vm10, %v620_v35  ;;  %1120 = vrot.lane.b32.xlu0 %v4338_v33, %s3534_s28 }
  0xf0   :  { %v672_v34 = vpop.permute.xlu1 %671  ;;  %v718_v39 = vpop.permute.xlu0 %717 }
  0xf1   :  { %674 = vst.msk [vmem:[#allocation6 + $0x28] sm:$0xff] %vm410_vm10, %v672_v34 }
  0xf2   :  { %1172 = vrot.lane.b32.xlu1 %v4336_v32, %s3534_s28  ;;  %720 = vst.msk [vmem:[#allocation6 + $0x30] sm:$0xff] %vm403_vm9, %v718_v39  ;;  %1029 = vrot.lane.b32.xlu0 %v1027_v37, %s3536_s23 }
  0xf4   :  { %v770_v38 = vpop.permute.xlu1 %769  ;;  %v627_v43 = vpop.permute.xlu0 %626 }
  0xf5   :  { %772 = vst.msk [vmem:[#allocation6 + $0x38] sm:$0xff] %vm403_vm9, %v770_v38 }
  0xf6   :  { %1081 = vrot.lane.b32.xlu1 %v1079_v36, %s3536_s23  ;;  %629 = vst.msk [vmem:[#allocation6 + $0x20] sm:$0xff] %vm418_vm11, %v627_v43  ;;  %1127 = vrot.lane.b32.xlu0 %v1125_v41, %s3535_s19 }
  0xf8   :  { %v679_v42 = vpop.permute.xlu1 %678  ;;  %v724_v48 = vpop.permute.xlu0 %723 }
  0xf9   :  { %681 = vst.msk [vmem:[#allocation6 + $0x28] sm:$0xff] %vm418_vm11, %v679_v42 }
  0xfa   :  { %1179 = vrot.lane.b32.xlu1 %v1177_v40, %s3535_s19  ;;  %726 = vst.msk [vmem:[#allocation6 + $0x30] sm:$0xff] %vm410_vm10, %v724_v48  ;;  %1035 = vrot.lane.b32.xlu0 %v1033_v46, %s3537_s16 }
  0xfc   :  { %v776_v47 = vpop.permute.xlu1 %775  ;;  %v633_v52 = vpop.permute.xlu0 %632 }
  0xfd   :  { %778 = vst.msk [vmem:[#allocation6 + $0x38] sm:$0xff] %vm410_vm10, %v776_v47 }
  0xfe   :  { %1087 = vrot.lane.b32.xlu1 %v1085_v44, %s3537_s16  ;;  %635 = vst.msk [vmem:[#allocation6 + $0x20] sm:$0xff] %vm425_vm12, %v633_v52  ;;  %1133 = vrot.lane.b32.xlu0 %v1131_v50, %s3536_s23 }
 0x100   :  { %v685_v51 = vpop.permute.xlu1 %684  ;;  %v731_v54 = vpop.permute.xlu0 %730 }
 0x101   :  { %687 = vst.msk [vmem:[#allocation6 + $0x28] sm:$0xff] %vm425_vm12, %v685_v51 }
 0x102   :  { %1185 = vrot.lane.b32.xlu1 %v1183_v49, %s3536_s23  ;;  %733 = vst.msk [vmem:[#allocation6 + $0x30] sm:$0xff] %vm418_vm11, %v731_v54  ;;  %1042 = vrot.lane.b32.xlu0 %v4168_v62, %s3538_s9 }
 0x104   :  { %v783_v53 = vpop.permute.xlu1 %782  ;;  %v639_v59 = vpop.permute.xlu0 %638 }
 0x105   :  { %785 = vst.msk [vmem:[#allocation6 + $0x38] sm:$0xff] %vm418_vm11, %v783_v53 }
 0x106   :  { %1094 = vrot.lane.b32.xlu1 %v4166_v60, %s3538_s9  ;;  %641 = vst.msk [vmem:[#allocation6 + $0x20] sm:$0xff] %vm432_vm13, %v639_v59  ;;  %1139 = vrot.lane.b32.xlu0 %v1137_v56, %s3537_s16  ;;  %v1196_v60 = vld [vmem:[#allocation2 + $0x330] sm:$0xff] }
 0x108   :  { %v691_v57 = vpop.permute.xlu1 %690  ;;  %v737_v1 = vpop.permute.xlu0 %736 }
 0x109   :  { %693 = vst.msk [vmem:[#allocation6 + $0x28] sm:$0xff] %vm432_vm13, %v691_v57 }
 0x10a   :  { %1191 = vrot.lane.b32.xlu1 %v1189_v55, %s3537_s16  ;;  %739 = vst.msk [vmem:[#allocation6 + $0x30] sm:$0xff] %vm425_vm12, %v737_v1  ;;  %1048 = vrot.lane.b32.xlu0 %v4308_v16, %s3539_s17  ;;  %s3542_s16 = smov 48  }
 0x10c   :  { %v789_v63 = vpop.permute.xlu1 %788  ;;  %v743_v13 = vpop.permute.xlu0 %742 }
 0x10d   :  { %791 = vst.msk [vmem:[#allocation6 + $0x38] sm:$0xff] %vm425_vm12, %v789_v63  ;;  %v1218_v14 = vld [vmem:[#allocation6 + $0x20] sm:$0xff] }
 0x10e   :  { %1100 = vrot.lane.b32.xlu1 %v4324_v25, %s3539_s17  ;;  %745 = vst.msk [vmem:[#allocation6 + $0x30] sm:$0xff] %vm432_vm13, %v743_v13  ;;  %1146 = vrot.lane.b32.xlu0 %v4187_v58, %s3538_s9 }
 0x110   :  { %v795_v62 = vpop.permute.xlu1 %794  ;;  %v1219_v2 = vld [vmem:[#allocation6 + $0x28] sm:$0xff]  ;;  %v803_v4 = vpop.permute.xlu0 %802 }
 0x111   :  { %797 = vst.msk [vmem:[#allocation6 + $0x38] sm:$0xff] %vm432_vm13, %v795_v62  ;;  %v1232_v45 = vpack.c.bf16 %v1219_v2, %v1218_v14 }
 0x112   :  { %1198 = vrot.lane.b32.xlu1 %v1196_v60, %s3538_s9  ;;  %805 = vst.msk [vmem:[#allocation6 + $0x40] sm:$0xff] %vm382_vm6, %v803_v4  ;;  %1054 = vrot.lane.b32.xlu0 %v4315_v19, %s3540_s26 }
 0x113   :  { %3350 = vmatprep.mubr.bf16.mxu0 %v1232_v45 }
 0x114   :  { %v855_v3 = vpop.permute.xlu1 %854  ;;  %v809_v61 = vpop.permute.xlu0 %808 }
 0x115   :  { %857 = vst.msk [vmem:[#allocation6 + $0x48] sm:$0xff] %vm382_vm6, %v855_v3  ;;  %v1220_v7 = vld [vmem:[#allocation6 + $0x30] sm:$0xff] }
 0x116   :  { %1106 = vrot.lane.b32.xlu1 %v4338_v33, %s3540_s26  ;;  %811 = vst.msk [vmem:[#allocation6 + $0x40] sm:$0xff] %vm389_vm7, %v809_v61  ;;  %1152 = vrot.lane.b32.xlu0 %v4322_v23, %s3539_s17 }
 0x118   :  { %v861_v6 = vpop.permute.xlu1 %860  ;;  %v1221_v8 = vld [vmem:[#allocation6 + $0x38] sm:$0xff]  ;;  %v907_v10 = vpop.permute.xlu0 %906 }
 0x119   :  { %863 = vst.msk [vmem:[#allocation6 + $0x48] sm:$0xff] %vm389_vm7, %v861_v6  ;;  %v1233_v58 = vpack.c.bf16 %v1221_v8, %v1220_v7 }
 0x11a   :  { %1204 = vrot.lane.b32.xlu1 %v1202_v5, %s3539_s17  ;;  %909 = vst.msk [vmem:[#allocation6 + $0x50] sm:$0xff] %vm382_vm6, %v907_v10  ;;  %1158 = vrot.lane.b32.xlu0 %v4336_v32, %s3540_s26  ;;  %s3543_s17 = smov 56  }
 0x11b   :  { %3351 = vmatmul.mubr.bf16.gmra.mrb[4].mxu0 %v1233_v58 }
 0x11c   :  { %v959_v9 = vpop.permute.xlu1 %958  ;;  %v816_v11 = vpop.permute.xlu0 %815 }
 0x11d   :  { %961 = vst.msk [vmem:[#allocation6 + $0x58] sm:$0xff] %vm382_vm6, %v959_v9 }
 0x11e   :  { %1210 = vrot.lane.b32.xlu1 %v1208_v24, %s3540_s26  ;;  %818 = vst.msk [vmem:[#allocation6 + $0x40] sm:$0xff] %vm396_vm8, %v816_v11 }
 0x120   :  { %v868_v21 = vpop.permute.xlu1 %867  ;;  %v913_v15 = vpop.permute.xlu0 %912 }
 0x121   :  { %870 = vst.msk [vmem:[#allocation6 + $0x48] sm:$0xff] %vm396_vm8, %v868_v21 }
 0x122   :  { %915 = vst.msk [vmem:[#allocation6 + $0x50] sm:$0xff] %vm389_vm7, %v913_v15 }
 0x124   :  { %v965_v12 = vpop.permute.xlu1 %964  ;;  %v822_v17 = vpop.permute.xlu0 %821 }
 0x125   :  { %967 = vst.msk [vmem:[#allocation6 + $0x58] sm:$0xff] %vm389_vm7, %v965_v12 }
 0x126   :  { %824 = vst.msk [vmem:[#allocation6 + $0x40] sm:$0xff] %vm403_vm9, %v822_v17 }
 0x128   :  { %v874_v16 = vpop.permute.xlu1 %873  ;;  %v920_v19 = vpop.permute.xlu0 %919 }
 0x129   :  { %876 = vst.msk [vmem:[#allocation6 + $0x48] sm:$0xff] %vm403_vm9, %v874_v16 }
 0x12a   :  { %922 = vst.msk [vmem:[#allocation6 + $0x50] sm:$0xff] %vm396_vm8, %v920_v19 }
 0x12c   :  { %v972_v18 = vpop.permute.xlu1 %971  ;;  %v828_v22 = vpop.permute.xlu0 %827 }
 0x12d   :  { %974 = vst.msk [vmem:[#allocation6 + $0x58] sm:$0xff] %vm396_vm8, %v972_v18 }
 0x12e   :  { %830 = vst.msk [vmem:[#allocation6 + $0x40] sm:$0xff] %vm410_vm10, %v828_v22 }
 0x130   :  { %v880_v20 = vpop.permute.xlu1 %879  ;;  %v926_v25 = vpop.permute.xlu0 %925 }
 0x131   :  { %882 = vst.msk [vmem:[#allocation6 + $0x48] sm:$0xff] %vm410_vm10, %v880_v20 }
 0x132   :  { %928 = vst.msk [vmem:[#allocation6 + $0x50] sm:$0xff] %vm403_vm9, %v926_v25 }
 0x134   :  { %v978_v23 = vpop.permute.xlu1 %977  ;;  %v835_v29 = vpop.permute.xlu0 %834 }
 0x135   :  { %980 = vst.msk [vmem:[#allocation6 + $0x58] sm:$0xff] %vm403_vm9, %v978_v23 }
 0x136   :  { %837 = vst.msk [vmem:[#allocation6 + $0x40] sm:$0xff] %vm418_vm11, %v835_v29 }
 0x138   :  { %v887_v27 = vpop.permute.xlu1 %886  ;;  %v932_v26 = vpop.permute.xlu0 %931 }
 0x139   :  { %889 = vst.msk [vmem:[#allocation6 + $0x48] sm:$0xff] %vm418_vm11, %v887_v27 }
 0x13a   :  { %934 = vst.msk [vmem:[#allocation6 + $0x50] sm:$0xff] %vm410_vm10, %v932_v26 }
 0x13c   :  { %v984_v30 = vpop.permute.xlu1 %983  ;;  %v841_v28 = vpop.permute.xlu0 %840 }
 0x13d   :  { %986 = vst.msk [vmem:[#allocation6 + $0x58] sm:$0xff] %vm410_vm10, %v984_v30 }
 0x13e   :  { %843 = vst.msk [vmem:[#allocation6 + $0x40] sm:$0xff] %vm425_vm12, %v841_v28 }
 0x140   :  { %v893_v31 = vpop.permute.xlu1 %892  ;;  %v939_v33 = vpop.permute.xlu0 %938 }
 0x141   :  { %895 = vst.msk [vmem:[#allocation6 + $0x48] sm:$0xff] %vm425_vm12, %v893_v31 }
 0x142   :  { %941 = vst.msk [vmem:[#allocation6 + $0x50] sm:$0xff] %vm418_vm11, %v939_v33  ;;  %v4460_v33 = vld [vmem:[%s5026_s2] ss:$0 sm:$0xff] }
 0x144   :  { %v991_v32 = vpop.permute.xlu1 %990  ;;  %v847_v35 = vpop.permute.xlu0 %846 }
 0x145   :  { %993 = vst.msk [vmem:[#allocation6 + $0x58] sm:$0xff] %vm418_vm11, %v991_v32 }
 0x146   :  { %849 = vst.msk [vmem:[#allocation6 + $0x40] sm:$0xff] %vm432_vm13, %v847_v35 }
 0x148   :  { %v899_v34 = vpop.permute.xlu1 %898  ;;  %v945_v37 = vpop.permute.xlu0 %944 }
 0x149   :  { %901 = vst.msk [vmem:[#allocation6 + $0x48] sm:$0xff] %vm432_vm13, %v899_v34 }
 0x14a   :  { %947 = vst.msk [vmem:[#allocation6 + $0x50] sm:$0xff] %vm425_vm12, %v945_v37  ;;  %v3490_v37 = vld [vmem:[%s5027_s5] sm:$0xff]  }
 0x14b   :  { %3378 = vmatprep.mubr.bf16.mxu1 %v3490_v37 }
 0x14c   :  { %v997_v36 = vpop.permute.xlu1 %996  ;;  %v951_v39 = vpop.permute.xlu0 %950 }
 0x14d   :  { %999 = vst.msk [vmem:[#allocation6 + $0x58] sm:$0xff] %vm425_vm12, %v997_v36  ;;  %v1222_v40 = vld [vmem:[#allocation6 + $0x40] sm:$0xff] }
 0x14e   :  { %953 = vst.msk [vmem:[#allocation6 + $0x50] sm:$0xff] %vm432_vm13, %v951_v39 }
 0x150   :  { %v1003_v38 = vpop.permute.xlu1 %1002  ;;  %v1223_v41 = vld [vmem:[#allocation6 + $0x48] sm:$0xff]  ;;  %v1011_v44 = vpop.permute.xlu0 %1010 }
 0x151   :  { %1005 = vst.msk [vmem:[#allocation6 + $0x58] sm:$0xff] %vm432_vm13, %v1003_v38  ;;  %v1234_v42 = vpack.c.bf16 %v1223_v41, %v1222_v40 }
 0x152   :  { %1013 = vst.msk [vmem:[#allocation6 + $0x60] sm:$0xff] %vm382_vm6, %v1011_v44 }
 0x153   :  { %3354 = vmatprep.mubr.bf16.mxu0 %v1234_v42 }
 0x154   :  { %v1063_v43 = vpop.permute.xlu1 %1062  ;;  %v1017_v47 = vpop.permute.xlu0 %1016 }
 0x155   :  { %1065 = vst.msk [vmem:[#allocation6 + $0x68] sm:$0xff] %vm382_vm6, %v1063_v43  ;;  %v1224_v48 = vld [vmem:[#allocation6 + $0x50] sm:$0xff] }
 0x156   :  { %1019 = vst.msk [vmem:[#allocation6 + $0x60] sm:$0xff] %vm389_vm7, %v1017_v47 }
 0x158   :  { %v1069_v46 = vpop.permute.xlu1 %1068  ;;  %v1225_v49 = vld [vmem:[#allocation6 + $0x58] sm:$0xff]  ;;  %v1115_v52 = vpop.permute.xlu0 %1114 }
 0x159   :  { %1071 = vst.msk [vmem:[#allocation6 + $0x68] sm:$0xff] %vm389_vm7, %v1069_v46  ;;  %v1235_v50 = vpack.c.bf16 %v1225_v49, %v1224_v48 }
 0x15a   :  { %1117 = vst.msk [vmem:[#allocation6 + $0x70] sm:$0xff] %vm382_vm6, %v1115_v52 }
 0x15b   :  { %3355 = vmatmul.mubr.bf16.gmra.mrb[8].mxu0 %v1235_v50 }
 0x15c   :  { %v1167_v51 = vpop.permute.xlu1 %1166  ;;  %v1024_v54 = vpop.permute.xlu0 %1023 }
 0x15d   :  { %1169 = vst.msk [vmem:[#allocation6 + $0x78] sm:$0xff] %vm382_vm6, %v1167_v51  ;;  %vm1782_vm6 = vcmask 322816  }
 0x15e   :  { %1026 = vst.msk [vmem:[#allocation6 + $0x60] sm:$0xff] %vm396_vm8, %v1024_v54 }
 0x160   :  { %v1076_v53 = vpop.permute.xlu1 %1075  ;;  %v1121_v56 = vpop.permute.xlu0 %1120 }
 0x161   :  { %1078 = vst.msk [vmem:[#allocation6 + $0x68] sm:$0xff] %vm396_vm8, %v1076_v53 }
 0x162   :  { %1123 = vst.msk [vmem:[#allocation6 + $0x70] sm:$0xff] %vm389_vm7, %v1121_v56 }
 0x164   :  { %v1173_v55 = vpop.permute.xlu1 %1172  ;;  %v1030_v59 = vpop.permute.xlu0 %1029 }
 0x165   :  { %1175 = vst.msk [vmem:[#allocation6 + $0x78] sm:$0xff] %vm389_vm7, %v1173_v55  ;;  %vm1789_vm7 = vcmask 388416  }
 0x166   :  { %1032 = vst.msk [vmem:[#allocation6 + $0x60] sm:$0xff] %vm403_vm9, %v1030_v59 }
 0x168   :  { %v1082_v57 = vpop.permute.xlu1 %1081  ;;  %v1128_v1 = vpop.permute.xlu0 %1127 }
 0x169   :  { %1084 = vst.msk [vmem:[#allocation6 + $0x68] sm:$0xff] %vm403_vm9, %v1082_v57 }
 0x16a   :  { %1130 = vst.msk [vmem:[#allocation6 + $0x70] sm:$0xff] %vm396_vm8, %v1128_v1 }
 0x16c   :  { %v1180_v63 = vpop.permute.xlu1 %1179  ;;  %v1036_v62 = vpop.permute.xlu0 %1035 }
 0x16d   :  { %1182 = vst.msk [vmem:[#allocation6 + $0x78] sm:$0xff] %vm396_vm8, %v1180_v63  ;;  %vm1796_vm8 = vcmask 454016  }
 0x16e   :  { %1038 = vst.msk [vmem:[#allocation6 + $0x60] sm:$0xff] %vm410_vm10, %v1036_v62 }
 0x170   :  { %v1088_v60 = vpop.permute.xlu1 %1087  ;;  %v1134_v14 = vpop.permute.xlu0 %1133 }
 0x171   :  { %1090 = vst.msk [vmem:[#allocation6 + $0x68] sm:$0xff] %vm410_vm10, %v1088_v60 }
 0x172   :  { %1136 = vst.msk [vmem:[#allocation6 + $0x70] sm:$0xff] %vm403_vm9, %v1134_v14 }
 0x174   :  { %v1186_v13 = vpop.permute.xlu1 %1185  ;;  %v1043_v45 = vpop.permute.xlu0 %1042 }
 0x175   :  { %1188 = vst.msk [vmem:[#allocation6 + $0x78] sm:$0xff] %vm403_vm9, %v1186_v13  ;;  %vm1803_vm9 = vcmask 519616  }
 0x176   :  { %1045 = vst.msk [vmem:[#allocation6 + $0x60] sm:$0xff] %vm418_vm11, %v1043_v45 }
 0x178   :  { %v1095_v2 = vpop.permute.xlu1 %1094  ;;  %v1140_v4 = vpop.permute.xlu0 %1139 }
 0x179   :  { %1097 = vst.msk [vmem:[#allocation6 + $0x68] sm:$0xff] %vm418_vm11, %v1095_v2 }
 0x17a   :  { %1142 = vst.msk [vmem:[#allocation6 + $0x70] sm:$0xff] %vm410_vm10, %v1140_v4 }
 0x17c   :  { %v1192_v3 = vpop.permute.xlu1 %1191  ;;  %v1049_v6 = vpop.permute.xlu0 %1048 }
 0x17d   :  { %1194 = vst.msk [vmem:[#allocation6 + $0x78] sm:$0xff] %vm410_vm10, %v1192_v3  ;;  %vm1810_vm10 = vcmask 585216  }
 0x17e   :  { %1051 = vst.msk [vmem:[#allocation6 + $0x60] sm:$0xff] %vm425_vm12, %v1049_v6 }
 0x180   :  { %v1101_v5 = vpop.permute.xlu1 %1100  ;;  %v1147_v7 = vpop.permute.xlu0 %1146 }
 0x181   :  { %1103 = vst.msk [vmem:[#allocation6 + $0x68] sm:$0xff] %vm425_vm12, %v1101_v5 }
 0x182   :  { %1149 = vst.msk [vmem:[#allocation6 + $0x70] sm:$0xff] %vm418_vm11, %v1147_v7 }
 0x184   :  { %v1199_v61 = vpop.permute.xlu1 %1198  ;;  %v1055_v58 = vpop.permute.xlu0 %1054 }
 0x185   :  { %1201 = vst.msk [vmem:[#allocation6 + $0x78] sm:$0xff] %vm418_vm11, %v1199_v61  ;;  %vm2366_vm11 = vcmask 261120  }
 0x186   :  { %1057 = vst.msk [vmem:[#allocation6 + $0x60] sm:$0xff] %vm432_vm13, %v1055_v58 }
 0x188   :  { %v1107_v8 = vpop.permute.xlu1 %1106  ;;  %v1153_v9 = vpop.permute.xlu0 %1152 }
 0x189   :  { %1109 = vst.msk [vmem:[#allocation6 + $0x68] sm:$0xff] %vm432_vm13, %v1107_v8 }
 0x18a   :  { %1155 = vst.msk [vmem:[#allocation6 + $0x70] sm:$0xff] %vm425_vm12, %v1153_v9 }
 0x18c   :  { %v1205_v24 = vpop.permute.xlu1 %1204  ;;  %v1159_v21 = vpop.permute.xlu0 %1158 }
 0x18d   :  { %1207 = vst.msk [vmem:[#allocation6 + $0x78] sm:$0xff] %vm425_vm12, %v1205_v24  ;;  %v1226_v11 = vld [vmem:[#allocation6 + $0x60] sm:$0xff]  ;;  %vm2456_vm12 = vcmask 123968  }
 0x18e   :  { %1161 = vst.msk [vmem:[#allocation6 + $0x70] sm:$0xff] %vm432_vm13, %v1159_v21 }
 0x190   :  { %v1211_v10 = vpop.permute.xlu1 %1210  ;;  %v1227_v12 = vld [vmem:[#allocation6 + $0x68] sm:$0xff] }
 0x191   :  { %1213 = vst.msk [vmem:[#allocation6 + $0x78] sm:$0xff] %vm432_vm13, %v1211_v10  ;;  %v1236_v15 = vpack.c.bf16 %v1227_v12, %v1226_v11  ;;  %vm2463_vm13 = vcmask 189568  }
 0x193   :  { %3358 = vmatprep.mubr.bf16.mxu0 %v1236_v15 }
 0x195   :  { %v1228_v16 = vld [vmem:[#allocation6 + $0x70] sm:$0xff] }
 0x198   :  { %v1229_v17 = vld [vmem:[#allocation6 + $0x78] sm:$0xff] }
 0x199   :  { %v1237_v18 = vpack.c.bf16 %v1229_v17, %v1228_v16 }
 0x19b   :  { %3359 = vmatmul.mubr.bf16.gmra.mrb[12].mxu0 %v1237_v18 }
 0x1ae   :  { %v3348_v19 = vpop.f32.mrb[0].mxu0 }
 0x1af   :  { %v1343_v20 = vpop.f32.mrb[1].mxu0  ;;  %v1352_v38 = vadd.f32 %v3348_v19, %v4460_v33  ;;  %v1756_v19 = vld [vmem:[#allocation3 + $0x5] sm:$0xf] }
 0x1b0   :  { %v3349_v22 = vpop.f32.mrb[2].mxu0  ;;  %v1344_v35 = vadd.f32 %v4460_v33, %v1343_v20  ;;  %1758 = vrot.lane.b32.xlu0 %v1756_v19, %s3534_s28 }
 0x1b1   :  { %v1346_v23 = vpop.f32.mrb[3].mxu0  ;;  %v4474_v41 = vmax.f32 %v1352_v38, 0.0  ;;  %v1355_v43 = vadd.f32 %v3349_v22, %v4460_v33 }
 0x1b2   :  { %v1347_v34 = vadd.f32 %v4460_v33, %v1346_v23  ;;  %v4470_v39 = vmax.f32 %v1344_v35, 0.0  ;;  %v1763_v23 = vld [vmem:[#allocation3 + $0x1] sm:$0xf] }
 0x1b3   :  { %v1445_v48 = vmul.f32 %v4474_v41, %v4474_v41  ;;  %v4484_v49 = vmax.f32 %v1355_v43, 0.0 }
 0x1b4   :  { %v4464_v36 = vmax.f32 %v1347_v34, 0.0  ;;  %v1443_v42 = vmul.f32 %v4470_v39, %v4470_v39  ;;  %1765 = vrot.lane.b32.xlu0 %v1763_v23, %s3536_s23  ;;  %v1487_v23 = vld [vmem:[%s5028_s3] sm:$0x1] }
 0x1b5   :  { %v1446_v54 = vmul.f32 %v4484_v49, %v4484_v49 }
 0x1b6   :  { %v1444_v40 = vmul.f32 %v4464_v36, %v4464_v36  ;;  %v1422_v46 = vadd.f32 %v4464_v36, %v4470_v39 }
 0x1b8   :  { %v1459_v47 = vadd.f32 %v1444_v40, %v1443_v42  ;;  %v1423_v52 = vadd.f32 %v1422_v46, %v4474_v41 }
 0x1ba   :  { %v1460_v53 = vadd.f32 %v1459_v47, %v1445_v48  ;;  %v1424_v57 = vadd.f32 %v1423_v52, %v4484_v49 }
 0x1bc   :  { %v1461_v63 = vadd.f32 %v1460_v53, %v1446_v54 }
 0x1ee   :  { %v3352_v25 = vpop.f32.mrb[4].mxu0 }
 0x1ef   :  { %v1359_v27 = vpop.f32.mrb[5].mxu0  ;;  %v1368_v59 = vadd.f32 %v3352_v25, %v4460_v33 }
 0x1f0   :  { %v3353_v29 = vpop.f32.mrb[6].mxu0  ;;  %v1360_v44 = vadd.f32 %v4460_v33, %v1359_v27 }
 0x1f1   :  { %v1362_v30 = vpop.f32.mrb[7].mxu0  ;;  %v4501_v13 = vmax.f32 %v1368_v59, 0.0  ;;  %v1371_v14 = vadd.f32 %v3353_v29, %v4460_v33 }
 0x1f2   :  { %v4486_v50 = vmax.f32 %v1360_v44, 0.0  ;;  %v1363_v51 = vadd.f32 %v4460_v33, %v1362_v30 }
 0x1f3   :  { %v1449_v4 = vmul.f32 %v4501_v13, %v4501_v13  ;;  %v4508_v5 = vmax.f32 %v1371_v14, 0.0 }
 0x1f4   :  { %v1447_v55 = vmul.f32 %v4486_v50, %v4486_v50  ;;  %v4494_v56 = vmax.f32 %v1363_v51, 0.0  ;;  %v1425_v1 = vadd.f32 %v1424_v57, %v4486_v50 }
 0x1f5   :  { %v1450_v58 = vmul.f32 %v4508_v5, %v4508_v5 }
 0x1f6   :  { %v1462_v60 = vadd.f32 %v1461_v63, %v1447_v55  ;;  %v1448_v62 = vmul.f32 %v4494_v56, %v4494_v56  ;;  %v1426_v45 = vadd.f32 %v1425_v1, %v4494_v56 }
 0x1f8   :  { %v1463_v3 = vadd.f32 %v1462_v60, %v1448_v62  ;;  %v1427_v7 = vadd.f32 %v1426_v45, %v4501_v13 }
 0x1fa   :  { %v1464_v8 = vadd.f32 %v1463_v3, %v1449_v4  ;;  %v1428_v10 = vadd.f32 %v1427_v7, %v4508_v5 }
 0x1fc   :  { %v1465_v11 = vadd.f32 %v1464_v8, %v1450_v58 }
 0x22e   :  { %v3356_v26 = vpop.f32.mrb[8].mxu0 }
 0x22f   :  { %v1375_v31 = vpop.f32.mrb[9].mxu0  ;;  %v1384_v21 = vadd.f32 %v3356_v26, %v4460_v33 }
 0x230   :  { %v3357_v28 = vpop.f32.mrb[10].mxu0  ;;  %v1376_v2 = vadd.f32 %v4460_v33, %v1375_v31 }
 0x231   :  { %v1378_v32 = vpop.f32.mrb[11].mxu0  ;;  %v4529_v17 = vmax.f32 %v1384_v21, 0.0  ;;  %v1387_v18 = vadd.f32 %v3357_v28, %v4460_v33 }
 0x232   :  { %v4510_v6 = vmax.f32 %v1376_v2, 0.0  ;;  %v1379_v61 = vadd.f32 %v4460_v33, %v1378_v32 }
 0x233   :  { %v1453_v25 = vmul.f32 %v4529_v17, %v4529_v17  ;;  %v4536_v27 = vmax.f32 %v1387_v18, 0.0 }
 0x234   :  { %v1451_v24 = vmul.f32 %v4510_v6, %v4510_v6  ;;  %v4522_v9 = vmax.f32 %v1379_v61, 0.0  ;;  %v1429_v12 = vadd.f32 %v1428_v10, %v4510_v6 }
 0x235   :  { %v1454_v35 = vmul.f32 %v4536_v27, %v4536_v27 }
 0x236   :  { %v1466_v15 = vadd.f32 %v1465_v11, %v1451_v24  ;;  %v1452_v16 = vmul.f32 %v4522_v9, %v4522_v9  ;;  %v1430_v20 = vadd.f32 %v1429_v12, %v4522_v9 }
 0x238   :  { %v1467_v22 = vadd.f32 %v1466_v15, %v1452_v16  ;;  %v1431_v29 = vadd.f32 %v1430_v20, %v4529_v17  ;;  %v1493_v20 = vlaneseq }
 0x23a   :  { %v1468_v26 = vadd.f32 %v1467_v22, %v1453_v25  ;;  %v1432_v40 = vadd.f32 %v1431_v29, %v4536_v27  ;;  %v1494_v22 = vshrl.u32 %v1493_v20, 7 }
 0x23c   :  { %v1469_v44 = vadd.f32 %v1468_v26, %v1454_v35  ;;  %v4565_v25 = vsub.s32 0, %v1494_v22  ;;  %v1489_v26 = vld [vmem:[%s5029_s4] sm:$0x1] }
 0x26e   :  { %v3360_v30 = vpop.f32.mrb[12].mxu0 }
 0x26f   :  { %v1391_v31 = vpop.f32.mrb[13].mxu0  ;;  %v1400_v28 = vadd.f32 %v3360_v30, %v4460_v33 }
 0x270   :  { %v1392_v32 = vadd.f32 %v4460_v33, %v1391_v31  ;;  %v3361_v34 = vpop.f32.mrb[14].mxu0 }
 0x271   :  { %v1394_v37 = vpop.f32.mrb[15].mxu0  ;;  %v1403_v42 = vadd.f32 %v3361_v34, %v4460_v33  ;;  %v4549_v46 = vmax.f32 %v1400_v28, 0.0 }
 0x272   :  { %v4544_v38 = vmax.f32 %v1392_v32, 0.0  ;;  %v1395_v43 = vadd.f32 %v4460_v33, %v1394_v37 }
 0x273   :  { %v4554_v53 = vmax.f32 %v1403_v42, 0.0  ;;  %v1457_v57 = vmul.f32 %v4549_v46, %v4549_v46 }
 0x274   :  { %v1433_v47 = vadd.f32 %v1432_v40, %v4544_v38  ;;  %v1455_v48 = vmul.f32 %v4544_v38, %v4544_v38  ;;  %v1419_v51 = vmax.f32 %v1395_v43, 0.0 }
 0x275   :  { %v1458_v63 = vmul.f32 %v4554_v53, %v4554_v53 }
 0x276   :  { %v1470_v52 = vadd.f32 %v1469_v44, %v1455_v48  ;;  %v1434_v54 = vadd.f32 %v1433_v47, %v1419_v51  ;;  %v1456_v55 = vmul.f32 %v1419_v51, %v1419_v51 }
 0x278   :  { %v1435_v59 = vadd.f32 %v1434_v54, %v4549_v46  ;;  %v1471_v33 = vadd.f32 %v1470_v52, %v1456_v55 }
 0x27a   :  { %v1436_v1 = vadd.f32 %v1435_v59, %v4554_v53  ;;  %v1472_v60 = vadd.f32 %v1471_v33, %v1457_v57 }
 0x27c   :  { %v1437_v62 = vrot.slane %v1436_v1, 4  ;;  %v1473_v14 = vadd.f32 %v1472_v60, %v1458_v63 }
 0x27e   :  { %v1438_v2 = vadd.f32 %v1437_v62, %v1436_v1  ;;  %v1474_v45 = vrot.slane %v1473_v14, 4 }
 0x280   :  { %v1439_v3 = vrot.slane %v1438_v2, 2  ;;  %v1475_v4 = vadd.f32 %v1474_v45, %v1473_v14 }
 0x282   :  { %v1440_v61 = vadd.f32 %v1439_v3, %v1438_v2  ;;  %v1476_v7 = vrot.slane %v1475_v4, 2 }
 0x284   :  { %v1441_v8 = vrot.slane %v1440_v61, 1  ;;  %v1477_v58 = vadd.f32 %v1476_v7, %v1475_v4 }
 0x286   :  { %v1442_v24 = vadd.f32 %v1441_v8, %v1440_v61  ;;  %v1478_v10 = vrot.slane %v1477_v58, 1 }
 0x288   :  { %v1479_v21 = vadd.f32 %v1478_v10, %v1477_v58  ;;  %v1480_v11 = vmul.f32 0.0078125, %v1442_v24  ;;  %v3493_v58 = vld [vmem:[%s5027_s5 + $0x18] sm:$0xff]   ;;  %v3494_v24 = vld [vmem:[%s5027_s5 + $0x20] sm:$0xff]   ;;  %v3495_v10 = vld [vmem:[%s5027_s5 + $0x28] sm:$0xff]  }
 0x28a   :  { %v1481_v12 = vmul.f32 0.0078125, %v1479_v21  ;;  %v1482_v15 = vmul.f32 %v1480_v11, %v1480_v11  ;;  %v3496_v21 = vld [vmem:[%s5027_s5 + $0x30] sm:$0xff]  }
 0x28c   :  { %v1483_v16 = vsub.f32 %v1481_v12, %v1482_v15  ;;  %v1964_v12 = vld [vmem:[#allocation3 + $0xa5] sm:$0xf]  ;;  %v1970_v15 = vld [vmem:[#allocation3 + $0xa1] sm:$0xf] }
 0x28d   :  { %1966 = vrot.lane.b32.xlu0 %v1964_v12, %s3534_s28 }
 0x28e   :  { %v1484_v18 = vmax.f32 %v1483_v16, 0.0  ;;  %v1759_v16 = vpop.permute.xlu0 %1758 }
 0x28f   :  { %1762 = vst.msk [vmem:[#allocation6] sm:$0xf] %vm1761_vm15, %v1759_v16 }
 0x290   :  { %v1485_v19 = vadd.f32 1e-05, %v1484_v18 }
 0x291   :  { %1972 = vrot.lane.b32.xlu0 %v1970_v15, %s3536_s23 }
 0x292   :  { %3524 = vrsqrt.f32 %v1485_v19  ;;  %v1766_v18 = vpop.permute.xlu0 %1765 }
 0x293   :  { %1769 = vst.msk [vmem:[#allocation6] sm:$0xf] %vm1768_vm0, %v1766_v18 }
 0x29c   :  { %v3525_v29 = vpop.eup %3524 }
 0x29d   :  { %v1488_v30 = vmul.f32 %v3525_v29, %v1487_v23 }
 0x29f   :  { %v1490_v31 = vmul.f32 %v1488_v30, %v1480_v11  ;;  %v1496_v28 = vrot.slane %v1488_v30, %v4565_v25  ;;  %v3497_v11 = vld [vmem:[%s5027_s5 + $0x38] sm:$0xff]  }
 0x2a1   :  { %v1491_v32 = vsub.f32 %v1489_v26, %v1490_v31  ;;  %v1511_v34 = vmul.f32 %v1496_v28, %v1419_v51  ;;  %v1498_v35 = vmul.f32 %v1496_v28, %v4470_v39  ;;  %v1499_v37 = vmul.f32 %v1496_v28, %v4464_v36 }
 0x2a2   :  { %v1500_v40 = vmul.f32 %v1496_v28, %v4474_v41  ;;  %v1501_v42 = vmul.f32 %v1496_v28, %v4484_v49  ;;  %v1502_v43 = vmul.f32 %v1496_v28, %v4486_v50  ;;  %v1503_v44 = vmul.f32 %v1496_v28, %v4494_v56 }
 0x2a3   :  { %v1518_v47 = vrot.slane %v1491_v32, %v4565_v25  ;;  %v1504_v48 = vmul.f32 %v1496_v28, %v4501_v13  ;;  %v1505_v52 = vmul.f32 %v1496_v28, %v4508_v5  ;;  %v1506_v51 = vmul.f32 %v1496_v28, %v4510_v6 }
 0x2a4   :  { %v1507_v39 = vmul.f32 %v1496_v28, %v4522_v9  ;;  %v1508_v36 = vmul.f32 %v1496_v28, %v4529_v17  ;;  %v1509_v41 = vmul.f32 %v1496_v28, %v4536_v27  ;;  %v1510_v49 = vmul.f32 %v1496_v28, %v4544_v38 }
 0x2a5   :  { %v1520_v54 = vadd.f32 %v1518_v47, %v1498_v35  ;;  %v1521_v50 = vadd.f32 %v1518_v47, %v1499_v37  ;;  %v1522_v55 = vadd.f32 %v1518_v47, %v1500_v40  ;;  %v1523_v56 = vadd.f32 %v1518_v47, %v1501_v42 }
 0x2a6   :  { %v1524_v57 = vadd.f32 %v1518_v47, %v1502_v43  ;;  %v1525_v59 = vadd.f32 %v1518_v47, %v1503_v44  ;;  %v1526_v33 = vadd.f32 %v1518_v47, %v1504_v48  ;;  %v1527_v13 = vadd.f32 %v1518_v47, %v1505_v52 }
 0x2a7   :  { %v1552_v63 = vpack.c.bf16 %v1521_v50, %v1520_v54  ;;  %v1553_v5 = vpack.c.bf16 %v1523_v56, %v1522_v55  ;;  %v1528_v1 = vadd.f32 %v1518_v47, %v1506_v51  ;;  %v1529_v6 = vadd.f32 %v1518_v47, %v1507_v39 }
 0x2a8   :  { %v1554_v60 = vpack.c.bf16 %v1525_v59, %v1524_v57  ;;  %v1555_v9 = vpack.c.bf16 %v1527_v13, %v1526_v33  ;;  %v1530_v62 = vadd.f32 %v1518_v47, %v1508_v36  ;;  %v1531_v17 = vadd.f32 %v1518_v47, %v1509_v41 }
 0x2a9   :  { %3362 = vmatprep.subr.bf16.mxu1 %v1552_v63  ;;  %v1556_v27 = vpack.c.bf16 %v1529_v6, %v1528_v1  ;;  %v1532_v14 = vadd.f32 %v1518_v47, %v1510_v49  ;;  %v1533_v38 = vadd.f32 %v1518_v47, %v1511_v34  ;;  %v1512_v2 = vmul.f32 %v1496_v28, %v4549_v46  ;;  %v3491_v46 = vld [vmem:[%s5027_s5 + $0x8] sm:$0xff]  }
 0x2aa   :  { %3363 = vmatpush3.bf16.msra.mxu1 %v1552_v63  ;;  %v1557_v45 = vpack.c.bf16 %v1531_v17, %v1530_v62  ;;  %v1513_v3 = vmul.f32 %v1496_v28, %v4554_v53  ;;  %v3492_v53 = vld [vmem:[%s5027_s5 + $0x10] sm:$0xff]   ;;  %s3541_s5 = smov 40  }
 0x2ab   :  { %3364 = vmatprep.subr.bf16.mxu1 %v1553_v5  ;;  %v1558_v4 = vpack.c.bf16 %v1533_v38, %v1532_v14  ;;  %v1534_v61 = vadd.f32 %v1518_v47, %v1512_v2 }
 0x2ac   :  { %v1535_v7 = vadd.f32 %v1518_v47, %v1513_v3 }
 0x2ae   :  { %3365 = vmatpush3.bf16.msra.mxu1 %v1553_v5  ;;  %v1559_v8 = vpack.c.bf16 %v1535_v7, %v1534_v61 }
 0x2af   :  { %3366 = vmatprep.subr.bf16.mxu1 %v1554_v60 }
 0x2b2   :  { %3367 = vmatpush3.bf16.msra.mxu1 %v1554_v60 }
 0x2b3   :  { %3368 = vmatprep.subr.bf16.mxu1 %v1555_v9 }
 0x2b6   :  { %3369 = vmatpush3.bf16.msra.mxu1 %v1555_v9 }
 0x2b7   :  { %3370 = vmatprep.subr.bf16.mxu1 %v1556_v27 }
 0x2ba   :  { %3371 = vmatpush3.bf16.msra.mxu1 %v1556_v27 }
 0x2bb   :  { %3372 = vmatprep.subr.bf16.mxu1 %v1557_v45 }
 0x2be   :  { %3373 = vmatpush3.bf16.msra.mxu1 %v1557_v45 }
 0x2bf   :  { %3374 = vmatprep.subr.bf16.mxu1 %v1558_v4 }
 0x2c2   :  { %3375 = vmatpush3.bf16.msra.mxu1 %v1558_v4 }
 0x2c3   :  { %3376 = vmatprep.subr.bf16.mxu1 %v1559_v8 }
 0x2c6   :  { %3377 = vmatpush3.bf16.msra.mxu1 %v1559_v8 }
 0x2c9   :  { %3379 = vmatmul.mubr.bf16.vlgmr.msra.gmra.mrb[0].mxu1 %v3491_v46 }
 0x2ca   :  { %3382 = vmatprep.mubr.bf16.mxu1 %v3492_v53 }
 0x2d1   :  { %3383 = vmatmul.mubr.bf16.gmra.mrb[4].mxu1 %v3493_v58 }
 0x2d2   :  { %3386 = vmatprep.mubr.bf16.mxu1 %v3494_v24 }
 0x2d9   :  { %3387 = vmatmul.mubr.bf16.gmra.mrb[8].mxu1 %v3495_v10 }
 0x2da   :  { %3390 = vmatprep.mubr.bf16.mxu1 %v3496_v21 }
 0x2e1   :  { %3391 = vmatmul.mubr.bf16.gmra.mrb[12].mxu1 %v3497_v11 }
 0x2ff   :  { %v1967_v19 = vpop.permute.xlu0 %1966 }
 0x300   :  { %1969 = vst.msk [vmem:[#allocation6 + $0x10] sm:$0xf] %vm1761_vm15, %v1967_v19 }
 0x303   :  { %v1973_v20 = vpop.permute.xlu0 %1972 }
 0x304   :  { %1975 = vst.msk [vmem:[#allocation6 + $0x10] sm:$0xf] %vm1768_vm0, %v1973_v20 }
 0x39c   :  { %v3380_v22 = vpop.f32.mrb[0].mxu1 }
 0x39d   :  { %1713 = vst.msk [vmem:[#allocation3 + $0x35] sm:$0xf] %vm222_vm5, %v3380_v22  ;;  %v1642_v23 = vpop.f32.mrb[1].mxu1 }
 0x39e   :  { %1714 = vst.msk [vmem:[#allocation3 + $0x2d] sm:$0xf0] %vm1707_vm1, %v3380_v22  ;;  %1708 = vst.msk [vmem:[#allocation3 + $0xd] sm:$0xf0] %vm1707_vm1, %v1642_v23  ;;  %v3381_v29 = vpop.f32.mrb[2].mxu1 }
 0x39f   :  { %1706 = vst.msk [vmem:[#allocation3 + $0x15] sm:$0xf] %vm222_vm5, %v1642_v23  ;;  %1716 = vst.msk [vmem:[#allocation3 + $0x45] sm:$0xf] %vm222_vm5, %v3381_v29  ;;  %v1645_v30 = vpop.f32.mrb[3].mxu1 }
 0x3a0   :  { %1717 = vst.msk [vmem:[#allocation3 + $0x3d] sm:$0xf0] %vm1707_vm1, %v3381_v29  ;;  %1711 = vst.msk [vmem:[#allocation3 + $0x1d] sm:$0xf0] %vm1707_vm1, %v1645_v30 }
 0x3a1   :  { %1710 = vst.msk [vmem:[#allocation3 + $0x25] sm:$0xf] %vm222_vm5, %v1645_v30 }
 0x3a4   :  { %v3384_v28 = vpop.f32.mrb[4].mxu1  ;;  %v1832_v32 = vld [vmem:[#allocation3 + $0x35] sm:$0xf] }
 0x3a5   :  { %v1826_v26 = vld [vmem:[#allocation3 + $0x30] sm:$0xf]  ;;  %1725 = vst.msk [vmem:[#allocation3 + $0x75] sm:$0xf] %vm222_vm5, %v3384_v28  ;;  %v1658_v34 = vpop.f32.mrb[5].mxu1 }
 0x3a6   :  { %1828 = vrot.lane.b32.xlu1 %v1826_v26, %s3538_s9  ;;  %v1770_v31 = vld [vmem:[#allocation3 + $0x10] sm:$0xf]  ;;  %1726 = vst.msk [vmem:[#allocation3 + $0x6d] sm:$0xf0] %vm1707_vm1, %v3384_v28  ;;  %v1777_v35 = vld [vmem:[#allocation3 + $0x15] sm:$0xf] }
 0x3a7   :  { %1772 = vrot.lane.b32.xlu0 %v1770_v31, %s3538_s9  ;;  %1719 = vst.msk [vmem:[#allocation3 + $0x55] sm:$0xf] %vm222_vm5, %v1658_v34  ;;  %v3385_v37 = vpop.f32.mrb[6].mxu1  ;;  %v1862_v42 = vld [vmem:[#allocation3 + $0x40] sm:$0xf] }
 0x3a8   :  { %1720 = vst.msk [vmem:[#allocation3 + $0x4d] sm:$0xf0] %vm1707_vm1, %v1658_v34  ;;  %1729 = vst.msk [vmem:[#allocation3 + $0x7d] sm:$0xf0] %vm1707_vm1, %v3385_v37  ;;  %v1661_v40 = vpop.f32.mrb[7].mxu1  ;;  %v3498_v28 = vld [vmem:[%s5025_s1 + $0x40] sm:$0xff]  }
 0x3a9   :  { %1728 = vst.msk [vmem:[#allocation3 + $0x85] sm:$0xf] %vm222_vm5, %v3385_v37  ;;  %1722 = vst.msk [vmem:[#allocation3 + $0x65] sm:$0xf] %vm222_vm5, %v1661_v40  ;;  %v1812_v43 = vld [vmem:[#allocation3 + $0x20] sm:$0xf]  ;;  %3394 = vmatprep.subr.bf16.mxu0 %v3498_v28 }
 0x3aa   :  { %1834 = vrot.lane.b32.xlu1 %v1832_v32, %s3540_s26  ;;  %1723 = vst.msk [vmem:[#allocation3 + $0x5d] sm:$0xf0] %vm1707_vm1, %v1661_v40  ;;  %v1838_v44 = vld [vmem:[#allocation3 + $0x31] sm:$0xf]  ;;  %v1844_v39 = vld [vmem:[#allocation3 + $0x40] sm:$0xf]  ;;  %3395 = vmatpush3.bf16.msra.mxu0 %v3498_v28 }
 0x3ab   :  { %1779 = vrot.lane.b32.xlu0 %v1777_v35, %s3540_s26  ;;  %1863 = vst.msk [vmem:[#allocation6 + $0x8] sm:$0xf] %vm222_vm5, %v1862_v42  ;;  %1813 = vst.msk [vmem:[#allocation6 + $0x4] sm:$0xf] %vm222_vm5, %v1812_v43  ;;  %v1784_v48 = vld [vmem:[#allocation3 + $0x11] sm:$0xf] }
 0x3ac   :  { %v3388_v47 = vpop.f32.mrb[8].mxu1  ;;  %v1864_v36 = vld [vmem:[#allocation3 + $0x45] sm:$0xf]  ;;  %v1870_v54 = vld [vmem:[#allocation3 + $0x41] sm:$0xf]  ;;  %v3500_v42 = vld [vmem:[%s5025_s1 + $0x50] sm:$0xff]  }
 0x3ad   :  { %1737 = vst.msk [vmem:[#allocation3 + $0xd5] sm:$0xf] %vm222_vm5, %v3388_v47  ;;  %v1674_v52 = vpop.f32.mrb[9].mxu1  ;;  %v1850_v49 = vld [vmem:[#allocation3 + $0x45] sm:$0xf] }
 0x3ae   :  { %1840 = vrot.lane.b32.xlu1 %v1838_v44, %s3541_s5  ;;  %1738 = vst.msk [vmem:[#allocation3 + $0xcd] sm:$0xf0] %vm1707_vm1, %v3388_v47  ;;  %1732 = vst.msk [vmem:[#allocation3 + $0xad] sm:$0xf0] %vm1707_vm1, %v1674_v52  ;;  %v3389_v51 = vpop.f32.mrb[10].mxu1  ;;  %v3499_v35 = vld [vmem:[%s5025_s1 + $0x48] sm:$0xff]  }
 0x3af   :  { %1786 = vrot.lane.b32.xlu0 %v1784_v48, %s3541_s5  ;;  %1731 = vst.msk [vmem:[#allocation3 + $0xb5] sm:$0xf] %vm222_vm5, %v1674_v52  ;;  %1740 = vst.msk [vmem:[#allocation3 + $0xe5] sm:$0xf] %vm222_vm5, %v3389_v51  ;;  %v1677_v41 = vpop.f32.mrb[11].mxu1  ;;  %3396 = vmatprep.subr.bf16.mxu0 %v3499_v35  ;;  %v3501_v44 = vld [vmem:[%s5025_s1 + $0x58] sm:$0xff]  }
 0x3b0   :  { %1741 = vst.msk [vmem:[#allocation3 + $0xdd] sm:$0xf0] %vm1707_vm1, %v3389_v51  ;;  %1735 = vst.msk [vmem:[#allocation3 + $0xbd] sm:$0xf0] %vm1707_vm1, %v1677_v41  ;;  %v1856_v50 = vld [vmem:[#allocation3 + $0x41] sm:$0xf]  ;;  %3397 = vmatpush3.bf16.msra.mxu0 %v3499_v35 }
 0x3b1   :  { %1734 = vst.msk [vmem:[#allocation3 + $0xc5] sm:$0xf] %vm222_vm5, %v1677_v41  ;;  %v1912_v57 = vld [vmem:[#allocation3 + $0x60] sm:$0xf]  ;;  %v1814_v5 = vld [vmem:[#allocation3 + $0x25] sm:$0xf]  ;;  %3398 = vmatprep.subr.bf16.mxu0 %v3500_v42 }
 0x3b2   :  { %1846 = vrot.lane.b32.xlu1 %v1844_v39, %s3542_s16  ;;  %v1791_v33 = vld [vmem:[#allocation3 + $0x20] sm:$0xf]  ;;  %1913 = vst.msk [vmem:[#allocation6 + $0xc] sm:$0xf] %vm222_vm5, %v1912_v57  ;;  %v1798_v6 = vld [vmem:[#allocation3 + $0x25] sm:$0xf] }
 0x3b3   :  { %1866 = vrot.lane.b32.xlu0 %v1864_v36, %s3534_s28  ;;  %v1820_v60 = vld [vmem:[#allocation3 + $0x21] sm:$0xf]  ;;  %v1926_v62 = vld [vmem:[#allocation3 + $0x70] sm:$0xf]  ;;  %v1932_v14 = vld [vmem:[#allocation3 + $0x75] sm:$0xf] }
 0x3b4   :  { %v3392_v55 = vpop.f32.mrb[12].mxu1  ;;  %v1805_v9 = vld [vmem:[#allocation3 + $0x21] sm:$0xf]  ;;  %v1876_v17 = vld [vmem:[#allocation3 + $0x50] sm:$0xf]  ;;  %3399 = vmatpush3.bf16.msra.mxu0 %v3500_v42  ;;  %v3503_v41 = vld [vmem:[%s5025_s1 + $0x68] sm:$0xff]  }
 0x3b5   :  { %1749 = vst.msk [vmem:[#allocation3 + $0x115] sm:$0xf] %vm222_vm5, %v3392_v55  ;;  %v1690_v56 = vpop.f32.mrb[13].mxu1  ;;  %v1882_v38 = vld [vmem:[#allocation3 + $0x55] sm:$0xf]  ;;  %3400 = vmatprep.subr.bf16.mxu0 %v3501_v44  ;;  %v3502_v51 = vld [vmem:[%s5025_s1 + $0x60] sm:$0xff]  }
 0x3b6   :  { %1852 = vrot.lane.b32.xlu1 %v1850_v49, %s3543_s17  ;;  %1750 = vst.msk [vmem:[#allocation3 + $0x10d] sm:$0xf0] %vm1707_vm1, %v3392_v55  ;;  %1744 = vst.msk [vmem:[#allocation3 + $0xed] sm:$0xf0] %vm1707_vm1, %v1690_v56  ;;  %v3393_v13 = vpop.f32.mrb[14].mxu1  ;;  %v3505_v55 = vld [vmem:[%s5025_s1 + $0x78] sm:$0xff]  }
 0x3b7   :  { %1872 = vrot.lane.b32.xlu0 %v1870_v54, %s3536_s23  ;;  %v2062_v59 = vld [vmem:[#allocation3 + $0xe0] sm:$0xf]  ;;  %1743 = vst.msk [vmem:[#allocation3 + $0xf5] sm:$0xf] %vm222_vm5, %v1690_v56  ;;  %1752 = vst.msk [vmem:[#allocation3 + $0x125] sm:$0xf] %vm222_vm5, %v3393_v13 }
 0x3b8   :  { %2063 = vst.msk [vmem:[#allocation6 + $0x18] sm:$0xf] %vm222_vm5, %v2062_v59  ;;  %v1693_v63 = vpop.f32.mrb[15].mxu1  ;;  %v2012_v1 = vld [vmem:[#allocation3 + $0xc0] sm:$0xf]  ;;  %3401 = vmatpush3.bf16.msra.mxu0 %v3501_v44  ;;  %v3504_v54 = vld [vmem:[%s5025_s1 + $0x70] sm:$0xff]  }
 0x3b9   :  { %1753 = vst.msk [vmem:[#allocation3 + $0x11d] sm:$0xf0] %vm1707_vm1, %v3393_v13  ;;  %1747 = vst.msk [vmem:[#allocation3 + $0xfd] sm:$0xf0] %vm1707_vm1, %v1693_v63  ;;  %v1938_v2 = vld [vmem:[#allocation3 + $0x71] sm:$0xf]  ;;  %3402 = vmatprep.subr.bf16.mxu0 %v3502_v51 }
 0x3ba   :  { %1858 = vrot.lane.b32.xlu1 %v1856_v50, %s3544_s12  ;;  %1746 = vst.msk [vmem:[#allocation3 + $0x105] sm:$0xf] %vm222_vm5, %v1693_v63  ;;  %2013 = vst.msk [vmem:[#allocation6 + $0x14] sm:$0xf] %vm222_vm5, %v2012_v1  ;;  %v1888_v45 = vld [vmem:[#allocation3 + $0x51] sm:$0xf] }
 0x3bb   :  { %1793 = vrot.lane.b32.xlu0 %v1791_v33, %s3542_s16  ;;  %v1944_v3 = vld [vmem:[#allocation3 + $0x80] sm:$0xf]  ;;  %v1950_v61 = vld [vmem:[#allocation3 + $0x85] sm:$0xf]  ;;  %v1976_v53 = vld [vmem:[#allocation3 + $0xb0] sm:$0xf] }
 0x3bc   :  { %v1894_v4 = vld [vmem:[#allocation3 + $0x60] sm:$0xf]  ;;  %v1900_v7 = vld [vmem:[#allocation3 + $0x65] sm:$0xf]  ;;  %v1982_v24 = vld [vmem:[#allocation3 + $0xb5] sm:$0xf]  ;;  %3403 = vmatpush3.bf16.msra.mxu0 %v3502_v51 }
 0x3bd   :  { %v1956_v8 = vld [vmem:[#allocation3 + $0x81] sm:$0xf]  ;;  %v1914_v58 = vld [vmem:[#allocation3 + $0x65] sm:$0xf]  ;;  %v2026_v21 = vld [vmem:[#allocation3 + $0xd0] sm:$0xf]  ;;  %3404 = vmatprep.subr.bf16.mxu0 %v3503_v41 }
 0x3be   :  { %1816 = vrot.lane.b32.xlu1 %v1814_v5, %s3534_s28  ;;  %v1906_v46 = vld [vmem:[#allocation3 + $0x61] sm:$0xf]  ;;  %v1988_v11 = vld [vmem:[#allocation3 + $0xb1] sm:$0xf]  ;;  %v2032_v12 = vld [vmem:[#allocation3 + $0xd5] sm:$0xf] }
 0x3bf   :  { %1800 = vrot.lane.b32.xlu0 %v1798_v6, %s3543_s17  ;;  %v1920_v10 = vld [vmem:[#allocation3 + $0x61] sm:$0xf]  ;;  %v2064_v15 = vld [vmem:[#allocation3 + $0xe5] sm:$0xf]  ;;  %v2038_v16 = vld [vmem:[#allocation3 + $0xd1] sm:$0xf] }
 0x3c0   :  { %v2112_v27 = vld [vmem:[#allocation3 + $0x100] sm:$0xf]  ;;  %v2050_v22 = vld [vmem:[#allocation3 + $0xe5] sm:$0xf]  ;;  %v2076_v26 = vld [vmem:[#allocation3 + $0xf0] sm:$0xf]  ;;  %3405 = vmatpush3.bf16.msra.mxu0 %v3503_v41 }
 0x3c1   :  { %2113 = vst.msk [vmem:[#allocation6 + $0x1c] sm:$0xf] %vm222_vm5, %v2112_v27  ;;  %v2070_v18 = vld [vmem:[#allocation3 + $0xe1] sm:$0xf]  ;;  %v2000_v23 = vld [vmem:[#allocation3 + $0xc5] sm:$0xf]  ;;  %3406 = vmatprep.subr.bf16.mxu0 %v3504_v54 }
 0x3c2   :  { %1822 = vrot.lane.b32.xlu1 %v1820_v60, %s3536_s23  ;;  %v2044_v19 = vld [vmem:[#allocation3 + $0xe0] sm:$0xf]  ;;  %v2014_v29 = vld [vmem:[#allocation3 + $0xc5] sm:$0xf]  ;;  %v2126_v32 = vld [vmem:[#allocation3 + $0x110] sm:$0xf] }
 0x3c3   :  { %1807 = vrot.lane.b32.xlu0 %v1805_v9, %s3544_s12  ;;  %v1994_v20 = vld [vmem:[#allocation3 + $0xc0] sm:$0xf]  ;;  %v2082_v34 = vld [vmem:[#allocation3 + $0xf5] sm:$0xf]  ;;  %v2088_v40 = vld [vmem:[#allocation3 + $0xf1] sm:$0xf] }
 0x3c4   :  { %v2006_v30 = vld [vmem:[#allocation3 + $0xc1] sm:$0xf]  ;;  %v2132_v37 = vld [vmem:[#allocation3 + $0x115] sm:$0xf]  ;;  %v2138_v43 = vld [vmem:[#allocation3 + $0x111] sm:$0xf]  ;;  %3407 = vmatpush3.bf16.msra.mxu0 %v3504_v54 }
 0x3c5   :  { %v2020_v31 = vld [vmem:[#allocation3 + $0xc1] sm:$0xf]  ;;  %v2100_v52 = vld [vmem:[#allocation3 + $0x105] sm:$0xf]  ;;  %vm1775_vm5 = vcmask 257216   ;;  %3408 = vmatprep.subr.bf16.mxu0 %v3505_v55  ;;  %vm2429_vm1 = vcmask 64518  }
 0x3c6   :  { %1928 = vrot.lane.b32.xlu1 %v1926_v62, %s3538_s9  ;;  %v2094_v47 = vld [vmem:[#allocation3 + $0x100] sm:$0xf]  ;;  %v2150_v39 = vld [vmem:[#allocation3 + $0x125] sm:$0xf] }
 0x3c7   :  { %1878 = vrot.lane.b32.xlu0 %v1876_v17, %s3538_s9  ;;  %v2144_v48 = vld [vmem:[#allocation3 + $0x120] sm:$0xf]  ;;  %v2114_v49 = vld [vmem:[#allocation3 + $0x105] sm:$0xf] }
 0x3c8   :  { %v2106_v36 = vld [vmem:[#allocation3 + $0x101] sm:$0xf]  ;;  %3409 = vmatpush3.bf16.msra.mxu0 %v3505_v55 }
 0x3c9   :  { %v2120_v57 = vld [vmem:[#allocation3 + $0x101] sm:$0xf]  ;;  %3422 = vmatprep.subr.bf16.mxu0 %v3532_v0 }
 0x3ca   :  { %1934 = vrot.lane.b32.xlu1 %v1932_v14, %s3540_s26  ;;  %v2056_v13 = vld [vmem:[#allocation3 + $0xe1] sm:$0xf] }
 0x3cb   :  { %1884 = vrot.lane.b32.xlu0 %v1882_v38, %s3540_s26  ;;  %v2156_v1 = vld [vmem:[#allocation3 + $0x121] sm:$0xf] }
 0x3ce   :  { %1940 = vrot.lane.b32.xlu1 %v1938_v2, %s3541_s5 }
 0x3cf   :  { %1890 = vrot.lane.b32.xlu0 %v1888_v45, %s3541_s5 }
 0x3d2   :  { %1946 = vrot.lane.b32.xlu1 %v1944_v3, %s3542_s16 }
 0x3d3   :  { %1896 = vrot.lane.b32.xlu0 %v1894_v4, %s3542_s16 }
 0x3d6   :  { %1952 = vrot.lane.b32.xlu1 %v1950_v61, %s3543_s17 }
 0x3d7   :  { %1902 = vrot.lane.b32.xlu0 %v1900_v7, %s3543_s17 }
 0x3da   :  { %1958 = vrot.lane.b32.xlu1 %v1956_v8, %s3544_s12  ;;  %v2449_v8 = vld [vmem:[#allocation4] sm:$0x3] }
 0x3db   :  { %1908 = vrot.lane.b32.xlu0 %v1906_v46, %s3544_s12 }
 0x3de   :  { %1916 = vrot.lane.b32.xlu1 %v1914_v58, %s3534_s28 }
 0x3df   :  { %1978 = vrot.lane.b32.xlu0 %v1976_v53, %s3538_s9 }
 0x3e2   :  { %1922 = vrot.lane.b32.xlu1 %v1920_v10, %s3536_s23 }
 0x3e3   :  { %1984 = vrot.lane.b32.xlu0 %v1982_v24, %s3540_s26 }
 0x3e6   :  { %2028 = vrot.lane.b32.xlu1 %v2026_v21, %s3538_s9 }
 0x3e7   :  { %1990 = vrot.lane.b32.xlu0 %v1988_v11, %s3541_s5 }
 0x3ea   :  { %2034 = vrot.lane.b32.xlu1 %v2032_v12, %s3540_s26 }
 0x3eb   :  { %2066 = vrot.lane.b32.xlu0 %v2064_v15, %s3534_s28 }
 0x3ee   :  { %2040 = vrot.lane.b32.xlu1 %v2038_v16, %s3541_s5 }
 0x3ef   :  { %2072 = vrot.lane.b32.xlu0 %v2070_v18, %s3536_s23 }
 0x3f2   :  { %2046 = vrot.lane.b32.xlu1 %v2044_v19, %s3542_s16 }
 0x3f3   :  { %1996 = vrot.lane.b32.xlu0 %v1994_v20, %s3542_s16 }
 0x3f6   :  { %2052 = vrot.lane.b32.xlu1 %v2050_v22, %s3543_s17 }
 0x3f7   :  { %2002 = vrot.lane.b32.xlu0 %v2000_v23, %s3543_s17 }
 0x3fa   :  { %2016 = vrot.lane.b32.xlu1 %v2014_v29, %s3534_s28 }
 0x3fb   :  { %2008 = vrot.lane.b32.xlu0 %v2006_v30, %s3544_s12 }
 0x3fe   :  { %2022 = vrot.lane.b32.xlu1 %v2020_v31, %s3536_s23 }
 0x3ff   :  { %2078 = vrot.lane.b32.xlu0 %v2076_v26, %s3538_s9 }
 0x402   :  { %2128 = vrot.lane.b32.xlu1 %v2126_v32, %s3538_s9 }
 0x403   :  { %2084 = vrot.lane.b32.xlu0 %v2082_v34, %s3540_s26 }
 0x406   :  { %2134 = vrot.lane.b32.xlu1 %v2132_v37, %s3540_s26 }
 0x407   :  { %2090 = vrot.lane.b32.xlu0 %v2088_v40, %s3541_s5 }
 0x40a   :  { %2140 = vrot.lane.b32.xlu1 %v2138_v43, %s3541_s5 }
 0x40b   :  { %2096 = vrot.lane.b32.xlu0 %v2094_v47, %s3542_s16 }
 0x40e   :  { %2146 = vrot.lane.b32.xlu1 %v2144_v48, %s3542_s16 }
 0x40f   :  { %2102 = vrot.lane.b32.xlu0 %v2100_v52, %s3543_s17 }
 0x412   :  { %2152 = vrot.lane.b32.xlu1 %v2150_v39, %s3543_s17 }
 0x413   :  { %2108 = vrot.lane.b32.xlu0 %v2106_v36, %s3544_s12 }
 0x416   :  { %2116 = vrot.lane.b32.xlu1 %v2114_v49, %s3534_s28 }
 0x418   :  { %v1829_v50 = vpop.permute.xlu1 %1828 }
 0x419   :  { %v1773_v56 = vpop.permute.xlu0 %1772 }
 0x41a   :  { %1776 = vst.msk [vmem:[#allocation6] sm:$0xf] %vm1775_vm5, %v1773_v56  ;;  %2122 = vrot.lane.b32.xlu1 %v2120_v57, %s3536_s23 }
 0x41c   :  { %v1835_v59 = vpop.permute.xlu1 %1834 }
 0x41d   :  { %v1780_v33 = vpop.permute.xlu0 %1779 }
 0x41e   :  { %1783 = vst.msk [vmem:[#allocation6] sm:$0xf] %vm1782_vm6, %v1780_v33  ;;  %2058 = vrot.lane.b32.xlu1 %v2056_v13, %s3544_s12 }
 0x420   :  { %v1841_v63 = vpop.permute.xlu1 %1840 }
 0x421   :  { %v1787_v5 = vpop.permute.xlu0 %1786 }
 0x422   :  { %1790 = vst.msk [vmem:[#allocation6] sm:$0xf] %vm1789_vm7, %v1787_v5  ;;  %2158 = vrot.lane.b32.xlu1 %v2156_v1, %s3544_s12  ;;  %v3506_v1 = vld [vmem:[%s5030_s6] sm:$0xff]  }
 0x423   :  { %3418 = vmatprep.mubr.msk.bf16.mxu1 %vm2366_vm11, %v3506_v1  ;;  %v3507_v1 = vld [vmem:[%s5030_s6 + $0x8] sm:$0xff]  }
 0x424   :  { %v1847_v6 = vpop.permute.xlu1 %1846 }
 0x425   :  { %v1867_v60 = vpop.permute.xlu0 %1866 }
 0x426   :  { %1869 = vst.msk [vmem:[#allocation6 + $0x8] sm:$0xf] %vm1761_vm15, %v1867_v60  ;;  %v2559_v60 = vld [vmem:[#allocation4 + $0x33] sm:$0x3] }
 0x428   :  { %v1853_v9 = vpop.permute.xlu1 %1852 }
 0x429   :  { %v1873_v62 = vpop.permute.xlu0 %1872 }
 0x42a   :  { %1875 = vst.msk [vmem:[#allocation6 + $0x8] sm:$0xf] %vm1768_vm0, %v1873_v62 }
 0x42c   :  { %v1859_v17 = vpop.permute.xlu1 %1858 }
 0x42d   :  { %v1794_v27 = vpop.permute.xlu0 %1793 }
 0x42e   :  { %1797 = vst.msk [vmem:[#allocation6] sm:$0xf] %vm1796_vm8, %v1794_v27 }
 0x430   :  { %v1817_v14 = vpop.permute.xlu1 %1816 }
 0x431   :  { %1819 = vst.msk [vmem:[#allocation6 + $0x4] sm:$0xf] %vm1761_vm15, %v1817_v14  ;;  %v1801_v38 = vpop.permute.xlu0 %1800 }
 0x432   :  { %1804 = vst.msk [vmem:[#allocation6] sm:$0xf] %vm1803_vm9, %v1801_v38 }
 0x434   :  { %v1823_v2 = vpop.permute.xlu1 %1822 }
 0x435   :  { %1825 = vst.msk [vmem:[#allocation6 + $0x4] sm:$0xf] %vm1768_vm0, %v1823_v2  ;;  %v1808_v45 = vpop.permute.xlu0 %1807 }
 0x436   :  { %1831 = vst.msk [vmem:[#allocation6 + $0x4] sm:$0xf] %vm1775_vm5, %v1829_v50 }
 0x437   :  { %1811 = vst.msk [vmem:[#allocation6] sm:$0xf] %vm1810_vm10, %v1808_v45 }
 0x438   :  { %1837 = vst.msk [vmem:[#allocation6 + $0x4] sm:$0xf] %vm1782_vm6, %v1835_v59  ;;  %v1929_v3 = vpop.permute.xlu1 %1928 }
 0x439   :  { %1843 = vst.msk [vmem:[#allocation6 + $0x4] sm:$0xf] %vm1789_vm7, %v1841_v63  ;;  %v1879_v4 = vpop.permute.xlu0 %1878 }
 0x43a   :  { %1849 = vst.msk [vmem:[#allocation6 + $0x4] sm:$0xf] %vm1796_vm8, %v1847_v6  ;;  %v2451_v6 = vld [vmem:[#allocation4 + $0x3] sm:$0x3] }
 0x43b   :  { %1855 = vst.msk [vmem:[#allocation6 + $0x4] sm:$0xf] %vm1803_vm9, %v1853_v9  ;;  %2453 = vrot.lane.b32.xlu0 %v2451_v6, %s3534_s28  ;;  %v3191_v9 = vld [vmem:[%s5026_s2 + $0x1] ss:$0 sm:$0xff] }
 0x43c   :  { %1881 = vst.msk [vmem:[#allocation6 + $0x8] sm:$0xf] %vm1775_vm5, %v1879_v4  ;;  %v1935_v61 = vpop.permute.xlu1 %1934  ;;  %v2458_v6 = vld [vmem:[#allocation4 + $0x1] sm:$0x3] }
 0x43d   :  { %1861 = vst.msk [vmem:[#allocation6 + $0x4] sm:$0xf] %vm1810_vm10, %v1859_v17  ;;  %v1885_v7 = vpop.permute.xlu0 %1884 }
 0x43e   :  { %1887 = vst.msk [vmem:[#allocation6 + $0x8] sm:$0xf] %vm1782_vm6, %v1885_v7 }
 0x43f   :  { %2561 = vrot.lane.b32.xlu0 %v2559_v60, %s3534_s28  ;;  %v2565_v60 = vld [vmem:[#allocation4 + $0x31] sm:$0x3] }
 0x440   :  { %v1941_v46 = vpop.permute.xlu1 %1940 }
 0x441   :  { %v1891_v53 = vpop.permute.xlu0 %1890 }
 0x442   :  { %1893 = vst.msk [vmem:[#allocation6 + $0x8] sm:$0xf] %vm1789_vm7, %v1891_v53 }
 0x443   :  { %2460 = vrot.lane.b32.xlu0 %v2458_v6, %s3536_s23 }
 0x444   :  { %v2162_v58 = vld [vmem:[#allocation6] sm:$0xff]  ;;  %v1947_v24 = vpop.permute.xlu1 %1946 }
 0x445   :  { %2450 = vst.msk [vmem:[#allocation6] sm:$0x3] %vm138_vm14, %v2449_v8  ;;  %v1897_v10 = vpop.permute.xlu0 %1896 }
 0x446   :  { %1899 = vst.msk [vmem:[#allocation6 + $0x8] sm:$0xf] %vm1796_vm8, %v1897_v10 }
 0x447   :  { %2567 = vrot.lane.b32.xlu0 %v2565_v60, %s3536_s23 }
 0x448   :  { %v1953_v21 = vpop.permute.xlu1 %1952 }
 0x449   :  { %v1903_v11 = vpop.permute.xlu0 %1902 }
 0x44a   :  { %1905 = vst.msk [vmem:[#allocation6 + $0x8] sm:$0xf] %vm1803_vm9, %v1903_v11 }
 0x44c   :  { %v1959_v12 = vpop.permute.xlu1 %1958 }
 0x44d   :  { %v1909_v15 = vpop.permute.xlu0 %1908 }
 0x44e   :  { %1911 = vst.msk [vmem:[#allocation6 + $0x8] sm:$0xf] %vm1810_vm10, %v1909_v15 }
 0x450   :  { %v1917_v16 = vpop.permute.xlu1 %1916 }
 0x451   :  { %1919 = vst.msk [vmem:[#allocation6 + $0xc] sm:$0xf] %vm1761_vm15, %v1917_v16  ;;  %v1979_v18 = vpop.permute.xlu0 %1978 }
 0x452   :  { %1981 = vst.msk [vmem:[#allocation6 + $0x10] sm:$0xf] %vm1775_vm5, %v1979_v18 }
 0x454   :  { %v1923_v19 = vpop.permute.xlu1 %1922 }
 0x455   :  { %1925 = vst.msk [vmem:[#allocation6 + $0xc] sm:$0xf] %vm1768_vm0, %v1923_v19  ;;  %v1985_v20 = vpop.permute.xlu0 %1984 }
 0x456   :  { %1931 = vst.msk [vmem:[#allocation6 + $0xc] sm:$0xf] %vm1775_vm5, %v1929_v3 }
 0x457   :  { %1987 = vst.msk [vmem:[#allocation6 + $0x10] sm:$0xf] %vm1782_vm6, %v1985_v20  ;;  %1937 = vst.msk [vmem:[#allocation6 + $0xc] sm:$0xf] %vm1782_vm6, %v1935_v61 }
 0x458   :  { %1943 = vst.msk [vmem:[#allocation6 + $0xc] sm:$0xf] %vm1789_vm7, %v1941_v46  ;;  %v2029_v22 = vpop.permute.xlu1 %2028 }
 0x459   :  { %1949 = vst.msk [vmem:[#allocation6 + $0xc] sm:$0xf] %vm1796_vm8, %v1947_v24  ;;  %v1991_v23 = vpop.permute.xlu0 %1990 }
 0x45a   :  { %1955 = vst.msk [vmem:[#allocation6 + $0xc] sm:$0xf] %vm1803_vm9, %v1953_v21 }
 0x45b   :  { %1993 = vst.msk [vmem:[#allocation6 + $0x10] sm:$0xf] %vm1789_vm7, %v1991_v23 }
 0x45c   :  { %1961 = vst.msk [vmem:[#allocation6 + $0xc] sm:$0xf] %vm1810_vm10, %v1959_v12  ;;  %v2035_v29 = vpop.permute.xlu1 %2034 }
 0x45d   :  { %v2067_v30 = vpop.permute.xlu0 %2066 }
 0x45e   :  { %2069 = vst.msk [vmem:[#allocation6 + $0x18] sm:$0xf] %vm1761_vm15, %v2067_v30 }
 0x460   :  { %v2041_v26 = vpop.permute.xlu1 %2040 }
 0x461   :  { %v2073_v31 = vpop.permute.xlu0 %2072 }
 0x462   :  { %2075 = vst.msk [vmem:[#allocation6 + $0x18] sm:$0xf] %vm1768_vm0, %v2073_v31 }
 0x463   :  { %v2163_v28 = vld [vmem:[#allocation6 + $0x8] sm:$0xff] }
 0x464   :  { %v2166_v32 = vpack.c.bf16 %v2163_v28, %v2162_v58  ;;  %v2047_v34 = vpop.permute.xlu1 %2046 }
 0x465   :  { %v1997_v35 = vpop.permute.xlu0 %1996 }
 0x466   :  { %3410 = vmatprep.mubr.bf16.mxu0 %v2166_v32  ;;  %1999 = vst.msk [vmem:[#allocation6 + $0x10] sm:$0xf] %vm1796_vm8, %v1997_v35 }
 0x468   :  { %v2053_v37 = vpop.permute.xlu1 %2052 }
 0x469   :  { %v2003_v40 = vpop.permute.xlu0 %2002 }
 0x46a   :  { %2005 = vst.msk [vmem:[#allocation6 + $0x10] sm:$0xf] %vm1803_vm9, %v2003_v40 }
 0x46c   :  { %v2017_v42 = vpop.permute.xlu1 %2016 }
 0x46d   :  { %2019 = vst.msk [vmem:[#allocation6 + $0x14] sm:$0xf] %vm1761_vm15, %v2017_v42  ;;  %v2009_v43 = vpop.permute.xlu0 %2008 }
 0x46e   :  { %2011 = vst.msk [vmem:[#allocation6 + $0x10] sm:$0xf] %vm1810_vm10, %v2009_v43 }
 0x470   :  { %v2023_v44 = vpop.permute.xlu1 %2022 }
 0x471   :  { %2025 = vst.msk [vmem:[#allocation6 + $0x14] sm:$0xf] %vm1768_vm0, %v2023_v44  ;;  %v2079_v47 = vpop.permute.xlu0 %2078 }
 0x472   :  { %2031 = vst.msk [vmem:[#allocation6 + $0x14] sm:$0xf] %vm1775_vm5, %v2029_v22  ;;  %2081 = vst.msk [vmem:[#allocation6 + $0x18] sm:$0xf] %vm1775_vm5, %v2079_v47  ;;  %v3200_v47 = vld [vmem:[%s5028_s3 + $0x1] sm:$0x1] }
 0x473   :  { %2037 = vst.msk [vmem:[#allocation6 + $0x14] sm:$0xf] %vm1782_vm6, %v2035_v29 }
 0x474   :  { %2043 = vst.msk [vmem:[#allocation6 + $0x14] sm:$0xf] %vm1789_vm7, %v2041_v26  ;;  %v2129_v48 = vpop.permute.xlu1 %2128 }
 0x475   :  { %2049 = vst.msk [vmem:[#allocation6 + $0x14] sm:$0xf] %vm1796_vm8, %v2047_v34  ;;  %v2085_v52 = vpop.permute.xlu0 %2084 }
 0x476   :  { %2055 = vst.msk [vmem:[#allocation6 + $0x14] sm:$0xf] %vm1803_vm9, %v2053_v37 }
 0x477   :  { %2087 = vst.msk [vmem:[#allocation6 + $0x18] sm:$0xf] %vm1782_vm6, %v2085_v52 }
 0x478   :  { %v2135_v51 = vpop.permute.xlu1 %2134 }
 0x479   :  { %v2091_v39 = vpop.permute.xlu0 %2090 }
 0x47a   :  { %2093 = vst.msk [vmem:[#allocation6 + $0x18] sm:$0xf] %vm1789_vm7, %v2091_v39 }
 0x47c   :  { %v2141_v36 = vpop.permute.xlu1 %2140 }
 0x47d   :  { %v2097_v41 = vpop.permute.xlu0 %2096 }
 0x47e   :  { %2099 = vst.msk [vmem:[#allocation6 + $0x18] sm:$0xf] %vm1796_vm8, %v2097_v41 }
 0x480   :  { %v2147_v49 = vpop.permute.xlu1 %2146 }
 0x481   :  { %v2103_v54 = vpop.permute.xlu0 %2102 }
 0x482   :  { %2105 = vst.msk [vmem:[#allocation6 + $0x18] sm:$0xf] %vm1803_vm9, %v2103_v54 }
 0x484   :  { %v2153_v50 = vpop.permute.xlu1 %2152 }
 0x485   :  { %v2109_v55 = vpop.permute.xlu0 %2108 }
 0x486   :  { %2111 = vst.msk [vmem:[#allocation6 + $0x18] sm:$0xf] %vm1810_vm10, %v2109_v55 }
 0x488   :  { %v2117_v56 = vpop.permute.xlu1 %2116 }
 0x489   :  { %2119 = vst.msk [vmem:[#allocation6 + $0x1c] sm:$0xf] %vm1761_vm15, %v2117_v56  ;;  %vm2424_vm15 = vcmask 60418  }
 0x48c   :  { %v2123_v57 = vpop.permute.xlu1 %2122 }
 0x48d   :  { %2125 = vst.msk [vmem:[#allocation6 + $0x1c] sm:$0xf] %vm1768_vm0, %v2123_v57  ;;  %vm2427_vm0 = vcmask 62468  }
 0x48e   :  { %2131 = vst.msk [vmem:[#allocation6 + $0x1c] sm:$0xf] %vm1775_vm5, %v2129_v48  ;;  %vm2477_vm5 = vcmask 320768  }
 0x48f   :  { %2137 = vst.msk [vmem:[#allocation6 + $0x1c] sm:$0xf] %vm1782_vm6, %v2135_v51  ;;  %v3201_v51 = vld [vmem:[%s5029_s4 + $0x1] sm:$0x1]  ;;  %vm2484_vm6 = vcmask 386368  }
 0x490   :  { %2143 = vst.msk [vmem:[#allocation6 + $0x1c] sm:$0xf] %vm1789_vm7, %v2141_v36  ;;  %v2059_v59 = vpop.permute.xlu1 %2058  ;;  %vm2491_vm7 = vcmask 451968  }
 0x491   :  { %2149 = vst.msk [vmem:[#allocation6 + $0x1c] sm:$0xf] %vm1796_vm8, %v2147_v49  ;;  %vm2498_vm8 = vcmask 517568  }
 0x492   :  { %2061 = vst.msk [vmem:[#allocation6 + $0x14] sm:$0xf] %vm1810_vm10, %v2059_v59 }
 0x493   :  { %2155 = vst.msk [vmem:[#allocation6 + $0x1c] sm:$0xf] %vm1803_vm9, %v2153_v50  ;;  %vm2505_vm9 = vcmask 583168  }
 0x494   :  { %v2159_v33 = vpop.permute.xlu1 %2158 }
 0x495   :  { %2161 = vst.msk [vmem:[#allocation6 + $0x1c] sm:$0xf] %vm1810_vm10, %v2159_v33  ;;  %vm2819_vm10 = vcmask 1043456  }
 0x499   :  { %v2164_v13 = vld [vmem:[#allocation6 + $0x10] sm:$0xff] }
 0x49c   :  { %v2165_v63 = vld [vmem:[#allocation6 + $0x18] sm:$0xff] }
 0x49d   :  { %v2167_v5 = vpack.c.bf16 %v2165_v63, %v2164_v13 }
 0x49f   :  { %3411 = vmatmul.mubr.bf16.vlgmr.msra.gmra.mrb[16].mxu0 %v2167_v5 }
 0x572   :  { %v3412_v62 = vpop.f32.mrb[16].mxu0 }
 0x573   :  { %v2275_v17 = vpop.f32.mrb[17].mxu0  ;;  %v2284_v27 = vadd.f32 %v3412_v62, %v3191_v9  ;;  %v2557_v62 = vld [vmem:[#allocation4 + $0x30] sm:$0x3] }
 0x574   :  { %v2276_v14 = vadd.f32 %v3191_v9, %v2275_v17  ;;  %v3413_v38 = vpop.f32.mrb[18].mxu0  ;;  %2558 = vst.msk [vmem:[#allocation6 + $0x4] sm:$0x3] %vm138_vm14, %v2557_v62 }
 0x575   :  { %v2278_v2 = vpop.f32.mrb[19].mxu0  ;;  %v2287_v3 = vadd.f32 %v3413_v38, %v3191_v9  ;;  %v2292_v61 = vmax.f32 %v2284_v27, 0.0 }
 0x576   :  { %v2290_v45 = vmax.f32 %v2276_v14, 0.0  ;;  %v2279_v4 = vadd.f32 %v3191_v9, %v2278_v2  ;;  %v2454_v9 = vpop.permute.xlu0 %2453 }
 0x577   :  { %v2293_v46 = vmax.f32 %v2287_v3, 0.0  ;;  %v2305_v24 = vmul.f32 %v2292_v61, %v2292_v61  ;;  %2457 = vst.msk [vmem:[#allocation6] sm:$0x3] %vm2456_vm12, %v2454_v9 }
 0x578   :  { %v2291_v7 = vmax.f32 %v2279_v4, 0.0  ;;  %v2303_v8 = vmul.f32 %v2290_v45, %v2290_v45 }
 0x579   :  { %v2306_v11 = vmul.f32 %v2293_v46, %v2293_v46 }
 0x57a   :  { %v2294_v53 = vadd.f32 %v2291_v7, %v2290_v45  ;;  %v2304_v58 = vmul.f32 %v2291_v7, %v2291_v7  ;;  %v2562_v17 = vpop.permute.xlu0 %2561 }
 0x57b   :  { %2564 = vst.msk [vmem:[#allocation6 + $0x4] sm:$0x3] %vm2456_vm12, %v2562_v17 }
 0x57c   :  { %v2295_v10 = vadd.f32 %v2294_v53, %v2292_v61  ;;  %v2307_v21 = vadd.f32 %v2304_v58, %v2303_v8 }
 0x57e   :  { %v2296_v12 = vadd.f32 %v2295_v10, %v2293_v46  ;;  %v2308_v15 = vadd.f32 %v2307_v21, %v2305_v24  ;;  %v2461_v27 = vpop.permute.xlu0 %2460 }
 0x57f   :  { %2464 = vst.msk [vmem:[#allocation6] sm:$0x3] %vm2463_vm13, %v2461_v27 }
 0x580   :  { %v2297_v16 = vrot.slane %v2296_v12, 4  ;;  %v2309_v18 = vadd.f32 %v2308_v15, %v2306_v11 }
 0x582   :  { %v2298_v19 = vadd.f32 %v2297_v16, %v2296_v12  ;;  %v2310_v20 = vrot.slane %v2309_v18, 4  ;;  %v2568_v14 = vpop.permute.xlu0 %2567 }
 0x583   :  { %2570 = vst.msk [vmem:[#allocation6 + $0x4] sm:$0x3] %vm2463_vm13, %v2568_v14 }
 0x584   :  { %v2299_v22 = vrot.slane %v2298_v19, 2  ;;  %v2311_v23 = vadd.f32 %v2310_v20, %v2309_v18  ;;  %v3508_v20 = vld [vmem:[%s5025_s1 + $0x80] sm:$0xff]  }
 0x585   :  { %3423 = vmatpush3.bf16.msra.mxu0 %v3508_v20 }
 0x586   :  { %v2300_v29 = vadd.f32 %v2299_v22, %v2298_v19  ;;  %v2312_v30 = vrot.slane %v2311_v23, 2  ;;  %3424 = vmatprep.subr.bf16.mxu0 %v3532_v0 }
 0x588   :  { %v2301_v26 = vrot.slane %v2300_v29, 1  ;;  %v2313_v31 = vadd.f32 %v2312_v30, %v2311_v23 }
 0x58a   :  { %v2302_v28 = vadd.f32 %v2301_v26, %v2300_v29  ;;  %v2314_v32 = vrot.slane %v2313_v31, 1  ;;  %v3509_v29 = vld [vmem:[%s5025_s1 + $0x88] sm:$0xff]  }
 0x58b   :  { %3425 = vmatpush3.bf16.msra.mxu0 %v3509_v29 }
 0x58c   :  { %v2315_v34 = vadd.f32 %v2314_v32, %v2313_v31  ;;  %v2316_v35 = vmul.f32 0.03125, %v2302_v28  ;;  %3426 = vmatprep.subr.bf16.mxu0 %v3532_v0  ;;  %v3510_v31 = vld [vmem:[%s5025_s1 + $0x90] sm:$0xff]  }
 0x58e   :  { %v2317_v37 = vmul.f32 0.03125, %v2315_v34  ;;  %v2318_v40 = vmul.f32 %v2316_v35, %v2316_v35  ;;  %v3511_v34 = vld [vmem:[%s5025_s1 + $0x98] sm:$0xff]  }
 0x58f   :  { %3427 = vmatpush3.bf16.msra.mxu0 %v3510_v31 }
 0x590   :  { %v2319_v42 = vsub.f32 %v2317_v37, %v2318_v40  ;;  %3428 = vmatprep.subr.bf16.mxu0 %v3532_v0  ;;  %v3512_v40 = vld [vmem:[%s5025_s1 + $0xa0] sm:$0xff]  }
 0x592   :  { %v2320_v43 = vmax.f32 %v2319_v42, 0.0 }
 0x593   :  { %3429 = vmatpush3.bf16.msra.mxu0 %v3511_v34 }
 0x594   :  { %v2321_v44 = vadd.f32 1e-05, %v2320_v43  ;;  %3430 = vmatprep.subr.bf16.mxu0 %v3532_v0 }
 0x596   :  { %3526 = vrsqrt.f32 %v2321_v44  ;;  %v3513_v44 = vld [vmem:[%s5025_s1 + $0xa8] sm:$0xff]  }
 0x597   :  { %3431 = vmatpush3.bf16.msra.mxu0 %v3512_v40 }
 0x598   :  { %3432 = vmatprep.subr.bf16.mxu0 %v3532_v0 }
 0x59b   :  { %3433 = vmatpush3.bf16.msra.mxu0 %v3513_v44 }
 0x59c   :  { %3434 = vmatprep.subr.bf16.mxu0 %v3532_v0 }
 0x5a0   :  { %v3527_v48 = vpop.eup %3526 }
 0x5a1   :  { %v2325_v52 = vmul.f32 %v3527_v48, %v3200_v47 }
 0x5a3   :  { %v2328_v39 = vmul.f32 %v2325_v52, %v2316_v35  ;;  %v2334_v36 = vrot.slane %v2325_v52, %v4565_v25  ;;  %v3514_v52 = vld [vmem:[%s5025_s1 + $0xb0] sm:$0xff]  }
 0x5a4   :  { %3435 = vmatpush3.bf16.msra.mxu0 %v3514_v52 }
 0x5a5   :  { %v2337_v41 = vmul.f32 %v2334_v36, %v2291_v7  ;;  %v2329_v49 = vsub.f32 %v3201_v51, %v2328_v39  ;;  %v2336_v54 = vmul.f32 %v2334_v36, %v2290_v45  ;;  %v2338_v50 = vmul.f32 %v2334_v36, %v2292_v61  ;;  %v3515_v39 = vld [vmem:[%s5025_s1 + $0xb8] sm:$0xff]   ;;  %3436 = vmatprep.subr.bf16.mxu0 %v3532_v0 }
 0x5a6   :  { %v2339_v55 = vmul.f32 %v2334_v36, %v2293_v46 }
 0x5a7   :  { %v2344_v56 = vrot.slane %v2329_v49, %v4565_v25 }
 0x5a8   :  { %3437 = vmatpush3.bf16.msra.mxu0 %v3515_v39  ;;  %v3232_v39 = vld [vmem:[%s5028_s3 + $0x2] sm:$0x1] }
 0x5a9   :  { %v2346_v57 = vadd.f32 %v2344_v56, %v2336_v54  ;;  %v2347_v59 = vadd.f32 %v2344_v56, %v2337_v41  ;;  %v2348_v33 = vadd.f32 %v2344_v56, %v2338_v50  ;;  %v2349_v13 = vadd.f32 %v2344_v56, %v2339_v55 }
 0x5ab   :  { %v2354_v63 = vpack.c.bf16 %v2347_v59, %v2346_v57  ;;  %v2355_v5 = vpack.c.bf16 %v2349_v13, %v2348_v33 }
 0x5ad   :  { %3414 = vmatprep.subr.bf16.mxu1 %v2354_v63 }
 0x5ae   :  { %3415 = vmatpush3.bf16.msra.mxu1 %v2354_v63 }
 0x5af   :  { %3416 = vmatprep.subr.bf16.mxu1 %v2355_v5 }
 0x5b2   :  { %3417 = vmatpush3.bf16.msra.mxu1 %v2355_v5 }
 0x5b3   :  { %3442 = vmatprep.subr.bf16.mxu1 %v3532_v0 }
 0x5b5   :  { %3419 = vmatmul.mubr.msk.bf16.vlgmr.msra.gmra.mrb[16].mxu1 %vm2366_vm11, %v3507_v1  ;;  %vm2889_vm11 = vcmask 122944  }
 0x688   :  { %v3420_v38 = vpop.f32.mrb[16].mxu1 }
 0x689   :  { %2438 = vst.msk [vmem:[#allocation4 + $0x3b] sm:$0x3] %vm138_vm14, %v3420_v38  ;;  %v2407_v2 = vpop.f32.mrb[17].mxu1 }
 0x68a   :  { %2439 = vst.msk [vmem:[#allocation4 + $0x37] sm:$0xc] %vm2424_vm15, %v3420_v38  ;;  %2425 = vst.msk [vmem:[#allocation4 + $0x7] sm:$0xc] %vm2424_vm15, %v2407_v2  ;;  %v3421_v45 = vpop.f32.mrb[18].mxu1 }
 0x68b   :  { %2441 = vst.msk [vmem:[#allocation4 + $0x3f] sm:$0x30] %vm2427_vm0, %v3420_v38  ;;  %2428 = vst.msk [vmem:[#allocation4 + $0xf] sm:$0x30] %vm2427_vm0, %v2407_v2  ;;  %v2410_v3 = vpop.f32.mrb[19].mxu1 }
 0x68c   :  { %2442 = vst.msk [vmem:[#allocation4 + $0x3b] sm:$0xc0] %vm2429_vm1, %v3420_v38  ;;  %2430 = vst.msk [vmem:[#allocation4 + $0xb] sm:$0xc0] %vm2429_vm1, %v2407_v2 }
 0x68d   :  { %2423 = vst.msk [vmem:[#allocation4 + $0xb] sm:$0x3] %vm138_vm14, %v2407_v2  ;;  %2444 = vst.msk [vmem:[#allocation4 + $0x4b] sm:$0x3] %vm138_vm14, %v3421_v45 }
 0x68e   :  { %2445 = vst.msk [vmem:[#allocation4 + $0x47] sm:$0xc] %vm2424_vm15, %v3421_v45  ;;  %2433 = vst.msk [vmem:[#allocation4 + $0x17] sm:$0xc] %vm2424_vm15, %v2410_v3  ;;  %vm2868_vm15 = vcmask 59394  }
 0x68f   :  { %2447 = vst.msk [vmem:[#allocation4 + $0x4f] sm:$0x30] %vm2427_vm0, %v3421_v45  ;;  %2435 = vst.msk [vmem:[#allocation4 + $0x1f] sm:$0x30] %vm2427_vm0, %v2410_v3  ;;  %vm2870_vm0 = vcmask 60419  }
 0x690   :  { %2448 = vst.msk [vmem:[#allocation4 + $0x4b] sm:$0xc0] %vm2429_vm1, %v3421_v45  ;;  %2436 = vst.msk [vmem:[#allocation4 + $0x1b] sm:$0xc0] %vm2429_vm1, %v2410_v3  ;;  %v2577_v8 = vld [vmem:[#allocation4 + $0x3b] sm:$0x3] }
 0x691   :  { %2432 = vst.msk [vmem:[#allocation4 + $0x1b] sm:$0x3] %vm138_vm14, %v2410_v3  ;;  %v2571_v61 = vld [vmem:[#allocation4 + $0x38] sm:$0x3]  ;;  %v2465_v15 = vld [vmem:[#allocation4 + $0x8] sm:$0x3] }
 0x692   :  { %v2609_v4 = vld [vmem:[#allocation4 + $0x43] sm:$0x3]  ;;  %2573 = vrot.lane.b32.xlu0 %v2571_v61, %s3538_s9  ;;  %v2583_v46 = vld [vmem:[#allocation4 + $0x39] sm:$0x3]  ;;  %v2509_v53 = vld [vmem:[#allocation4 + $0x13] sm:$0x3] }
 0x693   :  { %2611 = vrot.lane.b32.xlu1 %v2609_v4, %s3534_s28  ;;  %v2615_v7 = vld [vmem:[#allocation4 + $0x41] sm:$0x3]  ;;  %v2507_v24 = vld [vmem:[#allocation4 + $0x10] sm:$0x3]  ;;  %v2595_v11 = vld [vmem:[#allocation4 + $0x43] sm:$0x3] }
 0x694   :  { %v2607_v58 = vld [vmem:[#allocation4 + $0x40] sm:$0x3]  ;;  %2508 = vst.msk [vmem:[#allocation6 + $0x2] sm:$0x3] %vm138_vm14, %v2507_v24  ;;  %v2515_v21 = vld [vmem:[#allocation4 + $0x11] sm:$0x3] }
 0x695   :  { %2608 = vst.msk [vmem:[#allocation6 + $0x6] sm:$0x3] %vm138_vm14, %v2607_v58  ;;  %v2589_v10 = vld [vmem:[#allocation4 + $0x40] sm:$0x3]  ;;  %v2621_v12 = vld [vmem:[#allocation4 + $0x48] sm:$0x3] }
 0x696   :  { %2579 = vrot.lane.b32.xlu0 %v2577_v8, %s3540_s26  ;;  %v2627_v16 = vld [vmem:[#allocation4 + $0x4b] sm:$0x3]  ;;  %v2633_v19 = vld [vmem:[#allocation4 + $0x49] sm:$0x3]  ;;  %v2486_v30 = vld [vmem:[#allocation4 + $0x10] sm:$0x3] }
 0x697   :  { %2617 = vrot.lane.b32.xlu1 %v2615_v7, %s3536_s23  ;;  %v2472_v18 = vld [vmem:[#allocation4 + $0xb] sm:$0x3]  ;;  %v2479_v22 = vld [vmem:[#allocation4 + $0x9] sm:$0x3]  ;;  %v2639_v23 = vld [vmem:[#allocation4 + $0x50] sm:$0x3] }
 0x698   :  { %v2645_v26 = vld [vmem:[#allocation4 + $0x53] sm:$0x3]  ;;  %v2521_v32 = vld [vmem:[#allocation4 + $0x18] sm:$0x3]  ;;  %v2500_v35 = vld [vmem:[#allocation4 + $0x11] sm:$0x3] }
 0x699   :  { %v2493_v28 = vld [vmem:[#allocation4 + $0x13] sm:$0x3]  ;;  %v2527_v37 = vld [vmem:[#allocation4 + $0x1b] sm:$0x3]  ;;  %v2601_v42 = vld [vmem:[#allocation4 + $0x41] sm:$0x3] }
 0x69a   :  { %2585 = vrot.lane.b32.xlu0 %v2583_v46, %s3541_s5  ;;  %v2533_v43 = vld [vmem:[#allocation4 + $0x19] sm:$0x3]  ;;  %v2539_v47 = vld [vmem:[#allocation4 + $0x20] sm:$0x3]  ;;  %v2545_v48 = vld [vmem:[#allocation4 + $0x23] sm:$0x3] }
 0x69b   :  { %2511 = vrot.lane.b32.xlu1 %v2509_v53, %s3534_s28  ;;  %v2551_v51 = vld [vmem:[#allocation4 + $0x21] sm:$0x3]  ;;  %vm3545_vm14 = vmmov 0   ;;  %v2651_v36 = vld [vmem:[#allocation4 + $0x51] sm:$0x3]  ;;  %vm2873_vm1 = vcmask 61444  }
 0x69c   :  { %3438 = vmatprep.mubr.msk.bf16.mxu0 %vm3545_vm14, %v3532_v0  ;;  %3444 = vmatprep.mubr.msk.bf16.mxu1 %vm3545_vm14, %v3532_v0  ;;  %v2884_v58 = vld [vmem:[#allocation5 + $0x2] sm:$0x1]  ;;  %v2942_v24 = vld [vmem:[#allocation5 + $0x12] sm:$0x1] }
 0x69e   :  { %2591 = vrot.lane.b32.xlu0 %v2589_v10, %s3542_s16  ;;  %v2891_v10 = vld [vmem:[#allocation5 + $0x1] sm:$0x1] }
 0x69f   :  { %2517 = vrot.lane.b32.xlu1 %v2515_v21, %s3536_s23  ;;  %v2948_v21 = vld [vmem:[#allocation5 + $0x11] sm:$0x1] }
 0x6a2   :  { %2597 = vrot.lane.b32.xlu0 %v2595_v11, %s3543_s17  ;;  %v3223_v11 = vld [vmem:[%s5026_s2 + $0x2] ss:$0 sm:$0xff] }
 0x6a3   :  { %2623 = vrot.lane.b32.xlu1 %v2621_v12, %s3538_s9 }
 0x6a6   :  { %2467 = vrot.lane.b32.xlu0 %v2465_v15, %s3538_s9 }
 0x6a7   :  { %2629 = vrot.lane.b32.xlu1 %v2627_v16, %s3540_s26 }
 0x6aa   :  { %2474 = vrot.lane.b32.xlu0 %v2472_v18, %s3540_s26 }
 0x6ab   :  { %2635 = vrot.lane.b32.xlu1 %v2633_v19, %s3541_s5 }
 0x6ae   :  { %2481 = vrot.lane.b32.xlu0 %v2479_v22, %s3541_s5 }
 0x6af   :  { %2641 = vrot.lane.b32.xlu1 %v2639_v23, %s3542_s16 }
 0x6b2   :  { %2488 = vrot.lane.b32.xlu0 %v2486_v30, %s3542_s16 }
 0x6b3   :  { %2647 = vrot.lane.b32.xlu1 %v2645_v26, %s3543_s17 }
 0x6b6   :  { %2495 = vrot.lane.b32.xlu0 %v2493_v28, %s3543_s17 }
 0x6b7   :  { %2523 = vrot.lane.b32.xlu1 %v2521_v32, %s3538_s9 }
 0x6ba   :  { %2502 = vrot.lane.b32.xlu0 %v2500_v35, %s3544_s12 }
 0x6bb   :  { %2529 = vrot.lane.b32.xlu1 %v2527_v37, %s3540_s26 }
 0x6be   :  { %2603 = vrot.lane.b32.xlu0 %v2601_v42, %s3544_s12 }
 0x6bf   :  { %2535 = vrot.lane.b32.xlu1 %v2533_v43, %s3541_s5 }
 0x6c2   :  { %2886 = vrot.lane.b32.xlu0 %v2884_v58, %s3534_s28 }
 0x6c3   :  { %2541 = vrot.lane.b32.xlu1 %v2539_v47, %s3542_s16 }
 0x6c6   :  { %2893 = vrot.lane.b32.xlu0 %v2891_v10, %s3536_s23  ;;  %v3521_v10 = vld [vmem:[%s5025_s1 + $0xe8] sm:$0xff]  }
 0x6c7   :  { %2547 = vrot.lane.b32.xlu1 %v2545_v48, %s3543_s17 }
 0x6cb   :  { %2553 = vrot.lane.b32.xlu1 %v2551_v51, %s3544_s12 }
 0x6cf   :  { %2653 = vrot.lane.b32.xlu1 %v2651_v36, %s3544_s12 }
 0x6d3   :  { %2944 = vrot.lane.b32.xlu1 %v2942_v24, %s3534_s28 }
 0x6d7   :  { %2950 = vrot.lane.b32.xlu1 %v2948_v21, %s3536_s23 }
 0x704   :  { %v2574_v49 = vpop.permute.xlu0 %2573 }
 0x705   :  { %v2612_v41 = vpop.permute.xlu1 %2611  ;;  %2576 = vst.msk [vmem:[#allocation6 + $0x4] sm:$0x3] %vm2470_vm2, %v2574_v49  ;;  %v3233_v49 = vld [vmem:[%s5029_s4 + $0x2] sm:$0x1] }
 0x706   :  { %2614 = vst.msk [vmem:[#allocation6 + $0x6] sm:$0x3] %vm2456_vm12, %v2612_v41 }
 0x708   :  { %v2580_v50 = vpop.permute.xlu0 %2579 }
 0x709   :  { %v2618_v54 = vpop.permute.xlu1 %2617  ;;  %2582 = vst.msk [vmem:[#allocation6 + $0x4] sm:$0x3] %vm2477_vm5, %v2580_v50 }
 0x70a   :  { %2620 = vst.msk [vmem:[#allocation6 + $0x6] sm:$0x3] %vm2463_vm13, %v2618_v54 }
 0x70c   :  { %v2586_v56 = vpop.permute.xlu0 %2585 }
 0x70d   :  { %v2512_v55 = vpop.permute.xlu1 %2511  ;;  %2588 = vst.msk [vmem:[#allocation6 + $0x4] sm:$0x3] %vm2484_vm6, %v2586_v56 }
 0x70e   :  { %2514 = vst.msk [vmem:[#allocation6 + $0x2] sm:$0x3] %vm2456_vm12, %v2512_v55  ;;  %vm2903_vm12 = vcmask 254144  }
 0x710   :  { %v2592_v59 = vpop.permute.xlu0 %2591 }
 0x711   :  { %v2518_v57 = vpop.permute.xlu1 %2517  ;;  %2594 = vst.msk [vmem:[#allocation6 + $0x4] sm:$0x3] %vm2491_vm7, %v2592_v59 }
 0x712   :  { %2520 = vst.msk [vmem:[#allocation6 + $0x2] sm:$0x3] %vm2463_vm13, %v2518_v57  ;;  %vm2865_vm13 = vcmask 58369  }
 0x714   :  { %v2598_v13 = vpop.permute.xlu0 %2597 }
 0x715   :  { %v2624_v33 = vpop.permute.xlu1 %2623  ;;  %2600 = vst.msk [vmem:[#allocation6 + $0x4] sm:$0x3] %vm2498_vm8, %v2598_v13 }
 0x716   :  { %2626 = vst.msk [vmem:[#allocation6 + $0x6] sm:$0x3] %vm2470_vm2, %v2624_v33 }
 0x718   :  { %v2468_v5 = vpop.permute.xlu0 %2467 }
 0x719   :  { %v2630_v63 = vpop.permute.xlu1 %2629  ;;  %2471 = vst.msk [vmem:[#allocation6] sm:$0x3] %vm2470_vm2, %v2468_v5  ;;  %v2898_v5 = vld [vmem:[#allocation5 + $0x4] sm:$0x1] }
 0x71a   :  { %2632 = vst.msk [vmem:[#allocation6 + $0x6] sm:$0x3] %vm2477_vm5, %v2630_v63  ;;  %v2814_v63 = vld [vmem:[%s5031_s7] sm:$0xf]  ;;  %2900 = vrot.lane.b32.xlu0 %v2898_v5, %s3538_s9 }
 0x71c   :  { %v2475_v6 = vpop.permute.xlu0 %2474 }
 0x71d   :  { %v2636_v1 = vpop.permute.xlu1 %2635  ;;  %2478 = vst.msk [vmem:[#allocation6] sm:$0x3] %vm2477_vm5, %v2475_v6  ;;  %v2919_v6 = vld [vmem:[#allocation5 + $0x8] sm:$0x1] }
 0x71e   :  { %2638 = vst.msk [vmem:[#allocation6 + $0x6] sm:$0x3] %vm2484_vm6, %v2636_v1  ;;  %v2954_v1 = vld [vmem:[#allocation5 + $0x14] sm:$0x1]  ;;  %2921 = vrot.lane.b32.xlu0 %v2919_v6, %s3542_s16 }
 0x71f   :  { %2956 = vrot.lane.b32.xlu1 %v2954_v1, %s3538_s9 }
 0x720   :  { %v2482_v9 = vpop.permute.xlu0 %2481 }
 0x721   :  { %v2642_v60 = vpop.permute.xlu1 %2641  ;;  %2485 = vst.msk [vmem:[#allocation6] sm:$0x3] %vm2484_vm6, %v2482_v9  ;;  %v2940_v9 = vld [vmem:[#allocation5 + $0x10] sm:$0x1] }
 0x722   :  { %2644 = vst.msk [vmem:[#allocation6 + $0x6] sm:$0x3] %vm2491_vm7, %v2642_v60  ;;  %v2972_v60 = vld [vmem:[#allocation5 + $0x18] sm:$0x1] }
 0x723   :  { %2974 = vrot.lane.b32.xlu1 %v2972_v60, %s3542_s16 }
 0x724   :  { %v2489_v17 = vpop.permute.xlu0 %2488 }
 0x725   :  { %v2648_v62 = vpop.permute.xlu1 %2647  ;;  %2492 = vst.msk [vmem:[#allocation6] sm:$0x3] %vm2491_vm7, %v2489_v17  ;;  %v2882_v17 = vld [vmem:[#allocation5] sm:$0x1] }
 0x726   :  { %2650 = vst.msk [vmem:[#allocation6 + $0x6] sm:$0x3] %vm2498_vm8, %v2648_v62 }
 0x728   :  { %v2496_v14 = vpop.permute.xlu0 %2495 }
 0x729   :  { %v2524_v27 = vpop.permute.xlu1 %2523  ;;  %2499 = vst.msk [vmem:[#allocation6] sm:$0x3] %vm2498_vm8, %v2496_v14  ;;  %v3516_v14 = vld [vmem:[%s5025_s1 + $0xc0] sm:$0xff]  }
 0x72a   :  { %2526 = vst.msk [vmem:[#allocation6 + $0x2] sm:$0x3] %vm2470_vm2, %v2524_v27  ;;  %vm2878_vm2 = vcmask 63494  }
 0x72c   :  { %v2503_v2 = vpop.permute.xlu0 %2502 }
 0x72d   :  { %v2530_v38 = vpop.permute.xlu1 %2529  ;;  %2506 = vst.msk [vmem:[#allocation6] sm:$0x3] %vm2505_vm9, %v2503_v2 }
 0x72e   :  { %2532 = vst.msk [vmem:[#allocation6 + $0x2] sm:$0x3] %vm2477_vm5, %v2530_v38  ;;  %v3517_v38 = vld [vmem:[%s5025_s1 + $0xc8] sm:$0xff]   ;;  %vm2880_vm5 = vcmask 64519  }
 0x730   :  { %v2604_v3 = vpop.permute.xlu0 %2603 }
 0x731   :  { %v2536_v45 = vpop.permute.xlu1 %2535  ;;  %2606 = vst.msk [vmem:[#allocation6 + $0x4] sm:$0x3] %vm2505_vm9, %v2604_v3  ;;  %v3518_v3 = vld [vmem:[%s5025_s1 + $0xd0] sm:$0xff]  }
 0x732   :  { %2538 = vst.msk [vmem:[#allocation6 + $0x2] sm:$0x3] %vm2484_vm6, %v2536_v45  ;;  %vm2917_vm6 = vcmask 385344  }
 0x734   :  { %v2887_v27 = vpop.permute.xlu0 %2886 }
 0x735   :  { %v2542_v4 = vpop.permute.xlu1 %2541 }
 0x736   :  { %2544 = vst.msk [vmem:[#allocation6 + $0x2] sm:$0x3] %vm2491_vm7, %v2542_v4  ;;  %vm2924_vm7 = vcmask 450944  }
 0x738   :  { %v2894_v45 = vpop.permute.xlu0 %2893 }
 0x739   :  { %v2548_v61 = vpop.permute.xlu1 %2547 }
 0x73a   :  { %2550 = vst.msk [vmem:[#allocation6 + $0x2] sm:$0x3] %vm2498_vm8, %v2548_v61  ;;  %vm2931_vm8 = vcmask 516544  }
 0x73d   :  { %v2554_v7 = vpop.permute.xlu1 %2553 }
 0x73e   :  { %2556 = vst.msk [vmem:[#allocation6 + $0x2] sm:$0x3] %vm2505_vm9, %v2554_v7  ;;  %v3519_v7 = vld [vmem:[%s5025_s1 + $0xd8] sm:$0xff]  }
 0x741   :  { %v2654_v8 = vpop.permute.xlu1 %2653 }
 0x742   :  { %2656 = vst.msk [vmem:[#allocation6 + $0x6] sm:$0x3] %vm2505_vm9, %v2654_v8  ;;  %vm2938_vm9 = vcmask 582144  }
 0x745   :  { %v2945_v62 = vpop.permute.xlu1 %2944 }
 0x749   :  { %v2657_v46 = vld [vmem:[#allocation6] sm:$0xff]  ;;  %v2951_v2 = vpop.permute.xlu1 %2950 }
 0x74a   :  { %v2658_v53 = vpack.c.bf16 %v2657_v46, %v2657_v46  ;;  %2941 = vst.msk [vmem:[#allocation6 + $0x1] sm:$0x1] %vm143_vm4, %v2940_v9  ;;  %2883 = vst.msk [vmem:[#allocation6] sm:$0x1] %vm143_vm4, %v2882_v17  ;;  %v3520_v46 = vld [vmem:[%s5025_s1 + $0xe0] sm:$0xff]  }
 0x74b   :  { %2947 = vst.msk [vmem:[#allocation6 + $0x1] sm:$0x1] %vm2889_vm11, %v2945_v62  ;;  %2890 = vst.msk [vmem:[#allocation6] sm:$0x1] %vm2889_vm11, %v2887_v27 }
 0x74c   :  { %3439 = vmatmul.mubr.bf16.vlgmr.msra.gmra.mrb[20].mxu0 %v2658_v53 }
 0x78c   :  { %v2901_v4 = vpop.permute.xlu0 %2900 }
 0x791   :  { %v2957_v61 = vpop.permute.xlu1 %2956 }
 0x81f   :  { %v2766_v12 = vpop.f32.mrb[20].mxu0 }
 0x820   :  { %v2767_v15 = vadd.f32 %v3223_v11, %v2766_v12  ;;  %v3440_v16 = vpop.f32.mrb[21].mxu0  ;;  %v3522_v12 = vld [vmem:[%s5025_s1 + $0xf0] sm:$0xff]  }
 0x821   :  { %v2769_v18 = vpop.f32.mrb[22].mxu0 }
 0x822   :  { %v2772_v19 = vmax.f32 %v2767_v15, 0.0  ;;  %v3441_v20 = vpop.f32.mrb[23].mxu0  ;;  %v3523_v18 = vld [vmem:[%s5025_s1 + $0xf8] sm:$0xff]  }
 0x824   :  { %v2773_v22 = vrot.slane %v2772_v19, 4  ;;  %v2779_v23 = vmul.f32 %v2772_v19, %v2772_v19 }
 0x826   :  { %v2774_v29 = vadd.f32 %v2773_v22, %v2772_v19  ;;  %v2780_v30 = vrot.slane %v2779_v23, 4 }
 0x828   :  { %v2775_v26 = vrot.slane %v2774_v29, 2  ;;  %v2781_v31 = vadd.f32 %v2780_v30, %v2779_v23  ;;  %v2922_v30 = vpop.permute.xlu0 %2921 }
 0x82a   :  { %v2776_v28 = vadd.f32 %v2775_v26, %v2774_v29  ;;  %v2782_v32 = vrot.slane %v2781_v31, 2  ;;  %v2975_v29 = vpop.permute.xlu1 %2974 }
 0x82c   :  { %v2777_v34 = vrot.slane %v2776_v28, 1  ;;  %v2783_v35 = vadd.f32 %v2782_v32, %v2781_v31 }
 0x82e   :  { %v2778_v37 = vadd.f32 %v2777_v34, %v2776_v28  ;;  %v2784_v40 = vrot.slane %v2783_v35, 1 }
 0x830   :  { %v2785_v42 = vadd.f32 %v2784_v40, %v2783_v35  ;;  %v2786_v43 = vmul.f32 0.125, %v2778_v37 }
 0x832   :  { %v2787_v44 = vmul.f32 0.125, %v2785_v42  ;;  %v2788_v47 = vmul.f32 %v2786_v43, %v2786_v43 }
 0x834   :  { %v2789_v48 = vsub.f32 %v2787_v44, %v2788_v47 }
 0x836   :  { %v2790_v52 = vmax.f32 %v2789_v48, 0.0 }
 0x838   :  { %v2791_v51 = vadd.f32 1e-05, %v2790_v52 }
 0x83a   :  { %3528 = vrsqrt.f32 %v2791_v51 }
 0x844   :  { %v3529_v36 = vpop.eup %3528 }
 0x845   :  { %v2795_v41 = vmul.f32 %v3529_v36, %v3232_v39 }
 0x847   :  { %v2798_v54 = vmul.f32 %v2795_v41, %v2786_v43  ;;  %v2804_v50 = vrot.slane %v2795_v41, %v4565_v25  ;;  %v3252_v43 = vld [vmem:[%s5026_s2 + $0x3] ss:$0 sm:$0xff] }
 0x849   :  { %v2799_v55 = vsub.f32 %v3233_v49, %v2798_v54  ;;  %v2806_v56 = vmul.f32 %v2804_v50, %v2772_v19 }
 0x84b   :  { %v2811_v57 = vrot.slane %v2799_v55, %v4565_v25 }
 0x84d   :  { %v2813_v59 = vadd.f32 %v2811_v57, %v2806_v56 }
 0x84f   :  { %v2815_v33 = vpack.c.bf16 %v2813_v59, %v2813_v59 }
 0x851   :  { %v2821_v13 = vsel %vm2819_vm10, %v2815_v33, 0  ;;  %vm3106_vm10 = vcmask 1041408  }
 0x852   :  { %3443 = vmatpush3.bf16.msra.mxu1 %v2821_v13 }
 0x853   :  { %3448 = vmatprep.subr.bf16.mxu1 %v3532_v0 }
 0x855   :  { %3445 = vmatmul.mubr.msk.bf16.vlgmr.msra.gmra.mrb[20].mxu1 %vm136_vm3, %v2814_v63  ;;  %vm2896_vm3 = vcmask 188544  }
 0x856   :  { %3464 = vmatprep.mubr.msk.bf16.mxu1 %vm3545_vm14, %v3532_v0  ;;  %3449 = vmatpush3.bf16.msra.mxu1 %v3516_v14  ;;  %2953 = vst.msk [vmem:[#allocation6 + $0x1] sm:$0x1] %vm2896_vm3, %v2951_v2  ;;  %2897 = vst.msk [vmem:[#allocation6] sm:$0x1] %vm2896_vm3, %v2894_v45  ;;  %vm2875_vm14 = vcmask 62469  }
 0x857   :  { %3450 = vmatprep.subr.bf16.mxu1 %v3532_v0  ;;  %2904 = vst.msk [vmem:[#allocation6] sm:$0x1] %vm2903_vm12, %v2901_v4  ;;  %2959 = vst.msk [vmem:[#allocation6 + $0x1] sm:$0x1] %vm2903_vm12, %v2957_v61 }
 0x85a   :  { %3451 = vmatpush3.bf16.msra.mxu1 %v3517_v38  ;;  %v3261_v38 = vld [vmem:[%s5028_s3 + $0x3] sm:$0x1] }
 0x85b   :  { %3452 = vmatprep.subr.bf16.mxu1 %v3532_v0 }
 0x85e   :  { %3453 = vmatpush3.bf16.msra.mxu1 %v3518_v3  ;;  %v3262_v3 = vld [vmem:[%s5029_s4 + $0x3] sm:$0x1] }
 0x85f   :  { %3454 = vmatprep.subr.bf16.mxu1 %v3532_v0 }
 0x862   :  { %3455 = vmatpush3.bf16.msra.mxu1 %v3519_v7 }
 0x863   :  { %3456 = vmatprep.subr.bf16.mxu1 %v3532_v0 }
 0x866   :  { %3457 = vmatpush3.bf16.msra.mxu1 %v3520_v46 }
 0x867   :  { %3458 = vmatprep.subr.bf16.mxu1 %v3532_v0 }
 0x86a   :  { %3459 = vmatpush3.bf16.msra.mxu1 %v3521_v10 }
 0x86b   :  { %3460 = vmatprep.subr.bf16.mxu1 %v3532_v0 }
 0x86e   :  { %3461 = vmatpush3.bf16.msra.mxu1 %v3522_v12 }
 0x86f   :  { %3462 = vmatprep.subr.bf16.mxu1 %v3532_v0 }
 0x872   :  { %3463 = vmatpush3.bf16.msra.mxu1 %v3523_v18 }
 0x928   :  { %v2857_v8 = vpop.f32.mrb[20].mxu1 }
 0x929   :  { %2864 = vst.msk [vmem:[#allocation5 + $0x6] sm:$0x1] %vm143_vm4, %v2857_v8  ;;  %v3446_v53 = vpop.f32.mrb[21].mxu1  ;;  %vm2910_vm4 = vcmask 319744  }
 0x92a   :  { %2866 = vst.msk [vmem:[#allocation5 + $0x4] sm:$0x2] %vm2865_vm13, %v2857_v8  ;;  %v2860_v58 = vpop.f32.mrb[22].mxu1 }
 0x92b   :  { %2869 = vst.msk [vmem:[#allocation5 + $0x8] sm:$0x4] %vm2868_vm15, %v2857_v8  ;;  %v3447_v24 = vpop.f32.mrb[23].mxu1 }
 0x92c   :  { %2871 = vst.msk [vmem:[#allocation5 + $0x6] sm:$0x8] %vm2870_vm0, %v2857_v8 }
 0x92d   :  { %2874 = vst.msk [vmem:[#allocation5 + $0x12] sm:$0x10] %vm2873_vm1, %v2857_v8 }
 0x92e   :  { %2876 = vst.msk [vmem:[#allocation5 + $0x10] sm:$0x20] %vm2875_vm14, %v2857_v8 }
 0x92f   :  { %2879 = vst.msk [vmem:[#allocation5 + $0x14] sm:$0x40] %vm2878_vm2, %v2857_v8 }
 0x930   :  { %2881 = vst.msk [vmem:[#allocation5 + $0x12] sm:$0x80] %vm2880_vm5, %v2857_v8  ;;  %v2905_v11 = vld [vmem:[#allocation5 + $0x6] sm:$0x1] }
 0x931   :  { %2907 = vrot.lane.b32.xlu0 %v2905_v11, %s3540_s26  ;;  %v2912_v16 = vld [vmem:[#allocation5 + $0x5] sm:$0x1] }
 0x932   :  { %v2926_v20 = vld [vmem:[#allocation5 + $0xa] sm:$0x1] }
 0x933   :  { %v2933_v23 = vld [vmem:[#allocation5 + $0x9] sm:$0x1] }
 0x934   :  { %v2960_v21 = vld [vmem:[#allocation5 + $0x16] sm:$0x1] }
 0x935   :  { %2962 = vrot.lane.b32.xlu1 %v2960_v21, %s3540_s26  ;;  %v2966_v15 = vld [vmem:[#allocation5 + $0x15] sm:$0x1]  ;;  %2914 = vrot.lane.b32.xlu0 %v2912_v16, %s3541_s5 }
 0x936   :  { %v2978_v19 = vld [vmem:[#allocation5 + $0x1a] sm:$0x1] }
 0x937   :  { %v2984_v22 = vld [vmem:[#allocation5 + $0x19] sm:$0x1] }
 0x939   :  { %2968 = vrot.lane.b32.xlu1 %v2966_v15, %s3541_s5  ;;  %2928 = vrot.lane.b32.xlu0 %v2926_v20, %s3543_s17 }
 0x93d   :  { %2980 = vrot.lane.b32.xlu1 %v2978_v19, %s3543_s17  ;;  %2935 = vrot.lane.b32.xlu0 %v2933_v23, %s3544_s12 }
 0x941   :  { %2986 = vrot.lane.b32.xlu1 %v2984_v22, %s3544_s12 }
 0x9a3   :  { %v2908_v31 = vpop.permute.xlu0 %2907 }
 0x9a4   :  { %2911 = vst.msk [vmem:[#allocation6] sm:$0x1] %vm2910_vm4, %v2908_v31 }
 0x9a7   :  { %v2963_v26 = vpop.permute.xlu1 %2962  ;;  %v2915_v28 = vpop.permute.xlu0 %2914 }
 0x9a8   :  { %2965 = vst.msk [vmem:[#allocation6 + $0x1] sm:$0x1] %vm2910_vm4, %v2963_v26 }
 0x9a9   :  { %2918 = vst.msk [vmem:[#allocation6] sm:$0x1] %vm2917_vm6, %v2915_v28 }
 0x9aa   :  { %2925 = vst.msk [vmem:[#allocation6] sm:$0x1] %vm2924_vm7, %v2922_v30 }
 0x9ab   :  { %v2969_v0 = vpop.permute.xlu1 %2968  ;;  %v2929_v34 = vpop.permute.xlu0 %2928 }
 0x9ac   :  { %2971 = vst.msk [vmem:[#allocation6 + $0x1] sm:$0x1] %vm2917_vm6, %v2969_v0 }
 0x9ad   :  { %2977 = vst.msk [vmem:[#allocation6 + $0x1] sm:$0x1] %vm2924_vm7, %v2975_v29 }
 0x9ae   :  { %2932 = vst.msk [vmem:[#allocation6] sm:$0x1] %vm2931_vm8, %v2929_v34 }
 0x9af   :  { %v2981_v32 = vpop.permute.xlu1 %2980  ;;  %v2936_v37 = vpop.permute.xlu0 %2935 }
 0x9b0   :  { %2983 = vst.msk [vmem:[#allocation6 + $0x1] sm:$0x1] %vm2931_vm8, %v2981_v32 }
 0x9b1   :  { %2939 = vst.msk [vmem:[#allocation6] sm:$0x1] %vm2938_vm9, %v2936_v37 }
 0x9b3   :  { %v2987_v35 = vpop.permute.xlu1 %2986 }
 0x9b4   :  { %2989 = vst.msk [vmem:[#allocation6 + $0x1] sm:$0x1] %vm2938_vm9, %v2987_v35 }
 0x9bb   :  { %v2990_v40 = vld [vmem:[#allocation6] sm:$0x3] }
 0x9bc   :  { %v2991_v42 = vpack.c.bf16 %v2990_v40, %v2990_v40 }
 0x9be   :  { %3465 = vmatmul.mubr.bf16.vlgmr.msra.gmra.mrb[24].mxu1 %v2991_v42 }
 0xa91   :  { %v3099_v44 = vpop.f32.mrb[24].mxu1 }
 0xa92   :  { %v3100_v47 = vadd.f32 %v3252_v43, %v3099_v44  ;;  %v3466_v48 = vpop.f32.mrb[25].mxu1 }
 0xa93   :  { %v3102_v52 = vpop.f32.mrb[26].mxu1 }
 0xa94   :  { %v3105_v51 = vmax.f32 %v3100_v47, 0.0  ;;  %v3467_v39 = vpop.f32.mrb[27].mxu1 }
 0xa96   :  { %v3107_v36 = vsel %vm3106_vm10, %v3105_v51, 0.0  ;;  %v3114_v41 = vmul.f32 %v3105_v51, %v3105_v51 }
 0xa97   :  { %v3108_v49 = vrot.slane %v3107_v36, 4 }
 0xa98   :  { %v3115_v54 = vsel %vm3106_vm10, %v3114_v41, 0.0 }
 0xa99   :  { %v3109_v50 = vadd.f32 %v3108_v49, %v3107_v36  ;;  %v3116_v55 = vrot.slane %v3115_v54, 4 }
 0xa9b   :  { %v3110_v56 = vrot.slane %v3109_v50, 2  ;;  %v3117_v57 = vadd.f32 %v3116_v55, %v3115_v54 }
 0xa9d   :  { %v3111_v59 = vadd.f32 %v3110_v56, %v3109_v50  ;;  %v3118_v33 = vrot.slane %v3117_v57, 2 }
 0xa9f   :  { %v3112_v13 = vrot.slane %v3111_v59, 1  ;;  %v3119_v63 = vadd.f32 %v3118_v33, %v3117_v57 }
 0xaa1   :  { %v3113_v5 = vadd.f32 %v3112_v13, %v3111_v59  ;;  %v3120_v1 = vrot.slane %v3119_v63, 1 }
 0xaa3   :  { %v3121_v6 = vadd.f32 %v3120_v1, %v3119_v63  ;;  %v3122_v60 = vmul.f32 0.5, %v3113_v5 }
 0xaa5   :  { %v3123_v9 = vmul.f32 0.5, %v3121_v6  ;;  %v3124_v62 = vmul.f32 %v3122_v60, %v3122_v60 }
 0xaa7   :  { %v3125_v17 = vsub.f32 %v3123_v9, %v3124_v62 }
 0xaa9   :  { %v3126_v27 = vmax.f32 %v3125_v17, 0.0 }
 0xaab   :  { %v3127_v14 = vadd.f32 1e-05, %v3126_v27 }
 0xaad   :  { %3530 = vrsqrt.f32 %v3127_v14 }
 0xab7   :  { %v3531_v2 = vpop.eup %3530 }
 0xab8   :  { %v3131_v45 = vmul.f32 %v3531_v2, %v3261_v38 }
 0xaba   :  { %v3134_v4 = vmul.f32 %v3131_v45, %v3122_v60  ;;  %v3140_v61 = vrot.slane %v3131_v45, %v4565_v25 }
 0xabc   :  { %v3135_v7 = vsub.f32 %v3262_v3, %v3134_v4  ;;  %v3142_v8 = vmul.f32 %v3140_v61, %v3105_v51 }
 0xabe   :  { %v3147_v46 = vrot.slane %v3135_v7, %v4565_v25 }
 0xac0   :  { %v3149_v53 = vadd.f32 %v3147_v46, %v3142_v8 }
 0xac2   :  { %3150 = vst [vmem:[%s5032_s8] sm:$0x3] %v3149_v53  }

</bundles_post_ra>
